<compile_context>
chip_gen: v6e
topology: v6e:2x2x1
jax: 0.10.0
libtpu: 0.0.40
codegen_flags: <defaults>
</compile_context>

<pallas_src>
import functools

import jax
import jax.numpy as jnp
from jax.experimental import pallas as pl
from jax.experimental.pallas import tpu as pltpu

LANE = 128                      # channel axes padded to this (TPU lane width)
MAX_TILE_M = 1024               # rows per grid step of the 1x1-conv matmul kernel
MAX_TILE_H = 32                 # output rows per grid step of the 3x3-conv kernel
VMEM_LIMIT = 48 * 1024 * 1024   # explicit scoped-VMEM budget (< v7x 64 MiB)


def _round_up(x, m):
    return (x + m - 1) // m * m


def _pick_tile_m(m):
    """Row tile for the matmul kernel: multiple of 8, >=2 grid steps (megacore)."""
    if m <= 8:
        return m
    steps = max(2, pl.cdiv(m, MAX_TILE_M))
    return min(MAX_TILE_M, _round_up(pl.cdiv(m, steps), 8))


def _pick_tile_h(h):
    """Output-row tile of the 3x3-conv kernel (must divide H)."""
    if h <= MAX_TILE_H:
        return h
    for t in (32, 16, 8, 4, 2):
        if h % t == 0:
            return t
    return h


# ----------------------------------------------------------------------------
# Pallas kernel 1: 1x1 conv = matmul + bias + optional ReLU
# (BN scale already folded into the weight columns at init)
# ----------------------------------------------------------------------------
def _mm_kernel(x_ref, w_ref, b_ref, o_ref, *, relu):
    y = jnp.dot(x_ref[...].astype(w_ref.dtype), w_ref[...],
                preferred_element_type=jnp.float32)
    y = y + b_ref[...]
    if relu:
        y = jnp.maximum(y, 0.0)
    o_ref[...] = y.astype(o_ref.dtype)


def matmul_fused(x, w, b, *, relu, out_dtype=jnp.float32):
    """y = relu?(x @ w + b).  x:(M,K) bf16, w:(K,Cp) bf16, b:(1,Cp) f32.
    K and Cp are multiples of 128 by construction (padded at init)."""
    m, k = x.shape
    cp = w.shape[1]
    tile_m = _pick_tile_m(m)
    return pl.pallas_call(
        functools.partial(_mm_kernel, relu=relu),
        out_shape=jax.ShapeDtypeStruct((m, cp), out_dtype),
        grid=(pl.cdiv(m, tile_m),),
        in_specs=[
            pl.BlockSpec((tile_m, k), lambda i: (i, 0)),
            pl.BlockSpec((k, cp), lambda i: (0, 0)),
            pl.BlockSpec((1, cp), lambda i: (0, 0)),
        ],
        out_specs=pl.BlockSpec((tile_m, cp), lambda i: (i, 0)),
        compiler_params=pltpu.CompilerParams(
            dimension_semantics=("parallel",),
            vmem_limit_bytes=VMEM_LIMIT),
    )(x, w, b)


# ----------------------------------------------------------------------------
# Pallas kernel 2: spatially tiled fused FFC_BN_ACT conv
#   o = ReLU( sum_{kh,kw} x[.., kh:, kw:, :] @ w[kh*3+kw]   (3x3 l2l|g2l|l2g)
#             + s2in @ st2_w                                (SpectralTransform.conv2)
#             + bias )                                      (BN scale folded in w)
#       [ + res_scale * residual ]                          (fused triple residual)
# ----------------------------------------------------------------------------
def _conv_spec_kernel(*refs, th, wsp, has_res, res_scale):
    it = iter(refs)
    x_ref, s2_ref, w_ref, w2_ref, b_ref = [next(it) for _ in range(5)]
    res_ref = next(it) if has_res else None
    o_ref = next(it)

    # SpectralTransform.conv2 contribution (lands on the global-branch columns)
    acc = jnp.dot(s2_ref[0].reshape(th * wsp, -1), w2_ref[...],
                  preferred_element_type=jnp.float32)
    # 3x3 conv as 9 shifted MXU dots (the input block carries a +1 halo)
    for kh in range(3):
        for kw in range(3):
            patch = x_ref[0, kh:kh + th, kw:kw + wsp, :]
            acc = acc + jnp.dot(patch.reshape(th * wsp, -1),
                                w_ref[kh * 3 + kw],
                                preferred_element_type=jnp.float32)
    y = jnp.maximum(acc + b_ref[...], 0.0)            # fused BN bias + ReLU
    if has_res:
        y = y + res_scale * res_ref[0].reshape(th * wsp, -1)
    o_ref[0] = y.reshape(th, wsp, -1).astype(o_ref.dtype)


def ffc_conv_block(x_bf16, s2in, p, *, residual=None, out_dtype=jnp.float32):
    """One FFC_BN_ACT: fused 3x3 conv + spectral conv2 + BN + ReLU (+ residual)."""
    n, h, w, cin_p = x_bf16.shape
    cg2_p, cout_p = p["cg2_p"], p["cout_p"]
    th = _pick_tile_h(h)
    ht = h // th

    # reflect pad once, then overlapping row windows (+1 halo on each side)
    xpad = jnp.pad(x_bf16, ((0, 0), (1, 1), (1, 1), (0, 0)), mode="reflect")
    if ht == 1:
        xw = xpad                                      # (N, H+2, W+2, Cin_p)
    else:
        xw = jnp.concatenate(
            [xpad[:, None, i * th:i * th + th + 2] for i in range(ht)], axis=1
        ).reshape(n * ht, th + 2, w + 2, cin_p)

    operands = [xw, s2in.reshape(n * ht, th, w, cg2_p),
                p["conv_w"], p["st2_w"], p["conv_b"]]
    in_specs = [
        pl.BlockSpec((1, th + 2, w + 2, cin_p), lambda i: (i, 0, 0, 0)),
        pl.BlockSpec((1, th, w, cg2_p), lambda i: (i, 0, 0, 0)),
        pl.BlockSpec((9, cin_p, cout_p), lambda i: (0, 0, 0)),
        pl.BlockSpec((cg2_p, cout_p), lambda i: (0, 0)),
        pl.BlockSpec((1, cout_p), lambda i: (0, 0)),
    ]
    if residual is not None:
        operands.append(residual.reshape(n * ht, th, w, cout_p))
        in_specs.append(pl.BlockSpec((1, th, w, cout_p), lambda i: (i, 0, 0, 0)))

    kern = functools.partial(_conv_spec_kernel, th=th, wsp=w,
                             has_res=residual is not None, res_scale=3.0)
    out = pl.pallas_call(
        kern,
        out_shape=jax.ShapeDtypeStruct((n * ht, th, w, cout_p), out_dtype),
        grid=(n * ht,),
        in_specs=in_specs,
        out_specs=pl.BlockSpec((1, th, w, cout_p), lambda i: (i, 0, 0, 0)),
        compiler_params=pltpu.CompilerParams(
            dimension_semantics=("parallel",),
            vmem_limit_bytes=VMEM_LIMIT),
    )(*operands)
    return out.reshape(n, h, w, cout_p)


# ----------------------------------------------------------------------------
# Plain-JAX glue reproducing the module structure
# ----------------------------------------------------------------------------
def fourier_unit(x, w, b):
    """FourierUnit: rfft2 -> fused 1x1 conv + BN + ReLU (Pallas) -> irfft2.
    x: (N, H, W, Cp) f32 with zero padding channels; returns the same shape."""
    n, h, wsp, cp = x.shape
    # TODO(synk): rfftn/irfftn have no Pallas TPU primitive; kept in jnp.fft.
    f = jnp.fft.rfftn(x, axes=(1, 2), norm="ortho")           # (N,H,Wf,Cp) c64
    wf = f.shape[2]
    # channel interleave [c0_re, c0_im, c1_re, ...] matching torch permute/view
    ri = jnp.stack([jnp.real(f), jnp.imag(f)], axis=-1).reshape(n * h * wf, 2 * cp)
    y = matmul_fused(ri.astype(jnp.bfloat16), w, b, relu=True)
    y = y.reshape(n, h, wf, cp, 2)
    fc = jax.lax.complex(y[..., 0], y[..., 1])
    return jnp.fft.irfftn(fc, s=(h, wsp), axes=(1, 2), norm="ortho")


def spectral_conv2_input(x_bf16, p):
    """SpectralTransform up to (not including) conv2: returns the bf16
    (N, H, W, cg2_p) tensor  x1 + FourierUnit(x1) + tile(LFU(x1))  that the
    fused conv kernel contracts with st2_w."""
    n, h, wsp, cin_p = x_bf16.shape
    cg2, cg2_p = p["cg2"], p["cg2_p"]
    # conv1: 1x1 + BN + ReLU (local / padding input rows are zero in st1_w)
    x1 = matmul_fused(x_bf16.reshape(n * h * wsp, cin_p), p["st1_w"], p["st1_b"],
                      relu=True).reshape(n, h, wsp, cg2_p)
    # global Fourier unit
    fu = fourier_unit(x1, p["fu_w"], p["fu_b"])
    # local Fourier unit: first cg2//4 channels, 2x2 spatial fold -> channels
    c4 = cg2 // 4
    a = jnp.concatenate([x1[:, :h // 2, :, :c4], x1[:, h // 2:, :, :c4]], axis=-1)
    bsm = jnp.concatenate([a[:, :, :wsp // 2, :], a[:, :, wsp // 2:, :]], axis=-1)
    bsm = jnp.pad(bsm, ((0, 0), (0, 0), (0, 0), (0, cg2_p - cg2)))
    lfu = fourier_unit(bsm, p["lfu_w"], p["lfu_b"])
    xs = jnp.tile(lfu, (1, 2, 2, 1))    # folded into the s2in fusion by XLA
    return (x1 + fu + xs).astype(jnp.bfloat16)


def ffc_bn_act(x_bf16, p, *, residual=None, out_dtype=jnp.float32):
    s2in = spectral_conv2_input(x_bf16, p)
    return ffc_conv_block(x_bf16, s2in, p, residual=residual, out_dtype=out_dtype)


def ffc_skip_layer(gen_ft_nchw, mask, params):
    """FFCSkipLayer.forward; `mask` accepted but unused (as in the reference)."""
    del mask
    p1, p2 = params["conv1"], params["conv2"]
    x = jnp.transpose(gen_ft_nchw.astype(jnp.float32), (0, 2, 3, 1))    # NHWC
    n, h, wsp, dim = x.shape
    x_p = jnp.pad(x, ((0, 0), (0, 0), (0, 0), (0, p1["cin_p"] - dim)))  # lane pad
    x_bf = x_p.astype(jnp.bfloat16)
    # FFCResnetBlock conv1 -> conv2; the resnet / FFCBlock / gen_ft residuals
    # reduce to out = 3*x + conv2(conv1(x)) and are fused into conv2's kernel.
    y1 = ffc_bn_act(x_bf, p1, out_dtype=jnp.bfloat16)
    out = ffc_bn_act(y1, p2, residual=x_p, out_dtype=jnp.float32)
    out = out[..., :dim]
    return jnp.transpose(out, (0, 3, 1, 2))                             # NCHW


# ----------------------------------------------------------------------------
# Deterministic parameter init (mirrors __init__ shapes).  Channel padding to
# 128 lanes, weight fusion and BN-scale folding are all hoisted here.
# ----------------------------------------------------------------------------
def _bn_fold(c, eps=1e-5):
    """Eval-mode BN with default init stats -> per-channel (scale, bias)."""
    gamma = jnp.ones((c,), jnp.float32)
    beta = jnp.zeros((c,), jnp.float32)
    mean = jnp.zeros((c,), jnp.float32)
    var = jnp.ones((c,), jnp.float32)
    scale = gamma / jnp.sqrt(var + eps)
    bias = beta - mean * scale
    return scale, bias


def init_ffc_bn_act(key, in_cl, in_cg, out_cl, out_cg, std=0.1):
    cin = in_cl + in_cg
    out_c = out_cl + out_cg
    cg2 = out_cg // 2                       # SpectralTransform hidden width
    cin_p = _round_up(cin, LANE)
    cout_p = _round_up(out_c, LANE)
    cg2_p = _round_up(cg2, LANE)
    cfu = 2 * cg2_p                         # interleaved re/im channels (padded)

    ks = jax.random.split(key, 7)
    w_l2l = jax.random.normal(ks[0], (3, 3, in_cl, out_cl), jnp.float32) * std
    w_g2l = jax.random.normal(ks[1], (3, 3, in_cg, out_cl), jnp.float32) * std
    w_l2g = jax.random.normal(ks[2], (3, 3, in_cl, out_cg), jnp.float32) * std
    w_st1 = jax.random.normal(ks[3], (in_cg, cg2), jnp.float32) * std
    w_fu = jax.random.normal(ks[4], (2 * cg2, 2 * cg2), jnp.float32) * std
    w_lfu = jax.random.normal(ks[5], (2 * cg2, 2 * cg2), jnp.float32) * std
    w_st2 = jax.random.normal(ks[6], (cg2, out_cg), jnp.float32) * std

    s_l, b_l = _bn_fold(out_cl)
    s_g, b_g = _bn_fold(out_cg)
    s_1, b_1 = _bn_fold(cg2)
    s_f, b_f = _bn_fold(2 * cg2)
    s_lf, b_lf = _bn_fold(2 * cg2)

    # Fused 3x3 conv weight (9, Cin_p, Cout_p): convl2l|convg2l -> local cols,
    # convl2g -> global cols (zero rows for global/padding input channels),
    # per-branch BN scale folded into the columns.
    w_conv = jnp.zeros((3, 3, cin_p, cout_p), jnp.float32)
    w_conv = w_conv.at[:, :, :in_cl, :out_cl].set(w_l2l)
    w_conv = w_conv.at[:, :, in_cl:cin, :out_cl].set(w_g2l)
    w_conv = w_conv.at[:, :, :in_cl, out_cl:out_c].set(w_l2g)
    scale_out = jnp.zeros((cout_p,), jnp.float32).at[:out_c].set(
        jnp.concatenate([s_l, s_g]))
    w_conv = (w_conv * scale_out).reshape(9, cin_p, cout_p).astype(jnp.bfloat16)
    conv_b = jnp.zeros((1, cout_p), jnp.float32).at[0, :out_c].set(
        jnp.concatenate([b_l, b_g]))

    # SpectralTransform.conv2 (1x1, no BN/act): placed at the global-branch
    # columns and pre-scaled by the global-branch conv BN scale so the conv
    # kernel adds it straight into the pre-bias accumulator.
    st2_w = jnp.zeros((cg2_p, cout_p), jnp.float32).at[:cg2, out_cl:out_c].set(
        w_st2 * s_g[None, :]).astype(jnp.bfloat16)

    # SpectralTransform.conv1 (1x1 + BN + ReLU): consumes the full padded
    # input; rows of the local / padding channels are zero.
    st1_w = jnp.zeros((cin_p, cg2_p), jnp.float32).at[in_cl:cin, :cg2].set(
        w_st1 * s_1[None, :]).astype(jnp.bfloat16)
    st1_b = jnp.zeros((1, cg2_p), jnp.float32).at[0, :cg2].set(b_1)

    fu_w = jnp.zeros((cfu, cfu), jnp.float32).at[:2 * cg2, :2 * cg2].set(
        w_fu * s_f[None, :]).astype(jnp.bfloat16)
    fu_b = jnp.zeros((1, cfu), jnp.float32).at[0, :2 * cg2].set(b_f)
    lfu_w = jnp.zeros((cfu, cfu), jnp.float32).at[:2 * cg2, :2 * cg2].set(
        w_lfu * s_lf[None, :]).astype(jnp.bfloat16)
    lfu_b = jnp.zeros((1, cfu), jnp.float32).at[0, :2 * cg2].set(b_lf)

    return {
        "in_cl": in_cl, "in_cg": in_cg, "out_cl": out_cl, "out_cg": out_cg,
        "cg2": cg2, "cin_p": cin_p, "cout_p": cout_p, "cg2_p": cg2_p,
        "conv_w": w_conv, "conv_b": conv_b, "st2_w": st2_w,
        "st1_w": st1_w, "st1_b": st1_b,
        "fu_w": fu_w, "fu_b": fu_b, "lfu_w": lfu_w, "lfu_b": lfu_b,
    }


if __name__ == "__main__":
    # Small shapes consistent with the module (enable_lfu needs cg2 % 4 == 0,
    # hence dim=32 with ratio 0.75; spatial must be even & square for the LFU).
    N, dim, H, W = 2, 32, 16, 16
    ratio = 0.75
    in_cg = int(dim * ratio)            # global_in_num = 24
    in_cl = dim - in_cg                 # 8
    out_cg = int(dim * ratio)           # 24
    out_cl = dim - out_cg               # 8
    assert H == W and H % 2 == 0 and (out_cg // 2) % 4 == 0

    key = jax.random.PRNGKey(0)
    k_in, k_mask, k1, k2 = jax.random.split(key, 4)
    gen_ft = jax.random.normal(k_in, (N, dim, H, W), jnp.float32)
    mask = (jax.random.uniform(k_mask, (N, 1, H, W)) > 0.5).astype(jnp.float32)

    params = {
        "conv1": init_ffc_bn_act(k1, in_cl, in_cg, out_cl, out_cg),
        "conv2": init_ffc_bn_act(k2, out_cl, out_cg, out_cl, out_cg),
    }

    fwd = jax.jit(lambda g, m: ffc_skip_layer(g, m, params))
    out = jax.block_until_ready(fwd(gen_ft, mask))
    assert out.shape == (N, dim, H, W) and out.dtype == jnp.float32
    assert bool(jnp.all(jnp.isfinite(out)))
    print("KERNEL_OK")
</pallas_src>

<mosaic_0001>
module attributes {stable_mosaic.version = 11 : i64} {
  func.func @_mm_kernel(%arg0: i32, %arg1: memref<256x128xbf16, #tpu.memory_space<vmem>>, %arg2: memref<128x128xbf16, #tpu.memory_space<vmem>>, %arg3: memref<1x128xf32, #tpu.memory_space<vmem>>, %arg4: memref<256x128xf32, #tpu.memory_space<vmem>>) attributes {dimension_semantics = [#tpu.dimension_semantics<parallel>], iteration_bounds = array<i64: 2>, scalar_prefetch = 0 : i64, scratch_operands = 0 : i64, tpu.core_type = #tpu.core_type<tc>, window_params = [{transform_indices = @transform_0, window_bounds = array<i64: 256, 128>}, {pipeline_mode = #tpu.pipeline_mode<synchronous>, transform_indices = @transform_1, window_bounds = array<i64: 128, 128>}, {pipeline_mode = #tpu.pipeline_mode<synchronous>, transform_indices = @transform_2, window_bounds = array<i64: 1, 128>}, {transform_indices = @transform_3, window_bounds = array<i64: 256, 128>}]} {
    %c0 = arith.constant 0 : index
    %c0_0 = arith.constant 0 : index
    %0 = vector.load %arg1[%c0, %c0_0] : memref<256x128xbf16, #tpu.memory_space<vmem>>, vector<256x128xbf16>
    %c0_1 = arith.constant 0 : index
    %c0_2 = arith.constant 0 : index
    %1 = vector.load %arg2[%c0_1, %c0_2] : memref<128x128xbf16, #tpu.memory_space<vmem>>, vector<128x128xbf16>
    %cst = arith.constant dense<0.000000e+00> : vector<256x128xf32>
    %2 = tpu.matmul %0, %1, %cst {dimension_numbers = #tpu.dot_dimension_numbers<[1], [0], [0], [1], [0, 0, 1, 1], [], []>} : vector<256x128xbf16>, vector<128x128xbf16>, vector<256x128xf32> -> vector<256x128xf32>
    %c0_3 = arith.constant 0 : index
    %c0_4 = arith.constant 0 : index
    %3 = vector.load %arg3[%c0_3, %c0_4] : memref<1x128xf32, #tpu.memory_space<vmem>>, vector<1x128xf32>
    %4 = vector.broadcast %3 : vector<1x128xf32> to vector<256x128xf32>
    %5 = arith.addf %2, %4 : vector<256x128xf32>
    %cst_5 = arith.constant 0.000000e+00 : f32
    %6 = vector.broadcast %cst_5 : f32 to vector<256x128xf32>
    %7 = arith.maximumf %5, %6 : vector<256x128xf32>
    %c0_6 = arith.constant 0 : index
    %c0_7 = arith.constant 0 : index
    %8 = vector.load %arg4[%c0_6, %c0_7] : memref<256x128xf32, #tpu.memory_space<vmem>>, vector<256x128xf32>
    tpu.vector_store %arg4[%c0_6, %c0_7], %7 {strides = array<i32>} : memref<256x128xf32, #tpu.memory_space<vmem>>, vector<256x128xf32>,
    return
  }
  func.func @transform_0(%arg0: i32) -> (i32, i32) {
    %c0_i32 = arith.constant 0 : i32
    %c0_i32_0 = arith.constant 0 : i32
    return %arg0, %c0_i32 : i32, i32
  }
  func.func @transform_1(%arg0: i32) -> (i32, i32) {
    %c0_i32 = arith.constant 0 : i32
    %c0_i32_0 = arith.constant 0 : i32
    %c0_i32_1 = arith.constant 0 : i32
    return %c0_i32, %c0_i32_0 : i32, i32
  }
  func.func @transform_2(%arg0: i32) -> (i32, i32) {
    %c0_i32 = arith.constant 0 : i32
    %c0_i32_0 = arith.constant 0 : i32
    %c0_i32_1 = arith.constant 0 : i32
    return %c0_i32, %c0_i32_0 : i32, i32
  }
  func.func @transform_3(%arg0: i32) -> (i32, i32) {
    %c0_i32 = arith.constant 0 : i32
    %c0_i32_0 = arith.constant 0 : i32
    return %arg0, %c0_i32 : i32, i32
  }
}

module attributes {stable_mosaic.version = 11 : i64} {
  func.func @_mm_kernel(%arg0: i32, %arg1: memref<144x256xbf16, #tpu.memory_space<vmem>>, %arg2: memref<256x256xbf16, #tpu.memory_space<vmem>>, %arg3: memref<1x256xf32, #tpu.memory_space<vmem>>, %arg4: memref<144x256xf32, #tpu.memory_space<vmem>>) attributes {dimension_semantics = [#tpu.dimension_semantics<parallel>], iteration_bounds = array<i64: 2>, scalar_prefetch = 0 : i64, scratch_operands = 0 : i64, tpu.core_type = #tpu.core_type<tc>, window_params = [{transform_indices = @transform_0, window_bounds = array<i64: 144, 256>}, {pipeline_mode = #tpu.pipeline_mode<synchronous>, transform_indices = @transform_1, window_bounds = array<i64: 256, 256>}, {pipeline_mode = #tpu.pipeline_mode<synchronous>, transform_indices = @transform_2, window_bounds = array<i64: 1, 256>}, {transform_indices = @transform_3, window_bounds = array<i64: 144, 256>}]} {
    %c0 = arith.constant 0 : index
    %c0_0 = arith.constant 0 : index
    %0 = vector.load %arg1[%c0, %c0_0] : memref<144x256xbf16, #tpu.memory_space<vmem>>, vector<144x256xbf16>
    %c0_1 = arith.constant 0 : index
    %c0_2 = arith.constant 0 : index
    %1 = vector.load %arg2[%c0_1, %c0_2] : memref<256x256xbf16, #tpu.memory_space<vmem>>, vector<256x256xbf16>
    %cst = arith.constant dense<0.000000e+00> : vector<144x256xf32>
    %2 = tpu.matmul %0, %1, %cst {dimension_numbers = #tpu.dot_dimension_numbers<[1], [0], [0], [1], [0, 0, 1, 1], [], []>} : vector<144x256xbf16>, vector<256x256xbf16>, vector<144x256xf32> -> vector<144x256xf32>
    %c0_3 = arith.constant 0 : index
    %c0_4 = arith.constant 0 : index
    %3 = vector.load %arg3[%c0_3, %c0_4] : memref<1x256xf32, #tpu.memory_space<vmem>>, vector<1x256xf32>
    %4 = vector.broadcast %3 : vector<1x256xf32> to vector<144x256xf32>
    %5 = arith.addf %2, %4 : vector<144x256xf32>
    %cst_5 = arith.constant 0.000000e+00 : f32
    %6 = vector.broadcast %cst_5 : f32 to vector<144x256xf32>
    %7 = arith.maximumf %5, %6 : vector<144x256xf32>
    %c0_6 = arith.constant 0 : index
    %c0_7 = arith.constant 0 : index
    %8 = vector.load %arg4[%c0_6, %c0_7] : memref<144x256xf32, #tpu.memory_space<vmem>>, vector<144x256xf32>
    tpu.vector_store %arg4[%c0_6, %c0_7], %7 {strides = array<i32>} : memref<144x256xf32, #tpu.memory_space<vmem>>, vector<144x256xf32>,
    return
  }
  func.func @transform_0(%arg0: i32) -> (i32, i32) {
    %c0_i32 = arith.constant 0 : i32
    %c0_i32_0 = arith.constant 0 : i32
    return %arg0, %c0_i32 : i32, i32
  }
  func.func @transform_1(%arg0: i32) -> (i32, i32) {
    %c0_i32 = arith.constant 0 : i32
    %c0_i32_0 = arith.constant 0 : i32
    %c0_i32_1 = arith.constant 0 : i32
    return %c0_i32, %c0_i32_0 : i32, i32
  }
  func.func @transform_2(%arg0: i32) -> (i32, i32) {
    %c0_i32 = arith.constant 0 : i32
    %c0_i32_0 = arith.constant 0 : i32
    %c0_i32_1 = arith.constant 0 : i32
    return %c0_i32, %c0_i32_0 : i32, i32
  }
  func.func @transform_3(%arg0: i32) -> (i32, i32) {
    %c0_i32 = arith.constant 0 : i32
    %c0_i32_0 = arith.constant 0 : i32
    return %arg0, %c0_i32 : i32, i32
  }
}

module attributes {stable_mosaic.version = 11 : i64} {
  func.func @_mm_kernel(%arg0: i32, %arg1: memref<40x256xbf16, #tpu.memory_space<vmem>>, %arg2: memref<256x256xbf16, #tpu.memory_space<vmem>>, %arg3: memref<1x256xf32, #tpu.memory_space<vmem>>, %arg4: memref<40x256xf32, #tpu.memory_space<vmem>>) attributes {dimension_semantics = [#tpu.dimension_semantics<parallel>], iteration_bounds = array<i64: 2>, scalar_prefetch = 0 : i64, scratch_operands = 0 : i64, tpu.core_type = #tpu.core_type<tc>, window_params = [{transform_indices = @transform_0, window_bounds = array<i64: 40, 256>}, {pipeline_mode = #tpu.pipeline_mode<synchronous>, transform_indices = @transform_1, window_bounds = array<i64: 256, 256>}, {pipeline_mode = #tpu.pipeline_mode<synchronous>, transform_indices = @transform_2, window_bounds = array<i64: 1, 256>}, {transform_indices = @transform_3, window_bounds = array<i64: 40, 256>}]} {
    %c0 = arith.constant 0 : index
    %c0_0 = arith.constant 0 : index
    %0 = vector.load %arg1[%c0, %c0_0] : memref<40x256xbf16, #tpu.memory_space<vmem>>, vector<40x256xbf16>
    %c0_1 = arith.constant 0 : index
    %c0_2 = arith.constant 0 : index
    %1 = vector.load %arg2[%c0_1, %c0_2] : memref<256x256xbf16, #tpu.memory_space<vmem>>, vector<256x256xbf16>
    %cst = arith.constant dense<0.000000e+00> : vector<40x256xf32>
    %2 = tpu.matmul %0, %1, %cst {dimension_numbers = #tpu.dot_dimension_numbers<[1], [0], [0], [1], [0, 0, 1, 1], [], []>} : vector<40x256xbf16>, vector<256x256xbf16>, vector<40x256xf32> -> vector<40x256xf32>
    %c0_3 = arith.constant 0 : index
    %c0_4 = arith.constant 0 : index
    %3 = vector.load %arg3[%c0_3, %c0_4] : memref<1x256xf32, #tpu.memory_space<vmem>>, vector<1x256xf32>
    %4 = vector.broadcast %3 : vector<1x256xf32> to vector<40x256xf32>
    %5 = arith.addf %2, %4 : vector<40x256xf32>
    %cst_5 = arith.constant 0.000000e+00 : f32
    %6 = vector.broadcast %cst_5 : f32 to vector<40x256xf32>
    %7 = arith.maximumf %5, %6 : vector<40x256xf32>
    %c0_6 = arith.constant 0 : index
    %c0_7 = arith.constant 0 : index
    %8 = vector.load %arg4[%c0_6, %c0_7] : memref<40x256xf32, #tpu.memory_space<vmem>>, vector<40x256xf32>
    tpu.vector_store %arg4[%c0_6, %c0_7], %7 {strides = array<i32>} : memref<40x256xf32, #tpu.memory_space<vmem>>, vector<40x256xf32>,
    return
  }
  func.func @transform_0(%arg0: i32) -> (i32, i32) {
    %c0_i32 = arith.constant 0 : i32
    %c0_i32_0 = arith.constant 0 : i32
    return %arg0, %c0_i32 : i32, i32
  }
  func.func @transform_1(%arg0: i32) -> (i32, i32) {
    %c0_i32 = arith.constant 0 : i32
    %c0_i32_0 = arith.constant 0 : i32
    %c0_i32_1 = arith.constant 0 : i32
    return %c0_i32, %c0_i32_0 : i32, i32
  }
  func.func @transform_2(%arg0: i32) -> (i32, i32) {
    %c0_i32 = arith.constant 0 : i32
    %c0_i32_0 = arith.constant 0 : i32
    %c0_i32_1 = arith.constant 0 : i32
    return %c0_i32, %c0_i32_0 : i32, i32
  }
  func.func @transform_3(%arg0: i32) -> (i32, i32) {
    %c0_i32 = arith.constant 0 : i32
    %c0_i32_0 = arith.constant 0 : i32
    return %arg0, %c0_i32 : i32, i32
  }
}

module attributes {stable_mosaic.version = 11 : i64} {
  func.func @_conv_spec_kernel(%arg0: i32, %arg1: memref<1x18x18x128xbf16, #tpu.memory_space<vmem>>, %arg2: memref<1x16x16x128xbf16, #tpu.memory_space<vmem>>, %arg3: memref<9x128x128xbf16, #tpu.memory_space<vmem>>, %arg4: memref<128x128xbf16, #tpu.memory_space<vmem>>, %arg5: memref<1x128xf32, #tpu.memory_space<vmem>>, %arg6: memref<1x16x16x128xbf16, #tpu.memory_space<vmem>>) attributes {dimension_semantics = [#tpu.dimension_semantics<parallel>], iteration_bounds = array<i64: 2>, scalar_prefetch = 0 : i64, scratch_operands = 0 : i64, tpu.core_type = #tpu.core_type<tc>, window_params = [{transform_indices = @transform_0, window_bounds = array<i64: 1, 18, 18, 128>}, {transform_indices = @transform_1, window_bounds = array<i64: 1, 16, 16, 128>}, {pipeline_mode = #tpu.pipeline_mode<synchronous>, transform_indices = @transform_2, window_bounds = array<i64: 9, 128, 128>}, {pipeline_mode = #tpu.pipeline_mode<synchronous>, transform_indices = @transform_3, window_bounds = array<i64: 128, 128>}, {pipeline_mode = #tpu.pipeline_mode<synchronous>, transform_indices = @transform_4, window_bounds = array<i64: 1, 128>}, {transform_indices = @transform_5, window_bounds = array<i64: 1, 16, 16, 128>}]} {
    %c0 = arith.constant 0 : index
    %c0_0 = arith.constant 0 : index
    %c0_1 = arith.constant 0 : index
    %c0_2 = arith.constant 0 : index
    %0 = vector.load %arg2[%c0, %c0_0, %c0_1, %c0_2] : memref<1x16x16x128xbf16, #tpu.memory_space<vmem>>, vector<1x16x16x128xbf16>
    %1 = vector.shape_cast %0 : vector<1x16x16x128xbf16> to vector<16x16x128xbf16>
    %2 = vector.shape_cast %1 : vector<16x16x128xbf16> to vector<256x128xbf16>
    %c0_3 = arith.constant 0 : index
    %c0_4 = arith.constant 0 : index
    %3 = vector.load %arg4[%c0_3, %c0_4] : memref<128x128xbf16, #tpu.memory_space<vmem>>, vector<128x128xbf16>
    %cst = arith.constant dense<0.000000e+00> : vector<256x128xf32>
    %4 = tpu.matmul %2, %3, %cst {dimension_numbers = #tpu.dot_dimension_numbers<[1], [0], [0], [1], [0, 0, 1, 1], [], []>} : vector<256x128xbf16>, vector<128x128xbf16>, vector<256x128xf32> -> vector<256x128xf32>
    %c0_5 = arith.constant 0 : index
    %c0_6 = arith.constant 0 : index
    %c0_7 = arith.constant 0 : index
    %c0_8 = arith.constant 0 : index
    %5 = vector.load %arg1[%c0_5, %c0_6, %c0_7, %c0_8] : memref<1x18x18x128xbf16, #tpu.memory_space<vmem>>, vector<1x16x16x128xbf16>
    %6 = vector.shape_cast %5 : vector<1x16x16x128xbf16> to vector<16x16x128xbf16>
    %7 = vector.shape_cast %6 : vector<16x16x128xbf16> to vector<256x128xbf16>
    %c0_9 = arith.constant 0 : index
    %c0_10 = arith.constant 0 : index
    %c0_11 = arith.constant 0 : index
    %8 = vector.load %arg3[%c0_9, %c0_10, %c0_11] : memref<9x128x128xbf16, #tpu.memory_space<vmem>>, vector<1x128x128xbf16>
    %9 = vector.shape_cast %8 : vector<1x128x128xbf16> to vector<128x128xbf16>
    %cst_12 = arith.constant dense<0.000000e+00> : vector<256x128xf32>
    %10 = tpu.matmul %7, %9, %cst_12 {dimension_numbers = #tpu.dot_dimension_numbers<[1], [0], [0], [1], [0, 0, 1, 1], [], []>} : vector<256x128xbf16>, vector<128x128xbf16>, vector<256x128xf32> -> vector<256x128xf32>
    %11 = arith.addf %4, %10 : vector<256x128xf32>
    %c0_13 = arith.constant 0 : index
    %c0_14 = arith.constant 0 : index
    %c1 = arith.constant 1 : index
    %c0_15 = arith.constant 0 : index
    %12 = vector.load %arg1[%c0_13, %c0_14, %c1, %c0_15] : memref<1x18x18x128xbf16, #tpu.memory_space<vmem>>, vector<1x16x16x128xbf16>
    %13 = vector.shape_cast %12 : vector<1x16x16x128xbf16> to vector<16x16x128xbf16>
    %14 = vector.shape_cast %13 : vector<16x16x128xbf16> to vector<256x128xbf16>
    %c1_16 = arith.constant 1 : index
    %c0_17 = arith.constant 0 : index
    %c0_18 = arith.constant 0 : index
    %15 = vector.load %arg3[%c1_16, %c0_17, %c0_18] : memref<9x128x128xbf16, #tpu.memory_space<vmem>>, vector<1x128x128xbf16>
    %16 = vector.shape_cast %15 : vector<1x128x128xbf16> to vector<128x128xbf16>
    %cst_19 = arith.constant dense<0.000000e+00> : vector<256x128xf32>
    %17 = tpu.matmul %14, %16, %cst_19 {dimension_numbers = #tpu.dot_dimension_numbers<[1], [0], [0], [1], [0, 0, 1, 1], [], []>} : vector<256x128xbf16>, vector<128x128xbf16>, vector<256x128xf32> -> vector<256x128xf32>
    %18 = arith.addf %11, %17 : vector<256x128xf32>
    %c0_20 = arith.constant 0 : index
    %c0_21 = arith.constant 0 : index
    %c2 = arith.constant 2 : index
    %c0_22 = arith.constant 0 : index
    %19 = vector.load %arg1[%c0_20, %c0_21, %c2, %c0_22] : memref<1x18x18x128xbf16, #tpu.memory_space<vmem>>, vector<1x16x16x128xbf16>
    %20 = vector.shape_cast %19 : vector<1x16x16x128xbf16> to vector<16x16x128xbf16>
    %21 = vector.shape_cast %20 : vector<16x16x128xbf16> to vector<256x128xbf16>
    %c2_23 = arith.constant 2 : index
    %c0_24 = arith.constant 0 : index
    %c0_25 = arith.constant 0 : index
    %22 = vector.load %arg3[%c2_23, %c0_24, %c0_25] : memref<9x128x128xbf16, #tpu.memory_space<vmem>>, vector<1x128x128xbf16>
    %23 = vector.shape_cast %22 : vector<1x128x128xbf16> to vector<128x128xbf16>
    %cst_26 = arith.constant dense<0.000000e+00> : vector<256x128xf32>
    %24 = tpu.matmul %21, %23, %cst_26 {dimension_numbers = #tpu.dot_dimension_numbers<[1], [0], [0], [1], [0, 0, 1, 1], [], []>} : vector<256x128xbf16>, vector<128x128xbf16>, vector<256x128xf32> -> vector<256x128xf32>
    %25 = arith.addf %18, %24 : vector<256x128xf32>
    %c0_27 = arith.constant 0 : index
    %c1_28 = arith.constant 1 : index
    %c0_29 = arith.constant 0 : index
    %c0_30 = arith.constant 0 : index
    %26 = vector.load %arg1[%c0_27, %c1_28, %c0_29, %c0_30] : memref<1x18x18x128xbf16, #tpu.memory_space<vmem>>, vector<1x16x16x128xbf16>
    %27 = vector.shape_cast %26 : vector<1x16x16x128xbf16> to vector<16x16x128xbf16>
    %28 = vector.shape_cast %27 : vector<16x16x128xbf16> to vector<256x128xbf16>
    %c3 = arith.constant 3 : index
    %c0_31 = arith.constant 0 : index
    %c0_32 = arith.constant 0 : index
    %29 = vector.load %arg3[%c3, %c0_31, %c0_32] : memref<9x128x128xbf16, #tpu.memory_space<vmem>>, vector<1x128x128xbf16>
    %30 = vector.shape_cast %29 : vector<1x128x128xbf16> to vector<128x128xbf16>
    %cst_33 = arith.constant dense<0.000000e+00> : vector<256x128xf32>
    %31 = tpu.matmul %28, %30, %cst_33 {dimension_numbers = #tpu.dot_dimension_numbers<[1], [0], [0], [1], [0, 0, 1, 1], [], []>} : vector<256x128xbf16>, vector<128x128xbf16>, vector<256x128xf32> -> vector<256x128xf32>
    %32 = arith.addf %25, %31 : vector<256x128xf32>
    %c0_34 = arith.constant 0 : index
    %c1_35 = arith.constant 1 : index
    %c1_36 = arith.constant 1 : index
    %c0_37 = arith.constant 0 : index
    %33 = vector.load %arg1[%c0_34, %c1_35, %c1_36, %c0_37] : memref<1x18x18x128xbf16, #tpu.memory_space<vmem>>, vector<1x16x16x128xbf16>
    %34 = vector.shape_cast %33 : vector<1x16x16x128xbf16> to vector<16x16x128xbf16>
    %35 = vector.shape_cast %34 : vector<16x16x128xbf16> to vector<256x128xbf16>
    %c4 = arith.constant 4 : index
    %c0_38 = arith.constant 0 : index
    %c0_39 = arith.constant 0 : index
    %36 = vector.load %arg3[%c4, %c0_38, %c0_39] : memref<9x128x128xbf16, #tpu.memory_space<vmem>>, vector<1x128x128xbf16>
    %37 = vector.shape_cast %36 : vector<1x128x128xbf16> to vector<128x128xbf16>
    %cst_40 = arith.constant dense<0.000000e+00> : vector<256x128xf32>
    %38 = tpu.matmul %35, %37, %cst_40 {dimension_numbers = #tpu.dot_dimension_numbers<[1], [0], [0], [1], [0, 0, 1, 1], [], []>} : vector<256x128xbf16>, vector<128x128xbf16>, vector<256x128xf32> -> vector<256x128xf32>
    %39 = arith.addf %32, %38 : vector<256x128xf32>
    %c0_41 = arith.constant 0 : index
    %c1_42 = arith.constant 1 : index
    %c2_43 = arith.constant 2 : index
    %c0_44 = arith.constant 0 : index
    %40 = vector.load %arg1[%c0_41, %c1_42, %c2_43, %c0_44] : memref<1x18x18x128xbf16, #tpu.memory_space<vmem>>, vector<1x16x16x128xbf16>
    %41 = vector.shape_cast %40 : vector<1x16x16x128xbf16> to vector<16x16x128xbf16>
    %42 = vector.shape_cast %41 : vector<16x16x128xbf16> to vector<256x128xbf16>
    %c5 = arith.constant 5 : index
    %c0_45 = arith.constant 0 : index
    %c0_46 = arith.constant 0 : index
    %43 = vector.load %arg3[%c5, %c0_45, %c0_46] : memref<9x128x128xbf16, #tpu.memory_space<vmem>>, vector<1x128x128xbf16>
    %44 = vector.shape_cast %43 : vector<1x128x128xbf16> to vector<128x128xbf16>
    %cst_47 = arith.constant dense<0.000000e+00> : vector<256x128xf32>
    %45 = tpu.matmul %42, %44, %cst_47 {dimension_numbers = #tpu.dot_dimension_numbers<[1], [0], [0], [1], [0, 0, 1, 1], [], []>} : vector<256x128xbf16>, vector<128x128xbf16>, vector<256x128xf32> -> vector<256x128xf32>
    %46 = arith.addf %39, %45 : vector<256x128xf32>
    %c0_48 = arith.constant 0 : index
    %c2_49 = arith.constant 2 : index
    %c0_50 = arith.constant 0 : index
    %c0_51 = arith.constant 0 : index
    %47 = vector.load %arg1[%c0_48, %c2_49, %c0_50, %c0_51] : memref<1x18x18x128xbf16, #tpu.memory_space<vmem>>, vector<1x16x16x128xbf16>
    %48 = vector.shape_cast %47 : vector<1x16x16x128xbf16> to vector<16x16x128xbf16>
    %49 = vector.shape_cast %48 : vector<16x16x128xbf16> to vector<256x128xbf16>
    %c6 = arith.constant 6 : index
    %c0_52 = arith.constant 0 : index
    %c0_53 = arith.constant 0 : index
    %50 = vector.load %arg3[%c6, %c0_52, %c0_53] : memref<9x128x128xbf16, #tpu.memory_space<vmem>>, vector<1x128x128xbf16>
    %51 = vector.shape_cast %50 : vector<1x128x128xbf16> to vector<128x128xbf16>
    %cst_54 = arith.constant dense<0.000000e+00> : vector<256x128xf32>
    %52 = tpu.matmul %49, %51, %cst_54 {dimension_numbers = #tpu.dot_dimension_numbers<[1], [0], [0], [1], [0, 0, 1, 1], [], []>} : vector<256x128xbf16>, vector<128x128xbf16>, vector<256x128xf32> -> vector<256x128xf32>
    %53 = arith.addf %46, %52 : vector<256x128xf32>
    %c0_55 = arith.constant 0 : index
    %c2_56 = arith.constant 2 : index
    %c1_57 = arith.constant 1 : index
    %c0_58 = arith.constant 0 : index
    %54 = vector.load %arg1[%c0_55, %c2_56, %c1_57, %c0_58] : memref<1x18x18x128xbf16, #tpu.memory_space<vmem>>, vector<1x16x16x128xbf16>
    %55 = vector.shape_cast %54 : vector<1x16x16x128xbf16> to vector<16x16x128xbf16>
    %56 = vector.shape_cast %55 : vector<16x16x128xbf16> to vector<256x128xbf16>
    %c7 = arith.constant 7 : index
    %c0_59 = arith.constant 0 : index
    %c0_60 = arith.constant 0 : index
    %57 = vector.load %arg3[%c7, %c0_59, %c0_60] : memref<9x128x128xbf16, #tpu.memory_space<vmem>>, vector<1x128x128xbf16>
    %58 = vector.shape_cast %57 : vector<1x128x128xbf16> to vector<128x128xbf16>
    %cst_61 = arith.constant dense<0.000000e+00> : vector<256x128xf32>
    %59 = tpu.matmul %56, %58, %cst_61 {dimension_numbers = #tpu.dot_dimension_numbers<[1], [0], [0], [1], [0, 0, 1, 1], [], []>} : vector<256x128xbf16>, vector<128x128xbf16>, vector<256x128xf32> -> vector<256x128xf32>
    %60 = arith.addf %53, %59 : vector<256x128xf32>
    %c0_62 = arith.constant 0 : index
    %c2_63 = arith.constant 2 : index
    %c2_64 = arith.constant 2 : index
    %c0_65 = arith.constant 0 : index
    %61 = vector.load %arg1[%c0_62, %c2_63, %c2_64, %c0_65] : memref<1x18x18x128xbf16, #tpu.memory_space<vmem>>, vector<1x16x16x128xbf16>
    %62 = vector.shape_cast %61 : vector<1x16x16x128xbf16> to vector<16x16x128xbf16>
    %63 = vector.shape_cast %62 : vector<16x16x128xbf16> to vector<256x128xbf16>
    %c8 = arith.constant 8 : index
    %c0_66 = arith.constant 0 : index
    %c0_67 = arith.constant 0 : index
    %64 = vector.load %arg3[%c8, %c0_66, %c0_67] : memref<9x128x128xbf16, #tpu.memory_space<vmem>>, vector<1x128x128xbf16>
    %65 = vector.shape_cast %64 : vector<1x128x128xbf16> to vector<128x128xbf16>
    %cst_68 = arith.constant dense<0.000000e+00> : vector<256x128xf32>
    %66 = tpu.matmul %63, %65, %cst_68 {dimension_numbers = #tpu.dot_dimension_numbers<[1], [0], [0], [1], [0, 0, 1, 1], [], []>} : vector<256x128xbf16>, vector<128x128xbf16>, vector<256x128xf32> -> vector<256x128xf32>
    %67 = arith.addf %60, %66 : vector<256x128xf32>
    %c0_69 = arith.constant 0 : index
    %c0_70 = arith.constant 0 : index
    %68 = vector.load %arg5[%c0_69, %c0_70] : memref<1x128xf32, #tpu.memory_space<vmem>>, vector<1x128xf32>
    %69 = vector.broadcast %68 : vector<1x128xf32> to vector<256x128xf32>
    %70 = arith.addf %67, %69 : vector<256x128xf32>
    %cst_71 = arith.constant 0.000000e+00 : f32
    %71 = vector.broadcast %cst_71 : f32 to vector<256x128xf32>
    %72 = arith.maximumf %70, %71 : vector<256x128xf32>
    %73 = vector.shape_cast %72 : vector<256x128xf32> to vector<16x16x128xf32>
    %74 = arith.truncf %73 : vector<16x16x128xf32> to vector<16x16x128xbf16>
    %c0_72 = arith.constant 0 : index
    %c0_73 = arith.constant 0 : index
    %c0_74 = arith.constant 0 : index
    %c0_75 = arith.constant 0 : index
    %75 = vector.load %arg6[%c0_72, %c0_73, %c0_74, %c0_75] : memref<1x16x16x128xbf16, #tpu.memory_space<vmem>>, vector<1x16x16x128xbf16>
    %76 = vector.shape_cast %75 : vector<1x16x16x128xbf16> to vector<16x16x128xbf16>
    %77 = vector.shape_cast %74 : vector<16x16x128xbf16> to vector<1x16x16x128xbf16>
    tpu.vector_store %arg6[%c0_72, %c0_73, %c0_74, %c0_75], %77 {strides = array<i32>} : memref<1x16x16x128xbf16, #tpu.memory_space<vmem>>, vector<1x16x16x128xbf16>,
    return
  }
  func.func @transform_0(%arg0: i32) -> (i32, i32, i32, i32) {
    %c0_i32 = arith.constant 0 : i32
    %c0_i32_0 = arith.constant 0 : i32
    %c0_i32_1 = arith.constant 0 : i32
    %c0_i32_2 = arith.constant 0 : i32
    return %arg0, %c0_i32, %c0_i32_0, %c0_i32_1 : i32, i32, i32, i32
  }
  func.func @transform_1(%arg0: i32) -> (i32, i32, i32, i32) {
    %c0_i32 = arith.constant 0 : i32
    %c0_i32_0 = arith.constant 0 : i32
    %c0_i32_1 = arith.constant 0 : i32
    %c0_i32_2 = arith.constant 0 : i32
    return %arg0, %c0_i32, %c0_i32_0, %c0_i32_1 : i32, i32, i32, i32
  }
  func.func @transform_2(%arg0: i32) -> (i32, i32, i32) {
    %c0_i32 = arith.constant 0 : i32
    %c0_i32_0 = arith.constant 0 : i32
    %c0_i32_1 = arith.constant 0 : i32
    %c0_i32_2 = arith.constant 0 : i32
    return %c0_i32, %c0_i32_0, %c0_i32_1 : i32, i32, i32
  }
  func.func @transform_3(%arg0: i32) -> (i32, i32) {
    %c0_i32 = arith.constant 0 : i32
    %c0_i32_0 = arith.constant 0 : i32
    %c0_i32_1 = arith.constant 0 : i32
    return %c0_i32, %c0_i32_0 : i32, i32
  }
  func.func @transform_4(%arg0: i32) -> (i32, i32) {
    %c0_i32 = arith.constant 0 : i32
    %c0_i32_0 = arith.constant 0 : i32
    %c0_i32_1 = arith.constant 0 : i32
    return %c0_i32, %c0_i32_0 : i32, i32
  }
  func.func @transform_5(%arg0: i32) -> (i32, i32, i32, i32) {
    %c0_i32 = arith.constant 0 : i32
    %c0_i32_0 = arith.constant 0 : i32
    %c0_i32_1 = arith.constant 0 : i32
    %c0_i32_2 = arith.constant 0 : i32
    return %arg0, %c0_i32, %c0_i32_0, %c0_i32_1 : i32, i32, i32, i32
  }
}

module attributes {stable_mosaic.version = 11 : i64} {
  func.func @_mm_kernel(%arg0: i32, %arg1: memref<256x128xbf16, #tpu.memory_space<vmem>>, %arg2: memref<128x128xbf16, #tpu.memory_space<vmem>>, %arg3: memref<1x128xf32, #tpu.memory_space<vmem>>, %arg4: memref<256x128xf32, #tpu.memory_space<vmem>>) attributes {dimension_semantics = [#tpu.dimension_semantics<parallel>], iteration_bounds = array<i64: 2>, scalar_prefetch = 0 : i64, scratch_operands = 0 : i64, tpu.core_type = #tpu.core_type<tc>, window_params = [{transform_indices = @transform_0, window_bounds = array<i64: 256, 128>}, {pipeline_mode = #tpu.pipeline_mode<synchronous>, transform_indices = @transform_1, window_bounds = array<i64: 128, 128>}, {pipeline_mode = #tpu.pipeline_mode<synchronous>, transform_indices = @transform_2, window_bounds = array<i64: 1, 128>}, {transform_indices = @transform_3, window_bounds = array<i64: 256, 128>}]} {
    %c0 = arith.constant 0 : index
    %c0_0 = arith.constant 0 : index
    %0 = vector.load %arg1[%c0, %c0_0] : memref<256x128xbf16, #tpu.memory_space<vmem>>, vector<256x128xbf16>
    %c0_1 = arith.constant 0 : index
    %c0_2 = arith.constant 0 : index
    %1 = vector.load %arg2[%c0_1, %c0_2] : memref<128x128xbf16, #tpu.memory_space<vmem>>, vector<128x128xbf16>
    %cst = arith.constant dense<0.000000e+00> : vector<256x128xf32>
    %2 = tpu.matmul %0, %1, %cst {dimension_numbers = #tpu.dot_dimension_numbers<[1], [0], [0], [1], [0, 0, 1, 1], [], []>} : vector<256x128xbf16>, vector<128x128xbf16>, vector<256x128xf32> -> vector<256x128xf32>
    %c0_3 = arith.constant 0 : index
    %c0_4 = arith.constant 0 : index
    %3 = vector.load %arg3[%c0_3, %c0_4] : memref<1x128xf32, #tpu.memory_space<vmem>>, vector<1x128xf32>
    %4 = vector.broadcast %3 : vector<1x128xf32> to vector<256x128xf32>
    %5 = arith.addf %2, %4 : vector<256x128xf32>
    %cst_5 = arith.constant 0.000000e+00 : f32
    %6 = vector.broadcast %cst_5 : f32 to vector<256x128xf32>
    %7 = arith.maximumf %5, %6 : vector<256x128xf32>
    %c0_6 = arith.constant 0 : index
    %c0_7 = arith.constant 0 : index
    %8 = vector.load %arg4[%c0_6, %c0_7] : memref<256x128xf32, #tpu.memory_space<vmem>>, vector<256x128xf32>
    tpu.vector_store %arg4[%c0_6, %c0_7], %7 {strides = array<i32>} : memref<256x128xf32, #tpu.memory_space<vmem>>, vector<256x128xf32>,
    return
  }
  func.func @transform_0(%arg0: i32) -> (i32, i32) {
    %c0_i32 = arith.constant 0 : i32
    %c0_i32_0 = arith.constant 0 : i32
    return %arg0, %c0_i32 : i32, i32
  }
  func.func @transform_1(%arg0: i32) -> (i32, i32) {
    %c0_i32 = arith.constant 0 : i32
    %c0_i32_0 = arith.constant 0 : i32
    %c0_i32_1 = arith.constant 0 : i32
    return %c0_i32, %c0_i32_0 : i32, i32
  }
  func.func @transform_2(%arg0: i32) -> (i32, i32) {
    %c0_i32 = arith.constant 0 : i32
    %c0_i32_0 = arith.constant 0 : i32
    %c0_i32_1 = arith.constant 0 : i32
    return %c0_i32, %c0_i32_0 : i32, i32
  }
  func.func @transform_3(%arg0: i32) -> (i32, i32) {
    %c0_i32 = arith.constant 0 : i32
    %c0_i32_0 = arith.constant 0 : i32
    return %arg0, %c0_i32 : i32, i32
  }
}

module attributes {stable_mosaic.version = 11 : i64} {
  func.func @_conv_spec_kernel(%arg0: i32, %arg1: memref<1x18x18x128xbf16, #tpu.memory_space<vmem>>, %arg2: memref<1x16x16x128xbf16, #tpu.memory_space<vmem>>, %arg3: memref<9x128x128xbf16, #tpu.memory_space<vmem>>, %arg4: memref<128x128xbf16, #tpu.memory_space<vmem>>, %arg5: memref<1x128xf32, #tpu.memory_space<vmem>>, %arg6: memref<1x16x16x128xf32, #tpu.memory_space<vmem>>, %arg7: memref<1x16x16x128xf32, #tpu.memory_space<vmem>>) attributes {dimension_semantics = [#tpu.dimension_semantics<parallel>], iteration_bounds = array<i64: 2>, scalar_prefetch = 0 : i64, scratch_operands = 0 : i64, tpu.core_type = #tpu.core_type<tc>, window_params = [{transform_indices = @transform_0, window_bounds = array<i64: 1, 18, 18, 128>}, {transform_indices = @transform_1, window_bounds = array<i64: 1, 16, 16, 128>}, {pipeline_mode = #tpu.pipeline_mode<synchronous>, transform_indices = @transform_2, window_bounds = array<i64: 9, 128, 128>}, {pipeline_mode = #tpu.pipeline_mode<synchronous>, transform_indices = @transform_3, window_bounds = array<i64: 128, 128>}, {pipeline_mode = #tpu.pipeline_mode<synchronous>, transform_indices = @transform_4, window_bounds = array<i64: 1, 128>}, {transform_indices = @transform_5, window_bounds = array<i64: 1, 16, 16, 128>}, {transform_indices = @transform_6, window_bounds = array<i64: 1, 16, 16, 128>}]} {
    %c0 = arith.constant 0 : index
    %c0_0 = arith.constant 0 : index
    %c0_1 = arith.constant 0 : index
    %c0_2 = arith.constant 0 : index
    %0 = vector.load %arg2[%c0, %c0_0, %c0_1, %c0_2] : memref<1x16x16x128xbf16, #tpu.memory_space<vmem>>, vector<1x16x16x128xbf16>
    %1 = vector.shape_cast %0 : vector<1x16x16x128xbf16> to vector<16x16x128xbf16>
    %2 = vector.shape_cast %1 : vector<16x16x128xbf16> to vector<256x128xbf16>
    %c0_3 = arith.constant 0 : index
    %c0_4 = arith.constant 0 : index
    %3 = vector.load %arg4[%c0_3, %c0_4] : memref<128x128xbf16, #tpu.memory_space<vmem>>, vector<128x128xbf16>
    %cst = arith.constant dense<0.000000e+00> : vector<256x128xf32>
    %4 = tpu.matmul %2, %3, %cst {dimension_numbers = #tpu.dot_dimension_numbers<[1], [0], [0], [1], [0, 0, 1, 1], [], []>} : vector<256x128xbf16>, vector<128x128xbf16>, vector<256x128xf32> -> vector<256x128xf32>
    %c0_5 = arith.constant 0 : index
    %c0_6 = arith.constant 0 : index
    %c0_7 = arith.constant 0 : index
    %c0_8 = arith.constant 0 : index
    %5 = vector.load %arg1[%c0_5, %c0_6, %c0_7, %c0_8] : memref<1x18x18x128xbf16, #tpu.memory_space<vmem>>, vector<1x16x16x128xbf16>
    %6 = vector.shape_cast %5 : vector<1x16x16x128xbf16> to vector<16x16x128xbf16>
    %7 = vector.shape_cast %6 : vector<16x16x128xbf16> to vector<256x128xbf16>
    %c0_9 = arith.constant 0 : index
    %c0_10 = arith.constant 0 : index
    %c0_11 = arith.constant 0 : index
    %8 = vector.load %arg3[%c0_9, %c0_10, %c0_11] : memref<9x128x128xbf16, #tpu.memory_space<vmem>>, vector<1x128x128xbf16>
    %9 = vector.shape_cast %8 : vector<1x128x128xbf16> to vector<128x128xbf16>
    %cst_12 = arith.constant dense<0.000000e+00> : vector<256x128xf32>
    %10 = tpu.matmul %7, %9, %cst_12 {dimension_numbers = #tpu.dot_dimension_numbers<[1], [0], [0], [1], [0, 0, 1, 1], [], []>} : vector<256x128xbf16>, vector<128x128xbf16>, vector<256x128xf32> -> vector<256x128xf32>
    %11 = arith.addf %4, %10 : vector<256x128xf32>
    %c0_13 = arith.constant 0 : index
    %c0_14 = arith.constant 0 : index
    %c1 = arith.constant 1 : index
    %c0_15 = arith.constant 0 : index
    %12 = vector.load %arg1[%c0_13, %c0_14, %c1, %c0_15] : memref<1x18x18x128xbf16, #tpu.memory_space<vmem>>, vector<1x16x16x128xbf16>
    %13 = vector.shape_cast %12 : vector<1x16x16x128xbf16> to vector<16x16x128xbf16>
    %14 = vector.shape_cast %13 : vector<16x16x128xbf16> to vector<256x128xbf16>
    %c1_16 = arith.constant 1 : index
    %c0_17 = arith.constant 0 : index
    %c0_18 = arith.constant 0 : index
    %15 = vector.load %arg3[%c1_16, %c0_17, %c0_18] : memref<9x128x128xbf16, #tpu.memory_space<vmem>>, vector<1x128x128xbf16>
    %16 = vector.shape_cast %15 : vector<1x128x128xbf16> to vector<128x128xbf16>
    %cst_19 = arith.constant dense<0.000000e+00> : vector<256x128xf32>
    %17 = tpu.matmul %14, %16, %cst_19 {dimension_numbers = #tpu.dot_dimension_numbers<[1], [0], [0], [1], [0, 0, 1, 1], [], []>} : vector<256x128xbf16>, vector<128x128xbf16>, vector<256x128xf32> -> vector<256x128xf32>
    %18 = arith.addf %11, %17 : vector<256x128xf32>
    %c0_20 = arith.constant 0 : index
    %c0_21 = arith.constant 0 : index
    %c2 = arith.constant 2 : index
    %c0_22 = arith.constant 0 : index
    %19 = vector.load %arg1[%c0_20, %c0_21, %c2, %c0_22] : memref<1x18x18x128xbf16, #tpu.memory_space<vmem>>, vector<1x16x16x128xbf16>
    %20 = vector.shape_cast %19 : vector<1x16x16x128xbf16> to vector<16x16x128xbf16>
    %21 = vector.shape_cast %20 : vector<16x16x128xbf16> to vector<256x128xbf16>
    %c2_23 = arith.constant 2 : index
    %c0_24 = arith.constant 0 : index
    %c0_25 = arith.constant 0 : index
    %22 = vector.load %arg3[%c2_23, %c0_24, %c0_25] : memref<9x128x128xbf16, #tpu.memory_space<vmem>>, vector<1x128x128xbf16>
    %23 = vector.shape_cast %22 : vector<1x128x128xbf16> to vector<128x128xbf16>
    %cst_26 = arith.constant dense<0.000000e+00> : vector<256x128xf32>
    %24 = tpu.matmul %21, %23, %cst_26 {dimension_numbers = #tpu.dot_dimension_numbers<[1], [0], [0], [1], [0, 0, 1, 1], [], []>} : vector<256x128xbf16>, vector<128x128xbf16>, vector<256x128xf32> -> vector<256x128xf32>
    %25 = arith.addf %18, %24 : vector<256x128xf32>
    %c0_27 = arith.constant 0 : index
    %c1_28 = arith.constant 1 : index
    %c0_29 = arith.constant 0 : index
    %c0_30 = arith.constant 0 : index
    %26 = vector.load %arg1[%c0_27, %c1_28, %c0_29, %c0_30] : memref<1x18x18x128xbf16, #tpu.memory_space<vmem>>, vector<1x16x16x128xbf16>
    %27 = vector.shape_cast %26 : vector<1x16x16x128xbf16> to vector<16x16x128xbf16>
    %28 = vector.shape_cast %27 : vector<16x16x128xbf16> to vector<256x128xbf16>
    %c3 = arith.constant 3 : index
    %c0_31 = arith.constant 0 : index
    %c0_32 = arith.constant 0 : index
    %29 = vector.load %arg3[%c3, %c0_31, %c0_32] : memref<9x128x128xbf16, #tpu.memory_space<vmem>>, vector<1x128x128xbf16>
    %30 = vector.shape_cast %29 : vector<1x128x128xbf16> to vector<128x128xbf16>
    %cst_33 = arith.constant dense<0.000000e+00> : vector<256x128xf32>
    %31 = tpu.matmul %28, %30, %cst_33 {dimension_numbers = #tpu.dot_dimension_numbers<[1], [0], [0], [1], [0, 0, 1, 1], [], []>} : vector<256x128xbf16>, vector<128x128xbf16>, vector<256x128xf32> -> vector<256x128xf32>
    %32 = arith.addf %25, %31 : vector<256x128xf32>
    %c0_34 = arith.constant 0 : index
    %c1_35 = arith.constant 1 : index
    %c1_36 = arith.constant 1 : index
    %c0_37 = arith.constant 0 : index
    %33 = vector.load %arg1[%c0_34, %c1_35, %c1_36, %c0_37] : memref<1x18x18x128xbf16, #tpu.memory_space<vmem>>, vector<1x16x16x128xbf16>
    %34 = vector.shape_cast %33 : vector<1x16x16x128xbf16> to vector<16x16x128xbf16>
    %35 = vector.shape_cast %34 : vector<16x16x128xbf16> to vector<256x128xbf16>
    %c4 = arith.constant 4 : index
    %c0_38 = arith.constant 0 : index
    %c0_39 = arith.constant 0 : index
    %36 = vector.load %arg3[%c4, %c0_38, %c0_39] : memref<9x128x128xbf16, #tpu.memory_space<vmem>>, vector<1x128x128xbf16>
    %37 = vector.shape_cast %36 : vector<1x128x128xbf16> to vector<128x128xbf16>
    %cst_40 = arith.constant dense<0.000000e+00> : vector<256x128xf32>
    %38 = tpu.matmul %35, %37, %cst_40 {dimension_numbers = #tpu.dot_dimension_numbers<[1], [0], [0], [1], [0, 0, 1, 1], [], []>} : vector<256x128xbf16>, vector<128x128xbf16>, vector<256x128xf32> -> vector<256x128xf32>
    %39 = arith.addf %32, %38 : vector<256x128xf32>
    %c0_41 = arith.constant 0 : index
    %c1_42 = arith.constant 1 : index
    %c2_43 = arith.constant 2 : index
    %c0_44 = arith.constant 0 : index
    %40 = vector.load %arg1[%c0_41, %c1_42, %c2_43, %c0_44] : memref<1x18x18x128xbf16, #tpu.memory_space<vmem>>, vector<1x16x16x128xbf16>
    %41 = vector.shape_cast %40 : vector<1x16x16x128xbf16> to vector<16x16x128xbf16>
    %42 = vector.shape_cast %41 : vector<16x16x128xbf16> to vector<256x128xbf16>
    %c5 = arith.constant 5 : index
    %c0_45 = arith.constant 0 : index
    %c0_46 = arith.constant 0 : index
    %43 = vector.load %arg3[%c5, %c0_45, %c0_46] : memref<9x128x128xbf16, #tpu.memory_space<vmem>>, vector<1x128x128xbf16>
    %44 = vector.shape_cast %43 : vector<1x128x128xbf16> to vector<128x128xbf16>
    %cst_47 = arith.constant dense<0.000000e+00> : vector<256x128xf32>
    %45 = tpu.matmul %42, %44, %cst_47 {dimension_numbers = #tpu.dot_dimension_numbers<[1], [0], [0], [1], [0, 0, 1, 1], [], []>} : vector<256x128xbf16>, vector<128x128xbf16>, vector<256x128xf32> -> vector<256x128xf32>
    %46 = arith.addf %39, %45 : vector<256x128xf32>
    %c0_48 = arith.constant 0 : index
    %c2_49 = arith.constant 2 : index
    %c0_50 = arith.constant 0 : index
    %c0_51 = arith.constant 0 : index
    %47 = vector.load %arg1[%c0_48, %c2_49, %c0_50, %c0_51] : memref<1x18x18x128xbf16, #tpu.memory_space<vmem>>, vector<1x16x16x128xbf16>
    %48 = vector.shape_cast %47 : vector<1x16x16x128xbf16> to vector<16x16x128xbf16>
    %49 = vector.shape_cast %48 : vector<16x16x128xbf16> to vector<256x128xbf16>
    %c6 = arith.constant 6 : index
    %c0_52 = arith.constant 0 : index
    %c0_53 = arith.constant 0 : index
    %50 = vector.load %arg3[%c6, %c0_52, %c0_53] : memref<9x128x128xbf16, #tpu.memory_space<vmem>>, vector<1x128x128xbf16>
    %51 = vector.shape_cast %50 : vector<1x128x128xbf16> to vector<128x128xbf16>
    %cst_54 = arith.constant dense<0.000000e+00> : vector<256x128xf32>
    %52 = tpu.matmul %49, %51, %cst_54 {dimension_numbers = #tpu.dot_dimension_numbers<[1], [0], [0], [1], [0, 0, 1, 1], [], []>} : vector<256x128xbf16>, vector<128x128xbf16>, vector<256x128xf32> -> vector<256x128xf32>
    %53 = arith.addf %46, %52 : vector<256x128xf32>
    %c0_55 = arith.constant 0 : index
    %c2_56 = arith.constant 2 : index
    %c1_57 = arith.constant 1 : index
    %c0_58 = arith.constant 0 : index
    %54 = vector.load %arg1[%c0_55, %c2_56, %c1_57, %c0_58] : memref<1x18x18x128xbf16, #tpu.memory_space<vmem>>, vector<1x16x16x128xbf16>
    %55 = vector.shape_cast %54 : vector<1x16x16x128xbf16> to vector<16x16x128xbf16>
    %56 = vector.shape_cast %55 : vector<16x16x128xbf16> to vector<256x128xbf16>
    %c7 = arith.constant 7 : index
    %c0_59 = arith.constant 0 : index
    %c0_60 = arith.constant 0 : index
    %57 = vector.load %arg3[%c7, %c0_59, %c0_60] : memref<9x128x128xbf16, #tpu.memory_space<vmem>>, vector<1x128x128xbf16>
    %58 = vector.shape_cast %57 : vector<1x128x128xbf16> to vector<128x128xbf16>
    %cst_61 = arith.constant dense<0.000000e+00> : vector<256x128xf32>
    %59 = tpu.matmul %56, %58, %cst_61 {dimension_numbers = #tpu.dot_dimension_numbers<[1], [0], [0], [1], [0, 0, 1, 1], [], []>} : vector<256x128xbf16>, vector<128x128xbf16>, vector<256x128xf32> -> vector<256x128xf32>
    %60 = arith.addf %53, %59 : vector<256x128xf32>
    %c0_62 = arith.constant 0 : index
    %c2_63 = arith.constant 2 : index
    %c2_64 = arith.constant 2 : index
    %c0_65 = arith.constant 0 : index
    %61 = vector.load %arg1[%c0_62, %c2_63, %c2_64, %c0_65] : memref<1x18x18x128xbf16, #tpu.memory_space<vmem>>, vector<1x16x16x128xbf16>
    %62 = vector.shape_cast %61 : vector<1x16x16x128xbf16> to vector<16x16x128xbf16>
    %63 = vector.shape_cast %62 : vector<16x16x128xbf16> to vector<256x128xbf16>
    %c8 = arith.constant 8 : index
    %c0_66 = arith.constant 0 : index
    %c0_67 = arith.constant 0 : index
    %64 = vector.load %arg3[%c8, %c0_66, %c0_67] : memref<9x128x128xbf16, #tpu.memory_space<vmem>>, vector<1x128x128xbf16>
    %65 = vector.shape_cast %64 : vector<1x128x128xbf16> to vector<128x128xbf16>
    %cst_68 = arith.constant dense<0.000000e+00> : vector<256x128xf32>
    %66 = tpu.matmul %63, %65, %cst_68 {dimension_numbers = #tpu.dot_dimension_numbers<[1], [0], [0], [1], [0, 0, 1, 1], [], []>} : vector<256x128xbf16>, vector<128x128xbf16>, vector<256x128xf32> -> vector<256x128xf32>
    %67 = arith.addf %60, %66 : vector<256x128xf32>
    %c0_69 = arith.constant 0 : index
    %c0_70 = arith.constant 0 : index
    %68 = vector.load %arg5[%c0_69, %c0_70] : memref<1x128xf32, #tpu.memory_space<vmem>>, vector<1x128xf32>
    %69 = vector.broadcast %68 : vector<1x128xf32> to vector<256x128xf32>
    %70 = arith.addf %67, %69 : vector<256x128xf32>
    %cst_71 = arith.constant 0.000000e+00 : f32
    %71 = vector.broadcast %cst_71 : f32 to vector<256x128xf32>
    %72 = arith.maximumf %70, %71 : vector<256x128xf32>
    %c0_72 = arith.constant 0 : index
    %c0_73 = arith.constant 0 : index
    %c0_74 = arith.constant 0 : index
    %c0_75 = arith.constant 0 : index
    %73 = vector.load %arg6[%c0_72, %c0_73, %c0_74, %c0_75] : memref<1x16x16x128xf32, #tpu.memory_space<vmem>>, vector<1x16x16x128xf32>
    %74 = vector.shape_cast %73 : vector<1x16x16x128xf32> to vector<16x16x128xf32>
    %75 = vector.shape_cast %74 : vector<16x16x128xf32> to vector<256x128xf32>
    %cst_76 = arith.constant 3.000000e+00 : f32
    %76 = vector.broadcast %cst_76 : f32 to vector<256x128xf32>
    %77 = arith.mulf %76, %75 : vector<256x128xf32>
    %78 = arith.addf %72, %77 : vector<256x128xf32>
    %79 = vector.shape_cast %78 : vector<256x128xf32> to vector<16x16x128xf32>
    %c0_77 = arith.constant 0 : index
    %c0_78 = arith.constant 0 : index
    %c0_79 = arith.constant 0 : index
    %c0_80 = arith.constant 0 : index
    %80 = vector.load %arg7[%c0_77, %c0_78, %c0_79, %c0_80] : memref<1x16x16x128xf32, #tpu.memory_space<vmem>>, vector<1x16x16x128xf32>
    %81 = vector.shape_cast %80 : vector<1x16x16x128xf32> to vector<16x16x128xf32>
    %82 = vector.shape_cast %79 : vector<16x16x128xf32> to vector<1x16x16x128xf32>
    tpu.vector_store %arg7[%c0_77, %c0_78, %c0_79, %c0_80], %82 {strides = array<i32>} : memref<1x16x16x128xf32, #tpu.memory_space<vmem>>, vector<1x16x16x128xf32>,
    return
  }
  func.func @transform_0(%arg0: i32) -> (i32, i32, i32, i32) {
    %c0_i32 = arith.constant 0 : i32
    %c0_i32_0 = arith.constant 0 : i32
    %c0_i32_1 = arith.constant 0 : i32
    %c0_i32_2 = arith.constant 0 : i32
    return %arg0, %c0_i32, %c0_i32_0, %c0_i32_1 : i32, i32, i32, i32
  }
  func.func @transform_1(%arg0: i32) -> (i32, i32, i32, i32) {
    %c0_i32 = arith.constant 0 : i32
    %c0_i32_0 = arith.constant 0 : i32
    %c0_i32_1 = arith.constant 0 : i32
    %c0_i32_2 = arith.constant 0 : i32
    return %arg0, %c0_i32, %c0_i32_0, %c0_i32_1 : i32, i32, i32, i32
  }
  func.func @transform_2(%arg0: i32) -> (i32, i32, i32) {
    %c0_i32 = arith.constant 0 : i32
    %c0_i32_0 = arith.constant 0 : i32
    %c0_i32_1 = arith.constant 0 : i32
    %c0_i32_2 = arith.constant 0 : i32
    return %c0_i32, %c0_i32_0, %c0_i32_1 : i32, i32, i32
  }
  func.func @transform_3(%arg0: i32) -> (i32, i32) {
    %c0_i32 = arith.constant 0 : i32
    %c0_i32_0 = arith.constant 0 : i32
    %c0_i32_1 = arith.constant 0 : i32
    return %c0_i32, %c0_i32_0 : i32, i32
  }
  func.func @transform_4(%arg0: i32) -> (i32, i32) {
    %c0_i32 = arith.constant 0 : i32
    %c0_i32_0 = arith.constant 0 : i32
    %c0_i32_1 = arith.constant 0 : i32
    return %c0_i32, %c0_i32_0 : i32, i32
  }
  func.func @transform_5(%arg0: i32) -> (i32, i32, i32, i32) {
    %c0_i32 = arith.constant 0 : i32
    %c0_i32_0 = arith.constant 0 : i32
    %c0_i32_1 = arith.constant 0 : i32
    %c0_i32_2 = arith.constant 0 : i32
    return %arg0, %c0_i32, %c0_i32_0, %c0_i32_1 : i32, i32, i32, i32
  }
  func.func @transform_6(%arg0: i32) -> (i32, i32, i32, i32) {
    %c0_i32 = arith.constant 0 : i32
    %c0_i32_0 = arith.constant 0 : i32
    %c0_i32_1 = arith.constant 0 : i32
    %c0_i32_2 = arith.constant 0 : i32
    return %arg0, %c0_i32, %c0_i32_0, %c0_i32_1 : i32, i32, i32, i32
  }
}

</mosaic_0001>

<bundles_post_ra>
// kernel: _lambda_.8
= control target key start
LH: loop header
LB: loop body
LE: loop exit
PB: predicated region body
PF: predicated region fallthrough
CT: control target
= control target key end

     0   :  { %8 = vsyncpa [#allocation3], 0  ;;  %s914_s12 = smov 0   ;;  %s1045_s0 = inlined_call_operand.vmem [shape: bf16[512,128], index: 0, kind: input, shape index: {}]   ;;  %s1046_s1 = inlined_call_operand.hbm [shape: bf16[128,128], index: 1, kind: input, shape index: {}]   ;;  %s1047_s2 = inlined_call_operand.vmem [shape: f32[1,128], index: 2, kind: input, shape index: {}]   ;;  %s1048_s3 = inlined_call_operand.vmem [shape: f32[512,128], index: 3, kind: output, shape index: {}]  }
   0x1 LB: > { %s682_s13 = sadd.s32 4294967295, %s889_s12   ;;  %p684_p0 = scmp.ge.s32.totalorder %s889_s12, 1  ;;  %s889_s12 = sphi %s914_s12, %s14_s12  }
   0x2   : > { %p113_p1 = scmp.lt.s32.totalorder %s889_s12, 3  ;;  %s891_s14 = smov [#allocation2]  }
   0x3   : > { %s125_s15 = sshll.u32 %s891_s14, 4  ;;  %p926_p3 = scmp.eq.s32.totalorder %s682_s13, 0  ;;  %s126_s15 = int_to_ptr.vmem [resolvable:$true] %s125_s15 }
   0x4   : > { %p922_p2 = pnand %p684_p0, %p113_p1  ;;  %s864_s18 = scalar_lea.vmem %s126_s15, 1024 }
   0x5   : > { %p865_p7 = scmp.ne.s32.totalorder %s126_s15, %s864_s18  ;;  %p872_p10 = scmp.lt.s32.totalorder %s126_s15, %s126_s15 }
   0x6   : > { %p812_p4 = pneg %p922_p2  ;;  %p873_p11 = scmp.lt.s32.totalorder %s864_s18, %s864_s18 }
   0x8   : > { %p813_p5 = pnand %p926_p3, %p812_p4  ;;  %p874_p12 = por %p873_p11, %p872_p10 }
   0xa   : > { %p855_p6 = pneg %p813_p5 }
   0xc   : > { %p867_p8 = pnand %p865_p7, %p855_p6 }
   0xe   : > { %p868_p9 = pneg %p867_p8 }
  0x10   : > { %p875_p13 = pnand %p874_p12, %p868_p9 }
  0x12   : > { %878 = shalt.err (!%p875_p13)
}
  0x13   : > { %s892_s19 = smov 64   ;;  %s893_s20 = smov 4  }
  0x14   : > { %815 = dma.hbm_to_vmem [thread:$0]  (!%p813_p5), %s1046_s1, 1024, %s126_s15, [#allocation3], %s892_s19, %s892_s19, %s893_s20  }
  0x15   : > { %153 = sbr.rel (%p922_p2) target bundleno = 288 (0x120), region = 32 }
  0x1a   : > { %884 = dma.done.wait (%p926_p3), [#allocation3], 1024  }
  0x1b   : > { %886 = vsyncadd (%p926_p3), [#allocation3], 4294966272  ;;  %s689_s23 = sshll.u32 %s682_s13, 5  ;;  %v829_v0 = vld [vmem:[#allocation2 + $0x38] sm:$0xff]   ;;  %v830_v1 = vld [vmem:[#allocation2 + $0x30] sm:$0xff]  }
  0x1c   : > { %p178_p0 = scmp.lt.s32.totalorder %s689_s23, 63  ;;  %744 = vmatprep.subr.bf16.mxu0 %v829_v0  ;;  %792 = vmatprep.subr.bf16.mxu1 %v829_v0  ;;  %v831_v2 = vld [vmem:[#allocation2 + $0x28] sm:$0xff]   ;;  %v832_v3 = vld [vmem:[#allocation2 + $0x20] sm:$0xff]   ;;  %v833_v6 = vld [vmem:[#allocation2 + $0x18] sm:$0xff]  }
  0x1d   : > { %745 = vmatpush3.bf16.msra.mxu0 %v829_v0  ;;  %800 = vmatpush3.bf16.msra.mxu1 %v829_v0  ;;  %v834_v7 = vld [vmem:[#allocation2 + $0x10] sm:$0xff]   ;;  %v835_v8 = vld [vmem:[#allocation2 + $0x8] sm:$0xff]   ;;  %v836_v9 = vld [vmem:[#allocation2] sm:$0xff]  }
  0x1e   : > { %s1052_s23 = smov (!%p178_p0, %s689_s23), 63  ;;  %746 = vmatprep.subr.bf16.mxu0 %v830_v1  ;;  %793 = vmatprep.subr.bf16.mxu1 %v830_v1  ;;  %v970_v24 = vld [vmem:[%s1047_s2] ss:$0 sm:$0xff] }
  0x1f   : > { %s690_s24 = sshll.u32 %s1052_s23, 2  ;;  %s692_s30 = sshll.u32 %s1052_s23, 3 }
  0x20   : > { %s949_s27 = scalar_lea.vmem %s1045_s0, %s690_s24  ;;  %s978_s6 = scalar_lea.vmem %s1048_s3, %s692_s30 }
  0x21   : > { %747 = vmatpush3.bf16.msra.mxu0 %v830_v1  ;;  %801 = vmatpush3.bf16.msra.mxu1 %v830_v1  ;;  %v837_v4 = vld [vmem:[%s949_s27] sm:$0xff]   ;;  %v839_v10 = vld [vmem:[%s949_s27 + $0x8] sm:$0xff]   ;;  %v841_v12 = vld [vmem:[%s949_s27 + $0x10] sm:$0xff]  }
  0x22   : > { %748 = vmatprep.subr.bf16.mxu0 %v831_v2  ;;  %794 = vmatprep.subr.bf16.mxu1 %v831_v2  ;;  %v838_v5 = vld [vmem:[%s949_s27 + $0x40] sm:$0xff]   ;;  %v840_v11 = vld [vmem:[%s949_s27 + $0x48] sm:$0xff]   ;;  %v842_v13 = vld [vmem:[%s949_s27 + $0x50] sm:$0xff]  }
  0x23   : > { %760 = vmatprep.mubr.bf16.mxu0 %v837_v4  ;;  %776 = vmatprep.mubr.bf16.mxu1 %v838_v5  ;;  %v843_v14 = vld [vmem:[%s949_s27 + $0x18] sm:$0xff]   ;;  %v845_v16 = vld [vmem:[%s949_s27 + $0x20] sm:$0xff]   ;;  %v847_v18 = vld [vmem:[%s949_s27 + $0x28] sm:$0xff]  }
  0x24   : > { %v844_v15 = vld [vmem:[%s949_s27 + $0x58] sm:$0xff]   ;;  %v846_v17 = vld [vmem:[%s949_s27 + $0x60] sm:$0xff]   ;;  %v848_v19 = vld [vmem:[%s949_s27 + $0x68] sm:$0xff]  }
  0x25   : > { %749 = vmatpush3.bf16.msra.mxu0 %v831_v2  ;;  %802 = vmatpush3.bf16.msra.mxu1 %v831_v2  ;;  %v849_v20 = vld [vmem:[%s949_s27 + $0x30] sm:$0xff]   ;;  %v851_v22 = vld [vmem:[%s949_s27 + $0x38] sm:$0xff]  }
  0x26   : > { %750 = vmatprep.subr.bf16.mxu0 %v832_v3  ;;  %795 = vmatprep.subr.bf16.mxu1 %v832_v3  ;;  %v850_v21 = vld [vmem:[%s949_s27 + $0x70] sm:$0xff]   ;;  %v852_v23 = vld [vmem:[%s949_s27 + $0x78] sm:$0xff]  }
  0x29   : > { %751 = vmatpush3.bf16.msra.mxu0 %v832_v3  ;;  %803 = vmatpush3.bf16.msra.mxu1 %v832_v3 }
  0x2a   : > { %752 = vmatprep.subr.bf16.mxu0 %v833_v6  ;;  %796 = vmatprep.subr.bf16.mxu1 %v833_v6 }
  0x2d   : > { %753 = vmatpush3.bf16.msra.mxu0 %v833_v6  ;;  %804 = vmatpush3.bf16.msra.mxu1 %v833_v6 }
  0x2e   : > { %754 = vmatprep.subr.bf16.mxu0 %v834_v7  ;;  %797 = vmatprep.subr.bf16.mxu1 %v834_v7 }
  0x31   : > { %755 = vmatpush3.bf16.msra.mxu0 %v834_v7  ;;  %805 = vmatpush3.bf16.msra.mxu1 %v834_v7 }
  0x32   : > { %756 = vmatprep.subr.bf16.mxu0 %v835_v8  ;;  %798 = vmatprep.subr.bf16.mxu1 %v835_v8 }
  0x35   : > { %757 = vmatpush3.bf16.msra.mxu0 %v835_v8  ;;  %806 = vmatpush3.bf16.msra.mxu1 %v835_v8 }
  0x36   : > { %758 = vmatprep.subr.bf16.mxu0 %v836_v9  ;;  %799 = vmatprep.subr.bf16.mxu1 %v836_v9 }
  0x39   : > { %759 = vmatpush3.bf16.msra.mxu0 %v836_v9  ;;  %807 = vmatpush3.bf16.msra.mxu1 %v836_v9 }
  0x3c   : > { %761 = vmatmul.mubr.bf16.vlgmr.msra.gmra.mxu0 %v839_v10  ;;  %777 = vmatmul.mubr.bf16.vlgmr.msra.gmra.mxu1 %v840_v11 }
  0x3d   : > { %764 = vmatprep.mubr.bf16.mxu0 %v841_v12  ;;  %780 = vmatprep.mubr.bf16.mxu1 %v842_v13 }
  0x44   : > { %765 = vmatmul.mubr.bf16.gmra.mxu0 %v843_v14  ;;  %781 = vmatmul.mubr.bf16.gmra.mxu1 %v844_v15 }
  0x45   : > { %768 = vmatprep.mubr.bf16.mxu0 %v845_v16  ;;  %784 = vmatprep.mubr.bf16.mxu1 %v846_v17 }
  0x4c   : > { %769 = vmatmul.mubr.bf16.gmra.mxu0 %v847_v18  ;;  %785 = vmatmul.mubr.bf16.gmra.mxu1 %v848_v19 }
  0x4d   : > { %772 = vmatprep.mubr.bf16.mxu0 %v849_v20  ;;  %788 = vmatprep.mubr.bf16.mxu1 %v850_v21 }
  0x54   : > { %773 = vmatmul.mubr.bf16.gmra.mxu0 %v851_v22  ;;  %789 = vmatmul.mubr.bf16.gmra.mxu1 %v852_v23 }
  0xfc   : > { %v762_v25 = vpop.f32.mrf.mxu0  ;;  %v778_v26 = vpop.f32.mrf.mxu1 }
  0xfd   : > { %v432_v27 = vadd.f32 %v762_v25, %v970_v24  ;;  %v496_v28 = vadd.f32 %v778_v26, %v970_v24 }
  0xfe   : > { %v423_v29 = vpop.f32.mrf.mxu0  ;;  %v487_v30 = vpop.f32.mrf.mxu1 }
  0xff   : > { %v552_v31 = vmax.f32 %v432_v27, 0.0  ;;  %v568_v32 = vmax.f32 %v496_v28, 0.0  ;;  %v424_v33 = vadd.f32 %v970_v24, %v423_v29  ;;  %v488_v34 = vadd.f32 %v970_v24, %v487_v30 }
 0x100   : > { %v763_v35 = vpop.f32.mrf.mxu0  ;;  %v779_v36 = vpop.f32.mrf.mxu1 }
 0x101   : > { %584 = vst [vmem:[%s978_s6 + $0x10] sm:$0xff] %v552_v31  ;;  %600 = vst [vmem:[%s978_s6 + $0x90] sm:$0xff] %v568_v32  ;;  %v550_v37 = vmax.f32 %v424_v33, 0.0  ;;  %v566_v38 = vmax.f32 %v488_v34, 0.0  ;;  %v435_v39 = vadd.f32 %v763_v35, %v970_v24  ;;  %v499_v40 = vadd.f32 %v779_v36, %v970_v24 }
 0x102   : > { %v426_v41 = vpop.f32.mrf.mxu0  ;;  %v490_v42 = vpop.f32.mrf.mxu1 }
 0x103   : > { %582 = vst [vmem:[%s978_s6] sm:$0xff] %v550_v37  ;;  %598 = vst [vmem:[%s978_s6 + $0x80] sm:$0xff] %v566_v38  ;;  %v553_v43 = vmax.f32 %v435_v39, 0.0  ;;  %v569_v44 = vmax.f32 %v499_v40, 0.0  ;;  %v427_v45 = vadd.f32 %v970_v24, %v426_v41  ;;  %v491_v46 = vadd.f32 %v970_v24, %v490_v42 }
 0x104   : > { %v766_v47 = vpop.f32.mrf.mxu0  ;;  %v782_v48 = vpop.f32.mrf.mxu1 }
 0x105   : > { %585 = vst [vmem:[%s978_s6 + $0x18] sm:$0xff] %v553_v43  ;;  %601 = vst [vmem:[%s978_s6 + $0x98] sm:$0xff] %v569_v44  ;;  %v551_v49 = vmax.f32 %v427_v45, 0.0  ;;  %v567_v50 = vmax.f32 %v491_v46, 0.0  ;;  %v448_v51 = vadd.f32 %v766_v47, %v970_v24  ;;  %v512_v52 = vadd.f32 %v782_v48, %v970_v24 }
 0x106   : > { %v439_v53 = vpop.f32.mrf.mxu0  ;;  %v503_v54 = vpop.f32.mrf.mxu1 }
 0x107   : > { %583 = vst [vmem:[%s978_s6 + $0x8] sm:$0xff] %v551_v49  ;;  %599 = vst [vmem:[%s978_s6 + $0x88] sm:$0xff] %v567_v50  ;;  %v556_v55 = vmax.f32 %v448_v51, 0.0  ;;  %v572_v56 = vmax.f32 %v512_v52, 0.0  ;;  %v440_v57 = vadd.f32 %v970_v24, %v439_v53  ;;  %v504_v58 = vadd.f32 %v970_v24, %v503_v54 }
 0x108   : > { %v767_v59 = vpop.f32.mrf.mxu0  ;;  %v783_v60 = vpop.f32.mrf.mxu1 }
 0x109   : > { %588 = vst [vmem:[%s978_s6 + $0x30] sm:$0xff] %v556_v55  ;;  %604 = vst [vmem:[%s978_s6 + $0xb0] sm:$0xff] %v572_v56  ;;  %v554_v61 = vmax.f32 %v440_v57, 0.0  ;;  %v570_v62 = vmax.f32 %v504_v58, 0.0  ;;  %v451_v63 = vadd.f32 %v767_v59, %v970_v24  ;;  %v515_v0 = vadd.f32 %v783_v60, %v970_v24 }
 0x10a   : > { %v442_v1 = vpop.f32.mrf.mxu0  ;;  %v506_v2 = vpop.f32.mrf.mxu1 }
 0x10b   : > { %586 = vst [vmem:[%s978_s6 + $0x20] sm:$0xff] %v554_v61  ;;  %602 = vst [vmem:[%s978_s6 + $0xa0] sm:$0xff] %v570_v62  ;;  %v557_v3 = vmax.f32 %v451_v63, 0.0  ;;  %v573_v4 = vmax.f32 %v515_v0, 0.0  ;;  %v443_v5 = vadd.f32 %v970_v24, %v442_v1  ;;  %v507_v6 = vadd.f32 %v970_v24, %v506_v2 }
 0x10c   : > { %v770_v7 = vpop.f32.mrf.mxu0  ;;  %v786_v8 = vpop.f32.mrf.mxu1 }
 0x10d   : > { %589 = vst [vmem:[%s978_s6 + $0x38] sm:$0xff] %v557_v3  ;;  %605 = vst [vmem:[%s978_s6 + $0xb8] sm:$0xff] %v573_v4  ;;  %v555_v9 = vmax.f32 %v443_v5, 0.0  ;;  %v571_v10 = vmax.f32 %v507_v6, 0.0  ;;  %v464_v11 = vadd.f32 %v770_v7, %v970_v24  ;;  %v528_v12 = vadd.f32 %v786_v8, %v970_v24 }
 0x10e   : > { %v455_v13 = vpop.f32.mrf.mxu0  ;;  %v519_v14 = vpop.f32.mrf.mxu1 }
 0x10f   : > { %587 = vst [vmem:[%s978_s6 + $0x28] sm:$0xff] %v555_v9  ;;  %603 = vst [vmem:[%s978_s6 + $0xa8] sm:$0xff] %v571_v10  ;;  %v560_v15 = vmax.f32 %v464_v11, 0.0  ;;  %v576_v16 = vmax.f32 %v528_v12, 0.0  ;;  %v456_v17 = vadd.f32 %v970_v24, %v455_v13  ;;  %v520_v18 = vadd.f32 %v970_v24, %v519_v14 }
 0x110   : > { %v771_v19 = vpop.f32.mrf.mxu0  ;;  %v787_v20 = vpop.f32.mrf.mxu1 }
 0x111   : > { %592 = vst [vmem:[%s978_s6 + $0x50] sm:$0xff] %v560_v15  ;;  %608 = vst [vmem:[%s978_s6 + $0xd0] sm:$0xff] %v576_v16  ;;  %v558_v21 = vmax.f32 %v456_v17, 0.0  ;;  %v574_v22 = vmax.f32 %v520_v18, 0.0  ;;  %v467_v23 = vadd.f32 %v771_v19, %v970_v24  ;;  %v531_v25 = vadd.f32 %v787_v20, %v970_v24 }
 0x112   : > { %v458_v26 = vpop.f32.mrf.mxu0  ;;  %v522_v27 = vpop.f32.mrf.mxu1 }
 0x113   : > { %590 = vst [vmem:[%s978_s6 + $0x40] sm:$0xff] %v558_v21  ;;  %606 = vst [vmem:[%s978_s6 + $0xc0] sm:$0xff] %v574_v22  ;;  %v561_v28 = vmax.f32 %v467_v23, 0.0  ;;  %v577_v29 = vmax.f32 %v531_v25, 0.0  ;;  %v459_v30 = vadd.f32 %v970_v24, %v458_v26  ;;  %v523_v31 = vadd.f32 %v970_v24, %v522_v27 }
 0x114   : > { %v774_v32 = vpop.f32.mrf.mxu0  ;;  %v790_v33 = vpop.f32.mrf.mxu1 }
 0x115   : > { %593 = vst [vmem:[%s978_s6 + $0x58] sm:$0xff] %v561_v28  ;;  %609 = vst [vmem:[%s978_s6 + $0xd8] sm:$0xff] %v577_v29  ;;  %v559_v34 = vmax.f32 %v459_v30, 0.0  ;;  %v575_v35 = vmax.f32 %v523_v31, 0.0  ;;  %v480_v36 = vadd.f32 %v774_v32, %v970_v24  ;;  %v544_v37 = vadd.f32 %v790_v33, %v970_v24 }
 0x116   : > { %v471_v38 = vpop.f32.mrf.mxu0  ;;  %v535_v39 = vpop.f32.mrf.mxu1 }
 0x117   : > { %591 = vst [vmem:[%s978_s6 + $0x48] sm:$0xff] %v559_v34  ;;  %607 = vst [vmem:[%s978_s6 + $0xc8] sm:$0xff] %v575_v35  ;;  %v564_v40 = vmax.f32 %v480_v36, 0.0  ;;  %v580_v41 = vmax.f32 %v544_v37, 0.0  ;;  %v472_v42 = vadd.f32 %v970_v24, %v471_v38  ;;  %v536_v43 = vadd.f32 %v970_v24, %v535_v39 }
 0x118   : > { %v775_v44 = vpop.f32.mrf.mxu0  ;;  %v791_v45 = vpop.f32.mrf.mxu1 }
 0x119   : > { %596 = vst [vmem:[%s978_s6 + $0x70] sm:$0xff] %v564_v40  ;;  %612 = vst [vmem:[%s978_s6 + $0xf0] sm:$0xff] %v580_v41  ;;  %v562_v46 = vmax.f32 %v472_v42, 0.0  ;;  %v578_v47 = vmax.f32 %v536_v43, 0.0  ;;  %v483_v48 = vadd.f32 %v775_v44, %v970_v24  ;;  %v547_v49 = vadd.f32 %v791_v45, %v970_v24 }
 0x11a   : > { %v474_v50 = vpop.f32.mrf.mxu0  ;;  %v538_v51 = vpop.f32.mrf.mxu1 }
 0x11b   : > { %594 = vst [vmem:[%s978_s6 + $0x60] sm:$0xff] %v562_v46  ;;  %610 = vst [vmem:[%s978_s6 + $0xe0] sm:$0xff] %v578_v47  ;;  %v565_v52 = vmax.f32 %v483_v48, 0.0  ;;  %v581_v53 = vmax.f32 %v547_v49, 0.0  ;;  %v475_v54 = vadd.f32 %v970_v24, %v474_v50  ;;  %v539_v55 = vadd.f32 %v970_v24, %v538_v51 }
 0x11d   : > { %597 = vst [vmem:[%s978_s6 + $0x78] sm:$0xff] %v565_v52  ;;  %613 = vst [vmem:[%s978_s6 + $0xf8] sm:$0xff] %v581_v53  ;;  %v563_v56 = vmax.f32 %v475_v54, 0.0  ;;  %v579_v57 = vmax.f32 %v539_v55, 0.0 }
 0x11f   : > { %595 = vst [vmem:[%s978_s6 + $0x68] sm:$0xff] %v563_v56  ;;  %611 = vst [vmem:[%s978_s6 + $0xe8] sm:$0xff] %v579_v57 }
 0x120 PF: > { %s14_s12 = sadd.s32 1, %s889_s12  }
 0x121   : > { %p11_p1 = scmp.ge.s32.totalorder %s14_s12, 4  }
 0x123   :  { %13 = sbr.rel (!%p11_p1) target bundleno = 1 (0x1), region = 67 }
 0x128   :  { %636 = vsyncpa [#allocation3], 1 }
 0x129   :  { %638 = vsyncpa [#allocation3 + $0x1], 1 }

// kernel: _lambda_.9
= control target key start
LH: loop header
LB: loop body
LE: loop exit
PB: predicated region body
PF: predicated region fallthrough
CT: control target
= control target key end

     0   :  { %s950_s12 = smov 0   ;;  %s1168_s0 = inlined_call_operand.vmem [shape: bf16[288,256], index: 0, kind: input, shape index: {}]   ;;  %s1169_s1 = inlined_call_operand.vmem [shape: bf16[256,256], index: 1, kind: input, shape index: {}]   ;;  %s1170_s2 = inlined_call_operand.vmem [shape: f32[1,256], index: 2, kind: input, shape index: {}]   ;;  %s1171_s3 = inlined_call_operand.vmem [shape: f32[288,256], index: 3, kind: output, shape index: {}]  }
   0x1 LB: > { %s744_s13 = sadd.s32 4294967295, %s928_s12   ;;  %p748_p0 = scmp.ge.s32.totalorder %s928_s12, 1  ;;  %s928_s12 = sphi %s950_s12, %s13_s12  }
   0x2   : > { %p139_p1 = scmp.lt.s32.totalorder %s928_s12, 3 }
   0x4   : > { %p140_p2 = pnand %p748_p0, %p139_p1 }
   0x5   : > { %s165_s24 = smul.u32 (!%p140_p2), 18, %s744_s13 }
   0x6   : > { %143 = sbr.rel (%p140_p2) target bundleno = 312 (0x138), region = 32 }
   0x7   : > { %p166_p3 = scmp.lt.s32.totalorder (!%p140_p2), %s165_s24, 35 }
   0xb   : > { %v847_v0 = vld [vmem:[%s1169_s1 + $0x74] ss:$8 sps:$4 sm:$0xff]   ;;  %v849_v1 = vld [vmem:[%s1169_s1 + $0x70] ss:$8 sps:$4 sm:$0xff]   ;;  %v850_v2 = vld [vmem:[%s1169_s1 + $0x64] ss:$8 sps:$4 sm:$0xff]   ;;  %v231_v50 = vlaneseq }
   0xc   : > { %491 = vmatprep.subr.bf16.mxu0 %v847_v0  ;;  %807 = vmatprep.subr.bf16.mxu1 %v847_v0  ;;  %v852_v3 = vld [vmem:[%s1169_s1 + $0x60] ss:$8 sps:$4 sm:$0xff]   ;;  %v853_v4 = vld [vmem:[%s1169_s1 + $0x54] ss:$8 sps:$4 sm:$0xff]   ;;  %v855_v5 = vld [vmem:[%s1169_s1 + $0x50] ss:$8 sps:$4 sm:$0xff]  }
   0xd   : > { %492 = vmatpush1.bf16.msra.mxu0 %v849_v1  ;;  %823 = vmatpush1.bf16.msra.mxu1 %v849_v1  ;;  %v856_v6 = vld [vmem:[%s1169_s1 + $0x44] ss:$8 sps:$4 sm:$0xff]   ;;  %v858_v7 = vld [vmem:[%s1169_s1 + $0x40] ss:$8 sps:$4 sm:$0xff]   ;;  %v859_v8 = vld [vmem:[%s1169_s1 + $0x34] ss:$8 sps:$4 sm:$0xff]  }
   0xe   : > { %493 = vmatprep.subr.bf16.mxu0 %v850_v2  ;;  %808 = vmatprep.subr.bf16.mxu1 %v850_v2  ;;  %s1173_s24 = smov (!%p166_p3, %s165_s24), 35  ;;  %v861_v9 = vld [vmem:[%s1169_s1 + $0x30] ss:$8 sps:$4 sm:$0xff]   ;;  %v862_v10 = vld [vmem:[%s1169_s1 + $0x24] ss:$8 sps:$4 sm:$0xff]   ;;  %v232_v51 = vshrl.u32 %v231_v50, 7 }
   0xf   : > { %s805_s10 = sshll.u32 %s1173_s24, 3  ;;  %v864_v11 = vld [vmem:[%s1169_s1 + $0x20] ss:$8 sps:$4 sm:$0xff]   ;;  %v865_v12 = vld [vmem:[%s1169_s1 + $0x14] ss:$8 sps:$4 sm:$0xff]   ;;  %s806_s9 = sshll.u32 %s1173_s24, 4 }
  0x10   : > { %s1000_s16 = scalar_lea.vmem %s1168_s0, %s805_s10  ;;  %v867_v14 = vld [vmem:[%s1169_s1 + $0x10] ss:$8 sps:$4 sm:$0xff]   ;;  %v868_v16 = vld [vmem:[%s1169_s1 + $0x4] ss:$8 sps:$4 sm:$0xff]   ;;  %v870_v17 = vld [vmem:[%s1169_s1] ss:$8 sps:$4 sm:$0xff]   ;;  %s1093_s11 = scalar_lea.vmem %s1171_s3, %s806_s9 }
  0x11   : > { %494 = vmatpush1.bf16.msra.mxu0 %v852_v3  ;;  %824 = vmatpush1.bf16.msra.mxu1 %v852_v3  ;;  %v897_v13 = vld [vmem:[%s1000_s16 + $0x4] ss:$8 sps:$4 sm:$0xff]   ;;  %v900_v15 = vld [vmem:[%s1000_s16 + $0x54] ss:$8 sps:$4 sm:$0xff]   ;;  %v873_v19 = vld [vmem:[%s1169_s1 + $0xf0] ss:$8 sps:$4 sm:$0xff]  }
  0x12   : > { %495 = vmatprep.subr.bf16.mxu0 %v853_v4  ;;  %809 = vmatprep.subr.bf16.mxu1 %v853_v4  ;;  %v871_v18 = vld [vmem:[%s1169_s1 + $0xf4] ss:$8 sps:$4 sm:$0xff]   ;;  %v874_v20 = vld [vmem:[%s1169_s1 + $0xe4] ss:$8 sps:$4 sm:$0xff]   ;;  %v876_v21 = vld [vmem:[%s1169_s1 + $0xe0] ss:$8 sps:$4 sm:$0xff]  }
  0x13   : > { %523 = vmatprep.mubr.bf16.mxu0 %v897_v13  ;;  %573 = vmatprep.mubr.bf16.mxu1 %v900_v15  ;;  %v877_v22 = vld [vmem:[%s1169_s1 + $0xd4] ss:$8 sps:$4 sm:$0xff]   ;;  %v879_v23 = vld [vmem:[%s1169_s1 + $0xd0] ss:$8 sps:$4 sm:$0xff]   ;;  %v880_v24 = vld [vmem:[%s1169_s1 + $0xc4] ss:$8 sps:$4 sm:$0xff]  }
  0x14   : > { %v882_v25 = vld [vmem:[%s1169_s1 + $0xc0] ss:$8 sps:$4 sm:$0xff]   ;;  %v883_v26 = vld [vmem:[%s1169_s1 + $0xb4] ss:$8 sps:$4 sm:$0xff]   ;;  %v885_v27 = vld [vmem:[%s1169_s1 + $0xb0] ss:$8 sps:$4 sm:$0xff]  }
  0x15   : > { %496 = vmatpush1.bf16.msra.mxu0 %v855_v5  ;;  %825 = vmatpush1.bf16.msra.mxu1 %v855_v5  ;;  %v886_v28 = vld [vmem:[%s1169_s1 + $0xa4] ss:$8 sps:$4 sm:$0xff]   ;;  %v888_v29 = vld [vmem:[%s1169_s1 + $0xa0] ss:$8 sps:$4 sm:$0xff]   ;;  %v889_v30 = vld [vmem:[%s1169_s1 + $0x94] ss:$8 sps:$4 sm:$0xff]  }
  0x16   : > { %497 = vmatprep.subr.bf16.mxu0 %v856_v6  ;;  %810 = vmatprep.subr.bf16.mxu1 %v856_v6  ;;  %v891_v31 = vld [vmem:[%s1169_s1 + $0x90] ss:$8 sps:$4 sm:$0xff]   ;;  %v892_v32 = vld [vmem:[%s1169_s1 + $0x84] ss:$8 sps:$4 sm:$0xff]   ;;  %v894_v33 = vld [vmem:[%s1169_s1 + $0x80] ss:$8 sps:$4 sm:$0xff]  }
  0x17   : > { %v895_v34 = vld [vmem:[%s1000_s16] ss:$8 sps:$4 sm:$0xff]   ;;  %v898_v35 = vld [vmem:[%s1000_s16 + $0x50] ss:$8 sps:$4 sm:$0xff]   ;;  %v901_v36 = vld [vmem:[%s1000_s16 + $0x14] ss:$8 sps:$4 sm:$0xff]  }
  0x18   : > { %v904_v37 = vld [vmem:[%s1000_s16 + $0x64] ss:$8 sps:$4 sm:$0xff]   ;;  %v903_v38 = vld [vmem:[%s1000_s16 + $0x10] ss:$8 sps:$4 sm:$0xff]   ;;  %v906_v39 = vld [vmem:[%s1000_s16 + $0x60] ss:$8 sps:$4 sm:$0xff]  }
  0x19   : > { %498 = vmatpush1.bf16.msra.mxu0 %v858_v7  ;;  %826 = vmatpush1.bf16.msra.mxu1 %v858_v7  ;;  %v907_v40 = vld [vmem:[%s1000_s16 + $0x24] ss:$8 sps:$4 sm:$0xff]   ;;  %v910_v41 = vld [vmem:[%s1000_s16 + $0x74] ss:$8 sps:$4 sm:$0xff]   ;;  %v909_v42 = vld [vmem:[%s1000_s16 + $0x20] ss:$8 sps:$4 sm:$0xff]  }
  0x1a   : > { %499 = vmatprep.subr.bf16.mxu0 %v859_v8  ;;  %811 = vmatprep.subr.bf16.mxu1 %v859_v8  ;;  %v912_v43 = vld [vmem:[%s1000_s16 + $0x70] ss:$8 sps:$4 sm:$0xff]   ;;  %v913_v44 = vld [vmem:[%s1000_s16 + $0x34] ss:$8 sps:$4 sm:$0xff]   ;;  %v916_v45 = vld [vmem:[%s1000_s16 + $0x84] ss:$8 sps:$4 sm:$0xff]  }
  0x1b   : > { %v915_v46 = vld [vmem:[%s1000_s16 + $0x30] ss:$8 sps:$4 sm:$0xff]   ;;  %v918_v47 = vld [vmem:[%s1000_s16 + $0x80] ss:$8 sps:$4 sm:$0xff]   ;;  %v919_v48 = vld [vmem:[%s1000_s16 + $0x44] ss:$8 sps:$4 sm:$0xff]  }
  0x1c   : > { %v921_v49 = vld [vmem:[%s1000_s16 + $0x40] ss:$8 sps:$4 sm:$0xff]   ;;  %v233_v52 = vsub.s32 0, %v232_v51  ;;  %v237_v54 = vsub.s32 1, %v232_v51 }
  0x1d   : > { %500 = vmatpush1.bf16.msra.mxu0 %v861_v9  ;;  %827 = vmatpush1.bf16.msra.mxu1 %v861_v9  ;;  %v229_v53 = vld [vmem:[%s1170_s2] sm:$0x3] }
  0x1e   : > { %501 = vmatprep.subr.bf16.mxu0 %v862_v10  ;;  %812 = vmatprep.subr.bf16.mxu1 %v862_v10  ;;  %v1083_v55 = vrot.slane %v229_v53, %v233_v52  ;;  %v1086_v56 = vrot.slane %v229_v53, %v237_v54 }
  0x21   : > { %502 = vmatpush1.bf16.msra.mxu0 %v864_v11  ;;  %828 = vmatpush1.bf16.msra.mxu1 %v864_v11 }
  0x22   : > { %503 = vmatprep.subr.bf16.mxu0 %v865_v12  ;;  %813 = vmatprep.subr.bf16.mxu1 %v865_v12 }
  0x25   : > { %504 = vmatpush1.bf16.msra.mxu0 %v867_v14  ;;  %829 = vmatpush1.bf16.msra.mxu1 %v867_v14 }
  0x26   : > { %505 = vmatprep.subr.bf16.mxu0 %v868_v16  ;;  %814 = vmatprep.subr.bf16.mxu1 %v868_v16 }
  0x29   : > { %506 = vmatpush1.bf16.msra.mxu0 %v870_v17  ;;  %830 = vmatpush1.bf16.msra.mxu1 %v870_v17 }
  0x2a   : > { %507 = vmatprep.subr.bf16.mxu0 %v871_v18  ;;  %815 = vmatprep.subr.bf16.mxu1 %v871_v18 }
  0x2d   : > { %508 = vmatpush2.bf16.msra.mxu0 %v873_v19  ;;  %831 = vmatpush2.bf16.msra.mxu1 %v873_v19 }
  0x2e   : > { %509 = vmatprep.subr.bf16.mxu0 %v874_v20  ;;  %816 = vmatprep.subr.bf16.mxu1 %v874_v20 }
  0x31   : > { %510 = vmatpush2.bf16.msra.mxu0 %v876_v21  ;;  %832 = vmatpush2.bf16.msra.mxu1 %v876_v21 }
  0x32   : > { %511 = vmatprep.subr.bf16.mxu0 %v877_v22  ;;  %817 = vmatprep.subr.bf16.mxu1 %v877_v22 }
  0x35   : > { %512 = vmatpush2.bf16.msra.mxu0 %v879_v23  ;;  %833 = vmatpush2.bf16.msra.mxu1 %v879_v23 }
  0x36   : > { %513 = vmatprep.subr.bf16.mxu0 %v880_v24  ;;  %818 = vmatprep.subr.bf16.mxu1 %v880_v24 }
  0x39   : > { %514 = vmatpush2.bf16.msra.mxu0 %v882_v25  ;;  %834 = vmatpush2.bf16.msra.mxu1 %v882_v25 }
  0x3a   : > { %515 = vmatprep.subr.bf16.mxu0 %v883_v26  ;;  %819 = vmatprep.subr.bf16.mxu1 %v883_v26 }
  0x3d   : > { %516 = vmatpush2.bf16.msra.mxu0 %v885_v27  ;;  %835 = vmatpush2.bf16.msra.mxu1 %v885_v27 }
  0x3e   : > { %517 = vmatprep.subr.bf16.mxu0 %v886_v28  ;;  %820 = vmatprep.subr.bf16.mxu1 %v886_v28 }
  0x41   : > { %518 = vmatpush2.bf16.msra.mxu0 %v888_v29  ;;  %836 = vmatpush2.bf16.msra.mxu1 %v888_v29 }
  0x42   : > { %519 = vmatprep.subr.bf16.mxu0 %v889_v30  ;;  %821 = vmatprep.subr.bf16.mxu1 %v889_v30 }
  0x45   : > { %520 = vmatpush2.bf16.msra.mxu0 %v891_v31  ;;  %837 = vmatpush2.bf16.msra.mxu1 %v891_v31 }
  0x46   : > { %521 = vmatprep.subr.bf16.mxu0 %v892_v32  ;;  %822 = vmatprep.subr.bf16.mxu1 %v892_v32 }
  0x49   : > { %522 = vmatpush2.bf16.msra.mxu0 %v894_v33  ;;  %838 = vmatpush2.bf16.msra.mxu1 %v894_v33 }
  0x4c   : > { %524 = vmatmul.mubr.bf16.vlgmr.msra.gmra.mxu0 %v895_v34  ;;  %574 = vmatmul.mubr.bf16.vlgmr.msra.gmra.mxu1 %v898_v35 }
  0x4d   : > { %533 = vmatprep.mubr.bf16.mxu0 %v901_v36  ;;  %583 = vmatprep.mubr.bf16.mxu1 %v904_v37 }
  0x54   : > { %534 = vmatmul.mubr.bf16.gmra.mxu0 %v903_v38  ;;  %584 = vmatmul.mubr.bf16.gmra.mxu1 %v906_v39 }
  0x55   : > { %543 = vmatprep.mubr.bf16.mxu0 %v907_v40  ;;  %593 = vmatprep.mubr.bf16.mxu1 %v910_v41 }
  0x5c   : > { %544 = vmatmul.mubr.bf16.gmra.mxu0 %v909_v42  ;;  %594 = vmatmul.mubr.bf16.gmra.mxu1 %v912_v43 }
  0x5d   : > { %553 = vmatprep.mubr.bf16.mxu0 %v913_v44  ;;  %603 = vmatprep.mubr.bf16.mxu1 %v916_v45 }
  0x64   : > { %554 = vmatmul.mubr.bf16.gmra.mxu0 %v915_v46  ;;  %604 = vmatmul.mubr.bf16.gmra.mxu1 %v918_v47 }
  0x65   : > { %563 = vmatprep.mubr.bf16.mxu0 %v919_v48 }
  0x6c   : > { %564 = vmatmul.mubr.bf16.gmra.mxu0 %v921_v49 }
 0x10c   : > { %v525_v57 = vpop.f32.mrf.mxu0  ;;  %v575_v58 = vpop.f32.mrf.mxu1 }
 0x10d   : > { %v526_v59 = vadd.f32 %v525_v57, %v1083_v55  ;;  %v576_v60 = vadd.f32 %v575_v58, %v1083_v55 }
 0x10e   : > { %v527_v61 = vpop.f32.mrf.mxu0  ;;  %v577_v62 = vpop.f32.mrf.mxu1 }
 0x10f   : > { %v614_v63 = vmax.f32 %v526_v59, 0.0  ;;  %v528_v0 = vadd.f32 %v527_v61, %v1086_v56  ;;  %v634_v1 = vmax.f32 %v576_v60, 0.0  ;;  %v578_v2 = vadd.f32 %v577_v62, %v1086_v56 }
 0x110   : > { %v529_v3 = vpop.f32.mrf.mxu0  ;;  %v579_v4 = vpop.f32.mrf.mxu1 }
 0x111   : > { %650 = vst [vmem:[%s1093_s11] sm:$0xff] %v614_v63  ;;  %v615_v5 = vmax.f32 %v528_v0, 0.0  ;;  %670 = vst [vmem:[%s1093_s11 + $0xa0] sm:$0xff] %v634_v1  ;;  %v530_v6 = vadd.f32 %v529_v3, %v1083_v55  ;;  %v635_v7 = vmax.f32 %v578_v2, 0.0  ;;  %v580_v8 = vadd.f32 %v579_v4, %v1083_v55 }
 0x112   : > { %v531_v9 = vpop.f32.mrf.mxu0  ;;  %v581_v10 = vpop.f32.mrf.mxu1 }
 0x113   : > { %651 = vst [vmem:[%s1093_s11 + $0x8] sm:$0xff] %v615_v5  ;;  %v616_v11 = vmax.f32 %v530_v6, 0.0  ;;  %671 = vst [vmem:[%s1093_s11 + $0xa8] sm:$0xff] %v635_v7  ;;  %v532_v12 = vadd.f32 %v531_v9, %v1086_v56  ;;  %v636_v13 = vmax.f32 %v580_v8, 0.0  ;;  %v582_v14 = vadd.f32 %v581_v10, %v1086_v56 }
 0x114   : > { %v535_v15 = vpop.f32.mrf.mxu0  ;;  %v585_v16 = vpop.f32.mrf.mxu1 }
 0x115   : > { %652 = vst [vmem:[%s1093_s11 + $0x10] sm:$0xff] %v616_v11  ;;  %v617_v17 = vmax.f32 %v532_v12, 0.0  ;;  %672 = vst [vmem:[%s1093_s11 + $0xb0] sm:$0xff] %v636_v13  ;;  %v536_v18 = vadd.f32 %v535_v15, %v1083_v55  ;;  %v637_v19 = vmax.f32 %v582_v14, 0.0  ;;  %v586_v20 = vadd.f32 %v585_v16, %v1083_v55 }
 0x116   : > { %v537_v21 = vpop.f32.mrf.mxu0  ;;  %v587_v22 = vpop.f32.mrf.mxu1 }
 0x117   : > { %653 = vst [vmem:[%s1093_s11 + $0x18] sm:$0xff] %v617_v17  ;;  %v618_v23 = vmax.f32 %v536_v18, 0.0  ;;  %673 = vst [vmem:[%s1093_s11 + $0xb8] sm:$0xff] %v637_v19  ;;  %v538_v24 = vadd.f32 %v537_v21, %v1086_v56  ;;  %v638_v25 = vmax.f32 %v586_v20, 0.0  ;;  %v588_v26 = vadd.f32 %v587_v22, %v1086_v56 }
 0x118   : > { %v539_v27 = vpop.f32.mrf.mxu0  ;;  %v589_v28 = vpop.f32.mrf.mxu1 }
 0x119   : > { %654 = vst [vmem:[%s1093_s11 + $0x20] sm:$0xff] %v618_v23  ;;  %v619_v29 = vmax.f32 %v538_v24, 0.0  ;;  %674 = vst [vmem:[%s1093_s11 + $0xc0] sm:$0xff] %v638_v25  ;;  %v540_v30 = vadd.f32 %v539_v27, %v1083_v55  ;;  %v639_v31 = vmax.f32 %v588_v26, 0.0  ;;  %v590_v32 = vadd.f32 %v589_v28, %v1083_v55 }
 0x11a   : > { %v541_v33 = vpop.f32.mrf.mxu0  ;;  %v591_v34 = vpop.f32.mrf.mxu1 }
 0x11b   : > { %655 = vst [vmem:[%s1093_s11 + $0x28] sm:$0xff] %v619_v29  ;;  %v620_v35 = vmax.f32 %v540_v30, 0.0  ;;  %675 = vst [vmem:[%s1093_s11 + $0xc8] sm:$0xff] %v639_v31  ;;  %v542_v36 = vadd.f32 %v541_v33, %v1086_v56  ;;  %v640_v37 = vmax.f32 %v590_v32, 0.0  ;;  %v592_v38 = vadd.f32 %v591_v34, %v1086_v56 }
 0x11c   : > { %v545_v39 = vpop.f32.mrf.mxu0  ;;  %v595_v40 = vpop.f32.mrf.mxu1 }
 0x11d   : > { %656 = vst [vmem:[%s1093_s11 + $0x30] sm:$0xff] %v620_v35  ;;  %v621_v41 = vmax.f32 %v542_v36, 0.0  ;;  %676 = vst [vmem:[%s1093_s11 + $0xd0] sm:$0xff] %v640_v37  ;;  %v546_v42 = vadd.f32 %v545_v39, %v1083_v55  ;;  %v641_v43 = vmax.f32 %v592_v38, 0.0  ;;  %v596_v44 = vadd.f32 %v595_v40, %v1083_v55 }
 0x11e   : > { %v547_v45 = vpop.f32.mrf.mxu0  ;;  %v597_v46 = vpop.f32.mrf.mxu1 }
 0x11f   : > { %657 = vst [vmem:[%s1093_s11 + $0x38] sm:$0xff] %v621_v41  ;;  %v622_v47 = vmax.f32 %v546_v42, 0.0  ;;  %677 = vst [vmem:[%s1093_s11 + $0xd8] sm:$0xff] %v641_v43  ;;  %v548_v48 = vadd.f32 %v547_v45, %v1086_v56  ;;  %v642_v49 = vmax.f32 %v596_v44, 0.0  ;;  %v598_v50 = vadd.f32 %v597_v46, %v1086_v56 }
 0x120   : > { %v549_v51 = vpop.f32.mrf.mxu0  ;;  %v599_v52 = vpop.f32.mrf.mxu1 }
 0x121   : > { %658 = vst [vmem:[%s1093_s11 + $0x40] sm:$0xff] %v622_v47  ;;  %v623_v53 = vmax.f32 %v548_v48, 0.0  ;;  %678 = vst [vmem:[%s1093_s11 + $0xe0] sm:$0xff] %v642_v49  ;;  %v550_v54 = vadd.f32 %v549_v51, %v1083_v55  ;;  %v643_v57 = vmax.f32 %v598_v50, 0.0  ;;  %v600_v58 = vadd.f32 %v599_v52, %v1083_v55 }
 0x122   : > { %v551_v59 = vpop.f32.mrf.mxu0  ;;  %v601_v60 = vpop.f32.mrf.mxu1 }
 0x123   : > { %659 = vst [vmem:[%s1093_s11 + $0x48] sm:$0xff] %v623_v53  ;;  %v624_v61 = vmax.f32 %v550_v54, 0.0  ;;  %679 = vst [vmem:[%s1093_s11 + $0xe8] sm:$0xff] %v643_v57  ;;  %v552_v62 = vadd.f32 %v551_v59, %v1086_v56  ;;  %v644_v63 = vmax.f32 %v600_v58, 0.0  ;;  %v602_v0 = vadd.f32 %v601_v60, %v1086_v56 }
 0x124   : > { %v555_v1 = vpop.f32.mrf.mxu0  ;;  %v605_v2 = vpop.f32.mrf.mxu1 }
 0x125   : > { %660 = vst [vmem:[%s1093_s11 + $0x50] sm:$0xff] %v624_v61  ;;  %v625_v3 = vmax.f32 %v552_v62, 0.0  ;;  %680 = vst [vmem:[%s1093_s11 + $0xf0] sm:$0xff] %v644_v63  ;;  %v556_v4 = vadd.f32 %v555_v1, %v1083_v55  ;;  %v645_v5 = vmax.f32 %v602_v0, 0.0  ;;  %v606_v6 = vadd.f32 %v605_v2, %v1083_v55 }
 0x126   : > { %v557_v7 = vpop.f32.mrf.mxu0  ;;  %v607_v8 = vpop.f32.mrf.mxu1 }
 0x127   : > { %661 = vst [vmem:[%s1093_s11 + $0x58] sm:$0xff] %v625_v3  ;;  %v626_v9 = vmax.f32 %v556_v4, 0.0  ;;  %681 = vst [vmem:[%s1093_s11 + $0xf8] sm:$0xff] %v645_v5  ;;  %v558_v10 = vadd.f32 %v557_v7, %v1086_v56  ;;  %v646_v11 = vmax.f32 %v606_v6, 0.0  ;;  %v608_v12 = vadd.f32 %v607_v8, %v1086_v56 }
 0x128   : > { %v559_v13 = vpop.f32.mrf.mxu0  ;;  %v609_v14 = vpop.f32.mrf.mxu1 }
 0x129   : > { %662 = vst [vmem:[%s1093_s11 + $0x60] sm:$0xff] %v626_v9  ;;  %v627_v15 = vmax.f32 %v558_v10, 0.0  ;;  %682 = vst [vmem:[%s1093_s11 + $0x100] sm:$0xff] %v646_v11  ;;  %v560_v16 = vadd.f32 %v559_v13, %v1083_v55  ;;  %v647_v17 = vmax.f32 %v608_v12, 0.0  ;;  %v610_v18 = vadd.f32 %v609_v14, %v1083_v55 }
 0x12a   : > { %v561_v19 = vpop.f32.mrf.mxu0  ;;  %v611_v20 = vpop.f32.mrf.mxu1 }
 0x12b   : > { %663 = vst [vmem:[%s1093_s11 + $0x68] sm:$0xff] %v627_v15  ;;  %v628_v21 = vmax.f32 %v560_v16, 0.0  ;;  %683 = vst [vmem:[%s1093_s11 + $0x108] sm:$0xff] %v647_v17  ;;  %v562_v22 = vadd.f32 %v561_v19, %v1086_v56  ;;  %v648_v23 = vmax.f32 %v610_v18, 0.0  ;;  %v612_v24 = vadd.f32 %v611_v20, %v1086_v56 }
 0x12c   : > { %v565_v25 = vpop.f32.mrf.mxu0 }
 0x12d   : > { %664 = vst [vmem:[%s1093_s11 + $0x70] sm:$0xff] %v628_v21  ;;  %v629_v26 = vmax.f32 %v562_v22, 0.0  ;;  %684 = vst [vmem:[%s1093_s11 + $0x110] sm:$0xff] %v648_v23  ;;  %v566_v27 = vadd.f32 %v565_v25, %v1083_v55  ;;  %v649_v28 = vmax.f32 %v612_v24, 0.0 }
 0x12e   : > { %v567_v29 = vpop.f32.mrf.mxu0 }
 0x12f   : > { %665 = vst [vmem:[%s1093_s11 + $0x78] sm:$0xff] %v629_v26  ;;  %v630_v30 = vmax.f32 %v566_v27, 0.0  ;;  %685 = vst [vmem:[%s1093_s11 + $0x118] sm:$0xff] %v649_v28  ;;  %v568_v31 = vadd.f32 %v567_v29, %v1086_v56 }
 0x130   : > { %v569_v32 = vpop.f32.mrf.mxu0 }
 0x131   : > { %666 = vst [vmem:[%s1093_s11 + $0x80] sm:$0xff] %v630_v30  ;;  %v631_v33 = vmax.f32 %v568_v31, 0.0  ;;  %v570_v34 = vadd.f32 %v569_v32, %v1083_v55 }
 0x132   : > { %v571_v35 = vpop.f32.mrf.mxu0 }
 0x133   : > { %667 = vst [vmem:[%s1093_s11 + $0x88] sm:$0xff] %v631_v33  ;;  %v632_v36 = vmax.f32 %v570_v34, 0.0  ;;  %v572_v37 = vadd.f32 %v571_v35, %v1086_v56 }
 0x135   : > { %668 = vst [vmem:[%s1093_s11 + $0x90] sm:$0xff] %v632_v36  ;;  %v633_v38 = vmax.f32 %v572_v37, 0.0 }
 0x137   : > { %669 = vst [vmem:[%s1093_s11 + $0x98] sm:$0xff] %v633_v38 }
 0x138 PF: > { %s13_s12 = sadd.s32 1, %s928_s12  }
 0x139   : > { %p10_p4 = scmp.ge.s32.totalorder %s13_s12, 4  }
 0x13b   :  { %12 = sbr.rel (!%p10_p4) target bundleno = 1 (0x1), region = 62 }

// kernel: reverse.8
= control target key start
LH: loop header
LB: loop body
LE: loop exit
PB: predicated region body
PF: predicated region fallthrough
CT: control target
= control target key end

     0   :  { %s344_s0 = inlined_call_operand.vmem [shape: f32[2,128,16,7], index: 0, kind: input, shape index: {}]   ;;  %s345_s1 = inlined_call_operand.vmem [shape: f32[2,128,16,7], index: 1, kind: output, shape index: {}]  }
   0x1   :  { %v112_v0 = vld [vmem:[%s344_s0 + $0x60] sm:$0xff]  ;;  %v113_v1 = vld [vmem:[%s344_s0 + $0xd0] sm:$0xff]  ;;  %v138_v14 = vld [vmem:[%s344_s0 + $0x68] sm:$0xff] }
   0x2   :  { %v115_v2 = vld [vmem:[%s344_s0 + $0x50] sm:$0xff]  ;;  %4 = vst [vmem:[%s345_s1] sm:$0xff] %v112_v0  ;;  %114 = vst [vmem:[%s345_s1 + $0x70] sm:$0xff] %v113_v1  ;;  %v117_v3 = vld [vmem:[%s344_s0 + $0xc0] sm:$0xff] }
   0x3   :  { %116 = vst [vmem:[%s345_s1 + $0x10] sm:$0xff] %v115_v2  ;;  %v119_v4 = vld [vmem:[%s344_s0 + $0x40] sm:$0xff]  ;;  %v121_v5 = vld [vmem:[%s344_s0 + $0xb0] sm:$0xff]  ;;  %118 = vst [vmem:[%s345_s1 + $0x80] sm:$0xff] %v117_v3 }
   0x4   :  { %120 = vst [vmem:[%s345_s1 + $0x20] sm:$0xff] %v119_v4  ;;  %122 = vst [vmem:[%s345_s1 + $0x90] sm:$0xff] %v121_v5  ;;  %v123_v6 = vld [vmem:[%s344_s0 + $0x30] sm:$0xff]  ;;  %v125_v7 = vld [vmem:[%s344_s0 + $0xa0] sm:$0xff] }
   0x5   :  { %v127_v8 = vld [vmem:[%s344_s0 + $0x20] sm:$0xff]  ;;  %124 = vst [vmem:[%s345_s1 + $0x30] sm:$0xff] %v123_v6  ;;  %126 = vst [vmem:[%s345_s1 + $0xa0] sm:$0xff] %v125_v7  ;;  %v129_v9 = vld [vmem:[%s344_s0 + $0x90] sm:$0xff] }
   0x6   :  { %128 = vst [vmem:[%s345_s1 + $0x40] sm:$0xff] %v127_v8  ;;  %v131_v10 = vld [vmem:[%s344_s0 + $0x10] sm:$0xff]  ;;  %v133_v11 = vld [vmem:[%s344_s0 + $0x80] sm:$0xff]  ;;  %130 = vst [vmem:[%s345_s1 + $0xb0] sm:$0xff] %v129_v9 }
   0x7   :  { %132 = vst [vmem:[%s345_s1 + $0x50] sm:$0xff] %v131_v10  ;;  %134 = vst [vmem:[%s345_s1 + $0xc0] sm:$0xff] %v133_v11  ;;  %v49_v12 = vld [vmem:[%s344_s0] sm:$0xff]  ;;  %v136_v13 = vld [vmem:[%s344_s0 + $0x70] sm:$0xff] }
   0x8   :  { %135 = vst [vmem:[%s345_s1 + $0x60] sm:$0xff] %v49_v12  ;;  %137 = vst [vmem:[%s345_s1 + $0xd0] sm:$0xff] %v136_v13  ;;  %v140_v15 = vld [vmem:[%s344_s0 + $0xd8] sm:$0xff]  ;;  %v144_v17 = vld [vmem:[%s344_s0 + $0xc8] sm:$0xff] }
   0x9   :  { %139 = vst [vmem:[%s345_s1 + $0x8] sm:$0xff] %v138_v14  ;;  %v142_v16 = vld [vmem:[%s344_s0 + $0x58] sm:$0xff]  ;;  %141 = vst [vmem:[%s345_s1 + $0x78] sm:$0xff] %v140_v15  ;;  %v146_v18 = vld [vmem:[%s344_s0 + $0x48] sm:$0xff] }
   0xa   :  { %143 = vst [vmem:[%s345_s1 + $0x18] sm:$0xff] %v142_v16  ;;  %145 = vst [vmem:[%s345_s1 + $0x88] sm:$0xff] %v144_v17  ;;  %v148_v19 = vld [vmem:[%s344_s0 + $0xb8] sm:$0xff]  ;;  %v152_v21 = vld [vmem:[%s344_s0 + $0xa8] sm:$0xff] }
   0xb   :  { %v150_v20 = vld [vmem:[%s344_s0 + $0x38] sm:$0xff]  ;;  %147 = vst [vmem:[%s345_s1 + $0x28] sm:$0xff] %v146_v18  ;;  %149 = vst [vmem:[%s345_s1 + $0x98] sm:$0xff] %v148_v19  ;;  %v154_v22 = vld [vmem:[%s344_s0 + $0x28] sm:$0xff] }
   0xc   :  { %151 = vst [vmem:[%s345_s1 + $0x38] sm:$0xff] %v150_v20  ;;  %v156_v23 = vld [vmem:[%s344_s0 + $0x98] sm:$0xff]  ;;  %153 = vst [vmem:[%s345_s1 + $0xa8] sm:$0xff] %v152_v21  ;;  %v160_v25 = vld [vmem:[%s344_s0 + $0x88] sm:$0xff] }
   0xd   :  { %155 = vst [vmem:[%s345_s1 + $0x48] sm:$0xff] %v154_v22  ;;  %157 = vst [vmem:[%s345_s1 + $0xb8] sm:$0xff] %v156_v23  ;;  %v158_v24 = vld [vmem:[%s344_s0 + $0x18] sm:$0xff]  ;;  %v162_v26 = vld [vmem:[%s344_s0 + $0x8] sm:$0xff] }
   0xe   :  { %159 = vst [vmem:[%s345_s1 + $0x58] sm:$0xff] %v158_v24  ;;  %161 = vst [vmem:[%s345_s1 + $0xc8] sm:$0xff] %v160_v25  ;;  %v164_v27 = vld [vmem:[%s344_s0 + $0x78] sm:$0xff] }
   0xf   :  { %163 = vst [vmem:[%s345_s1 + $0x68] sm:$0xff] %v162_v26  ;;  %165 = vst [vmem:[%s345_s1 + $0xd8] sm:$0xff] %v164_v27 }

// kernel: _lambda_.10
= control target key start
LH: loop header
LB: loop body
LE: loop exit
PB: predicated region body
PF: predicated region fallthrough
CT: control target
= control target key end

     0   :  { %s729_s12 = smov 0   ;;  %s868_s0 = inlined_call_operand.vmem [shape: bf16[80,256], index: 0, kind: input, shape index: {}]   ;;  %s869_s1 = inlined_call_operand.vmem [shape: bf16[256,256], index: 1, kind: input, shape index: {}]   ;;  %s870_s2 = inlined_call_operand.vmem [shape: f32[1,256], index: 2, kind: input, shape index: {}]   ;;  %s871_s3 = inlined_call_operand.vmem [shape: f32[80,256], index: 3, kind: output, shape index: {}]  }
   0x1 LB: > { %s554_s13 = sadd.s32 4294967295, %s707_s12   ;;  %p558_p0 = scmp.ge.s32.totalorder %s707_s12, 1  ;;  %s707_s12 = sphi %s729_s12, %s13_s12  }
   0x2   : > { %p139_p1 = scmp.lt.s32.totalorder %s707_s12, 3 }
   0x4   : > { %p140_p2 = pnand %p558_p0, %p139_p1 }
   0x5   : > { %s165_s24 = smul.u32 (!%p140_p2), 5, %s554_s13 }
   0x6   : > { %143 = sbr.rel (%p140_p2) target bundleno = 284 (0x11c), region = 32 }
   0x7   : > { %p166_p3 = scmp.lt.s32.totalorder (!%p140_p2), %s165_s24, 9 }
   0xb   : > { %v645_v0 = vld [vmem:[%s869_s1 + $0x74] ss:$8 sps:$4 sm:$0xff]   ;;  %v647_v1 = vld [vmem:[%s869_s1 + $0x70] ss:$8 sps:$4 sm:$0xff]   ;;  %v648_v2 = vld [vmem:[%s869_s1 + $0x64] ss:$8 sps:$4 sm:$0xff]   ;;  %v218_v39 = vlaneseq }
   0xc   : > { %415 = vmatprep.subr.bf16.mxu0 %v645_v0  ;;  %605 = vmatprep.subr.bf16.mxu1 %v645_v0  ;;  %v650_v3 = vld [vmem:[%s869_s1 + $0x60] ss:$8 sps:$4 sm:$0xff]   ;;  %v651_v4 = vld [vmem:[%s869_s1 + $0x54] ss:$8 sps:$4 sm:$0xff]   ;;  %v653_v5 = vld [vmem:[%s869_s1 + $0x50] ss:$8 sps:$4 sm:$0xff]  }
   0xd   : > { %416 = vmatpush1.bf16.msra.mxu0 %v647_v1  ;;  %621 = vmatpush1.bf16.msra.mxu1 %v647_v1  ;;  %v654_v6 = vld [vmem:[%s869_s1 + $0x44] ss:$8 sps:$4 sm:$0xff]   ;;  %v656_v7 = vld [vmem:[%s869_s1 + $0x40] ss:$8 sps:$4 sm:$0xff]   ;;  %v657_v8 = vld [vmem:[%s869_s1 + $0x34] ss:$8 sps:$4 sm:$0xff]  }
   0xe   : > { %417 = vmatprep.subr.bf16.mxu0 %v648_v2  ;;  %606 = vmatprep.subr.bf16.mxu1 %v648_v2  ;;  %s873_s24 = smov (!%p166_p3, %s165_s24), 9  ;;  %v659_v9 = vld [vmem:[%s869_s1 + $0x30] ss:$8 sps:$4 sm:$0xff]   ;;  %v660_v10 = vld [vmem:[%s869_s1 + $0x24] ss:$8 sps:$4 sm:$0xff]   ;;  %v219_v40 = vshrl.u32 %v218_v39, 7 }
   0xf   : > { %s603_s10 = sshll.u32 %s873_s24, 3  ;;  %v662_v11 = vld [vmem:[%s869_s1 + $0x20] ss:$8 sps:$4 sm:$0xff]   ;;  %v663_v12 = vld [vmem:[%s869_s1 + $0x14] ss:$8 sps:$4 sm:$0xff]   ;;  %s604_s9 = sshll.u32 %s873_s24, 4 }
  0x10   : > { %s779_s16 = scalar_lea.vmem %s868_s0, %s603_s10  ;;  %v665_v14 = vld [vmem:[%s869_s1 + $0x10] ss:$8 sps:$4 sm:$0xff]   ;;  %v666_v16 = vld [vmem:[%s869_s1 + $0x4] ss:$8 sps:$4 sm:$0xff]   ;;  %v668_v17 = vld [vmem:[%s869_s1] ss:$8 sps:$4 sm:$0xff]   ;;  %s853_s11 = scalar_lea.vmem %s871_s3, %s604_s9 }
  0x11   : > { %418 = vmatpush1.bf16.msra.mxu0 %v650_v3  ;;  %622 = vmatpush1.bf16.msra.mxu1 %v650_v3  ;;  %v695_v13 = vld [vmem:[%s779_s16 + $0x4] ss:$8 sps:$4 sm:$0xff]   ;;  %v698_v15 = vld [vmem:[%s779_s16 + $0x14] ss:$8 sps:$4 sm:$0xff]   ;;  %v671_v19 = vld [vmem:[%s869_s1 + $0xf0] ss:$8 sps:$4 sm:$0xff]  }
  0x12   : > { %419 = vmatprep.subr.bf16.mxu0 %v651_v4  ;;  %607 = vmatprep.subr.bf16.mxu1 %v651_v4  ;;  %v669_v18 = vld [vmem:[%s869_s1 + $0xf4] ss:$8 sps:$4 sm:$0xff]   ;;  %v672_v20 = vld [vmem:[%s869_s1 + $0xe4] ss:$8 sps:$4 sm:$0xff]   ;;  %v674_v21 = vld [vmem:[%s869_s1 + $0xe0] ss:$8 sps:$4 sm:$0xff]  }
  0x13   : > { %447 = vmatprep.mubr.bf16.mxu0 %v695_v13  ;;  %457 = vmatprep.mubr.bf16.mxu1 %v698_v15  ;;  %v675_v22 = vld [vmem:[%s869_s1 + $0xd4] ss:$8 sps:$4 sm:$0xff]   ;;  %v677_v23 = vld [vmem:[%s869_s1 + $0xd0] ss:$8 sps:$4 sm:$0xff]   ;;  %v678_v24 = vld [vmem:[%s869_s1 + $0xc4] ss:$8 sps:$4 sm:$0xff]  }
  0x14   : > { %v680_v25 = vld [vmem:[%s869_s1 + $0xc0] ss:$8 sps:$4 sm:$0xff]   ;;  %v681_v26 = vld [vmem:[%s869_s1 + $0xb4] ss:$8 sps:$4 sm:$0xff]   ;;  %v683_v27 = vld [vmem:[%s869_s1 + $0xb0] ss:$8 sps:$4 sm:$0xff]  }
  0x15   : > { %420 = vmatpush1.bf16.msra.mxu0 %v653_v5  ;;  %623 = vmatpush1.bf16.msra.mxu1 %v653_v5  ;;  %v684_v28 = vld [vmem:[%s869_s1 + $0xa4] ss:$8 sps:$4 sm:$0xff]   ;;  %v686_v29 = vld [vmem:[%s869_s1 + $0xa0] ss:$8 sps:$4 sm:$0xff]   ;;  %v687_v30 = vld [vmem:[%s869_s1 + $0x94] ss:$8 sps:$4 sm:$0xff]  }
  0x16   : > { %421 = vmatprep.subr.bf16.mxu0 %v654_v6  ;;  %608 = vmatprep.subr.bf16.mxu1 %v654_v6  ;;  %v689_v31 = vld [vmem:[%s869_s1 + $0x90] ss:$8 sps:$4 sm:$0xff]   ;;  %v690_v32 = vld [vmem:[%s869_s1 + $0x84] ss:$8 sps:$4 sm:$0xff]   ;;  %v692_v33 = vld [vmem:[%s869_s1 + $0x80] ss:$8 sps:$4 sm:$0xff]  }
  0x17   : > { %v183_v34 = vld [vmem:[%s779_s16 + $0x20] sm:$0xff]  ;;  %v696_v36 = vld [vmem:[%s779_s16 + $0x10] ss:$8 sps:$4 sm:$0xff]   ;;  %v220_v41 = vsub.s32 0, %v219_v40  ;;  %v224_v43 = vsub.s32 1, %v219_v40 }
  0x18   : > { %v693_v35 = vld [vmem:[%s779_s16] ss:$8 sps:$4 sm:$0xff]   ;;  %v568_v37 = vcombine.high %v183_v34, %v183_v34  ;;  %v567_v38 = vcombine.low %v183_v34, %v183_v34 }
  0x19   : > { %422 = vmatpush1.bf16.msra.mxu0 %v656_v7  ;;  %624 = vmatpush1.bf16.msra.mxu1 %v656_v7  ;;  %v216_v42 = vld [vmem:[%s870_s2] sm:$0x3] }
  0x1a   : > { %423 = vmatprep.subr.bf16.mxu0 %v657_v8  ;;  %609 = vmatprep.subr.bf16.mxu1 %v657_v8  ;;  %v221_v44 = vrot.slane %v216_v42, %v220_v41  ;;  %v225_v45 = vrot.slane %v216_v42, %v224_v43 }
  0x1d   : > { %424 = vmatpush1.bf16.msra.mxu0 %v659_v9  ;;  %625 = vmatpush1.bf16.msra.mxu1 %v659_v9 }
  0x1e   : > { %425 = vmatprep.subr.bf16.mxu0 %v660_v10  ;;  %610 = vmatprep.subr.bf16.mxu1 %v660_v10 }
  0x21   : > { %426 = vmatpush1.bf16.msra.mxu0 %v662_v11  ;;  %626 = vmatpush1.bf16.msra.mxu1 %v662_v11 }
  0x22   : > { %427 = vmatprep.subr.bf16.mxu0 %v663_v12  ;;  %611 = vmatprep.subr.bf16.mxu1 %v663_v12 }
  0x25   : > { %428 = vmatpush1.bf16.msra.mxu0 %v665_v14  ;;  %627 = vmatpush1.bf16.msra.mxu1 %v665_v14 }
  0x26   : > { %429 = vmatprep.subr.bf16.mxu0 %v666_v16  ;;  %612 = vmatprep.subr.bf16.mxu1 %v666_v16 }
  0x29   : > { %430 = vmatpush1.bf16.msra.mxu0 %v668_v17  ;;  %628 = vmatpush1.bf16.msra.mxu1 %v668_v17 }
  0x2a   : > { %431 = vmatprep.subr.bf16.mxu0 %v669_v18  ;;  %613 = vmatprep.subr.bf16.mxu1 %v669_v18 }
  0x2d   : > { %432 = vmatpush2.bf16.msra.mxu0 %v671_v19  ;;  %629 = vmatpush2.bf16.msra.mxu1 %v671_v19 }
  0x2e   : > { %433 = vmatprep.subr.bf16.mxu0 %v672_v20  ;;  %614 = vmatprep.subr.bf16.mxu1 %v672_v20 }
  0x31   : > { %434 = vmatpush2.bf16.msra.mxu0 %v674_v21  ;;  %630 = vmatpush2.bf16.msra.mxu1 %v674_v21 }
  0x32   : > { %435 = vmatprep.subr.bf16.mxu0 %v675_v22  ;;  %615 = vmatprep.subr.bf16.mxu1 %v675_v22 }
  0x35   : > { %436 = vmatpush2.bf16.msra.mxu0 %v677_v23  ;;  %631 = vmatpush2.bf16.msra.mxu1 %v677_v23 }
  0x36   : > { %437 = vmatprep.subr.bf16.mxu0 %v678_v24  ;;  %616 = vmatprep.subr.bf16.mxu1 %v678_v24 }
  0x39   : > { %438 = vmatpush2.bf16.msra.mxu0 %v680_v25  ;;  %632 = vmatpush2.bf16.msra.mxu1 %v680_v25 }
  0x3a   : > { %439 = vmatprep.subr.bf16.mxu0 %v681_v26  ;;  %617 = vmatprep.subr.bf16.mxu1 %v681_v26 }
  0x3d   : > { %440 = vmatpush2.bf16.msra.mxu0 %v683_v27  ;;  %633 = vmatpush2.bf16.msra.mxu1 %v683_v27 }
  0x3e   : > { %441 = vmatprep.subr.bf16.mxu0 %v684_v28  ;;  %618 = vmatprep.subr.bf16.mxu1 %v684_v28 }
  0x41   : > { %442 = vmatpush2.bf16.msra.mxu0 %v686_v29  ;;  %634 = vmatpush2.bf16.msra.mxu1 %v686_v29 }
  0x42   : > { %443 = vmatprep.subr.bf16.mxu0 %v687_v30  ;;  %619 = vmatprep.subr.bf16.mxu1 %v687_v30 }
  0x45   : > { %444 = vmatpush2.bf16.msra.mxu0 %v689_v31  ;;  %635 = vmatpush2.bf16.msra.mxu1 %v689_v31 }
  0x46   : > { %445 = vmatprep.subr.bf16.mxu0 %v690_v32  ;;  %620 = vmatprep.subr.bf16.mxu1 %v690_v32 }
  0x49   : > { %446 = vmatpush2.bf16.msra.mxu0 %v692_v33  ;;  %636 = vmatpush2.bf16.msra.mxu1 %v692_v33 }
  0x4c   : > { %448 = vmatmul.mubr.bf16.vlgmr.msra.gmra.mxu0 %v693_v35  ;;  %458 = vmatmul.mubr.bf16.vlgmr.msra.gmra.mxu1 %v696_v36 }
  0x4d   : > { %467 = vmatprep.mubr.bf16.mxu1 %v568_v37 }
  0x54   : > { %468 = vmatmul.mubr.bf16.gmra.mxu1 %v567_v38 }
 0x10c   : > { %v449_v46 = vpop.f32.mrf.mxu0  ;;  %v459_v47 = vpop.f32.mrf.mxu1 }
 0x10d   : > { %v450_v48 = vadd.f32 %v449_v46, %v221_v44  ;;  %v460_v49 = vadd.f32 %v459_v47, %v221_v44 }
 0x10e   : > { %v451_v50 = vpop.f32.mrf.mxu0  ;;  %v461_v51 = vpop.f32.mrf.mxu1 }
 0x10f   : > { %v476_v52 = vmax.f32 %v450_v48, 0.0  ;;  %v480_v53 = vmax.f32 %v460_v49, 0.0  ;;  %v452_v54 = vadd.f32 %v451_v50, %v225_v45  ;;  %v462_v55 = vadd.f32 %v461_v51, %v225_v45 }
 0x110   : > { %v453_v56 = vpop.f32.mrf.mxu0  ;;  %v463_v57 = vpop.f32.mrf.mxu1 }
 0x111   : > { %486 = vst [vmem:[%s853_s11] sm:$0xff] %v476_v52  ;;  %490 = vst [vmem:[%s853_s11 + $0x20] sm:$0xff] %v480_v53  ;;  %v477_v58 = vmax.f32 %v452_v54, 0.0  ;;  %v481_v59 = vmax.f32 %v462_v55, 0.0  ;;  %v454_v60 = vadd.f32 %v453_v56, %v221_v44  ;;  %v464_v61 = vadd.f32 %v463_v57, %v221_v44 }
 0x112   : > { %v455_v62 = vpop.f32.mrf.mxu0  ;;  %v465_v63 = vpop.f32.mrf.mxu1 }
 0x113   : > { %487 = vst [vmem:[%s853_s11 + $0x8] sm:$0xff] %v477_v58  ;;  %491 = vst [vmem:[%s853_s11 + $0x28] sm:$0xff] %v481_v59  ;;  %v478_v0 = vmax.f32 %v454_v60, 0.0  ;;  %v482_v1 = vmax.f32 %v464_v61, 0.0  ;;  %v456_v2 = vadd.f32 %v455_v62, %v225_v45  ;;  %v466_v3 = vadd.f32 %v465_v63, %v225_v45 }
 0x114   : > { %v469_v4 = vpop.f32.mrf.mxu1 }
 0x115   : > { %488 = vst [vmem:[%s853_s11 + $0x10] sm:$0xff] %v478_v0  ;;  %492 = vst [vmem:[%s853_s11 + $0x30] sm:$0xff] %v482_v1  ;;  %v479_v5 = vmax.f32 %v456_v2, 0.0  ;;  %v483_v6 = vmax.f32 %v466_v3, 0.0  ;;  %v470_v7 = vadd.f32 %v469_v4, %v221_v44 }
 0x116   : > { %v471_v8 = vpop.f32.mrf.mxu1 }
 0x117   : > { %489 = vst [vmem:[%s853_s11 + $0x18] sm:$0xff] %v479_v5  ;;  %493 = vst [vmem:[%s853_s11 + $0x38] sm:$0xff] %v483_v6  ;;  %v484_v9 = vmax.f32 %v470_v7, 0.0  ;;  %v472_v10 = vadd.f32 %v471_v8, %v225_v45 }
 0x118   : > { %v473_v11 = vpop.f32.mrf.mxu1 }
 0x119   : > { %494 = vst [vmem:[%s853_s11 + $0x40] sm:$0xff] %v484_v9  ;;  %v485_v12 = vmax.f32 %v472_v10, 0.0 }
 0x11a   : > { %v474_v13 = vpop.f32.mrf.mxu1 }
 0x11b   : > { %495 = vst [vmem:[%s853_s11 + $0x48] sm:$0xff] %v485_v12 }
 0x11c PF: > { %s13_s12 = sadd.s32 1, %s707_s12  }
 0x11d   : > { %p10_p4 = scmp.ge.s32.totalorder %s13_s12, 4  }
 0x11f   :  { %12 = sbr.rel (!%p10_p4) target bundleno = 1 (0x1), region = 62 }

// kernel: reverse.10
= control target key start
LH: loop header
LB: loop body
LE: loop exit
PB: predicated region body
PF: predicated region fallthrough
CT: control target
= control target key end

     0   :  { %s80_s0 = inlined_call_operand.vmem [shape: f32[2,128,8,3], index: 0, kind: input, shape index: {}]   ;;  %s81_s1 = inlined_call_operand.vmem [shape: f32[2,128,8,3], index: 1, kind: output, shape index: {}]  }
   0x1   :  { %v24_v0 = vld [vmem:[%s80_s0 + $0x10] sm:$0xff]  ;;  %v25_v1 = vld [vmem:[%s80_s0 + $0x28] sm:$0xff]  ;;  %v29_v3 = vld [vmem:[%s80_s0 + $0x20] sm:$0xff] }
   0x2   :  { %v27_v2 = vld [vmem:[%s80_s0 + $0x8] sm:$0xff]  ;;  %4 = vst [vmem:[%s81_s1] sm:$0xff] %v24_v0  ;;  %26 = vst [vmem:[%s81_s1 + $0x18] sm:$0xff] %v25_v1  ;;  %v17_v4 = vld [vmem:[%s80_s0] sm:$0xff] }
   0x3   :  { %28 = vst [vmem:[%s81_s1 + $0x8] sm:$0xff] %v27_v2  ;;  %v32_v5 = vld [vmem:[%s80_s0 + $0x18] sm:$0xff]  ;;  %30 = vst [vmem:[%s81_s1 + $0x20] sm:$0xff] %v29_v3 }
   0x4   :  { %31 = vst [vmem:[%s81_s1 + $0x10] sm:$0xff] %v17_v4  ;;  %33 = vst [vmem:[%s81_s1 + $0x28] sm:$0xff] %v32_v5 }

// kernel: _lambda_.12
= control target key start
LH: loop header
LB: loop body
LE: loop exit
PB: predicated region body
PF: predicated region fallthrough
CT: control target
= control target key end

     0   :  { %s839_s12 = smov 0   ;;  %s973_s0 = inlined_call_operand.vmem [shape: bf16[512,128], index: 0, kind: input, shape index: {}]   ;;  %s974_s1 = inlined_call_operand.vmem [shape: bf16[128,128], index: 1, kind: input, shape index: {}]   ;;  %s975_s2 = inlined_call_operand.vmem [shape: f32[1,128], index: 2, kind: input, shape index: {}]   ;;  %s976_s3 = inlined_call_operand.vmem [shape: f32[512,128], index: 3, kind: output, shape index: {}]  }
   0x1 LB: > { %s655_s13 = sadd.s32 4294967295, %s817_s12   ;;  %p659_p0 = scmp.ge.s32.totalorder %s817_s12, 1  ;;  %s817_s12 = sphi %s839_s12, %s13_s12  }
   0x2   : > { %p138_p1 = scmp.lt.s32.totalorder %s817_s12, 3 }
   0x4   : > { %p139_p2 = pnand %p659_p0, %p138_p1 }
   0x5   : > { %s660_s16 = sshll.u32 (!%p139_p2), %s655_s13, 5 }
   0x6   : > { %142 = sbr.rel (%p139_p2) target bundleno = 272 (0x110), region = 32  ;;  %p163_p3 = scmp.lt.s32.totalorder (!%p139_p2), %s660_s16, 63 }
   0xb   : > { %v787_v0 = vld [vmem:[%s974_s1 + $0x38] sm:$0xff]   ;;  %v788_v1 = vld [vmem:[%s974_s1 + $0x30] sm:$0xff]   ;;  %s978_s16 = smov (!%p163_p3, %s660_s16), 63  ;;  %v789_v2 = vld [vmem:[%s974_s1 + $0x28] sm:$0xff]  }
   0xc   : > { %715 = vmatprep.subr.bf16.mxu0 %v787_v0  ;;  %763 = vmatprep.subr.bf16.mxu1 %v787_v0  ;;  %s661_s21 = sshll.u32 %s978_s16, 2  ;;  %v790_v3 = vld [vmem:[%s974_s1 + $0x20] sm:$0xff]   ;;  %v791_v6 = vld [vmem:[%s974_s1 + $0x18] sm:$0xff]   ;;  %v792_v7 = vld [vmem:[%s974_s1 + $0x10] sm:$0xff]   ;;  %s663_s10 = sshll.u32 %s978_s16, 3 }
   0xd   : > { %716 = vmatpush3.bf16.msra.mxu0 %v787_v0  ;;  %771 = vmatpush3.bf16.msra.mxu1 %v787_v0  ;;  %s862_s24 = scalar_lea.vmem %s973_s0, %s661_s21  ;;  %v793_v8 = vld [vmem:[%s974_s1 + $0x8] sm:$0xff]   ;;  %v794_v9 = vld [vmem:[%s974_s1] sm:$0xff]   ;;  %s906_s14 = scalar_lea.vmem %s976_s3, %s663_s10 }
   0xe   : > { %717 = vmatprep.subr.bf16.mxu0 %v788_v1  ;;  %764 = vmatprep.subr.bf16.mxu1 %v788_v1  ;;  %v795_v4 = vld [vmem:[%s862_s24] sm:$0xff]   ;;  %v797_v10 = vld [vmem:[%s862_s24 + $0x8] sm:$0xff]   ;;  %v799_v12 = vld [vmem:[%s862_s24 + $0x10] sm:$0xff]  }
   0xf   : > { %v796_v5 = vld [vmem:[%s862_s24 + $0x40] sm:$0xff]   ;;  %731 = vmatprep.mubr.bf16.mxu0 %v795_v4  ;;  %v798_v11 = vld [vmem:[%s862_s24 + $0x48] sm:$0xff]   ;;  %v800_v13 = vld [vmem:[%s862_s24 + $0x50] sm:$0xff]  }
  0x10   : > { %747 = vmatprep.mubr.bf16.mxu1 %v796_v5  ;;  %v801_v14 = vld [vmem:[%s862_s24 + $0x18] sm:$0xff]   ;;  %v803_v16 = vld [vmem:[%s862_s24 + $0x20] sm:$0xff]   ;;  %v805_v18 = vld [vmem:[%s862_s24 + $0x28] sm:$0xff]  }
  0x11   : > { %718 = vmatpush3.bf16.msra.mxu0 %v788_v1  ;;  %772 = vmatpush3.bf16.msra.mxu1 %v788_v1  ;;  %v802_v15 = vld [vmem:[%s862_s24 + $0x58] sm:$0xff]   ;;  %v804_v17 = vld [vmem:[%s862_s24 + $0x60] sm:$0xff]   ;;  %v806_v19 = vld [vmem:[%s862_s24 + $0x68] sm:$0xff]  }
  0x12   : > { %719 = vmatprep.subr.bf16.mxu0 %v789_v2  ;;  %765 = vmatprep.subr.bf16.mxu1 %v789_v2  ;;  %v807_v20 = vld [vmem:[%s862_s24 + $0x30] sm:$0xff]   ;;  %v809_v22 = vld [vmem:[%s862_s24 + $0x38] sm:$0xff]   ;;  %v898_v24 = vld [vmem:[%s975_s2] ss:$0 sm:$0xff] }
  0x13   : > { %v808_v21 = vld [vmem:[%s862_s24 + $0x70] sm:$0xff]   ;;  %v810_v23 = vld [vmem:[%s862_s24 + $0x78] sm:$0xff]  }
  0x15   : > { %720 = vmatpush3.bf16.msra.mxu0 %v789_v2  ;;  %773 = vmatpush3.bf16.msra.mxu1 %v789_v2 }
  0x16   : > { %721 = vmatprep.subr.bf16.mxu0 %v790_v3  ;;  %766 = vmatprep.subr.bf16.mxu1 %v790_v3 }
  0x19   : > { %722 = vmatpush3.bf16.msra.mxu0 %v790_v3  ;;  %774 = vmatpush3.bf16.msra.mxu1 %v790_v3 }
  0x1a   : > { %723 = vmatprep.subr.bf16.mxu0 %v791_v6  ;;  %767 = vmatprep.subr.bf16.mxu1 %v791_v6 }
  0x1d   : > { %724 = vmatpush3.bf16.msra.mxu0 %v791_v6  ;;  %775 = vmatpush3.bf16.msra.mxu1 %v791_v6 }
  0x1e   : > { %725 = vmatprep.subr.bf16.mxu0 %v792_v7  ;;  %768 = vmatprep.subr.bf16.mxu1 %v792_v7 }
  0x21   : > { %726 = vmatpush3.bf16.msra.mxu0 %v792_v7  ;;  %776 = vmatpush3.bf16.msra.mxu1 %v792_v7 }
  0x22   : > { %727 = vmatprep.subr.bf16.mxu0 %v793_v8  ;;  %769 = vmatprep.subr.bf16.mxu1 %v793_v8 }
  0x25   : > { %728 = vmatpush3.bf16.msra.mxu0 %v793_v8  ;;  %777 = vmatpush3.bf16.msra.mxu1 %v793_v8 }
  0x26   : > { %729 = vmatprep.subr.bf16.mxu0 %v794_v9  ;;  %770 = vmatprep.subr.bf16.mxu1 %v794_v9 }
  0x29   : > { %730 = vmatpush3.bf16.msra.mxu0 %v794_v9  ;;  %778 = vmatpush3.bf16.msra.mxu1 %v794_v9 }
  0x2c   : > { %732 = vmatmul.mubr.bf16.vlgmr.msra.gmra.mxu0 %v797_v10  ;;  %748 = vmatmul.mubr.bf16.vlgmr.msra.gmra.mxu1 %v798_v11 }
  0x2d   : > { %735 = vmatprep.mubr.bf16.mxu0 %v799_v12  ;;  %751 = vmatprep.mubr.bf16.mxu1 %v800_v13 }
  0x34   : > { %736 = vmatmul.mubr.bf16.gmra.mxu0 %v801_v14  ;;  %752 = vmatmul.mubr.bf16.gmra.mxu1 %v802_v15 }
  0x35   : > { %739 = vmatprep.mubr.bf16.mxu0 %v803_v16  ;;  %755 = vmatprep.mubr.bf16.mxu1 %v804_v17 }
  0x3c   : > { %740 = vmatmul.mubr.bf16.gmra.mxu0 %v805_v18  ;;  %756 = vmatmul.mubr.bf16.gmra.mxu1 %v806_v19 }
  0x3d   : > { %743 = vmatprep.mubr.bf16.mxu0 %v807_v20  ;;  %759 = vmatprep.mubr.bf16.mxu1 %v808_v21 }
  0x44   : > { %744 = vmatmul.mubr.bf16.gmra.mxu0 %v809_v22  ;;  %760 = vmatmul.mubr.bf16.gmra.mxu1 %v810_v23 }
  0xec   : > { %v733_v25 = vpop.f32.mrf.mxu0  ;;  %v749_v26 = vpop.f32.mrf.mxu1 }
  0xed   : > { %v417_v27 = vadd.f32 %v733_v25, %v898_v24  ;;  %v481_v28 = vadd.f32 %v749_v26, %v898_v24 }
  0xee   : > { %v408_v29 = vpop.f32.mrf.mxu0  ;;  %v472_v30 = vpop.f32.mrf.mxu1 }
  0xef   : > { %v537_v31 = vmax.f32 %v417_v27, 0.0  ;;  %v553_v32 = vmax.f32 %v481_v28, 0.0  ;;  %v409_v33 = vadd.f32 %v898_v24, %v408_v29  ;;  %v473_v34 = vadd.f32 %v898_v24, %v472_v30 }
  0xf0   : > { %v734_v35 = vpop.f32.mrf.mxu0  ;;  %v750_v36 = vpop.f32.mrf.mxu1 }
  0xf1   : > { %569 = vst [vmem:[%s906_s14 + $0x10] sm:$0xff] %v537_v31  ;;  %585 = vst [vmem:[%s906_s14 + $0x90] sm:$0xff] %v553_v32  ;;  %v535_v37 = vmax.f32 %v409_v33, 0.0  ;;  %v551_v38 = vmax.f32 %v473_v34, 0.0  ;;  %v420_v39 = vadd.f32 %v734_v35, %v898_v24  ;;  %v484_v40 = vadd.f32 %v750_v36, %v898_v24 }
  0xf2   : > { %v411_v41 = vpop.f32.mrf.mxu0  ;;  %v475_v42 = vpop.f32.mrf.mxu1 }
  0xf3   : > { %567 = vst [vmem:[%s906_s14] sm:$0xff] %v535_v37  ;;  %583 = vst [vmem:[%s906_s14 + $0x80] sm:$0xff] %v551_v38  ;;  %v538_v43 = vmax.f32 %v420_v39, 0.0  ;;  %v554_v44 = vmax.f32 %v484_v40, 0.0  ;;  %v412_v45 = vadd.f32 %v898_v24, %v411_v41  ;;  %v476_v46 = vadd.f32 %v898_v24, %v475_v42 }
  0xf4   : > { %v737_v47 = vpop.f32.mrf.mxu0  ;;  %v753_v48 = vpop.f32.mrf.mxu1 }
  0xf5   : > { %570 = vst [vmem:[%s906_s14 + $0x18] sm:$0xff] %v538_v43  ;;  %586 = vst [vmem:[%s906_s14 + $0x98] sm:$0xff] %v554_v44  ;;  %v536_v49 = vmax.f32 %v412_v45, 0.0  ;;  %v552_v50 = vmax.f32 %v476_v46, 0.0  ;;  %v433_v51 = vadd.f32 %v737_v47, %v898_v24  ;;  %v497_v52 = vadd.f32 %v753_v48, %v898_v24 }
  0xf6   : > { %v424_v53 = vpop.f32.mrf.mxu0  ;;  %v488_v54 = vpop.f32.mrf.mxu1 }
  0xf7   : > { %568 = vst [vmem:[%s906_s14 + $0x8] sm:$0xff] %v536_v49  ;;  %584 = vst [vmem:[%s906_s14 + $0x88] sm:$0xff] %v552_v50  ;;  %v541_v55 = vmax.f32 %v433_v51, 0.0  ;;  %v557_v56 = vmax.f32 %v497_v52, 0.0  ;;  %v425_v57 = vadd.f32 %v898_v24, %v424_v53  ;;  %v489_v58 = vadd.f32 %v898_v24, %v488_v54 }
  0xf8   : > { %v738_v59 = vpop.f32.mrf.mxu0  ;;  %v754_v60 = vpop.f32.mrf.mxu1 }
  0xf9   : > { %573 = vst [vmem:[%s906_s14 + $0x30] sm:$0xff] %v541_v55  ;;  %589 = vst [vmem:[%s906_s14 + $0xb0] sm:$0xff] %v557_v56  ;;  %v539_v61 = vmax.f32 %v425_v57, 0.0  ;;  %v555_v62 = vmax.f32 %v489_v58, 0.0  ;;  %v436_v63 = vadd.f32 %v738_v59, %v898_v24  ;;  %v500_v0 = vadd.f32 %v754_v60, %v898_v24 }
  0xfa   : > { %v427_v1 = vpop.f32.mrf.mxu0  ;;  %v491_v2 = vpop.f32.mrf.mxu1 }
  0xfb   : > { %571 = vst [vmem:[%s906_s14 + $0x20] sm:$0xff] %v539_v61  ;;  %587 = vst [vmem:[%s906_s14 + $0xa0] sm:$0xff] %v555_v62  ;;  %v542_v3 = vmax.f32 %v436_v63, 0.0  ;;  %v558_v4 = vmax.f32 %v500_v0, 0.0  ;;  %v428_v5 = vadd.f32 %v898_v24, %v427_v1  ;;  %v492_v6 = vadd.f32 %v898_v24, %v491_v2 }
  0xfc   : > { %v741_v7 = vpop.f32.mrf.mxu0  ;;  %v757_v8 = vpop.f32.mrf.mxu1 }
  0xfd   : > { %574 = vst [vmem:[%s906_s14 + $0x38] sm:$0xff] %v542_v3  ;;  %590 = vst [vmem:[%s906_s14 + $0xb8] sm:$0xff] %v558_v4  ;;  %v540_v9 = vmax.f32 %v428_v5, 0.0  ;;  %v556_v10 = vmax.f32 %v492_v6, 0.0  ;;  %v449_v11 = vadd.f32 %v741_v7, %v898_v24  ;;  %v513_v12 = vadd.f32 %v757_v8, %v898_v24 }
  0xfe   : > { %v440_v13 = vpop.f32.mrf.mxu0  ;;  %v504_v14 = vpop.f32.mrf.mxu1 }
  0xff   : > { %572 = vst [vmem:[%s906_s14 + $0x28] sm:$0xff] %v540_v9  ;;  %588 = vst [vmem:[%s906_s14 + $0xa8] sm:$0xff] %v556_v10  ;;  %v545_v15 = vmax.f32 %v449_v11, 0.0  ;;  %v561_v16 = vmax.f32 %v513_v12, 0.0  ;;  %v441_v17 = vadd.f32 %v898_v24, %v440_v13  ;;  %v505_v18 = vadd.f32 %v898_v24, %v504_v14 }
 0x100   : > { %v742_v19 = vpop.f32.mrf.mxu0  ;;  %v758_v20 = vpop.f32.mrf.mxu1 }
 0x101   : > { %577 = vst [vmem:[%s906_s14 + $0x50] sm:$0xff] %v545_v15  ;;  %593 = vst [vmem:[%s906_s14 + $0xd0] sm:$0xff] %v561_v16  ;;  %v543_v21 = vmax.f32 %v441_v17, 0.0  ;;  %v559_v22 = vmax.f32 %v505_v18, 0.0  ;;  %v452_v23 = vadd.f32 %v742_v19, %v898_v24  ;;  %v516_v25 = vadd.f32 %v758_v20, %v898_v24 }
 0x102   : > { %v443_v26 = vpop.f32.mrf.mxu0  ;;  %v507_v27 = vpop.f32.mrf.mxu1 }
 0x103   : > { %575 = vst [vmem:[%s906_s14 + $0x40] sm:$0xff] %v543_v21  ;;  %591 = vst [vmem:[%s906_s14 + $0xc0] sm:$0xff] %v559_v22  ;;  %v546_v28 = vmax.f32 %v452_v23, 0.0  ;;  %v562_v29 = vmax.f32 %v516_v25, 0.0  ;;  %v444_v30 = vadd.f32 %v898_v24, %v443_v26  ;;  %v508_v31 = vadd.f32 %v898_v24, %v507_v27 }
 0x104   : > { %v745_v32 = vpop.f32.mrf.mxu0  ;;  %v761_v33 = vpop.f32.mrf.mxu1 }
 0x105   : > { %578 = vst [vmem:[%s906_s14 + $0x58] sm:$0xff] %v546_v28  ;;  %594 = vst [vmem:[%s906_s14 + $0xd8] sm:$0xff] %v562_v29  ;;  %v544_v34 = vmax.f32 %v444_v30, 0.0  ;;  %v560_v35 = vmax.f32 %v508_v31, 0.0  ;;  %v465_v36 = vadd.f32 %v745_v32, %v898_v24  ;;  %v529_v37 = vadd.f32 %v761_v33, %v898_v24 }
 0x106   : > { %v456_v38 = vpop.f32.mrf.mxu0  ;;  %v520_v39 = vpop.f32.mrf.mxu1 }
 0x107   : > { %576 = vst [vmem:[%s906_s14 + $0x48] sm:$0xff] %v544_v34  ;;  %592 = vst [vmem:[%s906_s14 + $0xc8] sm:$0xff] %v560_v35  ;;  %v549_v40 = vmax.f32 %v465_v36, 0.0  ;;  %v565_v41 = vmax.f32 %v529_v37, 0.0  ;;  %v457_v42 = vadd.f32 %v898_v24, %v456_v38  ;;  %v521_v43 = vadd.f32 %v898_v24, %v520_v39 }
 0x108   : > { %v746_v44 = vpop.f32.mrf.mxu0  ;;  %v762_v45 = vpop.f32.mrf.mxu1 }
 0x109   : > { %581 = vst [vmem:[%s906_s14 + $0x70] sm:$0xff] %v549_v40  ;;  %597 = vst [vmem:[%s906_s14 + $0xf0] sm:$0xff] %v565_v41  ;;  %v547_v46 = vmax.f32 %v457_v42, 0.0  ;;  %v563_v47 = vmax.f32 %v521_v43, 0.0  ;;  %v468_v48 = vadd.f32 %v746_v44, %v898_v24  ;;  %v532_v49 = vadd.f32 %v762_v45, %v898_v24 }
 0x10a   : > { %v459_v50 = vpop.f32.mrf.mxu0  ;;  %v523_v51 = vpop.f32.mrf.mxu1 }
 0x10b   : > { %579 = vst [vmem:[%s906_s14 + $0x60] sm:$0xff] %v547_v46  ;;  %595 = vst [vmem:[%s906_s14 + $0xe0] sm:$0xff] %v563_v47  ;;  %v550_v52 = vmax.f32 %v468_v48, 0.0  ;;  %v566_v53 = vmax.f32 %v532_v49, 0.0  ;;  %v460_v54 = vadd.f32 %v898_v24, %v459_v50  ;;  %v524_v55 = vadd.f32 %v898_v24, %v523_v51 }
 0x10d   : > { %582 = vst [vmem:[%s906_s14 + $0x78] sm:$0xff] %v550_v52  ;;  %598 = vst [vmem:[%s906_s14 + $0xf8] sm:$0xff] %v566_v53  ;;  %v548_v56 = vmax.f32 %v460_v54, 0.0  ;;  %v564_v57 = vmax.f32 %v524_v55, 0.0 }
 0x10f   : > { %580 = vst [vmem:[%s906_s14 + $0x68] sm:$0xff] %v548_v56  ;;  %596 = vst [vmem:[%s906_s14 + $0xe8] sm:$0xff] %v564_v57 }
 0x110 PF: > { %s13_s12 = sadd.s32 1, %s817_s12  }
 0x111   : > { %p10_p4 = scmp.ge.s32.totalorder %s13_s12, 4  }
 0x113   :  { %12 = sbr.rel (!%p10_p4) target bundleno = 1 (0x1), region = 62 }

// kernel: _lambda_.11
= control target key start
LH: loop header
LB: loop body
LE: loop exit
PB: predicated region body
PF: predicated region fallthrough
CT: control target
= control target key end

     0   :  { %s7479_s18 = smov 0   ;;  %s9366_s0 = inlined_call_operand.vmem [shape: bf16[2,18,18,128], index: 0, kind: input, shape index: {}]   ;;  %s9367_s1 = inlined_call_operand.vmem [shape: bf16[2,16,16,128], index: 1, kind: input, shape index: {}]   ;;  %s9368_s2 = inlined_call_operand.vmem [shape: bf16[9,128,128], index: 2, kind: input, shape index: {}]   ;;  %s9369_s3 = inlined_call_operand.vmem [shape: bf16[128,128], index: 3, kind: input, shape index: {}]   ;;  %s9370_s4 = inlined_call_operand.vmem [shape: f32[1,128], index: 4, kind: input, shape index: {}]   ;;  %s9371_s5 = inlined_call_operand.vmem [shape: bf16[2,16,16,128], index: 5, kind: output, shape index: {}]  }
   0x1 LB: > { %s5786_s19 = sadd.s32 4294967295, %s7447_s18   ;;  %p5790_p0 = scmp.ge.s32.totalorder %s7447_s18, 1  ;;  %s7447_s18 = sphi %s7479_s18, %s15_s18  }
   0x2   : > { %p197_p1 = scmp.lt.s32.totalorder %s7447_s18, 3 }
   0x4   : > { %p198_p2 = pnand %p5790_p0, %p197_p1 }
   0x6   : > { %201 = sbr.rel (%p198_p2) target bundleno = 602 (0x25a), region = 40 }
   0xb   : > { %v7297_v0 = vld [vmem:[%s9368_s2 + $0x38] sm:$0xff]   ;;  %p230_p3 = scmp.lt.s32.totalorder %s5786_s19, 1  ;;  %v7299_v2 = vld [vmem:[%s9368_s2 + $0x30] sm:$0xff]   ;;  %v7301_v4 = vld [vmem:[%s9368_s2 + $0x28] sm:$0xff]   ;;  %vm1773_vm0 = vcmask 1042432   ;;  %vm1774_vm1 = vcmask 1046532  }
   0xc   : > { %v7298_v1 = vld [vmem:[%s9369_s3 + $0x38] sm:$0xff]   ;;  %6808 = vmatprep.subr.bf16.mxu0 %v7297_v0  ;;  %v7300_v3 = vld [vmem:[%s9369_s3 + $0x30] sm:$0xff]   ;;  %v7302_v5 = vld [vmem:[%s9369_s3 + $0x28] sm:$0xff]   ;;  %vm1000_vm2 = vsmask.f32 3328 }
   0xd   : > { %6856 = vmatprep.subr.bf16.mxu1 %v7298_v1  ;;  %6809 = vmatpush3.bf16.msra.mxu0 %v7297_v0  ;;  %s9431_s19 = smov (!%p230_p3, %s5786_s19), 1  ;;  %v7303_v6 = vld [vmem:[%s9368_s2 + $0x20] sm:$0xff]   ;;  %v7305_v8 = vld [vmem:[%s9368_s2 + $0x18] sm:$0xff]   ;;  %v7307_v10 = vld [vmem:[%s9368_s2 + $0x10] sm:$0xff]   ;;  %vm1001_vm3 = vsmask.f32 7440 }
   0xe   : > { %6857 = vmatpush3.bf16.msra.mxu1 %v7298_v1  ;;  %6810 = vmatprep.subr.bf16.mxu0 %v7299_v2  ;;  %v7304_v7 = vld [vmem:[%s9369_s3 + $0x20] sm:$0xff]   ;;  %s7288_s11 = smul.u32 216, %s9431_s19  ;;  %s6439_s12 = sshll.u32 %s9431_s19, 7  ;;  %v7306_v9 = vld [vmem:[%s9369_s3 + $0x18] sm:$0xff]   ;;  %v7308_v11 = vld [vmem:[%s9369_s3 + $0x10] sm:$0xff]  }
   0xf   : > { %6858 = vmatprep.subr.bf16.mxu1 %v7300_v3  ;;  %s7534_s26 = scalar_lea.vmem %s9367_s1, %s6439_s12  ;;  %v7309_v14 = vld [vmem:[%s9368_s2 + $0x8] sm:$0xff]   ;;  %v7311_v16 = vld [vmem:[%s9368_s2] sm:$0xff]   ;;  %v7317_v19 = vld [vmem:[%s9368_s2 + $0x78] sm:$0xff]   ;;  %s9283_s22 = scalar_lea.vmem %s9371_s5, %s6439_s12 }
  0x10   : > { %s7524_s21 = scalar_lea.vmem %s9366_s0, %s7288_s11  ;;  %v7314_v13 = vld [vmem:[%s7534_s26] sm:$0xff]   ;;  %v7310_v15 = vld [vmem:[%s9369_s3 + $0x8] sm:$0xff]   ;;  %v7318_v20 = vld [vmem:[%s9368_s2 + $0xb8] sm:$0xff]  }
  0x11   : > { %6811 = vmatpush3.bf16.msra.mxu0 %v7299_v2  ;;  %v7313_v12 = vld [vmem:[%s7524_s21] sm:$0xff]   ;;  %6872 = vmatprep.mubr.bf16.mxu1 %v7314_v13  ;;  %v7315_v18 = vld [vmem:[%s7524_s21 + $0xc] sm:$0xff]   ;;  %v7319_v22 = vld [vmem:[%s7524_s21 + $0x18] sm:$0xff]  }
  0x12   : > { %6859 = vmatpush3.bf16.msra.mxu1 %v7300_v3  ;;  %6812 = vmatprep.subr.bf16.mxu0 %v7301_v4  ;;  %v7312_v17 = vld [vmem:[%s9369_s3] sm:$0xff]   ;;  %v7316_v21 = vld [vmem:[%s7534_s26 + $0x8] sm:$0xff]   ;;  %v7320_v23 = vld [vmem:[%s7534_s26 + $0x10] sm:$0xff]  }
  0x13   : > { %6860 = vmatprep.subr.bf16.mxu1 %v7302_v5  ;;  %6824 = vmatprep.mubr.bf16.mxu0 %v7313_v12  ;;  %v7323_v24 = vld [vmem:[%s9368_s2 + $0x70] sm:$0xff]   ;;  %v7321_v26 = vld [vmem:[%s7524_s21 + $0x24] sm:$0xff]   ;;  %v7322_v29 = vld [vmem:[%s7534_s26 + $0x18] sm:$0xff]  }
  0x14   : > { %v7324_v25 = vld [vmem:[%s9368_s2 + $0xb0] sm:$0xff]   ;;  %v7329_v27 = vld [vmem:[%s9368_s2 + $0x68] sm:$0xff]   ;;  %v7326_v31 = vld [vmem:[%s7534_s26 + $0x20] sm:$0xff]  }
  0x15   : > { %6813 = vmatpush3.bf16.msra.mxu0 %v7301_v4  ;;  %v7330_v28 = vld [vmem:[%s9368_s2 + $0xa8] sm:$0xff]   ;;  %v7325_v30 = vld [vmem:[%s7524_s21 + $0x30] sm:$0xff]   ;;  %v7335_v32 = vld [vmem:[%s9368_s2 + $0x60] sm:$0xff]  }
  0x16   : > { %6861 = vmatpush3.bf16.msra.mxu1 %v7302_v5  ;;  %6814 = vmatprep.subr.bf16.mxu0 %v7303_v6  ;;  %v7336_v33 = vld [vmem:[%s9368_s2 + $0xa0] sm:$0xff]   ;;  %v7328_v35 = vld [vmem:[%s7534_s26 + $0x28] sm:$0xff]   ;;  %v7341_v36 = vld [vmem:[%s9368_s2 + $0x58] sm:$0xff]  }
  0x17   : > { %6862 = vmatprep.subr.bf16.mxu1 %v7304_v7  ;;  %v7327_v34 = vld [vmem:[%s7524_s21 + $0x3c] sm:$0xff]   ;;  %v7331_v38 = vld [vmem:[%s7524_s21 + $0x48] sm:$0xff]   ;;  %v7332_v39 = vld [vmem:[%s7534_s26 + $0x30] sm:$0xff]  }
  0x18   : > { %v7342_v37 = vld [vmem:[%s9368_s2 + $0x98] sm:$0xff]   ;;  %v7347_v40 = vld [vmem:[%s9368_s2 + $0x50] sm:$0xff]   ;;  %v7337_v44 = vld [vmem:[%s7524_s21 + $0x60] sm:$0xff]  }
  0x19   : > { %6815 = vmatpush3.bf16.msra.mxu0 %v7303_v6  ;;  %v7348_v41 = vld [vmem:[%s9368_s2 + $0x90] sm:$0xff]   ;;  %v7334_v43 = vld [vmem:[%s7534_s26 + $0x38] sm:$0xff]   ;;  %v7338_v45 = vld [vmem:[%s7534_s26 + $0x40] sm:$0xff]  }
  0x1a   : > { %6863 = vmatpush3.bf16.msra.mxu1 %v7304_v7  ;;  %6816 = vmatprep.subr.bf16.mxu0 %v7305_v8  ;;  %v7333_v42 = vld [vmem:[%s7524_s21 + $0x54] sm:$0xff]   ;;  %v7353_v46 = vld [vmem:[%s9368_s2 + $0x48] sm:$0xff]   ;;  %v7359_v52 = vld [vmem:[%s9368_s2 + $0x40] sm:$0xff]  }
  0x1b   : > { %6864 = vmatprep.subr.bf16.mxu1 %v7306_v9  ;;  %v7354_v47 = vld [vmem:[%s9368_s2 + $0x88] sm:$0xff]   ;;  %v7343_v50 = vld [vmem:[%s7524_s21 + $0x78] sm:$0xff]   ;;  %v7344_v51 = vld [vmem:[%s7534_s26 + $0x50] sm:$0xff]  }
  0x1c   : > { %v7339_v48 = vld [vmem:[%s7524_s21 + $0x6c] sm:$0xff]   ;;  %v7360_v53 = vld [vmem:[%s9368_s2 + $0x80] sm:$0xff]   ;;  %v954_v56 = vld [vmem:[%s7524_s21 + $0x8] sm:$0x1] }
  0x1d   : > { %6817 = vmatpush3.bf16.msra.mxu0 %v7305_v8  ;;  %v7340_v49 = vld [vmem:[%s7534_s26 + $0x48] sm:$0xff]   ;;  %v952_v54 = vld [vmem:[%s7524_s21] sm:$0xf]  ;;  %v953_v55 = vld [vmem:[%s7524_s21 + $0x4] sm:$0xf]  ;;  %v1023_v61 = vshll.u32 %v954_v56, 16 }
  0x1e   : > { %6865 = vmatpush3.bf16.msra.mxu1 %v7306_v9  ;;  %6818 = vmatprep.subr.bf16.mxu0 %v7307_v10  ;;  %v1004_v57 = vshrl.u32 %v952_v54, 16  ;;  %v1007_v58 = vshll.u32 %v952_v54, 16  ;;  %v1013_v59 = vshll.u32 %v953_v55, 16  ;;  %v1017_v60 = vshrl.u32 %v953_v55, 16  ;;  %v1709_v62 = vld [vmem:[%s7524_s21] sm:$0xe]  ;;  %vm7627_vm4 = vmor %vm1773_vm0, %vm1774_vm1 }
  0x1f   : > { %6866 = vmatprep.subr.bf16.mxu1 %v7308_v11  ;;  %v1778_v0 = vrot.slane %v953_v55, 5  ;;  %v5884_v3 = vrot.slane %v1709_v62, 9  ;;  %v1781_v4 = vrot.slane %v954_v56, 5  ;;  %v955_v5 = vld [vmem:[%s7524_s21 + $0xc] sm:$0xf]  ;;  %v7345_v6 = vld [vmem:[%s7524_s21 + $0x84] sm:$0xff]   ;;  %vm7645_vm5 = vmor %vm1000_vm2, %vm1001_vm3 }
  0x20   : > { %v1006_v1 = vrot.slane %v1004_v57, 4  ;;  %v1009_v2 = vrot.slane %v1007_v58, 5  ;;  %v1015_v7 = vrot.slane %v1013_v59, 5  ;;  %v1019_v8 = vrot.slane %v1017_v60, 4  ;;  %v7346_v12 = vld [vmem:[%s7534_s26 + $0x58] sm:$0xff]   ;;  %v7349_v13 = vld [vmem:[%s7524_s21 + $0x90] sm:$0xff]  }
  0x21   : > { %6819 = vmatpush3.bf16.msra.mxu0 %v7307_v10  ;;  %v1025_v9 = vrot.slane %v1023_v61, 5  ;;  %v1780_v10 = vrot.slane %v1778_v0, 4  ;;  %v1711_v56 = vld [vmem:[%s7524_s21 + $0x18] sm:$0xe]  ;;  %v7352_v57 = vld [vmem:[%s7534_s26 + $0x68] sm:$0xff]  }
  0x22   : > { %6867 = vmatpush3.bf16.msra.mxu1 %v7308_v11  ;;  %6820 = vmatprep.subr.bf16.mxu0 %v7309_v14  ;;  %v956_v11 = vld [vmem:[%s7524_s21 + $0x10] sm:$0xf]  ;;  %v961_v62 = vld [vmem:[%s7524_s21 + $0x24] sm:$0xf] }
  0x23   : > { %6868 = vmatprep.subr.bf16.mxu1 %v7310_v15 }
  0x25   : > { %6821 = vmatpush3.bf16.msra.mxu0 %v7309_v14  ;;  %v1010_v14 = vor.u32 %v1009_v2, %v1006_v1 }
  0x26   : > { %6869 = vmatpush3.bf16.msra.mxu1 %v7310_v15  ;;  %6822 = vmatprep.subr.bf16.mxu0 %v7311_v16  ;;  %v7638_v15 = vsel %vm7627_vm4, %v5884_v3, %v1778_v0  ;;  %v962_v0 = vld [vmem:[%s7524_s21 + $0x28] sm:$0xf] }
  0x27   : > { %6870 = vmatprep.subr.bf16.mxu1 %v7312_v17 }
  0x29   : > { %6823 = vmatpush3.bf16.msra.mxu0 %v7311_v16  ;;  %v957_v16 = vld [vmem:[%s7524_s21 + $0x14] sm:$0x1] }
  0x2a   : > { %6871 = vmatpush3.bf16.msra.mxu1 %v7312_v17  ;;  %6904 = vmatprep.subr.bf16.mxu0 %v7317_v19  ;;  %v1028_v17 = vshrl.u32 %v955_v5, 16 }
  0x2b   : > { %6952 = vmatprep.subr.bf16.mxu1 %v7318_v20 }
  0x2c   : > { %6825 = vmatmul.mubr.bf16.vlgmr.msra.gmra.mxu0 %v7315_v18  ;;  %v1031_v18 = vshll.u32 %v955_v5, 16  ;;  %v7355_v5 = vld [vmem:[%s7524_s21 + $0xa8] sm:$0xff]  }
  0x2d   : > { %6873 = vmatmul.mubr.bf16.vlgmr.msra.gmra.mxu1 %v7316_v21  ;;  %6905 = vmatpush3.bf16.msra.mxu0 %v7317_v19  ;;  %v1710_v19 = vld [vmem:[%s7524_s21 + $0xc] sm:$0xe] }
  0x2e   : > { %6953 = vmatpush3.bf16.msra.mxu1 %v7318_v20  ;;  %6828 = vmatprep.mubr.bf16.mxu0 %v7319_v22  ;;  %v7350_v20 = vld [vmem:[%s7534_s26 + $0x60] sm:$0xff]   ;;  %v1020_v22 = vor.u32 %v1019_v8, %v1015_v7 }
  0x2f   : > { %6876 = vmatprep.mubr.bf16.mxu1 %v7320_v23  ;;  %6906 = vmatprep.subr.bf16.mxu0 %v7323_v24  ;;  %v7651_v23 = vsel %vm7627_vm4, %v1780_v10, %v1781_v4  ;;  %v7356_v10 = vld [vmem:[%s7534_s26 + $0x70] sm:$0xff]  }
  0x30   : > { %6954 = vmatprep.subr.bf16.mxu1 %v7324_v25 }
  0x31   : > { %6907 = vmatpush3.bf16.msra.mxu0 %v7323_v24  ;;  %v1037_v24 = vshll.u32 %v956_v11, 16 }
  0x32   : > { %6955 = vmatpush3.bf16.msra.mxu1 %v7324_v25  ;;  %6908 = vmatprep.subr.bf16.mxu0 %v7329_v27  ;;  %v1041_v25 = vshrl.u32 %v956_v11, 16 }
  0x33   : > { %6956 = vmatprep.subr.bf16.mxu1 %v7330_v28 }
  0x34   : > { %6829 = vmatmul.mubr.bf16.gmra.mxu0 %v7321_v26  ;;  %v1011_v26 = vrot.slane %v1010_v14, 4 }
  0x35   : > { %6877 = vmatmul.mubr.bf16.gmra.mxu1 %v7322_v29  ;;  %6832 = vmatprep.mubr.bf16.mxu0 %v7325_v30  ;;  %v1033_v29 = vrot.slane %v1031_v18, 5  ;;  %v7658_v30 = vld [vmem:[%s9368_s2 + $0xf8] sm:$0xff]   ;;  %v1076_v18 = vshrl.u32 %v961_v62, 16 }
  0x36   : > { %6880 = vmatprep.mubr.bf16.mxu1 %v7326_v31  ;;  %6909 = vmatpush3.bf16.msra.mxu0 %v7329_v27  ;;  %v5916_v27 = vcombine.low %v7638_v15, %v7651_v23  ;;  %v1021_v31 = vrot.slane %v1020_v22, 4  ;;  %v970_v23 = vld [vmem:[%s7524_s21 + $0x48] sm:$0xf] }
  0x37   : > { %6957 = vmatpush3.bf16.msra.mxu1 %v7330_v28  ;;  %6910 = vmatprep.subr.bf16.mxu0 %v7335_v32  ;;  %v1030_v28 = vrot.slane %v1028_v17, 4  ;;  %v963_v17 = vld [vmem:[%s7524_s21 + $0x2c] sm:$0x1] }
  0x38   : > { %6958 = vmatprep.subr.bf16.mxu1 %v7336_v33 }
  0x3a   : > { %6911 = vmatpush3.bf16.msra.mxu0 %v7335_v32  ;;  %v1039_v32 = vrot.slane %v1037_v24, 5 }
  0x3b   : > { %6959 = vmatpush3.bf16.msra.mxu1 %v7336_v33  ;;  %6912 = vmatprep.subr.bf16.mxu0 %v7341_v36  ;;  %v1043_v33 = vrot.slane %v1041_v25, 4 }
  0x3c   : > { %6833 = vmatmul.mubr.bf16.gmra.mxu0 %v7327_v34  ;;  %6960 = vmatprep.subr.bf16.mxu1 %v7342_v37  ;;  %v1047_v34 = vshll.u32 %v957_v16, 16 }
  0x3d   : > { %6881 = vmatmul.mubr.bf16.gmra.mxu1 %v7328_v35  ;;  %6836 = vmatprep.mubr.bf16.mxu0 %v7331_v38  ;;  %v1016_v35 = vsel %vm7645_vm5, %v1011_v26, %v1015_v7  ;;  %v1785_v38 = vrot.slane %v956_v11, 5  ;;  %v1089_v26 = vshrl.u32 %v962_v0, 16 }
  0x3e   : > { %6884 = vmatprep.mubr.bf16.mxu1 %v7332_v39  ;;  %6913 = vmatpush3.bf16.msra.mxu0 %v7341_v36  ;;  %v1034_v36 = vor.u32 %v1033_v29, %v1030_v28  ;;  %v7666_v39 = vld [vmem:[%s9368_s2 + $0x138] sm:$0xff]   ;;  %v1712_v28 = vld [vmem:[%s7524_s21 + $0x24] sm:$0xe] }
  0x3f   : > { %6961 = vmatpush3.bf16.msra.mxu1 %v7342_v37  ;;  %6914 = vmatprep.subr.bf16.mxu0 %v7347_v40  ;;  %v5885_v37 = vrot.slane %v1710_v19, 9  ;;  %v1079_v19 = vshll.u32 %v961_v62, 16 }
  0x40   : > { %6962 = vmatprep.subr.bf16.mxu1 %v7348_v41 }
  0x42   : > { %6915 = vmatpush3.bf16.msra.mxu0 %v7347_v40  ;;  %v958_v40 = vld [vmem:[%s7524_s21 + $0x18] sm:$0xf] }
  0x43   : > { %6963 = vmatpush3.bf16.msra.mxu1 %v7348_v41  ;;  %6916 = vmatprep.subr.bf16.mxu0 %v7353_v46  ;;  %v1026_v41 = vsel %vm7645_vm5, %v1021_v31, %v1025_v9  ;;  %v1055_v54 = vshll.u32 %v958_v40, 16  ;;  %v1078_v31 = vrot.slane %v1076_v18, 4 }
  0x44   : > { %6837 = vmatmul.mubr.bf16.gmra.mxu0 %v7333_v42  ;;  %6964 = vmatprep.subr.bf16.mxu1 %v7354_v47  ;;  %v1044_v42 = vor.u32 %v1043_v33, %v1039_v32 }
  0x45   : > { %6885 = vmatmul.mubr.bf16.gmra.mxu1 %v7334_v43  ;;  %6840 = vmatprep.mubr.bf16.mxu0 %v7337_v44  ;;  %v1049_v43 = vrot.slane %v1047_v34, 5  ;;  %v1788_v44 = vrot.slane %v957_v16, 5  ;;  %v1057_v4 = vrot.slane %v1055_v54, 5 }
  0x46   : > { %6888 = vmatprep.mubr.bf16.mxu1 %v7338_v45  ;;  %6917 = vmatpush3.bf16.msra.mxu0 %v7353_v46  ;;  %v959_v45 = vld [vmem:[%s7524_s21 + $0x1c] sm:$0xf]  ;;  %v960_v46 = vld [vmem:[%s7524_s21 + $0x20] sm:$0x1] }
  0x47   : > { %6965 = vmatpush3.bf16.msra.mxu1 %v7354_v47  ;;  %6918 = vmatprep.subr.bf16.mxu0 %v7359_v52  ;;  %v7673_v47 = vcombine.low %v1016_v35, %v1026_v41  ;;  %v1061_v55 = vshll.u32 %v959_v45, 16  ;;  %v1065_v60 = vshrl.u32 %v959_v45, 16  ;;  %v1071_v61 = vshll.u32 %v960_v46, 16  ;;  %v7358_v41 = vld [vmem:[%s7534_s26 + $0x78] sm:$0xff]  }
  0x48   : > { %6966 = vmatprep.subr.bf16.mxu1 %v7360_v53  ;;  %v1795_v14 = vrot.slane %v960_v46, 5  ;;  %v965_v46 = vld [vmem:[%s7524_s21 + $0x34] sm:$0xf] }
  0x49   : > { %v1063_v7 = vrot.slane %v1061_v55, 5  ;;  %v1067_v8 = vrot.slane %v1065_v60, 4  ;;  %v1073_v9 = vrot.slane %v1071_v61, 5  ;;  %v1802_v55 = vrot.slane %v963_v17, 5 }
  0x4a   : > { %6919 = vmatpush3.bf16.msra.mxu0 %v7359_v52  ;;  %v1045_v52 = vrot.slane %v1044_v42, 4 }
  0x4b   : > { %6967 = vmatpush3.bf16.msra.mxu1 %v7360_v53  ;;  %7000 = vmatprep.subr.bf16.mxu0 %v7658_v30  ;;  %v1052_v53 = vshrl.u32 %v958_v40, 16  ;;  %v1068_v16 = vor.u32 %v1067_v8, %v1063_v7  ;;  %v7357_v40 = vld [vmem:[%s7524_s21 + $0xb4] sm:$0xff]  }
  0x4c   : > { %6841 = vmatmul.mubr.bf16.gmra.mxu0 %v7339_v48  ;;  %v1035_v48 = vrot.slane %v1034_v36, 4  ;;  %7048 = vmatprep.subr.bf16.mxu1 %v7666_v39  ;;  %v1050_v1 = vsel %vm7645_vm5, %v1045_v52, %v1049_v43  ;;  %v1091_v36 = vrot.slane %v1089_v26, 4  ;;  %v1799_v52 = vrot.slane %v962_v0, 5 }
  0x4d   : > { %6889 = vmatmul.mubr.bf16.gmra.mxu1 %v7340_v49  ;;  %6844 = vmatprep.mubr.bf16.mxu0 %v7343_v50  ;;  %v7677_v49 = vsel %vm7627_vm4, %v5885_v37, %v1785_v38  ;;  %v1787_v50 = vrot.slane %v1785_v38, 4  ;;  %v1054_v3 = vrot.slane %v1052_v53, 4  ;;  %v1069_v29 = vrot.slane %v1068_v16, 4  ;;  %v964_v38 = vld [vmem:[%s7524_s21 + $0x30] sm:$0xf] }
  0x4e   : > { %6892 = vmatprep.mubr.bf16.mxu1 %v7344_v51  ;;  %v7351_v51 = vld [vmem:[%s7524_s21 + $0x9c] sm:$0xff]   ;;  %v1040_v58 = vsel %vm7645_vm5, %v1035_v48, %v1039_v32  ;;  %v1081_v32 = vrot.slane %v1079_v19, 5  ;;  %v1095_v37 = vshll.u32 %v963_v17, 16  ;;  %v966_v53 = vld [vmem:[%s7524_s21 + $0x38] sm:$0x1]  ;;  %v1801_v62 = vrot.slane %v1799_v52, 4 }
  0x4f   : > { %v7687_v59 = vsel %vm7627_vm4, %v1787_v50, %v1788_v44  ;;  %v1058_v11 = vor.u32 %v1057_v4, %v1054_v3  ;;  %v1074_v42 = vsel %vm7645_vm5, %v1069_v29, %v1073_v9  ;;  %v968_v17 = vld [vmem:[%s7524_s21 + $0x40] sm:$0xf] }
  0x50   : > { %v5917_v2 = vcombine.low %v7677_v49, %v7687_v59  ;;  %v1082_v44 = vor.u32 %v1081_v32, %v1078_v31  ;;  %v7733_v8 = vsel %vm7627_vm4, %v1801_v62, %v1802_v55  ;;  %v1714_v31 = vld [vmem:[%s7524_s21 + $0x3c] sm:$0xe]  ;;  %v1137_v15 = vshrl.u32 %v968_v17, 16  ;;  %v7366_v59 = vld [vmem:[%s9368_s2 + $0x128] sm:$0xff]  }
  0x51   : > { %v1059_v22 = vrot.slane %v1058_v11, 4  ;;  %v967_v11 = vld [vmem:[%s7524_s21 + $0x3c] sm:$0xf] }
  0x52   : > { %v1083_v54 = vrot.slane %v1082_v44, 4  ;;  %v1127_v29 = vshll.u32 %v967_v11, 16  ;;  %v1139_v44 = vrot.slane %v1137_v15, 4  ;;  %v7367_v15 = vld [vmem:[%s9368_s2 + $0xe0] sm:$0xff]  }
  0x53   : > { %v1064_v34 = vsel %vm7645_vm5, %v1059_v22, %v1063_v7  ;;  %v1809_v22 = vrot.slane %v966_v53, 5 }
  0x54   : > { %6845 = vmatmul.mubr.bf16.gmra.mxu0 %v7345_v6  ;;  %v7696_v6 = vcombine.low %v1040_v58, %v1050_v1  ;;  %v7719_v48 = vcombine.low %v1064_v34, %v1074_v42  ;;  %v1713_v58 = vld [vmem:[%s7524_s21 + $0x30] sm:$0xe]  ;;  %v1109_v1 = vshll.u32 %v965_v46, 16  ;;  %v1133_v34 = vshll.u32 %v968_v17, 16 }
  0x55   : > { %6893 = vmatmul.mubr.bf16.gmra.mxu1 %v7346_v12  ;;  %6848 = vmatprep.mubr.bf16.mxu0 %v7349_v13  ;;  %v5886_v12 = vrot.slane %v1711_v56, 9  ;;  %v1792_v13 = vrot.slane %v959_v45, 5  ;;  %v5887_v45 = vrot.slane %v1712_v28, 9  ;;  %v1100_v56 = vshrl.u32 %v964_v38, 16 }
  0x56   : > { %6896 = vmatprep.mubr.bf16.mxu1 %v7350_v20  ;;  %v1085_v20 = vshll.u32 %v962_v0, 16  ;;  %v1111_v9 = vrot.slane %v1109_v1, 5  ;;  %v5888_v19 = vrot.slane %v1713_v58, 9  ;;  %v1124_v28 = vshrl.u32 %v967_v11, 16  ;;  %v972_v1 = vld [vmem:[%s7524_s21 + $0x50] sm:$0x1] }
  0x57   : > { %v7702_v24 = vsel %vm7627_vm4, %v5886_v12, %v1792_v13  ;;  %v1794_v25 = vrot.slane %v1792_v13, 4  ;;  %v7725_v61 = vsel %vm7627_vm4, %v5887_v45, %v1799_v52  ;;  %v1102_v4 = vrot.slane %v1100_v56, 4  ;;  %v973_v11 = vld [vmem:[%s7524_s21 + $0x54] sm:$0xf] }
  0x58   : > { %v1087_v33 = vrot.slane %v1085_v20, 5  ;;  %v5919_v13 = vcombine.low %v7725_v61, %v7733_v8  ;;  %v1806_v20 = vrot.slane %v965_v46, 5  ;;  %v1135_v42 = vrot.slane %v1133_v34, 5  ;;  %v976_v8 = vld [vmem:[%s7524_s21 + $0x60] sm:$0xf] }
  0x59   : > { %v7709_v35 = vsel %vm7627_vm4, %v1794_v25, %v1795_v14  ;;  %v1813_v58 = vrot.slane %v968_v17, 5  ;;  %v1175_v34 = vshll.u32 %v973_v11, 16 }
  0x5a   : > { %v5918_v43 = vcombine.low %v7702_v24, %v7709_v35  ;;  %v1092_v50 = vor.u32 %v1091_v36, %v1087_v33  ;;  %v1088_v3 = vsel %vm7645_vm5, %v1083_v54, %v1087_v33  ;;  %v7749_v32 = vsel %vm7627_vm4, %v5888_v19, %v1806_v20  ;;  %v7364_v54 = vld [vmem:[%s9368_s2 + $0x130] sm:$0xff]   ;;  %v974_v19 = vld [vmem:[%s7524_s21 + $0x58] sm:$0xf] }
  0x5b   : > { %v1808_v33 = vrot.slane %v1806_v20, 4  ;;  %v1140_v56 = vor.u32 %v1139_v44, %v1135_v42  ;;  %v7810_v20 = vld [vmem:[%s7524_s21 + $0x5c] sm:$0x1]  ;;  %v1177_v44 = vrot.slane %v1175_v34, 5  ;;  %v981_v34 = vld [vmem:[%s7524_s21 + $0x74] sm:$0x1] }
  0x5c   : > { %6849 = vmatmul.mubr.bf16.gmra.mxu0 %v7351_v51  ;;  %v1097_v51 = vrot.slane %v1095_v37, 5  ;;  %v1093_v60 = vrot.slane %v1092_v50, 4  ;;  %v1126_v37 = vrot.slane %v1124_v28, 4  ;;  %v1716_v28 = vld [vmem:[%s7524_s21 + $0x54] sm:$0xe]  ;;  %v1191_v61 = vshll.u32 %v7810_v20, 16 }
  0x5d   : > { %6897 = vmatmul.mubr.bf16.gmra.mxu1 %v7352_v57  ;;  %6852 = vmatprep.mubr.bf16.mxu0 %v7355_v5  ;;  %v1103_v57 = vshll.u32 %v964_v38, 16  ;;  %v1113_v5 = vshrl.u32 %v965_v46, 16  ;;  %v1129_v38 = vrot.slane %v1127_v29, 5  ;;  %v7363_v46 = vld [vmem:[%s9368_s2 + $0xf0] sm:$0xff]  }
  0x5e   : > { %6900 = vmatprep.mubr.bf16.mxu1 %v7356_v10  ;;  %v1098_v7 = vsel %vm7645_vm5, %v1093_v60, %v1097_v51  ;;  %v1119_v10 = vshll.u32 %v966_v53, 16  ;;  %v5889_v53 = vrot.slane %v1714_v31, 9 }
  0x5f   : > { %v1105_v0 = vrot.slane %v1103_v57, 5  ;;  %v7737_v12 = vcombine.low %v1088_v3, %v1098_v7  ;;  %v1115_v16 = vrot.slane %v1113_v5, 4  ;;  %v1130_v52 = vor.u32 %v1129_v38, %v1126_v37  ;;  %v7368_v38 = vld [vmem:[%s9368_s2 + $0x120] sm:$0xff]  }
  0x60   : > { %v1121_v18 = vrot.slane %v1119_v10, 5  ;;  %v1148_v3 = vshrl.u32 %v970_v23, 16  ;;  %v1815_v5 = vrot.slane %v1813_v58, 4  ;;  %v1167_v10 = vshll.u32 %v972_v1, 16 }
  0x61   : > { %v1106_v14 = vor.u32 %v1105_v0, %v1102_v4  ;;  %v1116_v26 = vor.u32 %v1115_v16, %v1111_v9  ;;  %v1131_v60 = vrot.slane %v1130_v52, 4  ;;  %v1141_v4 = vrot.slane %v1140_v56, 4 }
  0x62   : > { %v7781_v0 = vsel %vm7627_vm4, %v5889_v53, %v1813_v58  ;;  %v1185_v37 = vshrl.u32 %v974_v19, 16  ;;  %v1193_v56 = vrot.slane %v1191_v61, 5  ;;  %v978_v58 = vld [vmem:[%s7524_s21 + $0x68] sm:$0x1]  ;;  %v1239_v61 = vshll.u32 %v981_v34, 16 }
  0x63   : > { %v1107_v25 = vrot.slane %v1106_v14, 4  ;;  %v1117_v36 = vrot.slane %v1116_v26, 4  ;;  %v1823_v26 = vrot.slane %v972_v1, 5  ;;  %v1830_v1 = vrot.slane %v7810_v20, 5 }
  0x64   : > { %6853 = vmatmul.mubr.bf16.gmra.mxu0 %v7357_v40  ;;  %v7755_v40 = vld [vmem:[%s7524_s21 + $0x4c] sm:$0xf] }
  0x65   : > { %6901 = vmatmul.mubr.bf16.gmra.mxu1 %v7358_v41  ;;  %6920 = vmatprep.mubr.bf16.mxu0 %v7673_v47  ;;  %v969_v47 = vld [vmem:[%s7524_s21 + $0x44] sm:$0x1]  ;;  %v7759_v41 = vsel %vm7627_vm4, %v1808_v33, %v1809_v22  ;;  %v1122_v50 = vsel %vm7645_vm5, %v1117_v36, %v1121_v18  ;;  %v1157_v49 = vshll.u32 %v7755_v40, 16  ;;  %v1161_v7 = vshrl.u32 %v7755_v40, 16 }
  0x66   : > { %6968 = vmatprep.mubr.bf16.mxu1 %v5916_v27  ;;  %v1112_v27 = vsel %vm7645_vm5, %v1107_v25, %v1111_v9  ;;  %v1143_v45 = vshll.u32 %v969_v47, 16  ;;  %v5920_v51 = vcombine.low %v7749_v32, %v7759_v41  ;;  %v1816_v62 = vrot.slane %v969_v47, 5  ;;  %v1715_v9 = vld [vmem:[%s7524_s21 + $0x48] sm:$0xe]  ;;  %v977_v41 = vld [vmem:[%s7524_s21 + $0x64] sm:$0xf] }
  0x67   : > { %v5864_v55 = vcombine.low %v1112_v27, %v1122_v50  ;;  %v1163_v18 = vrot.slane %v1161_v7, 4  ;;  %v1169_v22 = vrot.slane %v1167_v10, 5  ;;  %v5890_v47 = vrot.slane %v1715_v9, 9  ;;  %v7372_v10 = vld [vmem:[%s9368_s2 + $0x110] sm:$0xff]  }
  0x68   : > { %v1145_v57 = vrot.slane %v1143_v45, 5  ;;  %v7801_v35 = vsel %vm7627_vm4, %v1815_v5, %v1816_v62  ;;  %v1820_v25 = vrot.slane %v7755_v40, 5  ;;  %v1172_v33 = vshrl.u32 %v973_v11, 16 }
  0x69   : > { %v5921_v16 = vcombine.low %v7781_v0, %v7801_v35  ;;  %v1181_v36 = vshll.u32 %v974_v19, 16  ;;  %v1187_v50 = vrot.slane %v1185_v37, 4  ;;  %v5891_v32 = vrot.slane %v1716_v28, 9  ;;  %v7373_v0 = vld [vmem:[%s9368_s2 + $0xc8] sm:$0xff]  }
  0x6a   : > { %v1146_v24 = vsel %vm7645_vm5, %v1141_v4, %v1145_v57  ;;  %v1822_v27 = vrot.slane %v1820_v25, 4  ;;  %v1827_v57 = vrot.slane %v974_v19, 5  ;;  %v1717_v4 = vld [vmem:[%s7524_s21 + $0x60] sm:$0xe]  ;;  %v1215_v19 = vshll.u32 %v978_v58, 16 }
  0x6b   : > { %v1834_v28 = vrot.slane %v977_v41, 5  ;;  %v1718_v37 = vld [vmem:[%s7524_s21 + $0x6c] sm:$0xe] }
  0x6c   : > { %6921 = vmatmul.mubr.bf16.vlgmr.msra.gmra.mxu0 %v7696_v6  ;;  %v1151_v6 = vshll.u32 %v970_v23, 16  ;;  %v7820_v23 = vsel %vm7627_vm4, %v5890_v47, %v1820_v25  ;;  %v1824_v45 = vsel %vm7627_vm4, %v1822_v27, %v1823_v26  ;;  %v1217_v25 = vrot.slane %v1215_v19, 5 }
  0x6d   : > { %6969 = vmatmul.mubr.bf16.vlgmr.msra.gmra.mxu1 %v5917_v2  ;;  %7001 = vmatpush3.bf16.msra.mxu0 %v7658_v30  ;;  %v7365_v30 = vld [vmem:[%s9368_s2 + $0xe8] sm:$0xff]   ;;  %v1150_v2 = vrot.slane %v1148_v3, 4  ;;  %v5922_v52 = vcombine.low %v7820_v23, %v1824_v45  ;;  %v1196_v3 = vshrl.u32 %v976_v8, 16  ;;  %v5892_v26 = vrot.slane %v1717_v4, 9  ;;  %v1719_v4 = vld [vmem:[%s7524_s21 + $0x78] sm:$0xe] }
  0x6e   : > { %7049 = vmatpush3.bf16.msra.mxu1 %v7666_v39  ;;  %6924 = vmatprep.mubr.bf16.mxu0 %v7719_v48  ;;  %v1136_v39 = vsel %vm7645_vm5, %v1131_v60, %v1135_v42  ;;  %v1153_v48 = vrot.slane %v1151_v6, 5  ;;  %v1174_v42 = vrot.slane %v1172_v33, 4  ;;  %v7370_v60 = vld [vmem:[%s9368_s2 + $0x118] sm:$0xff]   ;;  %v1199_v6 = vshll.u32 %v976_v8, 16 }
  0x6f   : > { %6972 = vmatprep.mubr.bf16.mxu1 %v5918_v43  ;;  %7002 = vmatprep.subr.bf16.mxu0 %v7363_v46  ;;  %v1159_v43 = vrot.slane %v1157_v49, 5  ;;  %v7804_v14 = vcombine.low %v1136_v39, %v1146_v24  ;;  %v1829_v49 = vrot.slane %v1827_v57, 4  ;;  %v1205_v39 = vshll.u32 %v977_v41, 16  ;;  %v982_v8 = vld [vmem:[%s7524_s21 + $0x78] sm:$0xf] }
  0x70   : > { %7050 = vmatprep.subr.bf16.mxu1 %v7364_v54  ;;  %v1154_v17 = vor.u32 %v1153_v48, %v1150_v2  ;;  %v1178_v53 = vor.u32 %v1177_v44, %v1174_v42  ;;  %v7371_v2 = vld [vmem:[%s9368_s2 + $0xd0] sm:$0xff]   ;;  %v1198_v7 = vrot.slane %v1196_v3, 4  ;;  %v1201_v9 = vrot.slane %v1199_v6, 5 }
  0x71   : > { %7003 = vmatpush3.bf16.msra.mxu0 %v7363_v46  ;;  %v1164_v31 = vor.u32 %v1163_v18, %v1159_v43  ;;  %v1183_v46 = vrot.slane %v1181_v36, 5  ;;  %v1209_v24 = vshrl.u32 %v977_v41, 16  ;;  %v1207_v18 = vrot.slane %v1205_v39, 5  ;;  %v983_v41 = vld [vmem:[%s7524_s21 + $0x7c] sm:$0xf] }
  0x72   : > { %7051 = vmatpush3.bf16.msra.mxu1 %v7364_v54  ;;  %7004 = vmatprep.subr.bf16.mxu0 %v7365_v30  ;;  %v1155_v29 = vrot.slane %v1154_v17, 4  ;;  %v1179_v62 = vrot.slane %v1178_v53, 4  ;;  %v1831_v17 = vsel %vm7627_vm4, %v1829_v49, %v1830_v1  ;;  %v1202_v47 = vor.u32 %v1201_v9, %v1198_v7 }
  0x73   : > { %7052 = vmatprep.subr.bf16.mxu1 %v7366_v59  ;;  %v1165_v40 = vrot.slane %v1164_v31, 4  ;;  %v1835_v35 = vsel %vm7627_vm4, %v5892_v26, %v1834_v28  ;;  %v1844_v1 = vrot.slane %v981_v34, 5  ;;  %v1244_v3 = vshrl.u32 %v982_v8, 16 }
  0x74   : > { %6925 = vmatmul.mubr.bf16.gmra.mxu0 %v7737_v12  ;;  %v1160_v12 = vsel %vm7645_vm5, %v1155_v29, %v1159_v43  ;;  %v1184_v48 = vsel %vm7645_vm5, %v1179_v62, %v1183_v46  ;;  %v7861_v43 = vld [vmem:[%s7524_s21 + $0x70] sm:$0xf]  ;;  %v1837_v29 = vrot.slane %v978_v58, 5  ;;  %v1203_v31 = vrot.slane %v1202_v47, 4  ;;  %v986_v47 = vld [vmem:[%s7524_s21 + $0x88] sm:$0xf] }
  0x75   : > { %6973 = vmatmul.mubr.bf16.gmra.mxu1 %v5919_v13  ;;  %6928 = vmatprep.mubr.bf16.mxu0 %v5864_v55  ;;  %v1170_v13 = vsel %vm7645_vm5, %v1165_v40, %v1169_v22  ;;  %v1188_v55 = vor.u32 %v1187_v50, %v1183_v46  ;;  %v1229_v27 = vshll.u32 %v7861_v43, 16  ;;  %v1233_v36 = vshrl.u32 %v7861_v43, 16 }
  0x76   : > { %6976 = vmatprep.mubr.bf16.mxu1 %v5920_v51  ;;  %7005 = vmatpush3.bf16.msra.mxu0 %v7365_v30  ;;  %v7369_v51 = vld [vmem:[%s9368_s2 + $0xd8] sm:$0xff]   ;;  %v5866_v54 = vcombine.low %v1160_v12, %v1170_v13  ;;  %v7852_v30 = vsel %vm7627_vm4, %v5891_v32, %v1827_v57  ;;  %v1208_v12 = vsel %vm7645_vm5, %v1203_v31, %v1207_v18  ;;  %v5893_v32 = vrot.slane %v1718_v37, 9  ;;  %v987_v31 = vld [vmem:[%s7524_s21 + $0x8c] sm:$0x1]  ;;  %v988_v37 = vld [vmem:[%s7524_s21 + $0x90] sm:$0xf] }
  0x77   : > { %7053 = vmatpush3.bf16.msra.mxu1 %v7366_v59  ;;  %7006 = vmatprep.subr.bf16.mxu0 %v7367_v15  ;;  %v1189_v5 = vrot.slane %v1188_v55, 4  ;;  %v979_v59 = vld [vmem:[%s7524_s21 + $0x6c] sm:$0xf]  ;;  %v5923_v22 = vcombine.low %v7852_v30, %v1831_v17  ;;  %v1231_v46 = vrot.slane %v1229_v27, 5  ;;  %v1235_v50 = vrot.slane %v1233_v36, 4  ;;  %v7916_v17 = vld [vmem:[%s9368_s2 + $0x178] sm:$0xff]  }
  0x78   : > { %7054 = vmatprep.subr.bf16.mxu1 %v7368_v38  ;;  %v1223_v23 = vshll.u32 %v979_v59, 16  ;;  %v1241_v57 = vrot.slane %v1239_v61, 5  ;;  %v1841_v58 = vrot.slane %v7861_v43, 5  ;;  %v1247_v6 = vshll.u32 %v982_v8, 16 }
  0x79   : > { %v1194_v11 = vsel %vm7645_vm5, %v1189_v5, %v1193_v56  ;;  %v1236_v56 = vor.u32 %v1235_v50, %v1231_v46  ;;  %v1253_v39 = vshll.u32 %v983_v41, 16  ;;  %v1257_v7 = vshrl.u32 %v983_v41, 16 }
  0x7a   : > { %7007 = vmatpush3.bf16.msra.mxu0 %v7367_v15  ;;  %v5867_v20 = vcombine.low %v1184_v48, %v1194_v11  ;;  %v1220_v15 = vshrl.u32 %v979_v59, 16  ;;  %v1225_v44 = vrot.slane %v1223_v23, 5  ;;  %v1842_v30 = vsel %vm7627_vm4, %v5893_v32, %v1841_v58  ;;  %v985_v11 = vld [vmem:[%s7524_s21 + $0x84] sm:$0xf]  ;;  %v990_v32 = vld [vmem:[%s7524_s21 + $0x98] sm:$0x1] }
  0x7b   : > { %7055 = vmatpush3.bf16.msra.mxu1 %v7368_v38  ;;  %7008 = vmatprep.subr.bf16.mxu0 %v7369_v51  ;;  %v7374_v38 = vld [vmem:[%s9368_s2 + $0x108] sm:$0xff]   ;;  %v1237_v5 = vrot.slane %v1236_v56, 4  ;;  %v1843_v49 = vrot.slane %v1841_v58, 4  ;;  %v1249_v48 = vrot.slane %v1247_v6, 5  ;;  %v1255_v43 = vrot.slane %v1253_v39, 5 }
  0x7c   : > { %6929 = vmatmul.mubr.bf16.gmra.mxu0 %v7804_v14  ;;  %7056 = vmatprep.subr.bf16.mxu1 %v7370_v60  ;;  %v1211_v14 = vrot.slane %v1209_v24, 4  ;;  %v1222_v42 = vrot.slane %v1220_v15, 4  ;;  %v5894_v26 = vrot.slane %v1719_v4, 9  ;;  %v1268_v15 = vshrl.u32 %v985_v11, 16  ;;  %v1721_v39 = vld [vmem:[%s7524_s21 + $0x90] sm:$0xe] }
  0x7d   : > { %6977 = vmatmul.mubr.bf16.gmra.mxu1 %v5921_v16  ;;  %6932 = vmatprep.mubr.bf16.mxu0 %v5866_v54  ;;  %v1836_v16 = vrot.slane %v1834_v28, 4  ;;  %v7376_v54 = vld [vmem:[%s9368_s2 + $0x100] sm:$0xff]   ;;  %v1242_v9 = vsel %vm7645_vm5, %v1237_v5, %v1241_v57  ;;  %v1845_v24 = vsel %vm7627_vm4, %v1843_v49, %v1844_v1  ;;  %v1848_v28 = vrot.slane %v983_v41, 5 }
  0x7e   : > { %6980 = vmatprep.mubr.bf16.mxu1 %v5922_v52  ;;  %7009 = vmatpush3.bf16.msra.mxu0 %v7369_v51  ;;  %v1212_v33 = vor.u32 %v1211_v14, %v1207_v18  ;;  %v1226_v53 = vor.u32 %v1225_v44, %v1222_v42  ;;  %v7375_v51 = vld [vmem:[%s9368_s2 + $0xc0] sm:$0xff]   ;;  %v5925_v19 = vcombine.low %v1842_v30, %v1845_v24  ;;  %v7922_v14 = vld [vmem:[%s9368_s2 + $0x1b8] sm:$0xff]   ;;  %v1271_v23 = vshll.u32 %v985_v11, 16  ;;  %v989_v44 = vld [vmem:[%s7524_s21 + $0x94] sm:$0xf] }
  0x7f   : > { %7057 = vmatpush3.bf16.msra.mxu1 %v7370_v60  ;;  %7010 = vmatprep.subr.bf16.mxu0 %v7371_v2  ;;  %v1838_v45 = vsel %vm7627_vm4, %v1836_v16, %v1837_v29  ;;  %v984_v60 = vld [vmem:[%s7524_s21 + $0x80] sm:$0x1]  ;;  %v1850_v16 = vrot.slane %v1848_v28, 4  ;;  %v1277_v27 = vshll.u32 %v986_v47, 16  ;;  %v1281_v36 = vshrl.u32 %v986_v47, 16 }
  0x80   : > { %7058 = vmatprep.subr.bf16.mxu1 %v7372_v10  ;;  %v1213_v40 = vrot.slane %v1212_v33, 4  ;;  %v5924_v52 = vcombine.low %v1835_v35, %v1838_v45  ;;  %v1227_v62 = vrot.slane %v1226_v53, 4  ;;  %v1851_v29 = vrot.slane %v984_v60, 5 }
  0x81   : > { %v1849_v35 = vsel %vm7627_vm4, %v5894_v26, %v1848_v28  ;;  %v1273_v42 = vrot.slane %v1271_v23, 5  ;;  %v1283_v50 = vrot.slane %v1281_v36, 4  ;;  %v1287_v61 = vshll.u32 %v987_v31, 16 }
  0x82   : > { %7011 = vmatpush3.bf16.msra.mxu0 %v7371_v2  ;;  %v1218_v13 = vsel %vm7645_vm5, %v1213_v40, %v1217_v25  ;;  %v1232_v59 = vsel %vm7645_vm5, %v1227_v62, %v1231_v46  ;;  %v1246_v2 = vrot.slane %v1244_v3, 4  ;;  %v1270_v40 = vrot.slane %v1268_v15, 4 }
  0x83   : > { %7059 = vmatpush3.bf16.msra.mxu1 %v7372_v10  ;;  %7012 = vmatprep.subr.bf16.mxu0 %v7373_v0  ;;  %v5868_v55 = vcombine.low %v1208_v12, %v1218_v13  ;;  %v1263_v10 = vshll.u32 %v984_v60, 16  ;;  %v5869_v18 = vcombine.low %v1232_v59, %v1242_v9  ;;  %v1852_v45 = vsel %vm7627_vm4, %v1850_v16, %v1851_v29  ;;  %v991_v9 = vld [vmem:[%s7524_s21 + $0x9c] sm:$0xf] }
  0x84   : > { %6933 = vmatmul.mubr.bf16.gmra.mxu0 %v5867_v20  ;;  %7060 = vmatprep.subr.bf16.mxu1 %v7374_v38  ;;  %v1250_v20 = vor.u32 %v1249_v48, %v1246_v2  ;;  %v1279_v46 = vrot.slane %v1277_v27, 5  ;;  %v5926_v13 = vcombine.low %v1849_v35, %v1852_v45  ;;  %v1858_v57 = vrot.slane %v987_v31, 5  ;;  %v994_v35 = vld [vmem:[%s7524_s21 + $0xa8] sm:$0xf] }
  0x85   : > { %6981 = vmatmul.mubr.bf16.gmra.mxu1 %v5923_v22  ;;  %6936 = vmatprep.mubr.bf16.mxu0 %v5868_v55  ;;  %v1259_v22 = vrot.slane %v1257_v7, 4  ;;  %v1265_v25 = vrot.slane %v1263_v10, 5  ;;  %v1855_v55 = vrot.slane %v986_v47, 5  ;;  %v1292_v58 = vshrl.u32 %v988_v37, 16 }
  0x86   : > { %6984 = vmatprep.mubr.bf16.mxu1 %v5924_v52  ;;  %7013 = vmatpush3.bf16.msra.mxu0 %v7373_v0  ;;  %v1251_v33 = vrot.slane %v1250_v20, 4  ;;  %v1720_v0 = vld [vmem:[%s7524_s21 + $0x84] sm:$0xe]  ;;  %v1274_v52 = vor.u32 %v1273_v42, %v1270_v40  ;;  %v1295_v60 = vshll.u32 %v988_v37, 16  ;;  %v1301_v6 = vshll.u32 %v989_v44, 16 }
  0x87   : > { %7061 = vmatpush3.bf16.msra.mxu1 %v7374_v38  ;;  %7014 = vmatprep.subr.bf16.mxu0 %v7375_v51  ;;  %v1260_v34 = vor.u32 %v1259_v22, %v1255_v43  ;;  %v5895_v53 = vrot.slane %v1720_v0, 9  ;;  %v1857_v3 = vrot.slane %v1855_v55, 4  ;;  %v1294_v5 = vrot.slane %v1292_v58, 4 }
  0x88   : > { %7062 = vmatprep.subr.bf16.mxu1 %v7376_v54  ;;  %v1256_v38 = vsel %vm7645_vm5, %v1251_v33, %v1255_v43  ;;  %v1275_v56 = vrot.slane %v1274_v52, 4  ;;  %v1297_v30 = vrot.slane %v1295_v60, 5  ;;  %v1305_v49 = vshrl.u32 %v989_v44, 16  ;;  %v1722_v33 = vld [vmem:[%s7524_s21 + $0x9c] sm:$0xe] }
  0x89   : > { %v1261_v12 = vrot.slane %v1260_v34, 4  ;;  %v1856_v1 = vsel %vm7627_vm4, %v5895_v53, %v1855_v55  ;;  %v1859_v2 = vsel %vm7627_vm4, %v1857_v3, %v1858_v57  ;;  %v1303_v48 = vrot.slane %v1301_v6, 5 }
  0x8a   : > { %7015 = vmatpush3.bf16.msra.mxu0 %v7375_v51  ;;  %v1284_v51 = vor.u32 %v1283_v50, %v1279_v46  ;;  %v1280_v4 = vsel %vm7645_vm5, %v1275_v56, %v1279_v46  ;;  %v1311_v7 = vshll.u32 %v990_v32, 16  ;;  %v5927_v43 = vcombine.low %v1856_v1, %v1859_v2 }
  0x8b   : > { %7063 = vmatpush3.bf16.msra.mxu1 %v7376_v54  ;;  %7096 = vmatprep.subr.bf16.mxu0 %v7916_v17  ;;  %v1266_v8 = vsel %vm7645_vm5, %v1261_v12, %v1265_v25  ;;  %v1289_v54 = vrot.slane %v1287_v61, 5  ;;  %v1298_v10 = vor.u32 %v1297_v30, %v1294_v5  ;;  %v1307_v11 = vrot.slane %v1305_v49, 4  ;;  %v993_v25 = vld [vmem:[%s7524_s21 + $0xa4] sm:$0x1] }
  0x8c   : > { %6937 = vmatmul.mubr.bf16.gmra.mxu0 %v5869_v18  ;;  %7144 = vmatprep.subr.bf16.mxu1 %v7922_v14  ;;  %v5870_v41 = vcombine.low %v1256_v38, %v1266_v8  ;;  %v1285_v62 = vrot.slane %v1284_v51, 4  ;;  %v992_v18 = vld [vmem:[%s7524_s21 + $0xa0] sm:$0xf]  ;;  %v5896_v20 = vrot.slane %v1721_v39, 9  ;;  %v1862_v22 = vrot.slane %v989_v44, 5 }
  0x8d   : > { %6985 = vmatmul.mubr.bf16.gmra.mxu1 %v5925_v19  ;;  %v1313_v19 = vrot.slane %v1311_v7, 5  ;;  %v1865_v47 = vrot.slane %v990_v32, 5  ;;  %v1299_v26 = vrot.slane %v1298_v10, 4  ;;  %v1308_v28 = vor.u32 %v1307_v11, %v1303_v48  ;;  %v995_v38 = vld [vmem:[%s7524_s21 + $0xac] sm:$0xf] }
  0x8e   : > { %6988 = vmatprep.mubr.bf16.mxu1 %v5926_v13  ;;  %6940 = vmatprep.mubr.bf16.mxu0 %v5870_v41  ;;  %v1290_v59 = vsel %vm7645_vm5, %v1285_v62, %v1289_v54  ;;  %v1316_v29 = vshrl.u32 %v991_v9, 16  ;;  %v1319_v31 = vshll.u32 %v991_v9, 16  ;;  %v1863_v34 = vsel %vm7627_vm4, %v5896_v20, %v1862_v22  ;;  %v996_v51 = vld [vmem:[%s7524_s21 + $0xb0] sm:$0x1]  ;;  %v1723_v62 = vld [vmem:[%s7524_s21 + $0xa8] sm:$0xe] }
  0x8f   : > { %v5871_v24 = vcombine.low %v1280_v4, %v1290_v59  ;;  %v1864_v15 = vrot.slane %v1862_v22, 4  ;;  %v1325_v23 = vshll.u32 %v992_v18, 16  ;;  %v1329_v0 = vshrl.u32 %v992_v18, 16  ;;  %v997_v59 = vld [vmem:[%s7524_s21 + $0xb4] sm:$0xf] }
  0x90   : > { %v1304_v16 = vsel %vm7645_vm5, %v1299_v26, %v1303_v48  ;;  %v1309_v27 = vrot.slane %v1308_v28, 4  ;;  %v1318_v36 = vrot.slane %v1316_v29, 4  ;;  %v1321_v37 = vrot.slane %v1319_v31, 5  ;;  %v1724_v20 = vld [vmem:[%s7524_s21 + $0xb4] sm:$0xe] }
  0x91   : > { %v1866_v12 = vsel %vm7627_vm4, %v1864_v15, %v1865_v47  ;;  %v1327_v40 = vrot.slane %v1325_v23, 5  ;;  %v1331_v42 = vrot.slane %v1329_v0, 4  ;;  %v1335_v44 = vshll.u32 %v993_v25, 16 }
  0x92   : > { %v1314_v45 = vsel %vm7645_vm5, %v1309_v27, %v1313_v19  ;;  %v5928_v46 = vcombine.low %v1863_v34, %v1866_v12  ;;  %v1322_v50 = vor.u32 %v1321_v37, %v1318_v36  ;;  %v5897_v61 = vrot.slane %v1722_v33, 9  ;;  %v6012_v34 = vld [vmem:[%s7524_s21 + $0xc] sm:$0xf] }
  0x93   : > { %v5872_v8 = vcombine.low %v1304_v16, %v1314_v45  ;;  %v1332_v13 = vor.u32 %v1331_v42, %v1327_v40  ;;  %v1337_v52 = vrot.slane %v1335_v44, 5  ;;  %v1869_v53 = vrot.slane %v992_v18, 5  ;;  %v7986_v44 = vld [vmem:[%s7524_s21 + $0x10] sm:$0xf] }
  0x94   : > { %6941 = vmatmul.mubr.bf16.gmra.mxu0 %v5871_v24  ;;  %v1323_v32 = vrot.slane %v1322_v50, 4  ;;  %v1872_v41 = vrot.slane %v993_v25, 5  ;;  %v1340_v54 = vshrl.u32 %v994_v35, 16  ;;  %v1343_v55 = vshll.u32 %v994_v35, 16  ;;  %v998_v24 = vld [vmem:[%s7524_s21 + $0xb8] sm:$0xf] }
  0x95   : > { %6989 = vmatmul.mubr.bf16.gmra.mxu1 %v5927_v43  ;;  %6944 = vmatprep.mubr.bf16.mxu0 %v5872_v8  ;;  %v1333_v56 = vrot.slane %v1332_v13, 4  ;;  %v1870_v57 = vsel %vm7627_vm4, %v5897_v61, %v1869_v53  ;;  %v1871_v58 = vrot.slane %v1869_v53, 4  ;;  %v1349_v60 = vshll.u32 %v995_v38, 16  ;;  %v999_v43 = vld [vmem:[%s7524_s21 + $0xbc] sm:$0x1] }
  0x96   : > { %6992 = vmatprep.mubr.bf16.mxu1 %v5928_v46  ;;  %v1328_v1 = vsel %vm7645_vm5, %v1323_v32, %v1327_v40  ;;  %v1342_v3 = vrot.slane %v1340_v54, 4  ;;  %v1345_v6 = vrot.slane %v1343_v55, 5  ;;  %v1353_v4 = vshrl.u32 %v995_v38, 16  ;;  %v7989_v8 = vld [vmem:[%s7524_s21 + $0x14] sm:$0x1] }
  0x97   : > { %v1338_v5 = vsel %vm7645_vm5, %v1333_v56, %v1337_v52  ;;  %v1873_v30 = vsel %vm7627_vm4, %v1871_v58, %v1872_v41  ;;  %v1351_v49 = vrot.slane %v1349_v60, 5  ;;  %v1359_v39 = vshll.u32 %v996_v51, 16  ;;  %v6015_v41 = vld [vmem:[%s7524_s21 + $0x18] sm:$0xf]  ;;  %v7377_v58 = vld [vmem:[%s7524_s21 + $0xc] sm:$0xff]  }
  0x98   : > { %v5873_v2 = vcombine.low %v1328_v1, %v1338_v5  ;;  %v5929_v48 = vcombine.low %v1870_v57, %v1873_v30  ;;  %v1346_v7 = vor.u32 %v1345_v6, %v1342_v3  ;;  %v1355_v9 = vrot.slane %v1353_v4, 4  ;;  %v8000_v3 = vld [vmem:[%s7524_s21 + $0x1c] sm:$0xf] }
  0x99   : > { %v1361_v10 = vrot.slane %v1359_v39, 5  ;;  %v5898_v11 = vrot.slane %v1723_v62, 9  ;;  %v1876_v18 = vrot.slane %v995_v38, 5  ;;  %v1879_v19 = vrot.slane %v996_v51, 5  ;;  %v6018_v39 = vld [vmem:[%s7524_s21 + $0x24] sm:$0xf] }
  0x9a   : > { %v1347_v22 = vrot.slane %v1346_v7, 4  ;;  %v1356_v47 = vor.u32 %v1355_v9, %v1351_v49  ;;  %v1364_v25 = vshrl.u32 %v997_v59, 16  ;;  %v1367_v26 = vshll.u32 %v997_v59, 16  ;;  %v8012_v9 = vld [vmem:[%s7524_s21 + $0x28] sm:$0xf] }
  0x9b   : > { %v1877_v28 = vsel %vm7627_vm4, %v5898_v11, %v1876_v18  ;;  %v1878_v29 = vrot.slane %v1876_v18, 4  ;;  %v1373_v31 = vshll.u32 %v998_v24, 16  ;;  %v1377_v33 = vshrl.u32 %v998_v24, 16  ;;  %v8016_v18 = vld [vmem:[%s7524_s21 + $0x2c] sm:$0x1] }
  0x9c   : > { %6945 = vmatmul.mubr.bf16.gmra.mxu0 %v5873_v2  ;;  %v1352_v15 = vsel %vm7645_vm5, %v1347_v22, %v1351_v49  ;;  %v1357_v23 = vrot.slane %v1356_v47, 4  ;;  %v1366_v0 = vrot.slane %v1364_v25, 4  ;;  %v1369_v35 = vrot.slane %v1367_v26, 5  ;;  %v8008_v49 = vld [vmem:[%s7524_s21 + $0x20] sm:$0x1] }
  0x9d   : > { %6993 = vmatmul.mubr.bf16.gmra.mxu1 %v5929_v48  ;;  %v1880_v16 = vsel %vm7627_vm4, %v1878_v29, %v1879_v19  ;;  %v1375_v27 = vrot.slane %v1373_v31, 5  ;;  %v1379_v36 = vrot.slane %v1377_v33, 4  ;;  %v1383_v37 = vshll.u32 %v999_v43, 16 }
  0x9e   : > { %v1362_v38 = vsel %vm7645_vm5, %v1357_v23, %v1361_v10  ;;  %v5930_v12 = vcombine.low %v1877_v28, %v1880_v16  ;;  %v1370_v40 = vor.u32 %v1369_v35, %v1366_v0  ;;  %v5899_v42 = vrot.slane %v1724_v20, 9 }
  0x9f   : > { %v5874_v45 = vcombine.low %v1352_v15, %v1362_v38  ;;  %v1380_v46 = vor.u32 %v1379_v36, %v1375_v27  ;;  %v1385_v50 = vrot.slane %v1383_v37, 5  ;;  %v1883_v61 = vrot.slane %v998_v24, 5  ;;  %v7378_v37 = vld [vmem:[%s7524_s21 + $0x18] sm:$0xff]  }
  0xa0   : > { %6996 = vmatprep.mubr.bf16.mxu1 %v5930_v12  ;;  %v1371_v13 = vrot.slane %v1370_v40, 4  ;;  %v1886_v52 = vrot.slane %v999_v43, 5  ;;  %v2646_v53 = vshrl.u32 %v6012_v34, 16  ;;  %v2649_v32 = vshll.u32 %v6012_v34, 16  ;;  %v7381_v12 = vld [vmem:[%s7524_s21 + $0x24] sm:$0xff]  }
  0xa1   : > { %6948 = vmatprep.mubr.bf16.mxu0 %v5874_v45  ;;  %v1381_v51 = vrot.slane %v1380_v46, 4  ;;  %v1884_v54 = vsel %vm7627_vm4, %v5899_v42, %v1883_v61  ;;  %v1885_v55 = vrot.slane %v1883_v61, 4  ;;  %v2655_v56 = vshll.u32 %v7986_v44, 16  ;;  %v8031_v45 = vld [vmem:[%s7524_s21 + $0x34] sm:$0xf] }
  0xa2   : > { %v1376_v57 = vsel %vm7645_vm5, %v1371_v13, %v1375_v27  ;;  %v2648_v60 = vrot.slane %v2646_v53, 4  ;;  %v2651_v62 = vrot.slane %v2649_v32, 5  ;;  %v2659_v1 = vshrl.u32 %v7986_v44, 16  ;;  %v6021_v27 = vld [vmem:[%s7524_s21 + $0x30] sm:$0xf] }
  0xa3   : > { %v1386_v6 = vsel %vm7645_vm5, %v1381_v51, %v1385_v50  ;;  %v1887_v4 = vsel %vm7627_vm4, %v1885_v55, %v1886_v52  ;;  %v2657_v5 = vrot.slane %v2655_v56, 5  ;;  %v2665_v30 = vshll.u32 %v7989_v8, 16  ;;  %v7383_v52 = vld [vmem:[%s9368_s2 + $0x170] sm:$0xff]   ;;  %v8039_v56 = vld [vmem:[%s7524_s21 + $0x38] sm:$0x1] }
  0xa4   : > { %v5875_v59 = vcombine.low %v1376_v57, %v1386_v6  ;;  %v5931_v2 = vcombine.low %v1884_v54, %v1887_v4  ;;  %v2652_v48 = vor.u32 %v2651_v62, %v2648_v60  ;;  %v2661_v7 = vrot.slane %v2659_v1, 4  ;;  %v7384_v60 = vld [vmem:[%s9368_s2 + $0x1b0] sm:$0xff]   ;;  %v6024_v62 = vld [vmem:[%s7524_s21 + $0x3c] sm:$0xf] }
  0xa5   : > { %v2667_v24 = vrot.slane %v2665_v30, 5  ;;  %v2670_v43 = vshrl.u32 %v6015_v41, 16  ;;  %v2673_v10 = vshll.u32 %v6015_v41, 16  ;;  %v2679_v11 = vshll.u32 %v8000_v3, 16  ;;  %v8050_v30 = vld [vmem:[%s7524_s21 + $0x40] sm:$0xf] }
  0xa6   : > { %6949 = vmatmul.mubr.bf16.gmra.mxu0 %v5875_v59  ;;  %6997 = vmatmul.mubr.bf16.gmra.mxu1 %v5931_v2  ;;  %v2653_v19 = vrot.slane %v2652_v48, 4  ;;  %v2662_v20 = vor.u32 %v2661_v7, %v2657_v5  ;;  %v2683_v22 = vshrl.u32 %v8000_v3, 16  ;;  %v2689_v47 = vshll.u32 %v8008_v49, 16  ;;  %v8054_v7 = vld [vmem:[%s7524_s21 + $0x44] sm:$0x1] }
  0xa7   : > { %7016 = vmatprep.mubr.bf16.mxu0 %v7377_v58  ;;  %v2672_v25 = vrot.slane %v2670_v43, 4  ;;  %v2675_v26 = vrot.slane %v2673_v10, 5  ;;  %v2681_v28 = vrot.slane %v2679_v11, 5  ;;  %v2694_v29 = vshrl.u32 %v6018_v39, 16  ;;  %v7387_v43 = vld [vmem:[%s9368_s2 + $0x168] sm:$0xff]   ;;  %v7382_v11 = vld [vmem:[%s7524_s21 + $0x30] sm:$0xff]  }
  0xa8   : > { %v2658_v31 = vsel %vm7645_vm5, %v2653_v19, %v2657_v5  ;;  %v2663_v33 = vrot.slane %v2662_v20, 4  ;;  %v2685_v34 = vrot.slane %v2683_v22, 4  ;;  %v2691_v15 = vrot.slane %v2689_v47, 5 }
  0xa9   : > { %v2676_v23 = vor.u32 %v2675_v26, %v2672_v25  ;;  %v2696_v0 = vrot.slane %v2694_v29, 4  ;;  %v2697_v35 = vshll.u32 %v6018_v39, 16  ;;  %v2703_v16 = vshll.u32 %v8012_v9, 16  ;;  %v7385_v25 = vld [vmem:[%s7524_s21 + $0x3c] sm:$0xff]  }
  0xaa   : > { %v2668_v36 = vsel %vm7645_vm5, %v2663_v33, %v2667_v24  ;;  %v2686_v38 = vor.u32 %v2685_v34, %v2681_v28  ;;  %v2707_v40 = vshrl.u32 %v8012_v9, 16  ;;  %v2713_v42 = vshll.u32 %v8016_v18, 16  ;;  %v6027_v24 = vld [vmem:[%s7524_s21 + $0x48] sm:$0xf] }
  0xab   : > { %v6076_v46 = vcombine.low %v2658_v31, %v2668_v36  ;;  %v2677_v50 = vrot.slane %v2676_v23, 4  ;;  %v2699_v61 = vrot.slane %v2697_v35, 5  ;;  %v2705_v13 = vrot.slane %v2703_v16, 5  ;;  %v7388_v23 = vld [vmem:[%s9368_s2 + $0x1a8] sm:$0xff]   ;;  %v7391_v36 = vld [vmem:[%s9368_s2 + $0x160] sm:$0xff]  }
  0xac   : > { %v2687_v53 = vrot.slane %v2686_v38, 4  ;;  %v2709_v32 = vrot.slane %v2707_v40, 4  ;;  %v2715_v41 = vrot.slane %v2713_v42, 5  ;;  %v2718_v51 = vshrl.u32 %v6021_v27, 16  ;;  %v6030_v42 = vld [vmem:[%s7524_s21 + $0x54] sm:$0xf] }
  0xad   : > { %7064 = vmatprep.mubr.bf16.mxu1 %v6076_v46  ;;  %v2682_v54 = vsel %vm7645_vm5, %v2677_v50, %v2681_v28  ;;  %v2700_v55 = vor.u32 %v2699_v61, %v2696_v0  ;;  %v2721_v57 = vshll.u32 %v6021_v27, 16  ;;  %v2727_v58 = vshll.u32 %v8031_v45, 16 }
  0xae   : > { %7017 = vmatmul.mubr.bf16.vlgmr.msra.gmra.mxu0 %v7378_v37  ;;  %v2692_v1 = vsel %vm7645_vm5, %v2687_v53, %v2691_v15  ;;  %v2710_v6 = vor.u32 %v2709_v32, %v2705_v13  ;;  %v2720_v4 = vrot.slane %v2718_v51, 4  ;;  %v2731_v5 = vshrl.u32 %v8031_v45, 16  ;;  %v8070_v15 = vld [vmem:[%s7524_s21 + $0x4c] sm:$0xf]  ;;  %v8092_v51 = vld [vmem:[%s7524_s21 + $0x58] sm:$0xf] }
  0xaf   : > { %v6077_v39 = vcombine.low %v2682_v54, %v2692_v1  ;;  %7097 = vmatpush3.bf16.msra.mxu0 %v7916_v17  ;;  %7020 = vmatprep.mubr.bf16.mxu0 %v7381_v12  ;;  %v2701_v59 = vrot.slane %v2700_v55, 4  ;;  %v2723_v2 = vrot.slane %v2721_v57, 5  ;;  %v2729_v48 = vrot.slane %v2727_v58, 5 }
  0xb0   : > { %v2711_v10 = vrot.slane %v2710_v6, 4  ;;  %v2733_v19 = vrot.slane %v2731_v5, 4  ;;  %v2737_v20 = vshll.u32 %v8039_v56, 16  ;;  %7098 = vmatprep.subr.bf16.mxu0 %v7383_v52  ;;  %v2742_v17 = vshrl.u32 %v6024_v62, 16  ;;  %v7386_v6 = vld [vmem:[%s7524_s21 + $0x48] sm:$0xff]  }
  0xb1   : > { %7065 = vmatmul.mubr.bf16.vlgmr.msra.gmra.mxu1 %v6077_v39  ;;  %v2706_v22 = vsel %vm7645_vm5, %v2701_v59, %v2705_v13  ;;  %v2724_v47 = vor.u32 %v2723_v2, %v2720_v4  ;;  %v2745_v26 = vshll.u32 %v6024_v62, 16  ;;  %v2751_v28 = vshll.u32 %v8050_v30, 16  ;;  %v8097_v62 = vld [vmem:[%s7524_s21 + $0x5c] sm:$0x1]  ;;  %v6033_v59 = vld [vmem:[%s7524_s21 + $0x60] sm:$0xf] }
  0xb2   : > { %7145 = vmatpush3.bf16.msra.mxu1 %v7922_v14  ;;  %v2716_v29 = vsel %vm7645_vm5, %v2711_v10, %v2715_v41  ;;  %v2734_v31 = vor.u32 %v2733_v19, %v2729_v48  ;;  %v2739_v33 = vrot.slane %v2737_v20, 5  ;;  %v2744_v34 = vrot.slane %v2742_v17, 4  ;;  %v8078_v14 = vld [vmem:[%s7524_s21 + $0x50] sm:$0x1]  ;;  %v7395_v2 = vld [vmem:[%s9368_s2 + $0x158] sm:$0xff]  }
  0xb3   : > { %v6078_v0 = vcombine.low %v2706_v22, %v2716_v29  ;;  %v2725_v35 = vrot.slane %v2724_v47, 4  ;;  %7099 = vmatpush3.bf16.msra.mxu0 %v7383_v52  ;;  %7146 = vmatprep.subr.bf16.mxu1 %v7384_v60  ;;  %v2747_v16 = vrot.slane %v2745_v26, 5  ;;  %v8075_v27 = vrot.slane %v2751_v28, 5  ;;  %v8116_v47 = vld [vmem:[%s7524_s21 + $0x64] sm:$0xf] }
  0xb4   : > { %v2735_v37 = vrot.slane %v2734_v31, 4  ;;  %v2755_v38 = vshrl.u32 %v8050_v30, 16  ;;  %v2761_v12 = vshll.u32 %v8054_v7, 16  ;;  %v2766_v40 = vshrl.u32 %v6027_v24, 16  ;;  %7100 = vmatprep.subr.bf16.mxu0 %v7387_v43 }
  0xb5   : > { %7068 = vmatprep.mubr.bf16.mxu1 %v6078_v0  ;;  %v2730_v46 = vsel %vm7645_vm5, %v2725_v35, %v2729_v48  ;;  %v2748_v50 = vor.u32 %v2747_v16, %v2744_v34  ;;  %v2769_v61 = vshll.u32 %v6027_v24, 16  ;;  %v2775_v13 = vshll.u32 %v8070_v15, 16 }
  0xb6   : > { %7021 = vmatmul.mubr.bf16.gmra.mxu0 %v7382_v11  ;;  %v2740_v52 = vsel %vm7645_vm5, %v2735_v37, %v2739_v33  ;;  %7147 = vmatpush3.bf16.msra.mxu1 %v7384_v60  ;;  %v2757_v53 = vrot.slane %v2755_v38, 4  ;;  %v2763_v32 = vrot.slane %v2761_v12, 5  ;;  %v2768_v41 = vrot.slane %v2766_v40, 4  ;;  %v7392_v60 = vld [vmem:[%s9368_s2 + $0x1a0] sm:$0xff]   ;;  %v8130_v38 = vld [vmem:[%s7524_s21 + $0x68] sm:$0x1] }
  0xb7   : > { %v6079_v54 = vcombine.low %v2730_v46, %v2740_v52  ;;  %7024 = vmatprep.mubr.bf16.mxu0 %v7385_v25  ;;  %v2749_v55 = vrot.slane %v2748_v50, 4  ;;  %v2771_v57 = vrot.slane %v2769_v61, 5  ;;  %v8094_v58 = vrot.slane %v2775_v13, 5  ;;  %7101 = vmatpush3.bf16.msra.mxu0 %v7387_v43  ;;  %v7389_v43 = vld [vmem:[%s7524_s21 + $0x54] sm:$0xff]   ;;  %v8137_v61 = vld [vmem:[%s7524_s21 + $0x70] sm:$0xf] }
  0xb8   : > { %v2758_v1 = vor.u32 %v2757_v53, %v8075_v27  ;;  %v2779_v4 = vshrl.u32 %v8070_v15, 16  ;;  %v2785_v5 = vshll.u32 %v8078_v14, 16  ;;  %7148 = vmatprep.subr.bf16.mxu1 %v7388_v23  ;;  %v2790_v39 = vshrl.u32 %v6030_v42, 16  ;;  %7102 = vmatprep.subr.bf16.mxu0 %v7391_v36  ;;  %v7396_v25 = vld [vmem:[%s9368_s2 + $0x198] sm:$0xff]   ;;  %v7399_v12 = vld [vmem:[%s9368_s2 + $0x150] sm:$0xff]  }
  0xb9   : > { %7069 = vmatmul.mubr.bf16.gmra.mxu1 %v6079_v54  ;;  %v2754_v48 = vsel %vm7645_vm5, %v2749_v55, %v8075_v27  ;;  %v2772_v24 = vor.u32 %v2771_v57, %v2768_v41  ;;  %v2793_v10 = vshll.u32 %v6030_v42, 16  ;;  %v2799_v11 = vshll.u32 %v8092_v51, 16  ;;  %v7400_v41 = vld [vmem:[%s9368_s2 + $0x190] sm:$0xff]   ;;  %v7390_v55 = vld [vmem:[%s7524_s21 + $0x60] sm:$0xff]  }
  0xba   : > { %v2759_v19 = vrot.slane %v2758_v1, 4  ;;  %v2781_v20 = vrot.slane %v2779_v4, 4  ;;  %v2787_v17 = vrot.slane %v2785_v5, 5  ;;  %7149 = vmatpush3.bf16.msra.mxu1 %v7388_v23  ;;  %v2792_v22 = vrot.slane %v2790_v39, 4  ;;  %v7403_v1 = vld [vmem:[%s9368_s2 + $0x148] sm:$0xff]  }
  0xbb   : > { %v2773_v26 = vrot.slane %v2772_v24, 4  ;;  %v2795_v28 = vrot.slane %v2793_v10, 5  ;;  %v2801_v29 = vrot.slane %v2799_v11, 5  ;;  %v2803_v31 = vshrl.u32 %v8092_v51, 16  ;;  %7103 = vmatpush3.bf16.msra.mxu0 %v7391_v36  ;;  %7150 = vmatprep.subr.bf16.mxu1 %v7392_v60  ;;  %v6036_v36 = vld [vmem:[%s7524_s21 + $0x6c] sm:$0xf] }
  0xbc   : > { %v2764_v33 = vsel %vm7645_vm5, %v2759_v19, %v2763_v32  ;;  %v2782_v34 = vor.u32 %v2781_v20, %v8094_v58  ;;  %v2809_v23 = vshll.u32 %v8097_v62, 16  ;;  %v2814_v0 = vshrl.u32 %v6033_v59, 16  ;;  %7104 = vmatprep.subr.bf16.mxu0 %v7395_v2  ;;  %v6039_v24 = vld [vmem:[%s7524_s21 + $0x78] sm:$0xf]  ;;  %v8159_v19 = vld [vmem:[%s7524_s21 + $0x7c] sm:$0xf] }
  0xbd   : > { %v6080_v35 = vcombine.low %v2754_v48, %v2764_v33  ;;  %v2778_v16 = vsel %vm7645_vm5, %v2773_v26, %v8094_v58  ;;  %v2796_v27 = vor.u32 %v2795_v28, %v2792_v22  ;;  %v2805_v37 = vrot.slane %v2803_v31, 4  ;;  %v8155_v48 = vld [vmem:[%s7524_s21 + $0x74] sm:$0x1]  ;;  %v7404_v20 = vld [vmem:[%s9368_s2 + $0x188] sm:$0xff]  }
  0xbe   : > { %7025 = vmatmul.mubr.bf16.gmra.mxu0 %v7386_v6  ;;  %v2783_v40 = vrot.slane %v2782_v34, 4  ;;  %v2811_v42 = vrot.slane %v2809_v23, 5  ;;  %v2816_v46 = vrot.slane %v2814_v0, 4  ;;  %v2817_v50 = vshll.u32 %v6033_v59, 16  ;;  %7151 = vmatpush3.bf16.msra.mxu1 %v7392_v60  ;;  %v7393_v59 = vld [vmem:[%s7524_s21 + $0x6c] sm:$0xff]  }
  0xbf   : > { %7072 = vmatprep.mubr.bf16.mxu1 %v6080_v35  ;;  %7028 = vmatprep.mubr.bf16.mxu0 %v7389_v43  ;;  %v2797_v13 = vrot.slane %v2796_v27, 4  ;;  %v2806_v52 = vor.u32 %v2805_v37, %v2801_v29  ;;  %v2823_v53 = vshll.u32 %v8116_v47, 16  ;;  %v2827_v32 = vshrl.u32 %v8116_v47, 16 }
  0xc0   : > { %v2788_v54 = vsel %vm7645_vm5, %v2783_v40, %v2787_v17  ;;  %v2819_v57 = vrot.slane %v2817_v50, 5  ;;  %v2833_v58 = vshll.u32 %v8130_v38, 16  ;;  %v2838_v60 = vshrl.u32 %v6036_v36, 16  ;;  %7105 = vmatpush3.bf16.msra.mxu0 %v7395_v2  ;;  %7152 = vmatprep.subr.bf16.mxu1 %v7396_v25 }
  0xc1   : > { %v6081_v6 = vcombine.low %v2778_v16, %v2788_v54  ;;  %v2802_v4 = vsel %vm7645_vm5, %v2797_v13, %v2801_v29  ;;  %v2807_v5 = vrot.slane %v2806_v52, 4  ;;  %v2825_v39 = vrot.slane %v2823_v53, 5  ;;  %7106 = vmatprep.subr.bf16.mxu0 %v7399_v12  ;;  %v8169_v29 = vld [vmem:[%s7524_s21 + $0x80] sm:$0x1]  ;;  %v7394_v53 = vld [vmem:[%s7524_s21 + $0x78] sm:$0xff]  }
  0xc2   : > { %v2820_v43 = vor.u32 %v2819_v57, %v2816_v46  ;;  %v2829_v10 = vrot.slane %v2827_v32, 4  ;;  %v2835_v2 = vrot.slane %v2833_v58, 5  ;;  %v2840_v11 = vrot.slane %v2838_v60, 4  ;;  %7153 = vmatpush3.bf16.msra.mxu1 %v7396_v25  ;;  %v7407_v25 = vld [vmem:[%s9368_s2 + $0x140] sm:$0xff]  }
  0xc3   : > { %7073 = vmatmul.mubr.bf16.gmra.mxu1 %v6081_v6  ;;  %v2812_v17 = vsel %vm7645_vm5, %v2807_v5, %v2811_v42  ;;  %v2841_v22 = vshll.u32 %v6036_v36, 16  ;;  %v2847_v26 = vshll.u32 %v8137_v61, 16  ;;  %v2851_v28 = vshrl.u32 %v8137_v61, 16  ;;  %7154 = vmatprep.subr.bf16.mxu1 %v7400_v41  ;;  %v6042_v57 = vld [vmem:[%s7524_s21 + $0x84] sm:$0xf] }
  0xc4   : > { %v6082_v31 = vcombine.low %v2802_v4, %v2812_v17  ;;  %v2821_v33 = vrot.slane %v2820_v43, 4  ;;  %v2830_v34 = vor.u32 %v2829_v10, %v2825_v39  ;;  %v2857_v23 = vshll.u32 %v8155_v48, 16  ;;  %7107 = vmatpush3.bf16.msra.mxu0 %v7399_v12  ;;  %v7408_v58 = vld [vmem:[%s9368_s2 + $0x180] sm:$0xff]   ;;  %v8197_v10 = vld [vmem:[%s7524_s21 + $0x8c] sm:$0x1] }
  0xc5   : > { %v2843_v0 = vrot.slane %v2841_v22, 5  ;;  %v2849_v35 = vrot.slane %v2847_v26, 5  ;;  %v2853_v16 = vrot.slane %v2851_v28, 4  ;;  %v2862_v27 = vshrl.u32 %v6039_v24, 16  ;;  %7108 = vmatprep.subr.bf16.mxu0 %v7403_v1  ;;  %v7397_v5 = vld [vmem:[%s7524_s21 + $0x84] sm:$0xff]  }
  0xc6   : > { %7076 = vmatprep.mubr.bf16.mxu1 %v6082_v31  ;;  %7029 = vmatmul.mubr.bf16.gmra.mxu0 %v7390_v55  ;;  %v2826_v37 = vsel %vm7645_vm5, %v2821_v33, %v2825_v39  ;;  %v2831_v36 = vrot.slane %v2830_v34, 4  ;;  %v2859_v40 = vrot.slane %v2857_v23, 5  ;;  %v2865_v42 = vshll.u32 %v6039_v24, 16  ;;  %v8189_v39 = vld [vmem:[%s7524_s21 + $0x88] sm:$0xf] }
  0xc7   : > { %7032 = vmatprep.mubr.bf16.mxu0 %v7393_v59  ;;  %v2844_v46 = vor.u32 %v2843_v0, %v2840_v11  ;;  %v2854_v50 = vor.u32 %v2853_v16, %v2849_v35  ;;  %v2864_v13 = vrot.slane %v2862_v27, 4  ;;  %v2871_v12 = vshll.u32 %v8159_v19, 16  ;;  %7155 = vmatpush3.bf16.msra.mxu1 %v7400_v41  ;;  %v8194_v59 = vld [vmem:[%s9368_s2 + $0x1f8] sm:$0xff]   ;;  %v6045_v26 = vld [vmem:[%s7524_s21 + $0x90] sm:$0xf] }
  0xc8   : > { %v2836_v52 = vsel %vm7645_vm5, %v2831_v36, %v2835_v2  ;;  %v2867_v32 = vrot.slane %v2865_v42, 5  ;;  %v2875_v54 = vshrl.u32 %v8159_v19, 16  ;;  %v2881_v55 = vshll.u32 %v8169_v29, 16  ;;  %7109 = vmatpush3.bf16.msra.mxu0 %v7403_v1  ;;  %7156 = vmatprep.subr.bf16.mxu1 %v7404_v20  ;;  %v8206_v23 = vld [vmem:[%s7524_s21 + $0x94] sm:$0xf]  ;;  %v8211_v0 = vld [vmem:[%s9368_s2 + $0x238] sm:$0xff]  }
  0xc9   : > { %v6083_v60 = vcombine.low %v2826_v37, %v2836_v52  ;;  %v2845_v6 = vrot.slane %v2844_v46, 4  ;;  %v2855_v41 = vrot.slane %v2854_v50, 4  ;;  %v2873_v4 = vrot.slane %v2871_v12, 5  ;;  %7110 = vmatprep.subr.bf16.mxu0 %v7407_v25  ;;  %v8216_v36 = vld [vmem:[%s7524_s21 + $0x98] sm:$0x1] }
  0xca   : > { %v2868_v1 = vor.u32 %v2867_v32, %v2864_v13  ;;  %v2877_v24 = vrot.slane %v2875_v54, 4  ;;  %v2883_v43 = vrot.slane %v2881_v55, 5  ;;  %v2886_v17 = vshrl.u32 %v6042_v57, 16  ;;  %v6048_v46 = vld [vmem:[%s7524_s21 + $0x9c] sm:$0xf] }
  0xcb   : > { %7077 = vmatmul.mubr.bf16.gmra.mxu1 %v6083_v60  ;;  %v2850_v2 = vsel %vm7645_vm5, %v2845_v6, %v2849_v35  ;;  %v2860_v11 = vsel %vm7645_vm5, %v2855_v41, %v2859_v40  ;;  %v2889_v22 = vshll.u32 %v6042_v57, 16  ;;  %v2895_v34 = vshll.u32 %v8189_v39, 16  ;;  %v8223_v32 = vld [vmem:[%s7524_s21 + $0xa0] sm:$0xf] }
  0xcc   : > { %v6084_v28 = vcombine.low %v2850_v2, %v2860_v11  ;;  %v2869_v31 = vrot.slane %v2868_v1, 4  ;;  %v2878_v33 = vor.u32 %v2877_v24, %v2873_v4  ;;  %7157 = vmatpush3.bf16.msra.mxu1 %v7404_v20  ;;  %7111 = vmatpush3.bf16.msra.mxu0 %v7407_v25  ;;  %v2888_v35 = vrot.slane %v2886_v17, 4  ;;  %v8234_v11 = vld [vmem:[%s7524_s21 + $0xa4] sm:$0x1] }
  0xcd   : > { %v2891_v16 = vrot.slane %v2889_v22, 5  ;;  %v2899_v27 = vshrl.u32 %v8189_v39, 16  ;;  %v2905_v37 = vshll.u32 %v8197_v10, 16  ;;  %7158 = vmatprep.subr.bf16.mxu1 %v7408_v58  ;;  %7192 = vmatprep.subr.bf16.mxu0 %v8194_v59  ;;  %v2897_v40 = vrot.slane %v2895_v34, 5 }
  0xce   : > { %7080 = vmatprep.mubr.bf16.mxu1 %v6084_v28  ;;  %7033 = vmatmul.mubr.bf16.gmra.mxu0 %v7394_v53  ;;  %v2874_v20 = vsel %vm7645_vm5, %v2869_v31, %v2873_v4  ;;  %v2879_v25 = vrot.slane %v2878_v33, 4  ;;  %v2910_v42 = vshrl.u32 %v6045_v26, 16  ;;  %v2913_v52 = vshll.u32 %v6045_v26, 16  ;;  %v7398_v53 = vld [vmem:[%s7524_s21 + $0x90] sm:$0xff]   ;;  %v6051_v28 = vld [vmem:[%s7524_s21 + $0xa8] sm:$0xf] }
  0xcf   : > { %7036 = vmatprep.mubr.bf16.mxu0 %v7397_v5  ;;  %v2892_v50 = vor.u32 %v2891_v16, %v2888_v35  ;;  %v2901_v13 = vrot.slane %v2899_v27, 4  ;;  %v2907_v12 = vrot.slane %v2905_v37, 5  ;;  %v2919_v57 = vshll.u32 %v8206_v23, 16  ;;  %v8240_v31 = vld [vmem:[%s7524_s21 + $0xac] sm:$0xf] }
  0xd0   : > { %v2884_v54 = vsel %vm7645_vm5, %v2879_v25, %v2883_v43  ;;  %v2912_v55 = vrot.slane %v2910_v42, 4  ;;  %v2923_v60 = vshrl.u32 %v8206_v23, 16  ;;  %7159 = vmatpush3.bf16.msra.mxu1 %v7408_v58  ;;  %v2915_v5 = vrot.slane %v2913_v52, 5  ;;  %v7401_v43 = vld [vmem:[%s7524_s21 + $0x9c] sm:$0xff]   ;;  %v8247_v52 = vld [vmem:[%s7524_s21 + $0xb0] sm:$0x1] }
  0xd1   : > { %v6085_v6 = vcombine.low %v2874_v20, %v2884_v54  ;;  %v2893_v41 = vrot.slane %v2892_v50, 4  ;;  %v2902_v4 = vor.u32 %v2901_v13, %v2897_v40  ;;  %7240 = vmatprep.subr.bf16.mxu1 %v8211_v0  ;;  %v2921_v1 = vrot.slane %v2919_v57, 5  ;;  %v6054_v57 = vld [vmem:[%s7524_s21 + $0xb4] sm:$0xf] }
  0xd2   : > { %v2925_v24 = vrot.slane %v2923_v60, 4  ;;  %v2929_v2 = vshll.u32 %v8216_v36, 16  ;;  %v2916_v22 = vor.u32 %v2915_v5, %v2912_v55  ;;  %v2934_v26 = vshrl.u32 %v6048_v46, 16  ;;  %v8258_v5 = vld [vmem:[%s7524_s21 + $0xb8] sm:$0xf] }
  0xd3   : > { %7081 = vmatmul.mubr.bf16.gmra.mxu1 %v6085_v6  ;;  %v2898_v17 = vsel %vm7645_vm5, %v2893_v41, %v2897_v40  ;;  %v2903_v58 = vrot.slane %v2902_v4, 4  ;;  %v2937_v35 = vshll.u32 %v6048_v46, 16  ;;  %v2943_v16 = vshll.u32 %v8223_v32, 16  ;;  %v7402_v6 = vld [vmem:[%s7524_s21 + $0xa8] sm:$0xff]  }
  0xd4   : > { %v2926_v33 = vor.u32 %v2925_v24, %v2921_v1  ;;  %v2931_v34 = vrot.slane %v2929_v2, 5  ;;  %v2917_v37 = vrot.slane %v2916_v22, 4  ;;  %v2936_v20 = vrot.slane %v2934_v26, 4 }
  0xd5   : > { %v2908_v27 = vsel %vm7645_vm5, %v2903_v58, %v2907_v12  ;;  %v2947_v25 = vshrl.u32 %v8223_v32, 16  ;;  %v2939_v50 = vrot.slane %v2937_v35, 5  ;;  %v2945_v13 = vrot.slane %v2943_v16, 5  ;;  %v7405_v35 = vld [vmem:[%s7524_s21 + $0xb4] sm:$0xff]  }
  0xd6   : > { %v6086_v40 = vcombine.low %v2898_v17, %v2908_v27  ;;  %7037 = vmatmul.mubr.bf16.gmra.mxu0 %v7398_v53  ;;  %v2927_v42 = vrot.slane %v2926_v33, 4  ;;  %v2922_v46 = vsel %vm7645_vm5, %v2917_v37, %v2921_v1  ;;  %v2953_v12 = vshll.u32 %v8234_v11, 16  ;;  %v8262_v33 = vld [vmem:[%s7524_s21 + $0xbc] sm:$0x1]  ;;  %v6057_v27 = vld [vmem:[%s7524_s21 + $0xc0] sm:$0xf] }
  0xd7   : > { %7040 = vmatprep.mubr.bf16.mxu0 %v7401_v43  ;;  %v2949_v54 = vrot.slane %v2947_v25, 4  ;;  %v2958_v55 = vshrl.u32 %v6051_v28, 16  ;;  %v2940_v60 = vor.u32 %v2939_v50, %v2936_v20  ;;  %v2961_v41 = vshll.u32 %v6051_v28, 16 }
  0xd8   : > { %7084 = vmatprep.mubr.bf16.mxu1 %v6086_v40  ;;  %v2932_v53 = vsel %vm7645_vm5, %v2927_v42, %v2931_v34  ;;  %v2967_v4 = vshll.u32 %v8240_v31, 16  ;;  %v2955_v2 = vrot.slane %v2953_v12, 5  ;;  %v2971_v26 = vshrl.u32 %v8240_v31, 16  ;;  %v8273_v12 = vld [vmem:[%s7524_s21 + $0xc4] sm:$0xf] }
  0xd9   : > { %v6087_v1 = vcombine.low %v2922_v46, %v2932_v53  ;;  %v2950_v24 = vor.u32 %v2949_v54, %v2945_v13  ;;  %v2960_v43 = vrot.slane %v2958_v55, 4  ;;  %v2941_v17 = vrot.slane %v2940_v60, 4 }
  0xda   : > { %v2963_v58 = vrot.slane %v2961_v41, 5  ;;  %v2969_v22 = vrot.slane %v2967_v4, 5  ;;  %v2977_v28 = vshll.u32 %v8247_v52, 16  ;;  %v2982_v16 = vshrl.u32 %v6054_v57, 16  ;;  %v8276_v4 = vld [vmem:[%s7524_s21 + $0xc8] sm:$0x1] }
  0xdb   : > { %7085 = vmatmul.mubr.bf16.gmra.mxu1 %v6087_v1  ;;  %v2951_v34 = vrot.slane %v2950_v24, 4  ;;  %v2946_v37 = vsel %vm7645_vm5, %v2941_v17, %v2945_v13  ;;  %v2973_v25 = vrot.slane %v2971_v26, 4  ;;  %v2985_v40 = vshll.u32 %v6054_v57, 16 }
  0xdc   : > { %v2964_v20 = vor.u32 %v2963_v58, %v2960_v43  ;;  %v2979_v50 = vrot.slane %v2977_v28, 5  ;;  %v2984_v46 = vrot.slane %v2982_v16, 4  ;;  %v2991_v54 = vshll.u32 %v8258_v5, 16 }
  0xdd   : > { %v2956_v42 = vsel %vm7645_vm5, %v2951_v34, %v2955_v2  ;;  %v2974_v60 = vor.u32 %v2973_v25, %v2969_v22  ;;  %v2987_v41 = vrot.slane %v2985_v40, 5  ;;  %v2995_v57 = vshrl.u32 %v8258_v5, 16  ;;  %v6100_v40 = vld [vmem:[%s7524_s21 + $0xc] sm:$0xe] }
  0xde   : > { %v6088_v55 = vcombine.low %v2946_v37, %v2956_v42  ;;  %7041 = vmatmul.mubr.bf16.gmra.mxu0 %v7402_v6  ;;  %v2965_v53 = vrot.slane %v2964_v20, 4  ;;  %v2993_v13 = vrot.slane %v2991_v54, 5  ;;  %v3001_v1 = vshll.u32 %v8262_v33, 16  ;;  %v7406_v37 = vld [vmem:[%s7524_s21 + $0xc0] sm:$0xff]  }
  0xdf   : > { %7044 = vmatprep.mubr.bf16.mxu0 %v7405_v35  ;;  %v3006_v24 = vshrl.u32 %v6057_v27, 16  ;;  %v2975_v43 = vrot.slane %v2974_v60, 4  ;;  %v2988_v6 = vor.u32 %v2987_v41, %v2984_v46  ;;  %v3009_v17 = vshll.u32 %v6057_v27, 16 }
  0xe0   : > { %7088 = vmatprep.mubr.bf16.mxu1 %v6088_v55  ;;  %v2970_v2 = vsel %vm7645_vm5, %v2965_v53, %v2969_v22  ;;  %v2997_v58 = vrot.slane %v2995_v57, 4  ;;  %v3003_v26 = vrot.slane %v3001_v1, 5  ;;  %v3015_v28 = vshll.u32 %v8273_v12, 16 }
  0xe1   : > { %v3008_v34 = vrot.slane %v3006_v24, 4  ;;  %v2980_v35 = vsel %vm7645_vm5, %v2975_v43, %v2979_v50  ;;  %v2989_v16 = vrot.slane %v2988_v6, 4  ;;  %v3011_v20 = vrot.slane %v3009_v17, 5  ;;  %v6101_v50 = vld [vmem:[%s7524_s21 + $0x18] sm:$0xe] }
  0xe2   : > { %v3019_v25 = vshrl.u32 %v8273_v12, 16  ;;  %v6089_v42 = vcombine.low %v2970_v2, %v2980_v35  ;;  %v2998_v22 = vor.u32 %v2997_v58, %v2993_v13  ;;  %v3017_v54 = vrot.slane %v3015_v28, 5 }
  0xe3   : > { %v3025_v27 = vshll.u32 %v8276_v4, 16  ;;  %v2994_v55 = vsel %vm7645_vm5, %v2989_v16, %v2993_v13  ;;  %v3012_v53 = vor.u32 %v3011_v20, %v3008_v34  ;;  %v6116_v24 = vrot.slane %v6100_v40, 9  ;;  %v6102_v34 = vld [vmem:[%s7524_s21 + $0x24] sm:$0xe] }
  0xe4   : > { %v3021_v60 = vrot.slane %v3019_v25, 4  ;;  %7089 = vmatmul.mubr.bf16.gmra.mxu1 %v6089_v42  ;;  %v2999_v57 = vrot.slane %v2998_v22, 4  ;;  %v3417_v43 = vrot.slane %v7986_v44, 5  ;;  %v3420_v58 = vrot.slane %v7989_v8, 5 }
  0xe5   : > { %v3027_v1 = vrot.slane %v3025_v27, 5  ;;  %v3013_v6 = vrot.slane %v3012_v53, 4  ;;  %v6117_v44 = vrot.slane %v6101_v50, 9  ;;  %v3424_v42 = vrot.slane %v8000_v3, 5  ;;  %v6103_v27 = vld [vmem:[%s7524_s21 + $0x30] sm:$0xe] }
  0xe6   : > { %7045 = vmatmul.mubr.bf16.gmra.mxu0 %v7406_v37  ;;  %v3022_v17 = vor.u32 %v3021_v60, %v3017_v54  ;;  %v3004_v35 = vsel %vm7645_vm5, %v2999_v57, %v3003_v26  ;;  %v3418_v16 = vsel %vm7627_vm4, %v6116_v24, %v3417_v43  ;;  %v3419_v20 = vrot.slane %v3417_v43, 4  ;;  %v6104_v50 = vld [vmem:[%s7524_s21 + $0x3c] sm:$0xe] }
  0xe7   : > { %v6090_v37 = vcombine.low %v2994_v55, %v3004_v35  ;;  %v3018_v40 = vsel %vm7645_vm5, %v3013_v6, %v3017_v54  ;;  %v7409_v57 = vld [vmem:[%s7524_s21 + $0x18] sm:$0xff]   ;;  %v3425_v3 = vsel %vm7627_vm4, %v6117_v44, %v3424_v42  ;;  %v3426_v24 = vrot.slane %v3424_v42, 4 }
  0xe8   : > { %v3023_v8 = vrot.slane %v3022_v17, 4  ;;  %v3421_v26 = vsel %vm7627_vm4, %v3419_v20, %v3420_v58  ;;  %v3438_v20 = vrot.slane %v8031_v45, 5  ;;  %v3441_v42 = vrot.slane %v8039_v56, 5  ;;  %v7413_v56 = vld [vmem:[%s7524_s21 + $0x30] sm:$0xff]  }
  0xe9   : > { %7092 = vmatprep.mubr.bf16.mxu1 %v6090_v37  ;;  %v6148_v55 = vcombine.low %v3418_v16, %v3421_v26  ;;  %v6119_v16 = vrot.slane %v6103_v27, 9  ;;  %v6120_v27 = vrot.slane %v6104_v50, 9  ;;  %v7410_v26 = vld [vmem:[%s7524_s21 + $0x24] sm:$0xff]  }
  0xea   : > { %v3028_v54 = vsel %vm7645_vm5, %v3023_v8, %v3027_v1  ;;  %v3434_v1 = vrot.slane %v8016_v18, 5  ;;  %v6105_v18 = vld [vmem:[%s7524_s21 + $0x48] sm:$0xe]  ;;  %v3440_v8 = vrot.slane %v3438_v20, 4 }
  0xeb   : > { %v6091_v6 = vcombine.low %v3018_v40, %v3028_v54  ;;  %7112 = vmatprep.mubr.bf16.mxu0 %v6148_v55  ;;  %v3439_v45 = vsel %vm7627_vm4, %v6119_v16, %v3438_v20  ;;  %v3445_v55 = vrot.slane %v8050_v30, 5  ;;  %v7416_v30 = vld [vmem:[%s9368_s2 + $0x230] sm:$0xff]  }
  0xec   : > { %v6826_v46 = vpop.f32.mrf.mxu0  ;;  %v3442_v50 = vsel %vm7627_vm4, %v3440_v8, %v3441_v42  ;;  %v6107_v8 = vld [vmem:[%s7524_s21 + $0x60] sm:$0xe] }
  0xed   : > { %v6874_v41 = vpop.f32.mrf.mxu1  ;;  %7093 = vmatmul.mubr.bf16.gmra.mxu1 %v6091_v6  ;;  %v6121_v6 = vrot.slane %v6105_v18, 9  ;;  %v8374_v42 = vld [vmem:[%s9368_s2 + $0x1e0] sm:$0xff]  }
  0xee   : > { %v520_v2 = vpop.f32.mrf.mxu0  ;;  %v8294_v28 = vadd.f32 %v6874_v41, %v6826_v46  ;;  %v3427_v46 = vrot.slane %v8008_v49, 5  ;;  %v6118_v49 = vrot.slane %v6102_v34, 9  ;;  %7160 = vmatprep.mubr.bf16.mxu1 %v7409_v57  ;;  %v3448_v57 = vrot.slane %v8054_v7, 5 }
  0xef   : > { %v825_v13 = vpop.f32.mrf.mxu1 }
  0xf0   : > { %v6827_v25 = vpop.f32.mrf.mxu0  ;;  %v8308_v53 = vadd.f32 %v825_v13, %v520_v2  ;;  %v3431_v2 = vrot.slane %v8012_v9, 5  ;;  %v3428_v13 = vsel %vm7627_vm4, %v3426_v24, %v3427_v46  ;;  %v7415_v9 = vld [vmem:[%s9368_s2 + $0x1f0] sm:$0xff]  }
  0xf1   : > { %v6875_v22 = vpop.f32.mrf.mxu1  ;;  %v6149_v44 = vcombine.low %v3425_v3, %v3428_v13  ;;  %v8344_v3 = vld [vmem:[%s7524_s21 + $0x54] sm:$0xe]  ;;  %v3447_v13 = vrot.slane %v3445_v55, 4 }
  0xf2   : > { %v8310_v60 = vadd.f32 %v6875_v22, %v6827_v25  ;;  %v523_v41 = vpop.f32.mrf.mxu0  ;;  %v3432_v34 = vsel %vm7627_vm4, %v6118_v49, %v3431_v2  ;;  %v3433_v25 = vrot.slane %v3431_v2, 4  ;;  %v3452_v49 = vrot.slane %v8070_v15, 5 }
  0xf3   : > { %v828_v43 = vpop.f32.mrf.mxu1  ;;  %7113 = vmatmul.mubr.bf16.vlgmr.msra.gmra.mxu0 %v6149_v44  ;;  %v6151_v2 = vcombine.low %v3439_v45, %v3442_v50  ;;  %v3483_v15 = vrot.slane %v8169_v29, 5  ;;  %v3455_v44 = vrot.slane %v8078_v14, 5  ;;  %v3459_v45 = vrot.slane %v8092_v51, 5  ;;  %v6108_v50 = vld [vmem:[%s7524_s21 + $0x6c] sm:$0xe] }
  0xf4   : > { %v8318_v17 = vadd.f32 %v828_v43, %v523_v41  ;;  %v6830_v58 = vpop.f32.mrf.mxu0  ;;  %v3435_v46 = vsel %vm7627_vm4, %v3433_v25, %v3434_v1  ;;  %7193 = vmatpush3.bf16.msra.mxu0 %v8194_v59  ;;  %v3446_v59 = vsel %vm7627_vm4, %v6120_v27, %v3445_v55  ;;  %v7419_v1 = vld [vmem:[%s9368_s2 + $0x1e8] sm:$0xff]   ;;  %v3454_v20 = vrot.slane %v3452_v49, 4 }
  0xf5   : > { %v6878_v35 = vpop.f32.mrf.mxu1  ;;  %v6150_v24 = vcombine.low %v3432_v34, %v3435_v46  ;;  %7194 = vmatprep.subr.bf16.mxu0 %v7415_v9  ;;  %v3511_v34 = vrot.slane %v8247_v52, 5  ;;  %v8378_v27 = vsel %vm7627_vm4, %v6121_v6, %v3452_v49  ;;  %v6122_v46 = vrot.slane %v8344_v3, 9  ;;  %7161 = vmatmul.mubr.bf16.vlgmr.msra.gmra.mxu1 %v7410_v26  ;;  %v6109_v6 = vld [vmem:[%s7524_s21 + $0x78] sm:$0xe]  ;;  %v7414_v49 = vld [vmem:[%s7524_s21 + $0x3c] sm:$0xff]  }
  0xf6   : > { %v8327_v37 = vadd.f32 %v6878_v35, %v6830_v58  ;;  %v536_v40 = vpop.f32.mrf.mxu0  ;;  %v3497_v35 = vrot.slane %v8216_v36, 5  ;;  %v8386_v55 = vsel %vm7627_vm4, %v3454_v20, %v3455_v44  ;;  %v3462_v3 = vrot.slane %v8097_v62, 5  ;;  %7241 = vmatpush3.bf16.msra.mxu1 %v8211_v0  ;;  %7164 = vmatprep.mubr.bf16.mxu1 %v7413_v56  ;;  %v7417_v62 = vld [vmem:[%s7524_s21 + $0x48] sm:$0xff]  }
  0xf7   : > { %v841_v22 = vpop.f32.mrf.mxu1  ;;  %7116 = vmatprep.mubr.bf16.mxu0 %v6150_v24  ;;  %v3461_v24 = vrot.slane %v3459_v45, 4  ;;  %7242 = vmatprep.subr.bf16.mxu1 %v7416_v30  ;;  %v6153_v20 = vcombine.low %v8378_v27, %v8386_v55  ;;  %v3469_v56 = vrot.slane %v8130_v38, 5  ;;  %v7427_v38 = vld [vmem:[%s9368_s2 + $0x1d8] sm:$0xff]   ;;  %v6125_v27 = vrot.slane %v6109_v6, 9 }
  0xf8   : > { %v8339_v41 = vadd.f32 %v841_v22, %v536_v40  ;;  %v6831_v54 = vpop.f32.mrf.mxu0  ;;  %v3449_v40 = vsel %vm7627_vm4, %v3447_v13, %v3448_v57  ;;  %7195 = vmatpush3.bf16.msra.mxu0 %v7415_v9  ;;  %v7420_v57 = vld [vmem:[%s9368_s2 + $0x228] sm:$0xff]  }
  0xf9   : > { %v6879_v43 = vpop.f32.mrf.mxu1  ;;  %v6152_v22 = vcombine.low %v3446_v59, %v3449_v40  ;;  %7196 = vmatprep.subr.bf16.mxu0 %v7419_v1 }
  0xfa   : > { %v8354_v7 = vadd.f32 %v6879_v43, %v6831_v54  ;;  %v539_v58 = vpop.f32.mrf.mxu0  ;;  %v3466_v54 = vrot.slane %v8116_v47, 5  ;;  %v3525_v47 = vrot.slane %v8276_v4, 5  ;;  %v6123_v43 = vrot.slane %v6107_v8, 9  ;;  %7243 = vmatpush3.bf16.msra.mxu1 %v7416_v30  ;;  %v7431_v30 = vld [vmem:[%s9368_s2 + $0x1d0] sm:$0xff]   ;;  %v6247_v4 = vld [vmem:[%s7524_s21 + $0x24] sm:$0xf] }
  0xfb   : > { %v844_v16 = vpop.f32.mrf.mxu1  ;;  %7117 = vmatmul.mubr.bf16.gmra.mxu0 %v6151_v2  ;;  %v3480_v2 = vrot.slane %v8159_v19, 5  ;;  %v6124_v8 = vrot.slane %v6108_v50, 9  ;;  %v6110_v19 = vld [vmem:[%s7524_s21 + $0x84] sm:$0xe]  ;;  %7244 = vmatprep.subr.bf16.mxu1 %v7420_v57  ;;  %v6111_v50 = vld [vmem:[%s7524_s21 + $0x90] sm:$0xe] }
  0xfc   : > { %v8365_v25 = vadd.f32 %v844_v16, %v539_v58  ;;  %v6834_v18 = vpop.f32.mrf.mxu0  ;;  %v3468_v13 = vrot.slane %v3466_v54, 4  ;;  %v3473_v16 = vrot.slane %v8137_v61, 5  ;;  %7120 = vmatprep.mubr.bf16.mxu0 %v6152_v22  ;;  %7197 = vmatpush3.bf16.msra.mxu0 %v7419_v1  ;;  %v3463_v61 = vsel %vm7627_vm4, %v3461_v24, %v3462_v3  ;;  %v7424_v1 = vld [vmem:[%s9368_s2 + $0x220] sm:$0xff]  }
  0xfd   : > { %v6882_v14 = vpop.f32.mrf.mxu1  ;;  %7198 = vmatprep.subr.bf16.mxu0 %v8374_v42  ;;  %v8425_v24 = vsel %vm7627_vm4, %v6123_v43, %v3466_v54  ;;  %v3482_v3 = vrot.slane %v3480_v2, 4  ;;  %v3490_v54 = vrot.slane %v8197_v10, 5  ;;  %7165 = vmatmul.mubr.bf16.gmra.mxu1 %v7414_v49 }
  0xfe   : > { %v8382_v51 = vadd.f32 %v6882_v14, %v6834_v18  ;;  %v552_v9 = vpop.f32.mrf.mxu0  ;;  %v3460_v18 = vsel %vm7627_vm4, %v6122_v46, %v3459_v45  ;;  %v3475_v14 = vrot.slane %v3473_v16, 4  ;;  %v3476_v45 = vrot.slane %v8155_v48, 5  ;;  %7168 = vmatprep.mubr.bf16.mxu1 %v7417_v62  ;;  %7245 = vmatpush3.bf16.msra.mxu1 %v7420_v57 }
  0xff   : > { %v857_v26 = vpop.f32.mrf.mxu1  ;;  %v3487_v46 = vrot.slane %v8189_v39, 5  ;;  %v6154_v48 = vcombine.low %v3460_v18, %v3463_v61  ;;  %v8434_v39 = vsel %vm7627_vm4, %v3468_v13, %v3469_v56  ;;  %v8447_v13 = vld [vmem:[%s9368_s2 + $0x218] sm:$0xff]   ;;  %v6127_v56 = vrot.slane %v6111_v50, 9  ;;  %7246 = vmatprep.subr.bf16.mxu1 %v7424_v1 }
 0x100   : > { %v8397_v58 = vadd.f32 %v857_v26, %v552_v9  ;;  %v6835_v59 = vpop.f32.mrf.mxu0  ;;  %v3494_v26 = vrot.slane %v8206_v23, 5  ;;  %7199 = vmatpush3.bf16.msra.mxu0 %v8374_v42  ;;  %v8451_v49 = vsel %vm7627_vm4, %v3475_v14, %v3476_v45  ;;  %v6112_v18 = vld [vmem:[%s7524_s21 + $0x9c] sm:$0xe]  ;;  %v3501_v61 = vrot.slane %v8223_v32, 5  ;;  %v7421_v14 = vld [vmem:[%s7524_s21 + $0x60] sm:$0xff]  }
 0x101   : > { %v6883_v0 = vpop.f32.mrf.mxu1  ;;  %7200 = vmatprep.subr.bf16.mxu0 %v7427_v38  ;;  %v3489_v42 = vrot.slane %v3487_v46, 4  ;;  %v8466_v62 = vsel %vm7627_vm4, %v3482_v3, %v3483_v15  ;;  %v6155_v32 = vcombine.low %v8425_v24, %v8434_v39 }
 0x102   : > { %v8405_v44 = vadd.f32 %v6883_v0, %v6835_v59  ;;  %v555_v40 = vpop.f32.mrf.mxu0  ;;  %v6126_v59 = vrot.slane %v6110_v19, 9  ;;  %v8442_v0 = vsel %vm7627_vm4, %v6124_v8, %v3473_v16  ;;  %v8455_v16 = vsel %vm7627_vm4, %v6125_v27, %v3480_v2  ;;  %v7418_v8 = vld [vmem:[%s7524_s21 + $0x54] sm:$0xff]   ;;  %v6113_v27 = vld [vmem:[%s7524_s21 + $0xa8] sm:$0xe]  ;;  %7247 = vmatpush3.bf16.msra.mxu1 %v7424_v1 }
 0x103   : > { %v860_v22 = vpop.f32.mrf.mxu1  ;;  %7121 = vmatmul.mubr.bf16.gmra.mxu0 %v6153_v20  ;;  %v3504_v2 = vrot.slane %v8234_v11, 5  ;;  %v3503_v45 = vrot.slane %v3501_v61, 4  ;;  %v6156_v15 = vcombine.low %v8442_v0, %v8451_v49  ;;  %v6129_v3 = vrot.slane %v6113_v27, 9  ;;  %7248 = vmatprep.subr.bf16.mxu1 %v8447_v13 }
 0x104   : > { %v8421_v55 = vadd.f32 %v860_v22, %v555_v40  ;;  %v6838_v9 = vpop.f32.mrf.mxu0  ;;  %v3496_v40 = vrot.slane %v3494_v26, 4  ;;  %v6128_v22 = vrot.slane %v6112_v18, 9  ;;  %7124 = vmatprep.mubr.bf16.mxu0 %v6154_v48  ;;  %7201 = vmatpush3.bf16.msra.mxu0 %v7427_v38  ;;  %v8480_v11 = vsel %vm7627_vm4, %v6126_v59, %v3487_v46  ;;  %v7435_v38 = vld [vmem:[%s9368_s2 + $0x1c8] sm:$0xff]  }
 0x105   : > { %v6886_v6 = vpop.f32.mrf.mxu1  ;;  %7202 = vmatprep.subr.bf16.mxu0 %v7431_v30  ;;  %v8489_v48 = vsel %vm7627_vm4, %v3489_v42, %v3490_v54  ;;  %v3515_v46 = vrot.slane %v8258_v5, 5  ;;  %v7432_v5 = vld [vmem:[%s9368_s2 + $0x210] sm:$0xff]   ;;  %v3518_v0 = vrot.slane %v8262_v33, 5  ;;  %v8516_v36 = vsel %vm7627_vm4, %v3503_v45, %v3504_v2  ;;  %7169 = vmatmul.mubr.bf16.gmra.mxu1 %v7418_v8  ;;  %v7436_v45 = vld [vmem:[%s9368_s2 + $0x208] sm:$0xff]  }
 0x106   : > { %v8438_v43 = vadd.f32 %v6886_v6, %v6838_v9  ;;  %v568_v23 = vpop.f32.mrf.mxu0  ;;  %v3508_v9 = vrot.slane %v8240_v31, 5  ;;  %v8503_v1 = vsel %vm7627_vm4, %v3496_v40, %v3497_v35  ;;  %v6114_v54 = vld [vmem:[%s7524_s21 + $0xb4] sm:$0xe]  ;;  %v6115_v40 = vld [vmem:[%s7524_s21 + $0xc0] sm:$0xe]  ;;  %v3522_v18 = vrot.slane %v8273_v12, 5  ;;  %7172 = vmatprep.mubr.bf16.mxu1 %v7421_v14  ;;  %7249 = vmatpush3.bf16.msra.mxu1 %v8447_v13 }
 0x107   : > { %v873_v10 = vpop.f32.mrf.mxu1  ;;  %v6130_v35 = vrot.slane %v6114_v54, 9  ;;  %v6131_v12 = vrot.slane %v6115_v40, 9  ;;  %7250 = vmatprep.subr.bf16.mxu1 %v7432_v5  ;;  %v6248_v13 = vld [vmem:[%s7524_s21 + $0x28] sm:$0xf] }
 0x108   : > { %v8460_v19 = vadd.f32 %v873_v10, %v568_v23  ;;  %v6839_v57 = vpop.f32.mrf.mxu0  ;;  %v3510_v6 = vrot.slane %v3508_v9, 4  ;;  %v8497_v23 = vsel %vm7627_vm4, %v6127_v56, %v3494_v26  ;;  %7203 = vmatpush3.bf16.msra.mxu0 %v7431_v30  ;;  %v8512_v26 = vsel %vm7627_vm4, %v6128_v22, %v3501_v61  ;;  %v7439_v61 = vld [vmem:[%s9368_s2 + $0x1c0] sm:$0xff]   ;;  %v7422_v22 = vld [vmem:[%s7524_s21 + $0x6c] sm:$0xff]  }
 0x109   : > { %v6887_v20 = vpop.f32.mrf.mxu1  ;;  %v3517_v56 = vrot.slane %v3515_v46, 4  ;;  %v8522_v33 = vsel %vm7627_vm4, %v6129_v3, %v3508_v9  ;;  %7204 = vmatprep.subr.bf16.mxu0 %v7435_v38  ;;  %v8540_v52 = vsel %vm7627_vm4, %v6130_v35, %v3515_v46  ;;  %v3524_v27 = vrot.slane %v3522_v18, 4  ;;  %v7425_v35 = vld [vmem:[%s7524_s21 + $0x78] sm:$0xff]  }
 0x10a   : > { %v8474_v50 = vadd.f32 %v6887_v20, %v6839_v57  ;;  %v571_v29 = vpop.f32.mrf.mxu0  ;;  %v8528_v30 = vsel %vm7627_vm4, %v3510_v6, %v3511_v34  ;;  %v8562_v3 = vsel %vm7627_vm4, %v6131_v12, %v3522_v18  ;;  %v6245_v6 = vld [vmem:[%s7524_s21 + $0x1c] sm:$0xf]  ;;  %7251 = vmatpush3.bf16.msra.mxu1 %v7432_v5 }
 0x10b   : > { %v876_v24 = vpop.f32.mrf.mxu1  ;;  %v8544_v34 = vsel %vm7627_vm4, %v3517_v56, %v3518_v0  ;;  %7125 = vmatmul.mubr.bf16.gmra.mxu0 %v6155_v32  ;;  %v4294_v40 = vshll.u32 %v6245_v6, 16  ;;  %v4298_v18 = vshrl.u32 %v6245_v6, 16  ;;  %7252 = vmatprep.subr.bf16.mxu1 %v7436_v45  ;;  %v5056_v20 = vrot.slane %v6245_v6, 5 }
 0x10c   : > { %v8492_v39 = vadd.f32 %v876_v24, %v571_v29  ;;  %v6842_v59 = vpop.f32.mrf.mxu0  ;;  %7128 = vmatprep.mubr.bf16.mxu0 %v6156_v15  ;;  %7205 = vmatpush3.bf16.msra.mxu0 %v7435_v38  ;;  %v6244_v24 = vld [vmem:[%s7524_s21 + $0x18] sm:$0xf]  ;;  %v8572_v15 = vsel %vm7627_vm4, %v3524_v27, %v3525_v47  ;;  %v6246_v38 = vld [vmem:[%s7524_s21 + $0x20] sm:$0x1]  ;;  %v4312_v6 = vshll.u32 %v6247_v4, 16 }
 0x10d   : > { %v6890_v42 = vpop.f32.mrf.mxu1  ;;  %7206 = vmatprep.subr.bf16.mxu0 %v7439_v61  ;;  %v4285_v54 = vshrl.u32 %v6244_v24, 16  ;;  %v4288_v0 = vshll.u32 %v6244_v24, 16  ;;  %v4296_v29 = vrot.slane %v4294_v40, 5  ;;  %7173 = vmatmul.mubr.bf16.gmra.mxu1 %v7422_v22  ;;  %v5059_v31 = vrot.slane %v6246_v38, 5  ;;  %v6249_v40 = vld [vmem:[%s7524_s21 + $0x2c] sm:$0x1] }
 0x10e   : > { %v8518_v10 = vadd.f32 %v6890_v42, %v6842_v59  ;;  %v584_v49 = vpop.f32.mrf.mxu0  ;;  %v6332_v42 = vld [vmem:[%s7524_s21 + $0x18] sm:$0xe]  ;;  %7176 = vmatprep.mubr.bf16.mxu1 %v7425_v35  ;;  %7253 = vmatpush3.bf16.msra.mxu1 %v7436_v45  ;;  %v9378_v22 = vcombine.low %v8455_v16, %v8466_v62  ;;  %v4314_v62 = vrot.slane %v4312_v6, 5 }
 0x10f   : > { %v889_v8 = vpop.f32.mrf.mxu1  ;;  %v4287_v27 = vrot.slane %v4285_v54, 4  ;;  %v6348_v24 = vrot.slane %v6332_v42, 9 }
 0x110   : > { %v8547_v2 = vadd.f32 %v889_v8, %v584_v49  ;;  %v6843_v14 = vpop.f32.mrf.mxu0  ;;  %v4304_v8 = vshll.u32 %v6246_v38, 16  ;;  %7207 = vmatpush3.bf16.msra.mxu0 %v7439_v61  ;;  %v4300_v49 = vrot.slane %v4298_v18, 4  ;;  %v9379_v18 = vcombine.low %v8480_v11, %v8489_v48 }
 0x111   : > { %v6891_v32 = vpop.f32.mrf.mxu1  ;;  %v8590_v61 = vsel %vm7627_vm4, %v6348_v24, %v5056_v20  ;;  %v7429_v24 = vld [vmem:[%s7524_s21 + $0x90] sm:$0xff]  }
 0x112   : > { %v8566_v46 = vadd.f32 %v6891_v32, %v6843_v14  ;;  %v587_v59 = vpop.f32.mrf.mxu0  ;;  %v7440_v14 = vld [vmem:[%s9368_s2 + $0x200] sm:$0xff]   ;;  %v4290_v32 = vrot.slane %v4288_v0, 5  ;;  %v4306_v9 = vrot.slane %v4304_v8, 5  ;;  %v4301_v54 = vor.u32 %v4300_v49, %v4296_v29 }
 0x113   : > { %v892_v56 = vpop.f32.mrf.mxu1  ;;  %v5058_v0 = vrot.slane %v5056_v20, 4  ;;  %7129 = vmatmul.mubr.bf16.gmra.mxu0 %v9378_v22  ;;  %7254 = vmatprep.subr.bf16.mxu1 %v7440_v14  ;;  %v4318_v49 = vshll.u32 %v6248_v13, 16 }
 0x114   : > { %9376 = vst [vmem:[#allocation2_spill] sm:$0xff] %v8566_v46  ;;  %v8580_v12 = vadd.f32 %v892_v56, %v587_v59  ;;  %v6846_v47 = vpop.f32.mrf.mxu0  ;;  %v4291_v56 = vor.u32 %v4290_v32, %v4287_v27  ;;  %7132 = vmatprep.mubr.bf16.mxu0 %v9379_v18  ;;  %v4302_v8 = vrot.slane %v4301_v54, 4  ;;  %7255 = vmatpush3.bf16.msra.mxu1 %v7440_v14  ;;  %v4328_v54 = vshll.u32 %v6249_v40, 16  ;;  %v6251_v18 = vld [vmem:[%s7524_s21 + $0x34] sm:$0xf] }
 0x115   : > { %v6894_v5 = vpop.f32.mrf.mxu1  ;;  %v8603_v16 = vsel %vm7627_vm4, %v5058_v0, %v5059_v31  ;;  %v4320_v48 = vrot.slane %v4318_v49, 5  ;;  %v6250_v0 = vld [vmem:[%s7524_s21 + $0x30] sm:$0xf] }
 0x116   : > { %9377 = vst [vmem:[#allocation3_spill] sm:$0xff] %v8580_v12  ;;  %v8586_v57 = vadd.f32 %v6894_v5, %v6846_v47  ;;  %v600_v59 = vpop.f32.mrf.mxu0  ;;  %v4309_v12 = vshrl.u32 %v6247_v4, 16  ;;  %v4292_v35 = vrot.slane %v4291_v56, 4  ;;  %v6333_v4 = vld [vmem:[%s7524_s21 + $0x24] sm:$0xe]  ;;  %v4307_v31 = vsel %vm7645_vm5, %v4302_v8, %v4306_v9 }
 0x117   : > { %v905_v46 = vpop.f32.mrf.mxu1  ;;  %v7426_v47 = vld [vmem:[%s7524_s21 + $0x84] sm:$0xff]   ;;  %v4330_v14 = vrot.slane %v4328_v54, 5  ;;  %v9383_v54 = vcombine.low %v8512_v26, %v8516_v36 }
 0x118   : > { %v8595_v42 = vadd.f32 %v905_v46, %v600_v59  ;;  %v6847_v38 = vpop.f32.mrf.mxu0  ;;  %v4311_v45 = vrot.slane %v4309_v12, 4  ;;  %v4322_v46 = vshrl.u32 %v6248_v13, 16  ;;  %v4297_v12 = vsel %vm7645_vm5, %v4292_v35, %v4296_v29  ;;  %7177 = vmatmul.mubr.bf16.gmra.mxu1 %v7426_v47  ;;  %v7433_v36 = vld [vmem:[%s7524_s21 + $0xa8] sm:$0xff]  }
 0x119   : > { %v6895_v20 = vpop.f32.mrf.mxu1  ;;  %v6349_v29 = vrot.slane %v6333_v4, 9  ;;  %v5063_v35 = vrot.slane %v6248_v13, 5  ;;  %7180 = vmatprep.mubr.bf16.mxu1 %v7429_v24  ;;  %v4342_v47 = vshll.u32 %v6251_v18, 16 }
 0x11a   : > { %v8607_v27 = vadd.f32 %v6895_v20, %v6847_v38  ;;  %v603_v32 = vpop.f32.mrf.mxu0  ;;  %v4315_v59 = vor.u32 %v4314_v62, %v4311_v45  ;;  %v4324_v56 = vrot.slane %v4322_v46, 4  ;;  %v8619_v38 = vcombine.low %v4297_v12, %v4307_v31  ;;  %v6252_v12 = vld [vmem:[%s7524_s21 + $0x38] sm:$0x1] }
 0x11b   : > { %v908_v5 = vpop.f32.mrf.mxu1  ;;  %v8626_v8 = vsel %vm7627_vm4, %v6349_v29, %v5063_v35  ;;  %v5065_v62 = vrot.slane %v5063_v35, 4  ;;  %v4333_v46 = vshrl.u32 %v6250_v0, 16  ;;  %v4344_v29 = vrot.slane %v4342_v47, 5  ;;  %v7430_v35 = vld [vmem:[%s7524_s21 + $0x9c] sm:$0xff]  }
 0x11c   : > { %9380 = vst [vmem:[#allocation4_spill] sm:$0xff] %v8607_v27  ;;  %v8617_v6 = vadd.f32 %v908_v5, %v603_v32  ;;  %v6850_v22 = vpop.f32.mrf.mxu0  ;;  %v4316_v20 = vrot.slane %v4315_v59, 4  ;;  %v4325_v11 = vor.u32 %v4324_v56, %v4320_v48  ;;  %v5066_v27 = vrot.slane %v6249_v40, 5 }
 0x11d   : > { %v6898_v49 = vpop.f32.mrf.mxu1  ;;  %v4336_v40 = vshll.u32 %v6250_v0, 16  ;;  %v9381_v5 = vcombine.low %v8497_v23, %v8503_v1  ;;  %v4335_v56 = vrot.slane %v4333_v46, 4  ;;  %v4352_v26 = vshll.u32 %v6252_v12, 16 }
 0x11e   : > { %v8622_v9 = vadd.f32 %v6898_v49, %v6850_v22  ;;  %v616_v45 = vpop.f32.mrf.mxu0  ;;  %v4321_v4 = vsel %vm7645_vm5, %v4316_v20, %v4320_v48  ;;  %v4326_v32 = vrot.slane %v4325_v11, 4  ;;  %v8638_v24 = vsel %vm7627_vm4, %v5065_v62, %v5066_v27  ;;  %v6334_v11 = vld [vmem:[%s7524_s21 + $0x30] sm:$0xe]  ;;  %v6253_v27 = vld [vmem:[%s7524_s21 + $0x3c] sm:$0xf] }
 0x11f   : > { %v921_v13 = vpop.f32.mrf.mxu1  ;;  %7133 = vmatmul.mubr.bf16.gmra.mxu0 %v9381_v5  ;;  %v4346_v48 = vshrl.u32 %v6251_v18, 16  ;;  %v4338_v22 = vrot.slane %v4336_v40, 5  ;;  %v6350_v5 = vrot.slane %v6334_v11, 9 }
 0x120   : > { %v8634_v31 = vadd.f32 %v921_v13, %v616_v45  ;;  %v6851_v59 = vpop.f32.mrf.mxu0  ;;  %7136 = vmatprep.mubr.bf16.mxu0 %v9383_v54  ;;  %v4331_v23 = vsel %vm7645_vm5, %v4326_v32, %v4330_v14  ;;  %v5070_v14 = vrot.slane %v6251_v18, 5  ;;  %v5073_v32 = vrot.slane %v6252_v12, 5  ;;  %v6254_v54 = vld [vmem:[%s7524_s21 + $0x40] sm:$0xf]  ;;  %7181 = vmatmul.mubr.bf16.gmra.mxu1 %v7430_v35  ;;  %v6335_v35 = vld [vmem:[%s7524_s21 + $0x3c] sm:$0xe] }
 0x121   : > { %v6899_v0 = vpop.f32.mrf.mxu1  ;;  %v8652_v45 = vcombine.low %v4321_v4, %v4331_v23  ;;  %v4348_v62 = vrot.slane %v4346_v48, 4  ;;  %v4339_v13 = vor.u32 %v4338_v22, %v4335_v56  ;;  %v4360_v56 = vshll.u32 %v6253_v27, 16  ;;  %v6255_v23 = vld [vmem:[%s7524_s21 + $0x44] sm:$0x1]  ;;  %7184 = vmatprep.mubr.bf16.mxu1 %v7433_v36 }
 0x122   : > { %9382 = vst [vmem:[#allocation5_spill] sm:$0xff] %v8634_v31  ;;  %v8650_v49 = vadd.f32 %v6899_v0, %v6851_v59  ;;  %v619_v20 = vpop.f32.mrf.mxu0  ;;  %v4354_v31 = vrot.slane %v4352_v26, 5  ;;  %v4357_v59 = vshrl.u32 %v6253_v27, 16  ;;  %v8660_v4 = vsel %vm7627_vm4, %v6350_v5, %v5070_v14 }
 0x123   : > { %v924_v46 = vpop.f32.mrf.mxu1  ;;  %v4349_v47 = vor.u32 %v4348_v62, %v4344_v29  ;;  %v5072_v48 = vrot.slane %v5070_v14, 4  ;;  %v4370_v27 = vshrl.u32 %v6254_v54, 16  ;;  %v9386_v5 = vcombine.low %v8522_v33, %v8528_v30 }
 0x124   : > { %9384 = vst [vmem:[#allocation6_spill] sm:$0xff] %v8650_v49  ;;  %v8656_v1 = vadd.f32 %v924_v46, %v619_v20  ;;  %v6854_v40 = vpop.f32.mrf.mxu0  ;;  %v4340_v49 = vrot.slane %v4339_v13, 4  ;;  %v4359_v22 = vrot.slane %v4357_v59, 4  ;;  %v4366_v20 = vshll.u32 %v6254_v54, 16 }
 0x125   : > { %v6902_v0 = vpop.f32.mrf.mxu1  ;;  %v4350_v11 = vrot.slane %v4349_v47, 4  ;;  %v8669_v46 = vsel %vm7627_vm4, %v5072_v48, %v5073_v32  ;;  %v4362_v13 = vrot.slane %v4360_v56, 5  ;;  %v6256_v32 = vld [vmem:[%s7524_s21 + $0x48] sm:$0xf]  ;;  %v9388_v47 = vcombine.low %v8540_v52, %v8544_v34  ;;  %v7434_v56 = vld [vmem:[%s7524_s21 + $0xb4] sm:$0xff]  }
 0x126   : > { %v8662_v18 = vadd.f32 %v6902_v0, %v6854_v40  ;;  %v632_v12 = vpop.f32.mrf.mxu0  ;;  %v4345_v26 = vsel %vm7645_vm5, %v4340_v49, %v4344_v29  ;;  %v4368_v49 = vrot.slane %v4366_v20, 5  ;;  %v4372_v0 = vrot.slane %v4370_v27, 4  ;;  %v7437_v20 = vld [vmem:[%s7524_s21 + $0xc0] sm:$0xff]  }
 0x127   : > { %v937_v62 = vpop.f32.mrf.mxu1  ;;  %7137 = vmatmul.mubr.bf16.gmra.mxu0 %v9386_v5  ;;  %v4355_v36 = vsel %vm7645_vm5, %v4350_v11, %v4354_v31  ;;  %v4363_v30 = vor.u32 %v4362_v13, %v4359_v22  ;;  %v4376_v48 = vshll.u32 %v6255_v23, 16  ;;  %v6351_v11 = vrot.slane %v6335_v35, 9 }
 0x128   : > { %9385 = vst [vmem:[#allocation7_spill] sm:$0xff] %v8662_v18  ;;  %v8675_v14 = vadd.f32 %v937_v62, %v632_v12  ;;  %v6855_v40 = vpop.f32.mrf.mxu0  ;;  %7140 = vmatprep.mubr.bf16.mxu0 %v9388_v47  ;;  %v8685_v33 = vcombine.low %v4345_v26, %v4355_v36  ;;  %v5077_v62 = vrot.slane %v6254_v54, 5  ;;  %v5080_v5 = vrot.slane %v6255_v23, 5  ;;  %v6257_v47 = vld [vmem:[%s7524_s21 + $0x4c] sm:$0xf]  ;;  %7185 = vmatmul.mubr.bf16.gmra.mxu1 %v7434_v56 }
 0x129   : > { %v6903_v59 = vpop.f32.mrf.mxu1  ;;  %v4373_v52 = vor.u32 %v4372_v0, %v4368_v49  ;;  %v4378_v34 = vrot.slane %v4376_v48, 5  ;;  %v4381_v18 = vshrl.u32 %v6256_v32, 16  ;;  %v4384_v35 = vshll.u32 %v6256_v32, 16  ;;  %v6336_v32 = vld [vmem:[%s7524_s21 + $0x48] sm:$0xe]  ;;  %7188 = vmatprep.mubr.bf16.mxu1 %v7437_v20 }
 0x12a   : > { %9387 = vst [vmem:[#allocation8_spill] sm:$0xff] %v8675_v14  ;;  %v8688_v12 = vadd.f32 %v6903_v59, %v6855_v40  ;;  %v635_v31 = vpop.f32.mrf.mxu0  ;;  %v4364_v14 = vrot.slane %v4363_v30, 4  ;;  %v8696_v13 = vsel %vm7627_vm4, %v6351_v11, %v5077_v62  ;;  %v5079_v27 = vrot.slane %v5077_v62, 4  ;;  %v6258_v59 = vld [vmem:[%s7524_s21 + $0x50] sm:$0x1] }
 0x12b   : > { %v940_v29 = vpop.f32.mrf.mxu1  ;;  %v4374_v36 = vrot.slane %v4373_v52, 4  ;;  %v4383_v30 = vrot.slane %v4381_v18, 4  ;;  %v4386_v48 = vrot.slane %v4384_v35, 5  ;;  %v4394_v11 = vshrl.u32 %v6257_v47, 16  ;;  %v6259_v35 = vld [vmem:[%s7524_s21 + $0x54] sm:$0xf] }
 0x12c   : > { %v8692_v26 = vadd.f32 %v940_v29, %v635_v31  ;;  %v6922_v22 = vpop.f32.mrf.mxu0  ;;  %v4369_v40 = vsel %vm7645_vm5, %v4364_v14, %v4368_v49  ;;  %v8704_v0 = vsel %vm7627_vm4, %v5079_v27, %v5080_v5  ;;  %v4390_v31 = vshll.u32 %v6257_v47, 16 }
 0x12d   : > { %v1679_v54 = vadd.f32 %v6922_v22, %v8294_v28  ;;  %v6970_v23 = vpop.f32.mrf.mxu1  ;;  %v4379_v18 = vsel %vm7645_vm5, %v4374_v36, %v4378_v34  ;;  %v6383_v49 = vcombine.low %v8696_v13, %v8704_v0  ;;  %v9389_v56 = vcombine.low %v8562_v3, %v8572_v15 }
 0x12e   : > { %v1550_v29 = vpop.f32.mrf.mxu0  ;;  %v8717_v52 = vcombine.low %v4369_v40, %v4379_v18  ;;  %v4387_v20 = vor.u32 %v4386_v48, %v4383_v30  ;;  %v4392_v22 = vrot.slane %v4390_v31, 5  ;;  %v4396_v27 = vrot.slane %v4394_v11, 4 }
 0x12f   : > { %v8707_v28 = vadd.f32 %v6970_v23, %v1679_v54  ;;  %v1677_v62 = vadd.f32 %v1550_v29, %v8308_v53  ;;  %v2051_v14 = vpop.f32.mrf.mxu1  ;;  %7141 = vmatmul.mubr.bf16.gmra.mxu0 %v9389_v56  ;;  %v4400_v23 = vshll.u32 %v6258_v59, 16  ;;  %v6352_v36 = vrot.slane %v6336_v32, 9  ;;  %v7438_v29 = vld [vmem:[%s7524_s21 + $0xcc] sm:$0xff]  }
 0x130   : > { %v6923_v5 = vpop.f32.mrf.mxu0  ;;  %7208 = vmatprep.mubr.bf16.mxu0 %v8619_v38  ;;  %v4388_v15 = vrot.slane %v4387_v20, 4  ;;  %v4397_v56 = vor.u32 %v4396_v27, %v4392_v22  ;;  %v5084_v40 = vrot.slane %v6257_v47, 5  ;;  %v5087_v30 = vrot.slane %v6258_v59, 5  ;;  %v6261_v27 = vld [vmem:[%s7524_s21 + $0x5c] sm:$0x1]  ;;  %7189 = vmatmul.mubr.bf16.gmra.mxu1 %v7438_v29 }
 0x131   : > { %v8721_v53 = vadd.f32 %v2051_v14, %v1677_v62  ;;  %v1680_v34 = vadd.f32 %v6923_v5, %v8310_v60  ;;  %v6971_v54 = vpop.f32.mrf.mxu1  ;;  %v4402_v11 = vrot.slane %v4400_v23, 5  ;;  %v6260_v62 = vld [vmem:[%s7524_s21 + $0x58] sm:$0xf]  ;;  %v4405_v14 = vshrl.u32 %v6259_v35, 16 }
 0x132   : > { %v1553_v3 = vpop.f32.mrf.mxu0  ;;  %v4393_v60 = vsel %vm7645_vm5, %v4388_v15, %v4392_v22  ;;  %v4398_v32 = vrot.slane %v4397_v56, 4  ;;  %v8733_v5 = vsel %vm7627_vm4, %v6352_v36, %v5084_v40  ;;  %v5086_v47 = vrot.slane %v5084_v40, 4  ;;  %v6337_v56 = vld [vmem:[%s7524_s21 + $0x54] sm:$0xe] }
 0x133   : > { %v8725_v48 = vadd.f32 %v6971_v54, %v1680_v34  ;;  %v1678_v31 = vadd.f32 %v1553_v3, %v8318_v17  ;;  %v2054_v38 = vpop.f32.mrf.mxu1  ;;  %v4407_v34 = vrot.slane %v4405_v14, 4  ;;  %v4408_v54 = vshll.u32 %v6259_v35, 16 }
 0x134   : > { %v6926_v18 = vpop.f32.mrf.mxu0  ;;  %v4403_v22 = vsel %vm7645_vm5, %v4398_v32, %v4402_v11  ;;  %v8743_v3 = vsel %vm7627_vm4, %v5086_v47, %v5087_v30  ;;  %v4414_v36 = vshll.u32 %v6260_v62, 16  ;;  %v4418_v15 = vshrl.u32 %v6260_v62, 16 }
 0x135   : > { %v8735_v59 = vadd.f32 %v2054_v38, %v1678_v31  ;;  %v1683_v20 = vadd.f32 %v6926_v18, %v8327_v37  ;;  %v6974_v17 = vpop.f32.mrf.mxu1  ;;  %v9390_v40 = vcombine.low %v8590_v61, %v8603_v16  ;;  %v6312_v31 = vcombine.low %v4393_v60, %v4403_v22 }
 0x136   : > { %v1566_v23 = vpop.f32.mrf.mxu0  ;;  %v6384_v38 = vcombine.low %v8733_v5, %v8743_v3  ;;  %v4410_v11 = vrot.slane %v4408_v54, 5  ;;  %v4416_v14 = vrot.slane %v4414_v36, 5  ;;  %v4420_v18 = vrot.slane %v4418_v15, 4  ;;  %v6263_v54 = vld [vmem:[%s7524_s21 + $0x64] sm:$0xf] }
 0x137   : > { %7256 = vmatprep.mubr.bf16.mxu1 %v9390_v40  ;;  %v8749_v37 = vadd.f32 %v6974_v17, %v1683_v20  ;;  %v1681_v35 = vadd.f32 %v1566_v23, %v8339_v41  ;;  %v2067_v29 = vpop.f32.mrf.mxu1  ;;  %7209 = vmatmul.mubr.bf16.vlgmr.msra.gmra.mxu0 %v8652_v45  ;;  %v4424_v32 = vshll.u32 %v6261_v27, 16  ;;  %v6353_v47 = vrot.slane %v6337_v56, 9  ;;  %v6262_v20 = vld [vmem:[%s7524_s21 + $0x60] sm:$0xf] }
 0x138   : > { %v6927_v30 = vpop.f32.mrf.mxu0  ;;  %7212 = vmatprep.mubr.bf16.mxu0 %v8685_v33  ;;  %v5091_v60 = vrot.slane %v6260_v62, 5  ;;  %v4411_v23 = vor.u32 %v4410_v11, %v4407_v34  ;;  %v4421_v22 = vor.u32 %v4420_v18, %v4416_v14  ;;  %v5094_v40 = vrot.slane %v6261_v27, 5 }
 0x139   : > { %v8756_v61 = vadd.f32 %v2067_v29, %v1681_v35  ;;  %v1684_v41 = vadd.f32 %v6927_v30, %v8354_v7  ;;  %v6975_v16 = vpop.f32.mrf.mxu1  ;;  %v4426_v45 = vrot.slane %v4424_v32, 5  ;;  %v4429_v34 = vshrl.u32 %v6262_v20, 16 }
 0x13a   : > { %v1569_v17 = vpop.f32.mrf.mxu0  ;;  %v8766_v7 = vsel %vm7627_vm4, %v6353_v47, %v5091_v60  ;;  %v5093_v56 = vrot.slane %v5091_v60, 4  ;;  %v4412_v35 = vrot.slane %v4411_v23, 4  ;;  %v4422_v29 = vrot.slane %v4421_v22, 4 }
 0x13b   : > { %v8761_v36 = vadd.f32 %v6975_v16, %v1684_v41  ;;  %v1682_v33 = vadd.f32 %v1569_v17, %v8365_v25  ;;  %v2070_v15 = vpop.f32.mrf.mxu1  ;;  %v4432_v30 = vshll.u32 %v6262_v20, 16  ;;  %v6264_v25 = vld [vmem:[%s7524_s21 + $0x68] sm:$0x1]  ;;  %v4438_v41 = vshll.u32 %v6263_v54, 16  ;;  %v6338_v16 = vld [vmem:[%s7524_s21 + $0x60] sm:$0xe] }
 0x13c   : > { %v6930_v62 = vpop.f32.mrf.mxu0  ;;  %v8773_v32 = vsel %vm7627_vm4, %v5093_v56, %v5094_v40  ;;  %v9391_v47 = vcombine.low %v8626_v8, %v8638_v24  ;;  %v4417_v60 = vsel %vm7645_vm5, %v4412_v35, %v4416_v14  ;;  %v4427_v20 = vsel %vm7645_vm5, %v4422_v29, %v4426_v45  ;;  %v6265_v14 = vld [vmem:[%s7524_s21 + $0x6c] sm:$0xf] }
 0x13d   : > { %v8768_v11 = vadd.f32 %v2070_v15, %v1682_v33  ;;  %v1687_v27 = vadd.f32 %v6930_v62, %v8382_v51  ;;  %v6978_v18 = vpop.f32.mrf.mxu1  ;;  %v6385_v51 = vcombine.low %v8766_v7, %v8773_v32  ;;  %v4431_v23 = vrot.slane %v4429_v34, 4 }
 0x13e   : > { %7257 = vmatmul.mubr.bf16.vlgmr.msra.gmra.mxu1 %v9391_v47  ;;  %v1582_v17 = vpop.f32.mrf.mxu0  ;;  %v9392_v22 = vcombine.low %v8660_v4, %v8669_v46  ;;  %v6313_v33 = vcombine.low %v4417_v60, %v4427_v20  ;;  %v4434_v15 = vrot.slane %v4432_v30, 5  ;;  %v4440_v56 = vrot.slane %v4438_v41, 5 }
 0x13f   : > { %v8789_v40 = vadd.f32 %v6978_v18, %v1687_v27  ;;  %v1685_v8 = vadd.f32 %v1582_v17, %v8397_v58  ;;  %v2083_v24 = vpop.f32.mrf.mxu1  ;;  %7213 = vmatmul.mubr.bf16.gmra.mxu0 %v8717_v52  ;;  %v4442_v62 = vshrl.u32 %v6263_v54, 16  ;;  %v4448_v35 = vshll.u32 %v6264_v25, 16  ;;  %v6266_v52 = vld [vmem:[%s7524_s21 + $0x70] sm:$0xf] }
 0x140   : > { %7260 = vmatprep.mubr.bf16.mxu1 %v9392_v22  ;;  %v6931_v45 = vpop.f32.mrf.mxu0  ;;  %v6354_v29 = vrot.slane %v6338_v16, 9  ;;  %7216 = vmatprep.mubr.bf16.mxu0 %v6312_v31  ;;  %v4435_v27 = vor.u32 %v4434_v15, %v4431_v23  ;;  %v5098_v58 = vrot.slane %v6263_v54, 5  ;;  %v5101_v60 = vrot.slane %v6264_v25, 5 }
 0x141   : > { %v8794_v34 = vadd.f32 %v2083_v24, %v1685_v8  ;;  %v1688_v4 = vadd.f32 %v6931_v45, %v8405_v44  ;;  %v6979_v46 = vpop.f32.mrf.mxu1  ;;  %v4444_v30 = vrot.slane %v4442_v62, 4  ;;  %v4450_v47 = vrot.slane %v4448_v35, 5  ;;  %v6267_v8 = vld [vmem:[%s7524_s21 + $0x74] sm:$0x1] }
 0x142   : > { %v1585_v18 = vpop.f32.mrf.mxu0  ;;  %v4453_v20 = vshrl.u32 %v6265_v14, 16  ;;  %v4436_v16 = vrot.slane %v4435_v27, 4  ;;  %v8803_v44 = vsel %vm7627_vm4, %v6354_v29, %v5098_v58  ;;  %v5100_v22 = vrot.slane %v5098_v58, 4 }
 0x143   : > { %v8798_v17 = vadd.f32 %v6979_v46, %v1688_v4  ;;  %v1686_v41 = vadd.f32 %v1585_v18, %v8421_v55  ;;  %v2086_v31 = vpop.f32.mrf.mxu1  ;;  %v4445_v23 = vor.u32 %v4444_v30, %v4440_v56  ;;  %v4456_v15 = vshll.u32 %v6265_v14, 16  ;;  %v6339_v4 = vld [vmem:[%s7524_s21 + $0x6c] sm:$0xe] }
 0x144   : > { %v6934_v54 = vpop.f32.mrf.mxu0  ;;  %v4455_v24 = vrot.slane %v4453_v20, 4  ;;  %v4441_v45 = vsel %vm7645_vm5, %v4436_v16, %v4440_v56  ;;  %v4462_v35 = vshll.u32 %v6266_v52, 16  ;;  %v5102_v46 = vsel %vm7627_vm4, %v5100_v22, %v5101_v60 }
 0x145   : > { %v8806_v25 = vadd.f32 %v2086_v31, %v1686_v41  ;;  %v1691_v62 = vadd.f32 %v6934_v54, %v8438_v43  ;;  %v6982_v55 = vpop.f32.mrf.mxu1  ;;  %v4446_v29 = vrot.slane %v4445_v23, 4  ;;  %v4458_v14 = vrot.slane %v4456_v15, 5  ;;  %v6268_v31 = vld [vmem:[%s7524_s21 + $0x78] sm:$0xf] }
 0x146   : > { %7261 = vmatmul.mubr.bf16.gmra.mxu1 %v6383_v49  ;;  %v4466_v27 = vshrl.u32 %v6266_v52, 16  ;;  %v1598_v58 = vpop.f32.mrf.mxu0  ;;  %v6386_v43 = vcombine.low %v8803_v44, %v5102_v46  ;;  %v4464_v18 = vrot.slane %v4462_v35, 5  ;;  %v4472_v30 = vshll.u32 %v6267_v8, 16 }
 0x147   : > { %7264 = vmatprep.mubr.bf16.mxu1 %v6384_v38  ;;  %v8821_v56 = vadd.f32 %v6982_v55, %v1691_v62  ;;  %v2099_v13 = vpop.f32.mrf.mxu1  ;;  %7217 = vmatmul.mubr.bf16.gmra.mxu0 %v6313_v33  ;;  %v4451_v0 = vsel %vm7645_vm5, %v4446_v29, %v4450_v47  ;;  %v4459_v49 = vor.u32 %v4458_v14, %v4455_v24  ;;  %v6355_v20 = vrot.slane %v6339_v4, 9  ;;  %v6270_v4 = vld [vmem:[%s7524_s21 + $0x80] sm:$0x1]  ;;  %v6340_v29 = vld [vmem:[%s7524_s21 + $0x78] sm:$0xe] }
 0x148   : > { %v4468_v60 = vrot.slane %v4466_v27, 4  ;;  %v6935_v41 = vpop.f32.mrf.mxu0  ;;  %v6314_v16 = vcombine.low %v4441_v45, %v4451_v0  ;;  %v4474_v5 = vrot.slane %v4472_v30, 5  ;;  %v5105_v3 = vrot.slane %v6266_v52, 5 }
 0x149   : > { %v5108_v38 = vrot.slane %v6267_v8, 5  ;;  %v6983_v44 = vpop.f32.mrf.mxu1  ;;  %v4460_v23 = vrot.slane %v4459_v49, 4  ;;  %v1689_v33 = vadd.f32 %v1598_v58, %v8460_v19  ;;  %v1692_v54 = vadd.f32 %v6935_v41, %v8474_v50  ;;  %v6269_v8 = vld [vmem:[%s7524_s21 + $0x7c] sm:$0xf] }
 0x14a   : > { %v4469_v22 = vor.u32 %v4468_v60, %v4464_v18  ;;  %v1601_v47 = vpop.f32.mrf.mxu0  ;;  %7220 = vmatprep.mubr.bf16.mxu0 %v6314_v16  ;;  %v8830_v24 = vsel %vm7627_vm4, %v6355_v20, %v5105_v3  ;;  %v5107_v15 = vrot.slane %v5105_v3, 4  ;;  %v4477_v62 = vshrl.u32 %v6268_v31, 16  ;;  %v6271_v60 = vld [vmem:[%s7524_s21 + $0x84] sm:$0xf] }
 0x14b   : > { %v1690_v45 = vadd.f32 %v1601_v47, %v8492_v39  ;;  %v2102_v52 = vpop.f32.mrf.mxu1  ;;  %v4465_v55 = vsel %vm7645_vm5, %v4460_v23, %v4464_v18  ;;  %v8836_v19 = vadd.f32 %v2099_v13, %v1689_v33  ;;  %v8838_v50 = vadd.f32 %v6983_v44, %v1692_v54  ;;  %v6272_v23 = vld [vmem:[%s7524_s21 + $0x88] sm:$0xf] }
 0x14c   : > { %v4470_v35 = vrot.slane %v4469_v22, 4  ;;  %v6938_v46 = vpop.f32.mrf.mxu0  ;;  %v5109_v14 = vsel %vm7627_vm4, %v5107_v15, %v5108_v38  ;;  %v4479_v39 = vrot.slane %v4477_v62, 4  ;;  %v4480_v58 = vshll.u32 %v6268_v31, 16 }
 0x14d   : > { %v8844_v27 = vadd.f32 %v2102_v52, %v1690_v45  ;;  %v6986_v30 = vpop.f32.mrf.mxu1  ;;  %v6387_v13 = vcombine.low %v8830_v24, %v5109_v14  ;;  %v4486_v0 = vshll.u32 %v6269_v8, 16  ;;  %v4490_v49 = vshrl.u32 %v6269_v8, 16  ;;  %v6273_v52 = vld [vmem:[%s7524_s21 + $0x8c] sm:$0x1] }
 0x14e   : > { %7265 = vmatmul.mubr.bf16.gmra.mxu1 %v6385_v51  ;;  %v4475_v18 = vsel %vm7645_vm5, %v4470_v35, %v4474_v5  ;;  %v1614_v20 = vpop.f32.mrf.mxu0  ;;  %v4482_v16 = vrot.slane %v4480_v58, 5  ;;  %v4496_v3 = vshll.u32 %v6270_v4, 16  ;;  %v6356_v31 = vrot.slane %v6340_v29, 9  ;;  %v6341_v29 = vld [vmem:[%s7524_s21 + $0x84] sm:$0xe] }
 0x14f   : > { %7268 = vmatprep.mubr.bf16.mxu1 %v6386_v43  ;;  %v6315_v41 = vcombine.low %v4465_v55, %v4475_v18  ;;  %v2115_v38 = vpop.f32.mrf.mxu1  ;;  %v4488_v44 = vrot.slane %v4486_v0, 5  ;;  %v4492_v7 = vrot.slane %v4490_v49, 4  ;;  %v5112_v32 = vrot.slane %v6269_v8, 5 }
 0x150   : > { %v5115_v51 = vrot.slane %v6270_v4, 5  ;;  %v6939_v5 = vpop.f32.mrf.mxu0  ;;  %v4483_v22 = vor.u32 %v4482_v16, %v4479_v39  ;;  %v4498_v33 = vrot.slane %v4496_v3, 5  ;;  %v1695_v54 = vadd.f32 %v6938_v46, %v8518_v10 }
 0x151   : > { %7221 = vmatmul.mubr.bf16.gmra.mxu0 %v6315_v41  ;;  %v4501_v47 = vshrl.u32 %v6271_v60, 16  ;;  %v6987_v43 = vpop.f32.mrf.mxu1  ;;  %v4493_v24 = vor.u32 %v4492_v7, %v4488_v44  ;;  %v5113_v15 = vsel %vm7627_vm4, %v6356_v31, %v5112_v32  ;;  %v5114_v45 = vrot.slane %v5112_v32, 4  ;;  %v6274_v7 = vld [vmem:[%s7524_s21 + $0x90] sm:$0xf] }
 0x152   : > { %v4504_v62 = vshll.u32 %v6271_v60, 16  ;;  %v4484_v55 = vrot.slane %v4483_v22, 4  ;;  %v8858_v8 = vadd.f32 %v6986_v30, %v1695_v54  ;;  %v4510_v4 = vshll.u32 %v6272_v23, 16  ;;  %v1617_v14 = vpop.f32.mrf.mxu0 }
 0x153   : > { %v4503_v35 = vrot.slane %v4501_v47, 4  ;;  %v2118_v39 = vpop.f32.mrf.mxu1  ;;  %v4494_v58 = vrot.slane %v4493_v24, 4  ;;  %v5116_v10 = vsel %vm7627_vm4, %v5114_v45, %v5115_v51  ;;  %v4514_v18 = vshrl.u32 %v6272_v23, 16  ;;  %v9393_v45 = vld [vmem:[#allocation2_spill] sm:$0xff] }
 0x154   : > { %v4506_v46 = vrot.slane %v4504_v62, 5  ;;  %v4489_v0 = vsel %vm7645_vm5, %v4484_v55, %v4488_v44  ;;  %v6388_v49 = vcombine.low %v5113_v15, %v5116_v10  ;;  %v4512_v60 = vrot.slane %v4510_v4, 5  ;;  %v6942_v47 = vpop.f32.mrf.mxu0 }
 0x155   : > { %v4520_v41 = vshll.u32 %v6273_v52, 16  ;;  %v4499_v30 = vsel %vm7645_vm5, %v4494_v58, %v4498_v33  ;;  %v4516_v3 = vrot.slane %v4514_v18, 4  ;;  %v6357_v31 = vrot.slane %v6341_v29, 9  ;;  %v6990_v24 = vpop.f32.mrf.mxu1  ;;  %v6275_v29 = vld [vmem:[%s7524_s21 + $0x94] sm:$0xf] }
 0x156   : > { %7269 = vmatmul.mubr.bf16.gmra.mxu1 %v6387_v13  ;;  %v4507_v16 = vor.u32 %v4506_v46, %v4503_v35  ;;  %v6316_v32 = vcombine.low %v4489_v0, %v4499_v30  ;;  %v5119_v22 = vrot.slane %v6272_v23, 5  ;;  %v5122_v54 = vrot.slane %v6273_v52, 5  ;;  %v9394_v35 = vld [vmem:[#allocation3_spill] sm:$0xff]  ;;  %v8874_v52 = vpop.f32.mrf.mxu0  ;;  %v6276_v46 = vld [vmem:[%s7524_s21 + $0x98] sm:$0x1] }
 0x157   : > { %7272 = vmatprep.mubr.bf16.mxu1 %v6388_v49  ;;  %v4522_v51 = vrot.slane %v4520_v41, 5  ;;  %v4517_v15 = vor.u32 %v4516_v3, %v4512_v60  ;;  %v1693_v13 = vadd.f32 %v1614_v20, %v8547_v2  ;;  %v1696_v33 = vadd.f32 %v6939_v5, %v9393_v45  ;;  %v8876_v58 = vpop.f32.mrf.mxu1  ;;  %v6342_v18 = vld [vmem:[%s7524_s21 + $0x90] sm:$0xe]  ;;  %v6278_v45 = vld [vmem:[%s7524_s21 + $0xa0] sm:$0xf] }
 0x158   : > { %v4508_v44 = vrot.slane %v4507_v16, 4  ;;  %7224 = vmatprep.mubr.bf16.mxu0 %v6316_v32  ;;  %v5120_v62 = vsel %vm7627_vm4, %v6357_v31, %v5119_v22  ;;  %v5121_v55 = vrot.slane %v5119_v22, 4  ;;  %v1694_v4 = vadd.f32 %v1617_v14, %v9394_v35  ;;  %v6943_v30 = vpop.f32.mrf.mxu0  ;;  %v6277_v31 = vld [vmem:[%s7524_s21 + $0x9c] sm:$0xf] }
 0x159   : > { %v4525_v23 = vshrl.u32 %v6274_v7, 16  ;;  %v4518_v2 = vrot.slane %v4517_v15, 4  ;;  %v8880_v20 = vadd.f32 %v2115_v38, %v1693_v13  ;;  %v8882_v5 = vadd.f32 %v6987_v43, %v1696_v33  ;;  %v8890_v16 = vpop.f32.mrf.mxu1 }
 0x15a   : > { %v4513_v10 = vsel %vm7645_vm5, %v4508_v44, %v4512_v60  ;;  %v5123_v14 = vsel %vm7627_vm4, %v5121_v55, %v5122_v54  ;;  %v8888_v0 = vadd.f32 %v2118_v39, %v1694_v4  ;;  %v4528_v41 = vshll.u32 %v6274_v7, 16  ;;  %v1633_v35 = vpop.f32.mrf.mxu0 }
 0x15b   : > { %9395 = vst [vmem:[#allocation2_spill] sm:$0xff] %v8880_v20  ;;  %9396 = vst [vmem:[#allocation3_spill] sm:$0xff] %v8882_v5  ;;  %v4527_v49 = vrot.slane %v4525_v23, 4  ;;  %v4523_v60 = vsel %vm7645_vm5, %v4518_v2, %v4522_v51  ;;  %v6389_v38 = vcombine.low %v5120_v62, %v5123_v14  ;;  %v4534_v3 = vshll.u32 %v6275_v29, 16  ;;  %v2134_v4 = vpop.f32.mrf.mxu1 }
 0x15c   : > { %9397 = vst [vmem:[#allocation9_spill] sm:$0xff] %v8888_v0  ;;  %v4538_v43 = vshrl.u32 %v6275_v29, 16  ;;  %v6317_v32 = vcombine.low %v4513_v10, %v4523_v60  ;;  %v4530_v22 = vrot.slane %v4528_v41, 5  ;;  %v4544_v44 = vshll.u32 %v6276_v46, 16 }
 0x15d   : > { %v6358_v15 = vrot.slane %v6342_v18, 9  ;;  %v4536_v39 = vrot.slane %v4534_v3, 5  ;;  %v5126_v7 = vrot.slane %v6275_v29, 5  ;;  %v5129_v13 = vrot.slane %v6276_v46, 5  ;;  %v6279_v18 = vld [vmem:[%s7524_s21 + $0xa4] sm:$0x1] }
 0x15e   : > { %7273 = vmatmul.mubr.bf16.gmra.mxu1 %v6389_v38  ;;  %v4540_v54 = vrot.slane %v4538_v43, 4  ;;  %7225 = vmatmul.mubr.bf16.gmra.mxu0 %v6317_v32  ;;  %v4531_v33 = vor.u32 %v4530_v22, %v4527_v49  ;;  %v4546_v55 = vrot.slane %v4544_v44, 5  ;;  %v1699_v51 = vadd.f32 %v6942_v47, %v8586_v57  ;;  %v6343_v49 = vld [vmem:[%s7524_s21 + $0x9c] sm:$0xe] }
 0x15f   : > { %v4549_v62 = vshrl.u32 %v6277_v31, 16  ;;  %v5127_v10 = vsel %vm7627_vm4, %v6358_v15, %v5126_v7  ;;  %v5128_v2 = vrot.slane %v5126_v7, 4  ;;  %v4552_v14 = vshll.u32 %v6277_v31, 16  ;;  %v6946_v31 = vpop.f32.mrf.mxu0  ;;  %v8907_v15 = vpop.f32.mrf.mxu1 }
 0x160   : > { %v4541_v23 = vor.u32 %v4540_v54, %v4536_v39  ;;  %v4532_v41 = vrot.slane %v4531_v33, 4  ;;  %v8900_v29 = vadd.f32 %v6990_v24, %v1699_v51  ;;  %v4558_v60 = vshll.u32 %v6278_v45, 16  ;;  %v6280_v51 = vld [vmem:[%s7524_s21 + $0xa8] sm:$0xf] }
 0x161   : > { %v4551_v46 = vrot.slane %v4549_v62, 4  ;;  %v5130_v57 = vsel %vm7627_vm4, %v5128_v2, %v5129_v13  ;;  %v4554_v47 = vrot.slane %v4552_v14, 5  ;;  %v4562_v3 = vshrl.u32 %v6278_v45, 16 }
 0x162   : > { %9398 = vst [vmem:[#allocation10_spill] sm:$0xff] %v8900_v29  ;;  %v4542_v38 = vrot.slane %v4541_v23, 4  ;;  %v4537_v43 = vsel %vm7645_vm5, %v4532_v41, %v4536_v39  ;;  %v6390_v32 = vcombine.low %v5127_v10, %v5130_v57  ;;  %v4560_v22 = vrot.slane %v4558_v60, 5  ;;  %v8912_v39 = vpop.f32.mrf.mxu0  ;;  %v8914_v10 = vpop.f32.mrf.mxu1 }
 0x163   : > { %v4568_v44 = vshll.u32 %v6279_v18, 16  ;;  %v4555_v54 = vor.u32 %v4554_v47, %v4551_v46  ;;  %v4564_v7 = vrot.slane %v4562_v3, 4  ;;  %v6359_v33 = vrot.slane %v6343_v49, 9  ;;  %v9399_v46 = vld [vmem:[#allocation4_spill] sm:$0xff] }
 0x164   : > { %v4547_v24 = vsel %vm7645_vm5, %v4542_v38, %v4546_v55  ;;  %7276 = vmatprep.mubr.bf16.mxu1 %v6390_v32  ;;  %v5133_v23 = vrot.slane %v6278_v45, 5  ;;  %v5136_v2 = vrot.slane %v6279_v18, 5  ;;  %v1697_v55 = vadd.f32 %v8874_v52, %v8595_v42  ;;  %v6281_v18 = vld [vmem:[%s7524_s21 + $0xac] sm:$0xf]  ;;  %v8923_v47 = vpop.f32.mrf.mxu0  ;;  %v8925_v3 = vpop.f32.mrf.mxu1  ;;  %v6282_v32 = vld [vmem:[%s7524_s21 + $0xb0] sm:$0x1] }
 0x165   : > { %v6318_v13 = vcombine.low %v4537_v43, %v4547_v24  ;;  %v4570_v62 = vrot.slane %v4568_v44, 5  ;;  %v4556_v14 = vrot.slane %v4555_v54, 4  ;;  %v4565_v41 = vor.u32 %v4564_v7, %v4560_v22  ;;  %v6344_v44 = vld [vmem:[%s7524_s21 + $0xa8] sm:$0xe] }
 0x166   : > { %v1700_v60 = vadd.f32 %v6943_v30, %v9399_v46  ;;  %v5134_v49 = vsel %vm7627_vm4, %v6359_v33, %v5133_v23  ;;  %v5135_v38 = vrot.slane %v5133_v23, 4  ;;  %v1698_v45 = vadd.f32 %v1633_v35, %v8617_v6  ;;  %v8944_v46 = vpop.f32.mrf.mxu1 }
 0x167   : > { %7228 = vmatprep.mubr.bf16.mxu0 %v6318_v13  ;;  %v4573_v57 = vshrl.u32 %v6280_v51, 16  ;;  %v4561_v43 = vsel %vm7645_vm5, %v4556_v14, %v4560_v22  ;;  %v4566_v42 = vrot.slane %v4565_v41, 4  ;;  %v8930_v52 = vadd.f32 %v8876_v58, %v1697_v55  ;;  %v6283_v13 = vld [vmem:[%s7524_s21 + $0xb4] sm:$0xf]  ;;  %v1649_v55 = vpop.f32.mrf.mxu0 }
 0x168   : > { %v8933_v30 = vadd.f32 %v8890_v16, %v1700_v60  ;;  %v5137_v6 = vsel %vm7627_vm4, %v5135_v38, %v5136_v2  ;;  %v8939_v35 = vadd.f32 %v2134_v4, %v1698_v45  ;;  %v4576_v54 = vshll.u32 %v6280_v51, 16 }
 0x169   : > { %9400 = vst [vmem:[#allocation4_spill] sm:$0xff] %v8930_v52  ;;  %v4575_v24 = vrot.slane %v4573_v57, 4  ;;  %v4571_v7 = vsel %vm7645_vm5, %v4566_v42, %v4570_v62  ;;  %v6391_v22 = vcombine.low %v5134_v49, %v5137_v6  ;;  %v4582_v33 = vshll.u32 %v6281_v18, 16  ;;  %v6284_v62 = vld [vmem:[%s7524_s21 + $0xb8] sm:$0xf] }
 0x16a   : > { %9401 = vst [vmem:[#allocation11_spill] sm:$0xff] %v8933_v30  ;;  %9402 = vst [vmem:[#allocation12_spill] sm:$0xff] %v8939_v35  ;;  %v4586_v58 = vshrl.u32 %v6281_v18, 16  ;;  %v6319_v23 = vcombine.low %v4561_v43, %v4571_v7  ;;  %v4578_v16 = vrot.slane %v4576_v54, 5  ;;  %v4592_v14 = vshll.u32 %v6282_v32, 16  ;;  %v9404_v35 = vld [vmem:[#allocation5_spill] sm:$0xff] }
 0x16b   : > { %v6360_v41 = vrot.slane %v6344_v44, 9  ;;  %7277 = vmatmul.mubr.bf16.gmra.mxu1 %v6391_v22  ;;  %v4584_v4 = vrot.slane %v4582_v33, 5  ;;  %v5140_v51 = vrot.slane %v6281_v18, 5  ;;  %v5143_v60 = vrot.slane %v6282_v32, 5  ;;  %v6285_v6 = vld [vmem:[%s7524_s21 + $0xbc] sm:$0x1] }
 0x16c   : > { %v4588_v2 = vrot.slane %v4586_v58, 4  ;;  %7229 = vmatmul.mubr.bf16.gmra.mxu0 %v6319_v23  ;;  %v4579_v49 = vor.u32 %v4578_v16, %v4575_v24  ;;  %v4594_v38 = vrot.slane %v4592_v14, 5  ;;  %v1703_v45 = vadd.f32 %v6946_v31, %v8622_v9  ;;  %v6345_v33 = vld [vmem:[%s7524_s21 + $0xb4] sm:$0xe]  ;;  %v8955_v58 = vpop.f32.mrf.mxu0  ;;  %v8957_v24 = vpop.f32.mrf.mxu1 }
 0x16d   : > { %v4597_v57 = vshrl.u32 %v6283_v13, 16  ;;  %v5141_v42 = vsel %vm7627_vm4, %v6360_v41, %v5140_v51  ;;  %v5142_v44 = vrot.slane %v5140_v51, 4  ;;  %v4600_v54 = vshll.u32 %v6283_v13, 16 }
 0x16e   : > { %v4589_v43 = vor.u32 %v4588_v2, %v4584_v4  ;;  %v4580_v7 = vrot.slane %v4579_v49, 4  ;;  %v8952_v22 = vadd.f32 %v8907_v15, %v1703_v45  ;;  %v4606_v32 = vshll.u32 %v6284_v62, 16  ;;  %v8963_v2 = vpop.f32.mrf.mxu0  ;;  %v8965_v51 = vpop.f32.mrf.mxu1 }
 0x16f   : > { %v4599_v18 = vrot.slane %v4597_v57, 4  ;;  %v5144_v31 = vsel %vm7627_vm4, %v5142_v44, %v5143_v60  ;;  %v4602_v23 = vrot.slane %v4600_v54, 5  ;;  %v4610_v16 = vshrl.u32 %v6284_v62, 16 }
 0x170   : > { %9403 = vst [vmem:[#allocation13_spill] sm:$0xff] %v8952_v22  ;;  %v4590_v9 = vrot.slane %v4589_v43, 4  ;;  %v4585_v13 = vsel %vm7645_vm5, %v4580_v7, %v4584_v4  ;;  %v6392_v14 = vcombine.low %v5141_v42, %v5144_v31  ;;  %v4608_v15 = vrot.slane %v4606_v32, 5  ;;  %v6286_v22 = vld [vmem:[%s7524_s21 + $0xc0] sm:$0xf]  ;;  %v8970_v42 = vpop.f32.mrf.mxu0  ;;  %v8972_v7 = vpop.f32.mrf.mxu1 }
 0x171   : > { %v4616_v41 = vshll.u32 %v6285_v6, 16  ;;  %v4603_v45 = vor.u32 %v4602_v23, %v4599_v18  ;;  %v4612_v57 = vrot.slane %v4610_v16, 4  ;;  %v6361_v43 = vrot.slane %v6345_v33, 9  ;;  %v9405_v18 = vld [vmem:[#allocation6_spill] sm:$0xff] }
 0x172   : > { %v4595_v49 = vsel %vm7645_vm5, %v4590_v9, %v4594_v38  ;;  %7280 = vmatprep.mubr.bf16.mxu1 %v6392_v14  ;;  %v5147_v54 = vrot.slane %v6284_v62, 5  ;;  %v5150_v4 = vrot.slane %v6285_v6, 5  ;;  %v1701_v38 = vadd.f32 %v8912_v39, %v9404_v35  ;;  %v6287_v23 = vld [vmem:[%s7524_s21 + $0xc4] sm:$0xf]  ;;  %v6288_v35 = vld [vmem:[%s7524_s21 + $0xc8] sm:$0x1] }
 0x173   : > { %v6320_v60 = vcombine.low %v4585_v13, %v4595_v49  ;;  %v4618_v44 = vrot.slane %v4616_v41, 5  ;;  %v4604_v32 = vrot.slane %v4603_v45, 4  ;;  %v4613_v31 = vor.u32 %v4612_v57, %v4608_v15  ;;  %v8982_v13 = vpop.f32.mrf.mxu0  ;;  %v6346_v49 = vld [vmem:[%s7524_s21 + $0xc0] sm:$0xe]  ;;  %v8994_v45 = vpop.f32.mrf.mxu1 }
 0x174   : > { %v1704_v33 = vadd.f32 %v8923_v47, %v9405_v18  ;;  %v5148_v9 = vsel %vm7627_vm4, %v6361_v43, %v5147_v54  ;;  %v5149_v62 = vrot.slane %v5147_v54, 4  ;;  %v1702_v6 = vadd.f32 %v1649_v55, %v8656_v1 }
 0x175   : > { %7232 = vmatprep.mubr.bf16.mxu0 %v6320_v60  ;;  %v4621_v16 = vshrl.u32 %v6286_v22, 16  ;;  %v4609_v14 = vsel %vm7645_vm5, %v4604_v32, %v4608_v15  ;;  %v4614_v41 = vrot.slane %v4613_v31, 4  ;;  %v8987_v39 = vadd.f32 %v8914_v10, %v1701_v38  ;;  %v9001_v43 = vpop.f32.mrf.mxu0  ;;  %v6289_v32 = vld [vmem:[%s7524_s21 + $0xcc] sm:$0xf] }
 0x176   : > { %v8990_v47 = vadd.f32 %v8925_v3, %v1704_v33  ;;  %v5151_v1 = vsel %vm7627_vm4, %v5149_v62, %v5150_v4  ;;  %v8999_v55 = vadd.f32 %v8944_v46, %v1702_v6  ;;  %v4624_v15 = vshll.u32 %v6286_v22, 16 }
 0x177   : > { %9406 = vst [vmem:[#allocation5_spill] sm:$0xff] %v8987_v39  ;;  %v4623_v57 = vrot.slane %v4621_v16, 4  ;;  %v4619_v10 = vsel %vm7645_vm5, %v4614_v41, %v4618_v44  ;;  %v6393_v3 = vcombine.low %v5148_v9, %v5151_v1  ;;  %v4630_v60 = vshll.u32 %v6287_v23, 16  ;;  %v9006_v4 = vpop.f32.mrf.mxu0  ;;  %v6290_v16 = vld [vmem:[%s7524_s21 + $0xd0] sm:$0xf]  ;;  %v9409_v41 = vld [vmem:[#allocation7_spill] sm:$0xff] }
 0x178   : > { %9407 = vst [vmem:[#allocation6_spill] sm:$0xff] %v8990_v47  ;;  %9408 = vst [vmem:[#allocation14_spill] sm:$0xff] %v8999_v55  ;;  %v4634_v54 = vshrl.u32 %v6287_v23, 16  ;;  %v6321_v31 = vcombine.low %v4609_v14, %v4619_v10  ;;  %v4626_v38 = vrot.slane %v4624_v15, 5  ;;  %v4640_v18 = vshll.u32 %v6288_v35, 16  ;;  %v7066_v55 = vpop.f32.mrf.mxu1 }
 0x179   : > { %v6362_v33 = vrot.slane %v6346_v49, 9  ;;  %7281 = vmatmul.mubr.bf16.gmra.mxu1 %v6393_v3  ;;  %v4632_v46 = vrot.slane %v4630_v60, 5  ;;  %v5154_v62 = vrot.slane %v6287_v23, 5  ;;  %v5157_v6 = vrot.slane %v6288_v35, 5  ;;  %v7019_v15 = vpop.f32.mrf.mxu0  ;;  %v6291_v60 = vld [vmem:[%s7524_s21 + $0xd4] sm:$0x1] }
 0x17a   : > { %v4636_v22 = vrot.slane %v4634_v54, 4  ;;  %7233 = vmatmul.mubr.bf16.gmra.mxu0 %v6321_v31  ;;  %v4627_v44 = vor.u32 %v4626_v38, %v4623_v57  ;;  %v4642_v9 = vrot.slane %v4640_v18, 5  ;;  %v1707_v14 = vadd.f32 %v8955_v58, %v9409_v41  ;;  %v3192_v23 = vpop.f32.mrf.mxu1  ;;  %v6347_v38 = vld [vmem:[%s7524_s21 + $0xcc] sm:$0xe] }
 0x17b   : > { %v4645_v1 = vshrl.u32 %v6289_v32, 16  ;;  %v5155_v10 = vsel %vm7627_vm4, %v6362_v33, %v5154_v62  ;;  %v5156_v3 = vrot.slane %v5154_v62, 4  ;;  %v4648_v54 = vshll.u32 %v6289_v32, 16  ;;  %v2441_v18 = vpop.f32.mrf.mxu0 }
 0x17c   : > { %v4637_v49 = vor.u32 %v4636_v22, %v4632_v46  ;;  %v4628_v35 = vrot.slane %v4627_v44, 4  ;;  %v9015_v47 = vadd.f32 %v8957_v24, %v1707_v14  ;;  %v4654_v57 = vshll.u32 %v6290_v16, 16  ;;  %v7067_v30 = vpop.f32.mrf.mxu1 }
 0x17d   : > { %v4647_v31 = vrot.slane %v4645_v1, 4  ;;  %v5158_v58 = vsel %vm7627_vm4, %v5156_v3, %v5157_v6  ;;  %v4650_v22 = vrot.slane %v4648_v54, 5  ;;  %v4658_v41 = vshrl.u32 %v6290_v16, 16  ;;  %v7022_v52 = vpop.f32.mrf.mxu0 }
 0x17e   : > { %9410 = vst [vmem:[#allocation7_spill] sm:$0xff] %v9015_v47  ;;  %v4638_v39 = vrot.slane %v4637_v49, 4  ;;  %v4633_v33 = vsel %vm7645_vm5, %v4628_v35, %v4632_v46  ;;  %v6394_v32 = vcombine.low %v5155_v10, %v5158_v58  ;;  %v4656_v62 = vrot.slane %v4654_v57, 5  ;;  %v3195_v49 = vpop.f32.mrf.mxu1  ;;  %v9411_v46 = vld [vmem:[#allocation8_spill] sm:$0xff] }
 0x17f   : > { %v4664_v44 = vshll.u32 %v6291_v60, 16  ;;  %v4651_v14 = vor.u32 %v4650_v22, %v4647_v31  ;;  %v4660_v1 = vrot.slane %v4658_v41, 4  ;;  %v6363_v47 = vrot.slane %v6347_v38, 9  ;;  %v2454_v0 = vpop.f32.mrf.mxu0 }
 0x180   : > { %v4643_v24 = vsel %vm7645_vm5, %v4638_v39, %v4642_v9  ;;  %7284 = vmatprep.mubr.bf16.mxu1 %v6394_v32  ;;  %v5161_v3 = vrot.slane %v6290_v16, 5  ;;  %v5164_v54 = vrot.slane %v6291_v60, 5  ;;  %v1705_v10 = vadd.f32 %v8963_v2, %v9411_v46  ;;  %v7070_v57 = vpop.f32.mrf.mxu1 }
 0x181   : > { %v6322_v29 = vcombine.low %v4633_v33, %v4643_v24  ;;  %v4666_v6 = vrot.slane %v4664_v44, 5  ;;  %v4652_v5 = vrot.slane %v4651_v14, 4  ;;  %v4661_v20 = vor.u32 %v4660_v1, %v4656_v62  ;;  %v7023_v60 = vpop.f32.mrf.mxu0 }
 0x182   : > { %v1708_v35 = vadd.f32 %v8970_v42, %v8688_v12  ;;  %v5162_v39 = vsel %vm7627_vm4, %v6363_v47, %v5161_v3  ;;  %v5163_v9 = vrot.slane %v5161_v3, 4  ;;  %v1706_v31 = vadd.f32 %v8982_v13, %v8692_v26 }
 0x183   : > { %7236 = vmatprep.mubr.bf16.mxu0 %v6322_v29  ;;  %v2567_v16 = vadd.f32 %v9001_v43, %v8707_v28  ;;  %v4657_v38 = vsel %vm7645_vm5, %v4652_v5, %v4656_v62  ;;  %v4662_v2 = vrot.slane %v4661_v20, 4  ;;  %v9037_v58 = vadd.f32 %v8965_v51, %v1705_v10  ;;  %v3208_v29 = vpop.f32.mrf.mxu1  ;;  %v2457_v5 = vpop.f32.mrf.mxu0 }
 0x184   : > { %v9040_v12 = vadd.f32 %v8972_v7, %v1708_v35  ;;  %v5165_v42 = vsel %vm7627_vm4, %v5163_v9, %v5164_v54  ;;  %v9045_v26 = vadd.f32 %v8994_v45, %v1706_v31  ;;  %v2565_v28 = vadd.f32 %v9006_v4, %v8721_v53 }
 0x185   : > { %v9047_v13 = vadd.f32 %v7066_v55, %v2567_v16  ;;  %v4667_v20 = vsel %vm7645_vm5, %v4662_v2, %v4666_v6  ;;  %v6395_v51 = vcombine.low %v5162_v39, %v5165_v42  ;;  %v2568_v7 = vadd.f32 %v7019_v15, %v8725_v48  ;;  %v7071_v43 = vpop.f32.mrf.mxu1  ;;  %v7026_v41 = vpop.f32.mrf.mxu0  ;;  %v9412_v2 = vld [vmem:[#allocation2_spill] sm:$0xff] }
 0x186   : > { %v2566_v47 = vadd.f32 %v2441_v18, %v8735_v59  ;;  %v6323_v63 = vcombine.low %v4657_v38, %v4667_v20  ;;  %v9055_v22 = vadd.f32 %v3192_v23, %v2565_v28  ;;  %v2571_v45 = vadd.f32 %v7022_v52, %v8749_v37 }
 0x187   : > { %v2569_v55 = vadd.f32 %v2454_v0, %v8756_v61  ;;  %7285 = vmatmul.mubr.bf16.gmra.mxu1 %v6395_v51  ;;  %v9059_v53 = vadd.f32 %v7067_v30, %v2568_v7  ;;  %v2572_v21 = vadd.f32 %v7023_v60, %v8761_v36  ;;  %v2570_v48 = vadd.f32 %v2457_v5, %v8768_v11  ;;  %v3211_v15 = vpop.f32.mrf.mxu1  ;;  %v2470_v52 = vpop.f32.mrf.mxu0  ;;  %v9413_v5 = vld [vmem:[#allocation3_spill] sm:$0xff] }
 0x188   : > { %v9061_v4 = vadd.f32 %v3195_v49, %v2566_v47  ;;  %7237 = vmatmul.mubr.bf16.gmra.mxu0 %v6323_v63  ;;  %v9065_v59 = vadd.f32 %v7070_v57, %v2571_v45  ;;  %v2575_v37 = vadd.f32 %v7026_v41, %v8789_v40  ;;  %v2573_v30 = vadd.f32 %v2470_v52, %v8794_v34  ;;  %v9414_v47 = vld [vmem:[#allocation9_spill] sm:$0xff] }
 0x189   : > { %v9067_v23 = vadd.f32 %v3208_v29, %v2569_v55  ;;  %v9070_v61 = vadd.f32 %v7071_v43, %v2572_v21  ;;  %v9072_v0 = vadd.f32 %v3211_v15, %v2570_v48  ;;  %v7027_v18 = vpop.f32.mrf.mxu0  ;;  %v7074_v33 = vpop.f32.mrf.mxu1  ;;  %v9415_v55 = vld [vmem:[#allocation10_spill] sm:$0xff] }
 0x18a   : > { %v2576_v36 = vadd.f32 %v7027_v18, %v8798_v17  ;;  %v9076_v11 = vadd.f32 %v7074_v33, %v2575_v37  ;;  %v9416_v37 = vld [vmem:[#allocation4_spill] sm:$0xff] }
 0x18b   : > { %v2473_v32 = vpop.f32.mrf.mxu0  ;;  %v3224_v62 = vpop.f32.mrf.mxu1 }
 0x18c   : > { %v2574_v44 = vadd.f32 %v2473_v32, %v8806_v25  ;;  %v9079_v24 = vadd.f32 %v3224_v62, %v2573_v30 }
 0x18d   : > { %v7030_v40 = vpop.f32.mrf.mxu0  ;;  %v7075_v14 = vpop.f32.mrf.mxu1 }
 0x18e   : > { %v2579_v1 = vadd.f32 %v7030_v40, %v8821_v56  ;;  %v9082_v49 = vadd.f32 %v7075_v14, %v2576_v36  ;;  %v9417_v36 = vld [vmem:[#allocation11_spill] sm:$0xff]  ;;  %v9418_v14 = vld [vmem:[#allocation12_spill] sm:$0xff] }
 0x18f   : > { %v2486_v6 = vpop.f32.mrf.mxu0  ;;  %v3227_v34 = vpop.f32.mrf.mxu1 }
 0x190   : > { %v2577_v3 = vadd.f32 %v2486_v6, %v8836_v19  ;;  %v9085_v54 = vadd.f32 %v3227_v34, %v2574_v44 }
 0x191   : > { %v7031_v17 = vpop.f32.mrf.mxu0  ;;  %v7078_v46 = vpop.f32.mrf.mxu1 }
 0x192   : > { %v2580_v10 = vadd.f32 %v7031_v17, %v8838_v50  ;;  %v9088_v35 = vadd.f32 %v7078_v46, %v2579_v1  ;;  %v9419_v17 = vld [vmem:[#allocation13_spill] sm:$0xff] }
 0x193   : > { %v2489_v25 = vpop.f32.mrf.mxu0  ;;  %v3240_v57 = vpop.f32.mrf.mxu1 }
 0x194   : > { %v2578_v39 = vadd.f32 %v2489_v25, %v8844_v27  ;;  %v9091_v9 = vadd.f32 %v3240_v57, %v2577_v3 }
 0x195   : > { %v7034_v56 = vpop.f32.mrf.mxu0  ;;  %v7079_v31 = vpop.f32.mrf.mxu1 }
 0x196   : > { %v2583_v16 = vadd.f32 %v7034_v56, %v8858_v8  ;;  %v9094_v60 = vadd.f32 %v7079_v31, %v2580_v10 }
 0x197   : > { %v2502_v19 = vpop.f32.mrf.mxu0  ;;  %v3243_v38 = vpop.f32.mrf.mxu1 }
 0x198   : > { %v2581_v29 = vadd.f32 %v2502_v19, %v9412_v2  ;;  %v9097_v42 = vadd.f32 %v3243_v38, %v2578_v39  ;;  %v9420_v39 = vld [vmem:[#allocation5_spill] sm:$0xff]  ;;  %v9421_v19 = vld [vmem:[#allocation6_spill] sm:$0xff] }
 0x199   : > { %v7035_v50 = vpop.f32.mrf.mxu0  ;;  %v7082_v28 = vpop.f32.mrf.mxu1 }
 0x19a   : > { %v2584_v20 = vadd.f32 %v7035_v50, %v9413_v5  ;;  %v9100_v51 = vadd.f32 %v7082_v28, %v2583_v16  ;;  %v9422_v50 = vld [vmem:[#allocation14_spill] sm:$0xff] }
 0x19b   : > { %v2505_v27 = vpop.f32.mrf.mxu0  ;;  %v3256_v7 = vpop.f32.mrf.mxu1 }
 0x19c   : > { %v2582_v43 = vadd.f32 %v2505_v27, %v9414_v47  ;;  %v9103_v63 = vadd.f32 %v3256_v7, %v2581_v29  ;;  %v9423_v7 = vld [vmem:[#allocation7_spill] sm:$0xff] }
 0x19d   : > { %v7038_v8 = vpop.f32.mrf.mxu0  ;;  %v7083_v45 = vpop.f32.mrf.mxu1 }
 0x19e   : > { %v2587_v41 = vadd.f32 %v7038_v8, %v9415_v55  ;;  %v9106_v21 = vadd.f32 %v7083_v45, %v2584_v20 }
 0x19f   : > { %v2518_v48 = vpop.f32.mrf.mxu0  ;;  %v3259_v15 = vpop.f32.mrf.mxu1 }
 0x1a0   : > { %v2585_v52 = vadd.f32 %v2518_v48, %v9416_v37  ;;  %v9109_v30 = vadd.f32 %v3259_v15, %v2582_v43 }
 0x1a1   : > { %v7039_v18 = vpop.f32.mrf.mxu0  ;;  %v7086_v33 = vpop.f32.mrf.mxu1 }
 0x1a2   : > { %v2588_v32 = vadd.f32 %v7039_v18, %v9417_v36  ;;  %v9112_v62 = vadd.f32 %v7086_v33, %v2587_v41 }
 0x1a3   : > { %v2521_v44 = vpop.f32.mrf.mxu0  ;;  %v3272_v40 = vpop.f32.mrf.mxu1 }
 0x1a4   : > { %v2586_v1 = vadd.f32 %v2521_v44, %v9418_v14  ;;  %v9115_v6 = vadd.f32 %v3272_v40, %v2585_v52 }
 0x1a5   : > { %v7042_v34 = vpop.f32.mrf.mxu0  ;;  %v7087_v3 = vpop.f32.mrf.mxu1 }
 0x1a6   : > { %v2591_v46 = vadd.f32 %v7042_v34, %v9419_v17  ;;  %v9118_v10 = vadd.f32 %v7087_v3, %v2588_v32 }
 0x1a7   : > { %v2534_v25 = vpop.f32.mrf.mxu0  ;;  %v3275_v57 = vpop.f32.mrf.mxu1 }
 0x1a8   : > { %v2589_v56 = vadd.f32 %v2534_v25, %v9420_v39  ;;  %v9121_v31 = vadd.f32 %v3275_v57, %v2586_v1 }
 0x1a9   : > { %v7043_v16 = vpop.f32.mrf.mxu0  ;;  %v7090_v29 = vpop.f32.mrf.mxu1 }
 0x1aa   : > { %v2592_v38 = vadd.f32 %v7043_v16, %v9421_v19  ;;  %v9125_v5 = vadd.f32 %v7090_v29, %v2591_v46 }
 0x1ab   : > { %v2537_v2 = vpop.f32.mrf.mxu0  ;;  %v3288_v27 = vpop.f32.mrf.mxu1 }
 0x1ac   : > { %v2590_v28 = vadd.f32 %v2537_v2, %v9422_v50  ;;  %v9128_v43 = vadd.f32 %v3288_v27, %v2589_v56 }
 0x1ad   : > { %v7046_v20 = vpop.f32.mrf.mxu0  ;;  %v7091_v45 = vpop.f32.mrf.mxu1 }
 0x1ae   : > { %v2595_v47 = vadd.f32 %v7046_v20, %v9423_v7  ;;  %v9131_v41 = vadd.f32 %v7091_v45, %v2592_v38 }
 0x1af   : > { %v2550_v8 = vpop.f32.mrf.mxu0  ;;  %v3291_v15 = vpop.f32.mrf.mxu1 }
 0x1b0   : > { %v2593_v55 = vadd.f32 %v2550_v8, %v9037_v58  ;;  %v9134_v52 = vadd.f32 %v3291_v15, %v2590_v28 }
 0x1b1   : > { %v7047_v48 = vpop.f32.mrf.mxu0  ;;  %v7094_v33 = vpop.f32.mrf.mxu1 }
 0x1b2   : > { %v2596_v37 = vadd.f32 %v7047_v48, %v9040_v12  ;;  %v9137_v32 = vadd.f32 %v7094_v33, %v2595_v47 }
 0x1b3   : > { %v2553_v18 = vpop.f32.mrf.mxu0  ;;  %v3304_v44 = vpop.f32.mrf.mxu1 }
 0x1b4   : > { %v2594_v36 = vadd.f32 %v2553_v18, %v9045_v26  ;;  %v9139_v14 = vadd.f32 %v3304_v44, %v2593_v55 }
 0x1b5   : > { %v7114_v40 = vpop.f32.mrf.mxu0  ;;  %v7095_v1 = vpop.f32.mrf.mxu1 }
 0x1b6   : > { %v3819_v58 = vadd.f32 %v7114_v40, %v9047_v13  ;;  %v9142_v3 = vadd.f32 %v7095_v1, %v2596_v37 }
 0x1b7   : > { %v3690_v34 = vpop.f32.mrf.mxu0  ;;  %v3307_v17 = vpop.f32.mrf.mxu1 }
 0x1b8   : > { %v3817_v12 = vadd.f32 %v3690_v34, %v9055_v22  ;;  %v9147_v25 = vadd.f32 %v3307_v17, %v2594_v36 }
 0x1b9   : > { %v9145_v46 = vpop.f32.mrf.mxu0  ;;  %v7162_v26 = vpop.f32.mrf.mxu1 }
 0x1ba   : > { %v9151_v39 = vadd.f32 %v7162_v26, %v3819_v58 }
 0x1bb   : > { %v9149_v57 = vpop.f32.mrf.mxu0  ;;  %v4077_v56 = vpop.f32.mrf.mxu1 }
 0x1bc   : > { %v9153_v19 = vadd.f32 %v4077_v56, %v3817_v12 }
 0x1bd   : > { %v7118_v16 = vpop.f32.mrf.mxu0  ;;  %v9156_v38 = vpop.f32.mrf.mxu1 }
 0x1be   : > { %v3823_v13 = vadd.f32 %v7118_v16, %v9065_v59 }
 0x1bf   : > { %v3706_v2 = vpop.f32.mrf.mxu0  ;;  %v9159_v29 = vpop.f32.mrf.mxu1 }
 0x1c0   : > { %v3821_v22 = vadd.f32 %v3706_v2, %v9067_v23 }
 0x1c1   : > { %v9161_v50 = vpop.f32.mrf.mxu0  ;;  %v7166_v28 = vpop.f32.mrf.mxu1 }
 0x1c2   : > { %v9165_v27 = vadd.f32 %v7166_v28, %v3823_v13 }
 0x1c3   : > { %v9163_v20 = vpop.f32.mrf.mxu0  ;;  %v4093_v7 = vpop.f32.mrf.mxu1 }
 0x1c4   : > { %v9167_v8 = vadd.f32 %v4093_v7, %v3821_v22 }
 0x1c5   : > { %v7122_v47 = vpop.f32.mrf.mxu0  ;;  %v9170_v45 = vpop.f32.mrf.mxu1 }
 0x1c6   : > { %v3827_v59 = vadd.f32 %v7122_v47, %v9076_v11 }
 0x1c7   : > { %v3722_v55 = vpop.f32.mrf.mxu0  ;;  %v9173_v48 = vpop.f32.mrf.mxu1 }
 0x1c8   : > { %v3825_v23 = vadd.f32 %v3722_v55, %v9079_v24 }
 0x1c9   : > { %v9175_v15 = vpop.f32.mrf.mxu0  ;;  %v7170_v37 = vpop.f32.mrf.mxu1 }
 0x1ca   : > { %v9179_v33 = vadd.f32 %v7170_v37, %v3827_v59 }
 0x1cb   : > { %v9177_v18 = vpop.f32.mrf.mxu0  ;;  %v4109_v36 = vpop.f32.mrf.mxu1 }
 0x1cc   : > { %v9181_v40 = vadd.f32 %v4109_v36, %v3825_v23 }
 0x1cd   : > { %v7126_v44 = vpop.f32.mrf.mxu0  ;;  %v9184_v58 = vpop.f32.mrf.mxu1 }
 0x1ce   : > { %v3831_v11 = vadd.f32 %v7126_v44, %v9088_v35 }
 0x1cf   : > { %v3738_v1 = vpop.f32.mrf.mxu0  ;;  %v9187_v34 = vpop.f32.mrf.mxu1 }
 0x1d0   : > { %v3829_v24 = vadd.f32 %v3738_v1, %v9091_v9 }
 0x1d1   : > { %v9189_v12 = vpop.f32.mrf.mxu0  ;;  %v7174_v17 = vpop.f32.mrf.mxu1 }
 0x1d2   : > { %v9193_v56 = vadd.f32 %v7174_v17, %v3831_v11 }
 0x1d3   : > { %v9191_v26 = vpop.f32.mrf.mxu0  ;;  %v4125_v16 = vpop.f32.mrf.mxu1 }
 0x1d4   : > { %v9195_v2 = vadd.f32 %v4125_v16, %v3829_v24 }
 0x1d5   : > { %v7130_v13 = vpop.f32.mrf.mxu0  ;;  %v9198_v22 = vpop.f32.mrf.mxu1 }
 0x1d6   : > { %v3835_v35 = vadd.f32 %v7130_v13, %v9100_v51 }
 0x1d7   : > { %v3754_v28 = vpop.f32.mrf.mxu0  ;;  %v9201_v7 = vpop.f32.mrf.mxu1 }
 0x1d8   : > { %v3833_v9 = vadd.f32 %v3754_v28, %v9103_v63 }
 0x1d9   : > { %v9203_v47 = vpop.f32.mrf.mxu0  ;;  %v7178_v59 = vpop.f32.mrf.mxu1 }
 0x1da   : > { %v9207_v23 = vadd.f32 %v7178_v59, %v3835_v35 }
 0x1db   : > { %v9205_v55 = vpop.f32.mrf.mxu0  ;;  %v4141_v37 = vpop.f32.mrf.mxu1 }
 0x1dc   : > { %v9209_v44 = vadd.f32 %v4141_v37, %v3833_v9 }
 0x1dd   : > { %v9212_v11 = vpop.f32.mrf.mxu1 }
 0x1de   : > { %9424 = vst [vmem:[#allocation8_spill] sm:$0xff] %v9209_v44  ;;  %9425 = vst [vmem:[#allocation2_spill] sm:$0xff] %v9212_v11 }
 0x1df   : > { %v7134_v36 = vpop.f32.mrf.mxu0  ;;  %v9215_v24 = vpop.f32.mrf.mxu1 }
 0x1e0   : > { %v3839_v51 = vadd.f32 %v7134_v36, %v9112_v62  ;;  %9426 = vst [vmem:[#allocation3_spill] sm:$0xff] %v9215_v24 }
 0x1e1   : > { %v3770_v1 = vpop.f32.mrf.mxu0  ;;  %v7182_v13 = vpop.f32.mrf.mxu1 }
 0x1e2   : > { %v3837_v63 = vadd.f32 %v3770_v1, %v9115_v6  ;;  %v9218_v35 = vadd.f32 %v7182_v13, %v3839_v51 }
 0x1e3   : > { %v7135_v17 = vpop.f32.mrf.mxu0  ;;  %v4157_v9 = vpop.f32.mrf.mxu1 }
 0x1e4   : > { %v3840_v16 = vadd.f32 %v7135_v17, %v9118_v10  ;;  %v9221_v44 = vadd.f32 %v4157_v9, %v3837_v63 }
 0x1e5   : > { %v3773_v28 = vpop.f32.mrf.mxu0  ;;  %v7183_v36 = vpop.f32.mrf.mxu1 }
 0x1e6   : > { %v3838_v59 = vadd.f32 %v3773_v28, %v9121_v31  ;;  %v9224_v6 = vadd.f32 %v7183_v36, %v3840_v16 }
 0x1e7   : > { %v7138_v37 = vpop.f32.mrf.mxu0  ;;  %v4160_v24 = vpop.f32.mrf.mxu1 }
 0x1e8   : > { %v3843_v62 = vadd.f32 %v7138_v37, %v9125_v5  ;;  %v9227_v17 = vadd.f32 %v4160_v24, %v3838_v59 }
 0x1e9   : > { %v3786_v11 = vpop.f32.mrf.mxu0  ;;  %v7186_v13 = vpop.f32.mrf.mxu1 }
 0x1ea   : > { %v3841_v1 = vadd.f32 %v3786_v11, %v9128_v43  ;;  %v9230_v28 = vadd.f32 %v7186_v13, %v3843_v62 }
 0x1eb   : > { %v7139_v10 = vpop.f32.mrf.mxu0  ;;  %v4173_v9 = vpop.f32.mrf.mxu1 }
 0x1ec   : > { %v3844_v51 = vadd.f32 %v7139_v10, %v9131_v41  ;;  %v9233_v37 = vadd.f32 %v4173_v9, %v3841_v1 }
 0x1ed   : > { %v3789_v31 = vpop.f32.mrf.mxu0  ;;  %v7187_v36 = vpop.f32.mrf.mxu1 }
 0x1ee   : > { %v3842_v63 = vadd.f32 %v3789_v31, %v9134_v52  ;;  %v9236_v11 = vadd.f32 %v7187_v36, %v3844_v51  ;;  %v3820_v51 = vadd.f32 %v9145_v46, %v9059_v53 }
 0x1ef   : > { %v7142_v5 = vpop.f32.mrf.mxu0  ;;  %v4176_v59 = vpop.f32.mrf.mxu1 }
 0x1f0   : > { %v3847_v16 = vadd.f32 %v7142_v5, %v9137_v32  ;;  %v9239_v10 = vadd.f32 %v4176_v59, %v3842_v63  ;;  %v3818_v63 = vadd.f32 %v9149_v57, %v9061_v4  ;;  %v9262_v4 = vld [vmem:[%s9370_s4] ss:$0 sm:$0xff] }
 0x1f1   : > { %v3802_v43 = vpop.f32.mrf.mxu0  ;;  %v7190_v13 = vpop.f32.mrf.mxu1 }
 0x1f2   : > { %v3845_v24 = vadd.f32 %v3802_v43, %v9139_v14  ;;  %v9242_v31 = vadd.f32 %v7190_v13, %v3847_v16 }
 0x1f3   : > { %v7143_v41 = vpop.f32.mrf.mxu0  ;;  %v4189_v9 = vpop.f32.mrf.mxu1 }
 0x1f4   : > { %v3848_v62 = vadd.f32 %v7143_v41, %v9142_v3  ;;  %v9247_v5 = vadd.f32 %v4189_v9, %v3845_v24  ;;  %v4205_v24 = vadd.f32 %v9159_v29, %v3818_v63 }
 0x1f5   : > { %v3805_v52 = vpop.f32.mrf.mxu0  ;;  %v7191_v14 = vpop.f32.mrf.mxu1 }
 0x1f6   : > { %v3846_v1 = vadd.f32 %v3805_v52, %v9147_v25  ;;  %v9251_v43 = vadd.f32 %v7191_v14, %v3848_v62  ;;  %v4207_v25 = vadd.f32 %v9156_v38, %v3820_v51  ;;  %v3824_v38 = vadd.f32 %v9161_v50, %v9070_v61 }
 0x1f7   : > { %v7210_v32 = vpop.f32.mrf.mxu0  ;;  %v4192_v16 = vpop.f32.mrf.mxu1 }
 0x1f8   : > { %v4960_v3 = vadd.f32 %v7210_v32, %v9151_v39  ;;  %v9255_v41 = vadd.f32 %v4192_v16, %v3846_v1 }
 0x1f9   : > { %v4831_v36 = vpop.f32.mrf.mxu0 }
 0x1fa   : > { %v4958_v13 = vadd.f32 %v4831_v36, %v9153_v19  ;;  %v3822_v19 = vadd.f32 %v9163_v20, %v9072_v0 }
 0x1fb   : > { %v7211_v59 = vpop.f32.mrf.mxu0 }
 0x1fc   : > { %v4961_v57 = vadd.f32 %v7211_v59, %v4207_v25  ;;  %v4211_v59 = vadd.f32 %v9170_v45, %v3824_v38  ;;  %v4209_v0 = vadd.f32 %v9173_v48, %v3822_v19 }
 0x1fd   : > { %v4834_v46 = vpop.f32.mrf.mxu0 }
 0x1fe   : > { %v7258_v53 = vpop.f32.mrf.mxu1  ;;  %v4959_v9 = vadd.f32 %v4834_v46, %v4205_v24 }
 0x1ff   : > { %v5458_v52 = vadd.f32 %v7258_v53, %v4960_v3  ;;  %v7214_v62 = vpop.f32.mrf.mxu0 }
 0x200   : > { %v5329_v39 = vpop.f32.mrf.mxu1  ;;  %v4964_v36 = vadd.f32 %v7214_v62, %v9165_v27 }
 0x201   : > { %v5456_v1 = vadd.f32 %v5329_v39, %v4958_v13  ;;  %v5497_v32 = vadd.f32 %v9262_v4, %v5458_v52  ;;  %v4847_v51 = vpop.f32.mrf.mxu0 }
 0x202   : > { %v7259_v29 = vpop.f32.mrf.mxu1  ;;  %v4962_v25 = vadd.f32 %v4847_v51, %v9167_v8 }
 0x203   : > { %v5459_v14 = vadd.f32 %v7259_v29, %v4961_v57  ;;  %v5495_v63 = vadd.f32 %v9262_v4, %v5456_v1  ;;  %v7215_v16 = vpop.f32.mrf.mxu0  ;;  %v5529_v20 = vmax.f32 %v5497_v32, 0.0  ;;  %v3828_v57 = vadd.f32 %v9175_v15, %v9082_v49 }
 0x204   : > { %v5332_v3 = vpop.f32.mrf.mxu1  ;;  %v4965_v52 = vadd.f32 %v7215_v16, %v4211_v59 }
 0x205   : > { %v5498_v61 = vadd.f32 %v9262_v4, %v5459_v14  ;;  %v5457_v50 = vadd.f32 %v5332_v3, %v4959_v9  ;;  %v4850_v53 = vpop.f32.mrf.mxu0  ;;  %v5527_v39 = vmax.f32 %v5495_v63, 0.0  ;;  %v3826_v9 = vadd.f32 %v9177_v18, %v9085_v54 }
 0x206   : > { %v7262_v13 = vpop.f32.mrf.mxu1  ;;  %v4963_v1 = vadd.f32 %v4850_v53, %v4209_v0  ;;  %v4215_v3 = vadd.f32 %v9184_v58, %v3828_v57  ;;  %v3832_v58 = vadd.f32 %v9189_v12, %v9094_v60  ;;  %v3830_v57 = vadd.f32 %v9191_v26, %v9097_v42 }
 0x207   : > { %v5530_v46 = vmax.f32 %v5498_v61, 0.0  ;;  %v5496_v27 = vadd.f32 %v9262_v4, %v5457_v50  ;;  %v5462_v24 = vadd.f32 %v7262_v13, %v4964_v36  ;;  %v7218_v45 = vpop.f32.mrf.mxu0  ;;  %v4213_v18 = vadd.f32 %v9187_v34, %v3826_v9 }
 0x208   : > { %v5345_v8 = vpop.f32.mrf.mxu1  ;;  %v4968_v51 = vadd.f32 %v7218_v45, %v9179_v33 }
 0x209   : > { %v6481_v48 = vpack.c.bf16 %v5530_v46, %v5529_v20  ;;  %v5528_v62 = vmax.f32 %v5496_v27, 0.0  ;;  %v5460_v38 = vadd.f32 %v5345_v8, %v4962_v25  ;;  %v5501_v49 = vadd.f32 %v9262_v4, %v5462_v24  ;;  %v4863_v19 = vpop.f32.mrf.mxu0 }
 0x20a   : > { %v7263_v15 = vpop.f32.mrf.mxu1  ;;  %v4966_v54 = vadd.f32 %v4863_v19, %v9181_v40 }
 0x20b   : > { %6553 = vst [vmem:[%s9283_s22 + $0x8] sm:$0xff] %v6481_v48   ;;  %v6476_v32 = vpack.c.bf16 %v5528_v62, %v5527_v39  ;;  %v5463_v29 = vadd.f32 %v7263_v15, %v4965_v52  ;;  %v5499_v14 = vadd.f32 %v9262_v4, %v5460_v38  ;;  %v7219_v63 = vpop.f32.mrf.mxu0  ;;  %v5533_v61 = vmax.f32 %v5501_v49, 0.0 }
 0x20c   : > { %v5348_v36 = vpop.f32.mrf.mxu1  ;;  %v4969_v13 = vadd.f32 %v7219_v63, %v4215_v3  ;;  %v4217_v15 = vadd.f32 %v9201_v7, %v3830_v57 }
 0x20d   : > { %6477 = vst [vmem:[%s9283_s22] sm:$0xff] %v6476_v32   ;;  %v5502_v16 = vadd.f32 %v9262_v4, %v5463_v29  ;;  %v5461_v59 = vadd.f32 %v5348_v36, %v4963_v1  ;;  %v4866_v25 = vpop.f32.mrf.mxu0  ;;  %v5531_v53 = vmax.f32 %v5499_v14, 0.0  ;;  %v4219_v1 = vadd.f32 %v9198_v22, %v3832_v58 }
 0x20e   : > { %v7266_v50 = vpop.f32.mrf.mxu1  ;;  %v4967_v52 = vadd.f32 %v4866_v25, %v4213_v18 }
 0x20f   : > { %v5534_v0 = vmax.f32 %v5502_v16, 0.0  ;;  %v5500_v33 = vadd.f32 %v9262_v4, %v5461_v59  ;;  %v5466_v20 = vadd.f32 %v7266_v50, %v4968_v51 }
 0x210   : > { %v5361_v46 = vpop.f32.mrf.mxu1 }
 0x211   : > { %v6491_v27 = vpack.c.bf16 %v5534_v0, %v5533_v61  ;;  %v5532_v24 = vmax.f32 %v5500_v33, 0.0  ;;  %v5464_v40 = vadd.f32 %v5361_v46, %v4966_v54  ;;  %v7222_v34 = vpop.f32.mrf.mxu0  ;;  %v5505_v39 = vadd.f32 %v9262_v4, %v5466_v20 }
 0x212   : > { %v7267_v8 = vpop.f32.mrf.mxu1  ;;  %v4972_v62 = vadd.f32 %v7222_v34, %v9193_v56  ;;  %v3836_v20 = vadd.f32 %v9203_v47, %v9106_v21 }
 0x213   : > { %6555 = vst [vmem:[%s9283_s22 + $0x18] sm:$0xff] %v6491_v27   ;;  %v6486_v45 = vpack.c.bf16 %v5532_v24, %v5531_v53  ;;  %v5467_v48 = vadd.f32 %v7267_v8, %v4969_v13  ;;  %v4879_v60 = vpop.f32.mrf.mxu0  ;;  %v5503_v12 = vadd.f32 %v9262_v4, %v5464_v40  ;;  %v5537_v19 = vmax.f32 %v5505_v39, 0.0 }
 0x214   : > { %v5364_v38 = vpop.f32.mrf.mxu1  ;;  %v4970_v42 = vadd.f32 %v4879_v60, %v9195_v2  ;;  %v3834_v24 = vadd.f32 %v9205_v55, %v9109_v30 }
 0x215   : > { %6554 = vst [vmem:[%s9283_s22 + $0x10] sm:$0xff] %v6486_v45   ;;  %v5506_v9 = vadd.f32 %v9262_v4, %v5467_v48  ;;  %v5465_v49 = vadd.f32 %v5364_v38, %v4967_v52  ;;  %v7223_v26 = vpop.f32.mrf.mxu0  ;;  %v5535_v22 = vmax.f32 %v5503_v12, 0.0  ;;  %v9427_v45 = vld [vmem:[#allocation2_spill] sm:$0xff]  ;;  %v9428_v48 = vld [vmem:[#allocation8_spill] sm:$0xff] }
 0x216   : > { %v7270_v32 = vpop.f32.mrf.mxu1  ;;  %v4973_v14 = vadd.f32 %v7223_v26, %v4219_v1  ;;  %v4223_v21 = vadd.f32 %v9427_v45, %v3836_v20  ;;  %v9429_v1 = vld [vmem:[#allocation3_spill] sm:$0xff] }
 0x217   : > { %v5538_v29 = vmax.f32 %v5506_v9, 0.0  ;;  %v5504_v56 = vadd.f32 %v9262_v4, %v5465_v49  ;;  %v5470_v51 = vadd.f32 %v7270_v32, %v4972_v62  ;;  %v4882_v36 = vpop.f32.mrf.mxu0  ;;  %v4221_v9 = vadd.f32 %v9429_v1, %v3834_v24 }
 0x218   : > { %v5377_v63 = vpop.f32.mrf.mxu1  ;;  %v4971_v54 = vadd.f32 %v4882_v36, %v4217_v15 }
 0x219   : > { %v6501_v3 = vpack.c.bf16 %v5538_v29, %v5537_v19  ;;  %v5536_v16 = vmax.f32 %v5504_v56, 0.0  ;;  %v5468_v59 = vadd.f32 %v5377_v63, %v4970_v42  ;;  %v5509_v7 = vadd.f32 %v9262_v4, %v5470_v51 }
 0x21a   : > { %v7271_v2 = vpop.f32.mrf.mxu1 }
 0x21b   : > { %6557 = vst [vmem:[%s9283_s22 + $0x28] sm:$0xff] %v6501_v3   ;;  %v6496_v18 = vpack.c.bf16 %v5536_v16, %v5535_v22  ;;  %v5471_v61 = vadd.f32 %v7271_v2, %v4973_v14  ;;  %v5507_v25 = vadd.f32 %v9262_v4, %v5468_v59  ;;  %v5541_v58 = vmax.f32 %v5509_v7, 0.0 }
 0x21c   : > { %v5380_v50 = vpop.f32.mrf.mxu1 }
 0x21d   : > { %6556 = vst [vmem:[%s9283_s22 + $0x20] sm:$0xff] %v6496_v18   ;;  %v5510_v0 = vadd.f32 %v9262_v4, %v5471_v61  ;;  %v5469_v33 = vadd.f32 %v5380_v50, %v4971_v54  ;;  %v5539_v34 = vmax.f32 %v5507_v25, 0.0 }
 0x21e   : > { %v7274_v13 = vpop.f32.mrf.mxu1  ;;  %v7226_v27 = vpop.f32.mrf.mxu0 }
 0x21f   : > { %v5542_v53 = vmax.f32 %v5510_v0, 0.0  ;;  %v5508_v46 = vadd.f32 %v9262_v4, %v5469_v33  ;;  %v4976_v40 = vadd.f32 %v7226_v27, %v9207_v23 }
 0x220   : > { %v5393_v52 = vpop.f32.mrf.mxu1  ;;  %v4895_v8 = vpop.f32.mrf.mxu0 }
 0x221   : > { %v6511_v57 = vpack.c.bf16 %v5542_v53, %v5541_v58  ;;  %v5540_v39 = vmax.f32 %v5508_v46, 0.0  ;;  %v5474_v47 = vadd.f32 %v7274_v13, %v4976_v40  ;;  %v4974_v62 = vadd.f32 %v4895_v8, %v9428_v48 }
 0x222   : > { %v7227_v12 = vpop.f32.mrf.mxu0  ;;  %v7275_v38 = vpop.f32.mrf.mxu1 }
 0x223   : > { %6559 = vst [vmem:[%s9283_s22 + $0x38] sm:$0xff] %v6511_v57   ;;  %v6506_v60 = vpack.c.bf16 %v5540_v39, %v5539_v34  ;;  %v5472_v30 = vadd.f32 %v5393_v52, %v4974_v62  ;;  %v4977_v55 = vadd.f32 %v7227_v12, %v4223_v21  ;;  %v5513_v49 = vadd.f32 %v9262_v4, %v5474_v47 }
 0x224   : > { %v4898_v23 = vpop.f32.mrf.mxu0  ;;  %v5396_v15 = vpop.f32.mrf.mxu1 }
 0x225   : > { %6558 = vst [vmem:[%s9283_s22 + $0x30] sm:$0xff] %v6506_v60   ;;  %v5475_v42 = vadd.f32 %v7275_v38, %v4977_v55  ;;  %v4975_v26 = vadd.f32 %v4898_v23, %v4221_v9  ;;  %v5511_v19 = vadd.f32 %v9262_v4, %v5472_v30  ;;  %v5545_v56 = vmax.f32 %v5513_v49, 0.0 }
 0x227   : > { %v5514_v32 = vadd.f32 %v9262_v4, %v5475_v42  ;;  %v5473_v29 = vadd.f32 %v5396_v15, %v4975_v26  ;;  %v5543_v36 = vmax.f32 %v5511_v19, 0.0 }
 0x229   : > { %v5546_v51 = vmax.f32 %v5514_v32, 0.0  ;;  %v5512_v14 = vadd.f32 %v9262_v4, %v5473_v29 }
 0x22b   : > { %v6521_v22 = vpack.c.bf16 %v5546_v51, %v5545_v56  ;;  %v5544_v63 = vmax.f32 %v5512_v14, 0.0  ;;  %v7278_v3 = vpop.f32.mrf.mxu1 }
 0x22c   : > { %v7230_v16 = vpop.f32.mrf.mxu0 }
 0x22d   : > { %6561 = vst [vmem:[%s9283_s22 + $0x48] sm:$0xff] %v6521_v22   ;;  %v6516_v59 = vpack.c.bf16 %v5544_v63, %v5543_v36  ;;  %v4980_v54 = vadd.f32 %v7230_v16, %v9218_v35  ;;  %v5409_v2 = vpop.f32.mrf.mxu1 }
 0x22e   : > { %v4911_v18 = vpop.f32.mrf.mxu0 }
 0x22f   : > { %6560 = vst [vmem:[%s9283_s22 + $0x40] sm:$0xff] %v6516_v59   ;;  %v5478_v7 = vadd.f32 %v7278_v3, %v4980_v54  ;;  %v4978_v61 = vadd.f32 %v4911_v18, %v9221_v44  ;;  %v7279_v25 = vpop.f32.mrf.mxu1 }
 0x230   : > { %v7231_v50 = vpop.f32.mrf.mxu0 }
 0x231   : > { %v5476_v0 = vadd.f32 %v5409_v2, %v4978_v61  ;;  %v4981_v33 = vadd.f32 %v7231_v50, %v9224_v6  ;;  %v5517_v13 = vadd.f32 %v9262_v4, %v5478_v7  ;;  %v5412_v46 = vpop.f32.mrf.mxu1 }
 0x232   : > { %v4914_v20 = vpop.f32.mrf.mxu0 }
 0x233   : > { %v5479_v58 = vadd.f32 %v7279_v25, %v4981_v33  ;;  %v4979_v53 = vadd.f32 %v4914_v20, %v9227_v17  ;;  %v5515_v35 = vadd.f32 %v9262_v4, %v5476_v0  ;;  %v5549_v44 = vmax.f32 %v5517_v13, 0.0 }
 0x235   : > { %v5518_v27 = vadd.f32 %v9262_v4, %v5479_v58  ;;  %v5477_v24 = vadd.f32 %v5412_v46, %v4979_v53  ;;  %v5547_v34 = vmax.f32 %v5515_v35, 0.0 }
 0x237   : > { %v5550_v40 = vmax.f32 %v5518_v27, 0.0  ;;  %v5516_v52 = vadd.f32 %v9262_v4, %v5477_v24 }
 0x239   : > { %v6531_v6 = vpack.c.bf16 %v5550_v40, %v5549_v44  ;;  %v5548_v57 = vmax.f32 %v5516_v52, 0.0  ;;  %v7282_v39 = vpop.f32.mrf.mxu1 }
 0x23a   : > { %v7234_v8 = vpop.f32.mrf.mxu0 }
 0x23b   : > { %6563 = vst [vmem:[%s9283_s22 + $0x58] sm:$0xff] %v6531_v6   ;;  %v6526_v45 = vpack.c.bf16 %v5548_v57, %v5547_v34  ;;  %v4984_v17 = vadd.f32 %v7234_v8, %v9230_v28  ;;  %v5425_v21 = vpop.f32.mrf.mxu1 }
 0x23c   : > { %v4927_v47 = vpop.f32.mrf.mxu0 }
 0x23d   : > { %6562 = vst [vmem:[%s9283_s22 + $0x50] sm:$0xff] %v6526_v45   ;;  %v5482_v48 = vadd.f32 %v7282_v39, %v4984_v17  ;;  %v4982_v62 = vadd.f32 %v4927_v47, %v9233_v37  ;;  %v7283_v12 = vpop.f32.mrf.mxu1 }
 0x23e   : > { %v7235_v60 = vpop.f32.mrf.mxu0 }
 0x23f   : > { %v5480_v38 = vadd.f32 %v5425_v21, %v4982_v62  ;;  %v4985_v1 = vadd.f32 %v7235_v60, %v9236_v11  ;;  %v5521_v30 = vadd.f32 %v9262_v4, %v5482_v48  ;;  %v5428_v49 = vpop.f32.mrf.mxu1 }
 0x240   : > { %v4930_v9 = vpop.f32.mrf.mxu0 }
 0x241   : > { %v5483_v55 = vadd.f32 %v7283_v12, %v4985_v1  ;;  %v4983_v23 = vadd.f32 %v4930_v9, %v9239_v10  ;;  %v5519_v28 = vadd.f32 %v9262_v4, %v5480_v38  ;;  %v5553_v37 = vmax.f32 %v5521_v30, 0.0 }
 0x243   : > { %v5522_v42 = vadd.f32 %v9262_v4, %v5483_v55  ;;  %v5481_v26 = vadd.f32 %v5428_v49, %v4983_v23  ;;  %v5551_v32 = vmax.f32 %v5519_v28, 0.0 }
 0x245   : > { %v5554_v15 = vmax.f32 %v5522_v42, 0.0  ;;  %v5520_v19 = vadd.f32 %v9262_v4, %v5481_v26 }
 0x247   : > { %v6541_v11 = vpack.c.bf16 %v5554_v15, %v5553_v37  ;;  %v5552_v29 = vmax.f32 %v5520_v19, 0.0  ;;  %v7286_v56 = vpop.f32.mrf.mxu1 }
 0x248   : > { %v7238_v51 = vpop.f32.mrf.mxu0 }
 0x249   : > { %6565 = vst [vmem:[%s9283_s22 + $0x68] sm:$0xff] %v6541_v11   ;;  %v6536_v14 = vpack.c.bf16 %v5552_v29, %v5551_v32  ;;  %v4988_v10 = vadd.f32 %v7238_v51, %v9242_v31  ;;  %v5441_v36 = vpop.f32.mrf.mxu1 }
 0x24a   : > { %v4943_v22 = vpop.f32.mrf.mxu0 }
 0x24b   : > { %6564 = vst [vmem:[%s9283_s22 + $0x60] sm:$0xff] %v6536_v14   ;;  %v5486_v63 = vadd.f32 %v7286_v56, %v4988_v10  ;;  %v4986_v3 = vadd.f32 %v4943_v22, %v9247_v5  ;;  %v7287_v59 = vpop.f32.mrf.mxu1 }
 0x24c   : > { %v7239_v16 = vpop.f32.mrf.mxu0 }
 0x24d   : > { %v5484_v54 = vadd.f32 %v5441_v36, %v4986_v3  ;;  %v4989_v2 = vadd.f32 %v7239_v16, %v9251_v43  ;;  %v5525_v7 = vadd.f32 %v9262_v4, %v5486_v63  ;;  %v5444_v31 = vpop.f32.mrf.mxu1 }
 0x24e   : > { %v4946_v18 = vpop.f32.mrf.mxu0 }
 0x24f   : > { %v5487_v61 = vadd.f32 %v7287_v59, %v4989_v2  ;;  %v4987_v50 = vadd.f32 %v4946_v18, %v9255_v41  ;;  %v5523_v25 = vadd.f32 %v9262_v4, %v5484_v54  ;;  %v5557_v5 = vmax.f32 %v5525_v7, 0.0 }
 0x251   : > { %v5526_v0 = vadd.f32 %v9262_v4, %v5487_v61  ;;  %v5485_v33 = vadd.f32 %v5444_v31, %v4987_v50  ;;  %v5555_v58 = vmax.f32 %v5523_v25, 0.0 }
 0x253   : > { %v5558_v20 = vmax.f32 %v5526_v0, 0.0  ;;  %v5524_v13 = vadd.f32 %v9262_v4, %v5485_v33 }
 0x255   : > { %v6551_v53 = vpack.c.bf16 %v5558_v20, %v5557_v5  ;;  %v5556_v43 = vmax.f32 %v5524_v13, 0.0 }
 0x257   : > { %6567 = vst [vmem:[%s9283_s22 + $0x78] sm:$0xff] %v6551_v53   ;;  %v6546_v46 = vpack.c.bf16 %v5556_v43, %v5555_v58 }
 0x259   : > { %6566 = vst [vmem:[%s9283_s22 + $0x70] sm:$0xff] %v6546_v46  }
 0x25a PF: > { %s15_s18 = sadd.s32 1, %s7447_s18  }
 0x25b   : > { %p12_p4 = scmp.ge.s32.totalorder %s15_s18, 4  }
 0x25d   :  { %14 = sbr.rel (!%p12_p4) target bundleno = 1 (0x1), region = 83 }

// kernel: _lambda_.15
= control target key start
LH: loop header
LB: loop body
LE: loop exit
PB: predicated region body
PF: predicated region fallthrough
CT: control target
= control target key end

     0   :  { %s7355_s21 = smov 0   ;;  %s9326_s0 = inlined_call_operand.vmem [shape: bf16[2,18,18,128], index: 0, kind: input, shape index: {}]   ;;  %s9327_s1 = inlined_call_operand.vmem [shape: bf16[2,16,16,128], index: 1, kind: input, shape index: {}]   ;;  %s9328_s2 = inlined_call_operand.vmem [shape: bf16[9,128,128], index: 2, kind: input, shape index: {}]   ;;  %s9329_s3 = inlined_call_operand.vmem [shape: bf16[128,128], index: 3, kind: input, shape index: {}]   ;;  %s9330_s4 = inlined_call_operand.vmem [shape: f32[1,128], index: 4, kind: input, shape index: {}]   ;;  %s9331_s5 = inlined_call_operand.vmem [shape: f32[2,16,16,128], index: 5, kind: input, shape index: {}]   ;;  %s9332_s6 = inlined_call_operand.vmem [shape: f32[2,16,16,128], index: 6, kind: output, shape index: {}]  }
   0x1 LB: > { %s5813_s22 = sadd.s32 4294967295, %s7318_s21   ;;  %p5817_p0 = scmp.ge.s32.totalorder %s7318_s21, 1  ;;  %s7318_s21 = sphi %s7355_s21, %s16_s21  }
   0x2   : > { %p232_p1 = scmp.lt.s32.totalorder %s7318_s21, 3 }
   0x4   : > { %p233_p2 = pnand %p5817_p0, %p232_p1 }
   0x6   : > { %236 = sbr.rel (%p233_p2) target bundleno = 602 (0x25a), region = 44 }
   0xb   : > { %v7168_v0 = vld [vmem:[%s9328_s2 + $0x38] sm:$0xff]   ;;  %p272_p3 = scmp.lt.s32.totalorder %s5813_s22, 1  ;;  %v7170_v2 = vld [vmem:[%s9328_s2 + $0x30] sm:$0xff]   ;;  %v7172_v4 = vld [vmem:[%s9328_s2 + $0x28] sm:$0xff]   ;;  %vm1820_vm0 = vcmask 1042432   ;;  %vm1821_vm1 = vcmask 1046532  }
   0xc   : > { %v7169_v1 = vld [vmem:[%s9329_s3 + $0x38] sm:$0xff]   ;;  %6679 = vmatprep.subr.bf16.mxu0 %v7168_v0  ;;  %v7171_v3 = vld [vmem:[%s9329_s3 + $0x30] sm:$0xff]   ;;  %v7173_v5 = vld [vmem:[%s9329_s3 + $0x28] sm:$0xff]   ;;  %vm1047_vm2 = vsmask.f32 3328 }
   0xd   : > { %6727 = vmatprep.subr.bf16.mxu1 %v7169_v1  ;;  %6680 = vmatpush3.bf16.msra.mxu0 %v7168_v0  ;;  %s9432_s22 = smov (!%p272_p3, %s5813_s22), 1  ;;  %v7174_v6 = vld [vmem:[%s9328_s2 + $0x20] sm:$0xff]   ;;  %v7176_v8 = vld [vmem:[%s9328_s2 + $0x18] sm:$0xff]   ;;  %v7178_v10 = vld [vmem:[%s9328_s2 + $0x10] sm:$0xff]   ;;  %vm1048_vm3 = vsmask.f32 7440 }
   0xe   : > { %6728 = vmatpush3.bf16.msra.mxu1 %v7169_v1  ;;  %6681 = vmatprep.subr.bf16.mxu0 %v7170_v2  ;;  %v7175_v7 = vld [vmem:[%s9329_s3 + $0x20] sm:$0xff]   ;;  %s7159_s15 = smul.u32 216, %s9432_s22  ;;  %s6436_s16 = sshll.u32 %s9432_s22, 7  ;;  %v7177_v9 = vld [vmem:[%s9329_s3 + $0x18] sm:$0xff]   ;;  %v7179_v11 = vld [vmem:[%s9329_s3 + $0x10] sm:$0xff]  }
   0xf   : > { %6729 = vmatprep.subr.bf16.mxu1 %v7171_v3  ;;  %s7408_s30 = scalar_lea.vmem %s9327_s1, %s6436_s16  ;;  %v7180_v14 = vld [vmem:[%s9328_s2 + $0x8] sm:$0xff]   ;;  %v7182_v16 = vld [vmem:[%s9328_s2] sm:$0xff]   ;;  %v7188_v19 = vld [vmem:[%s9328_s2 + $0x78] sm:$0xff]  }
  0x10   : > { %s7400_s25 = scalar_lea.vmem %s9326_s0, %s7159_s15  ;;  %v7185_v13 = vld [vmem:[%s7408_s30] sm:$0xff]   ;;  %v7181_v15 = vld [vmem:[%s9329_s3 + $0x8] sm:$0xff]   ;;  %v7189_v20 = vld [vmem:[%s9328_s2 + $0xb8] sm:$0xff]  }
  0x11   : > { %6682 = vmatpush3.bf16.msra.mxu0 %v7170_v2  ;;  %v7184_v12 = vld [vmem:[%s7400_s25] sm:$0xff]   ;;  %6743 = vmatprep.mubr.bf16.mxu1 %v7185_v13  ;;  %v7186_v18 = vld [vmem:[%s7400_s25 + $0xc] sm:$0xff]   ;;  %v7190_v22 = vld [vmem:[%s7400_s25 + $0x18] sm:$0xff]  }
  0x12   : > { %6730 = vmatpush3.bf16.msra.mxu1 %v7171_v3  ;;  %6683 = vmatprep.subr.bf16.mxu0 %v7172_v4  ;;  %v7183_v17 = vld [vmem:[%s9329_s3] sm:$0xff]   ;;  %v7187_v21 = vld [vmem:[%s7408_s30 + $0x8] sm:$0xff]   ;;  %v7191_v23 = vld [vmem:[%s7408_s30 + $0x10] sm:$0xff]  }
  0x13   : > { %6731 = vmatprep.subr.bf16.mxu1 %v7173_v5  ;;  %6695 = vmatprep.mubr.bf16.mxu0 %v7184_v12  ;;  %v7194_v24 = vld [vmem:[%s9328_s2 + $0x70] sm:$0xff]   ;;  %v7192_v26 = vld [vmem:[%s7400_s25 + $0x24] sm:$0xff]   ;;  %v7193_v29 = vld [vmem:[%s7408_s30 + $0x18] sm:$0xff]  }
  0x14   : > { %v7195_v25 = vld [vmem:[%s9328_s2 + $0xb0] sm:$0xff]   ;;  %v7200_v27 = vld [vmem:[%s9328_s2 + $0x68] sm:$0xff]   ;;  %v7197_v31 = vld [vmem:[%s7408_s30 + $0x20] sm:$0xff]  }
  0x15   : > { %6684 = vmatpush3.bf16.msra.mxu0 %v7172_v4  ;;  %v7201_v28 = vld [vmem:[%s9328_s2 + $0xa8] sm:$0xff]   ;;  %v7196_v30 = vld [vmem:[%s7400_s25 + $0x30] sm:$0xff]   ;;  %v7206_v32 = vld [vmem:[%s9328_s2 + $0x60] sm:$0xff]  }
  0x16   : > { %6732 = vmatpush3.bf16.msra.mxu1 %v7173_v5  ;;  %6685 = vmatprep.subr.bf16.mxu0 %v7174_v6  ;;  %v7207_v33 = vld [vmem:[%s9328_s2 + $0xa0] sm:$0xff]   ;;  %v7199_v35 = vld [vmem:[%s7408_s30 + $0x28] sm:$0xff]   ;;  %v7212_v36 = vld [vmem:[%s9328_s2 + $0x58] sm:$0xff]  }
  0x17   : > { %6733 = vmatprep.subr.bf16.mxu1 %v7175_v7  ;;  %v7198_v34 = vld [vmem:[%s7400_s25 + $0x3c] sm:$0xff]   ;;  %v7202_v38 = vld [vmem:[%s7400_s25 + $0x48] sm:$0xff]   ;;  %v7203_v39 = vld [vmem:[%s7408_s30 + $0x30] sm:$0xff]  }
  0x18   : > { %v7213_v37 = vld [vmem:[%s9328_s2 + $0x98] sm:$0xff]   ;;  %v7218_v40 = vld [vmem:[%s9328_s2 + $0x50] sm:$0xff]   ;;  %v7208_v44 = vld [vmem:[%s7400_s25 + $0x60] sm:$0xff]  }
  0x19   : > { %6686 = vmatpush3.bf16.msra.mxu0 %v7174_v6  ;;  %v7219_v41 = vld [vmem:[%s9328_s2 + $0x90] sm:$0xff]   ;;  %v7205_v43 = vld [vmem:[%s7408_s30 + $0x38] sm:$0xff]   ;;  %v7209_v45 = vld [vmem:[%s7408_s30 + $0x40] sm:$0xff]  }
  0x1a   : > { %6734 = vmatpush3.bf16.msra.mxu1 %v7175_v7  ;;  %6687 = vmatprep.subr.bf16.mxu0 %v7176_v8  ;;  %v7204_v42 = vld [vmem:[%s7400_s25 + $0x54] sm:$0xff]   ;;  %v7224_v46 = vld [vmem:[%s9328_s2 + $0x48] sm:$0xff]   ;;  %v7230_v52 = vld [vmem:[%s9328_s2 + $0x40] sm:$0xff]  }
  0x1b   : > { %6735 = vmatprep.subr.bf16.mxu1 %v7177_v9  ;;  %v7225_v47 = vld [vmem:[%s9328_s2 + $0x88] sm:$0xff]   ;;  %v7214_v50 = vld [vmem:[%s7400_s25 + $0x78] sm:$0xff]   ;;  %v7215_v51 = vld [vmem:[%s7408_s30 + $0x50] sm:$0xff]  }
  0x1c   : > { %v7210_v48 = vld [vmem:[%s7400_s25 + $0x6c] sm:$0xff]   ;;  %v7231_v53 = vld [vmem:[%s9328_s2 + $0x80] sm:$0xff]   ;;  %v1001_v56 = vld [vmem:[%s7400_s25 + $0x8] sm:$0x1] }
  0x1d   : > { %6688 = vmatpush3.bf16.msra.mxu0 %v7176_v8  ;;  %v7211_v49 = vld [vmem:[%s7408_s30 + $0x48] sm:$0xff]   ;;  %v999_v54 = vld [vmem:[%s7400_s25] sm:$0xf]  ;;  %v1000_v55 = vld [vmem:[%s7400_s25 + $0x4] sm:$0xf]  ;;  %v1070_v61 = vshll.u32 %v1001_v56, 16 }
  0x1e   : > { %6736 = vmatpush3.bf16.msra.mxu1 %v7177_v9  ;;  %6689 = vmatprep.subr.bf16.mxu0 %v7178_v10  ;;  %v1051_v57 = vshrl.u32 %v999_v54, 16  ;;  %v1054_v58 = vshll.u32 %v999_v54, 16  ;;  %v1060_v59 = vshll.u32 %v1000_v55, 16  ;;  %v1064_v60 = vshrl.u32 %v1000_v55, 16  ;;  %v1756_v62 = vld [vmem:[%s7400_s25] sm:$0xe]  ;;  %vm7501_vm4 = vmor %vm1820_vm0, %vm1821_vm1 }
  0x1f   : > { %6737 = vmatprep.subr.bf16.mxu1 %v7179_v11  ;;  %v1825_v0 = vrot.slane %v1000_v55, 5  ;;  %v5913_v3 = vrot.slane %v1756_v62, 9  ;;  %v1828_v4 = vrot.slane %v1001_v56, 5  ;;  %v1002_v5 = vld [vmem:[%s7400_s25 + $0xc] sm:$0xf]  ;;  %v7216_v6 = vld [vmem:[%s7400_s25 + $0x84] sm:$0xff]   ;;  %vm7519_vm5 = vmor %vm1047_vm2, %vm1048_vm3 }
  0x20   : > { %v1053_v1 = vrot.slane %v1051_v57, 4  ;;  %v1056_v2 = vrot.slane %v1054_v58, 5  ;;  %v1062_v7 = vrot.slane %v1060_v59, 5  ;;  %v1066_v8 = vrot.slane %v1064_v60, 4  ;;  %v7217_v12 = vld [vmem:[%s7408_s30 + $0x58] sm:$0xff]   ;;  %v7220_v13 = vld [vmem:[%s7400_s25 + $0x90] sm:$0xff]  }
  0x21   : > { %6690 = vmatpush3.bf16.msra.mxu0 %v7178_v10  ;;  %v1072_v9 = vrot.slane %v1070_v61, 5  ;;  %v1827_v10 = vrot.slane %v1825_v0, 4  ;;  %v1758_v56 = vld [vmem:[%s7400_s25 + $0x18] sm:$0xe]  ;;  %v7223_v57 = vld [vmem:[%s7408_s30 + $0x68] sm:$0xff]  }
  0x22   : > { %6738 = vmatpush3.bf16.msra.mxu1 %v7179_v11  ;;  %6691 = vmatprep.subr.bf16.mxu0 %v7180_v14  ;;  %v1003_v11 = vld [vmem:[%s7400_s25 + $0x10] sm:$0xf]  ;;  %v1008_v62 = vld [vmem:[%s7400_s25 + $0x24] sm:$0xf] }
  0x23   : > { %6739 = vmatprep.subr.bf16.mxu1 %v7181_v15 }
  0x25   : > { %6692 = vmatpush3.bf16.msra.mxu0 %v7180_v14  ;;  %v1057_v14 = vor.u32 %v1056_v2, %v1053_v1 }
  0x26   : > { %6740 = vmatpush3.bf16.msra.mxu1 %v7181_v15  ;;  %6693 = vmatprep.subr.bf16.mxu0 %v7182_v16  ;;  %v7512_v15 = vsel %vm7501_vm4, %v5913_v3, %v1825_v0  ;;  %v1009_v0 = vld [vmem:[%s7400_s25 + $0x28] sm:$0xf] }
  0x27   : > { %6741 = vmatprep.subr.bf16.mxu1 %v7183_v17 }
  0x29   : > { %6694 = vmatpush3.bf16.msra.mxu0 %v7182_v16  ;;  %v1004_v16 = vld [vmem:[%s7400_s25 + $0x14] sm:$0x1] }
  0x2a   : > { %6742 = vmatpush3.bf16.msra.mxu1 %v7183_v17  ;;  %6775 = vmatprep.subr.bf16.mxu0 %v7188_v19  ;;  %v1075_v17 = vshrl.u32 %v1002_v5, 16 }
  0x2b   : > { %6823 = vmatprep.subr.bf16.mxu1 %v7189_v20 }
  0x2c   : > { %6696 = vmatmul.mubr.bf16.vlgmr.msra.gmra.mxu0 %v7186_v18  ;;  %v1078_v18 = vshll.u32 %v1002_v5, 16  ;;  %v7226_v5 = vld [vmem:[%s7400_s25 + $0xa8] sm:$0xff]  }
  0x2d   : > { %6744 = vmatmul.mubr.bf16.vlgmr.msra.gmra.mxu1 %v7187_v21  ;;  %6776 = vmatpush3.bf16.msra.mxu0 %v7188_v19  ;;  %v1757_v19 = vld [vmem:[%s7400_s25 + $0xc] sm:$0xe] }
  0x2e   : > { %6824 = vmatpush3.bf16.msra.mxu1 %v7189_v20  ;;  %6699 = vmatprep.mubr.bf16.mxu0 %v7190_v22  ;;  %v7221_v20 = vld [vmem:[%s7408_s30 + $0x60] sm:$0xff]   ;;  %v1067_v22 = vor.u32 %v1066_v8, %v1062_v7 }
  0x2f   : > { %6747 = vmatprep.mubr.bf16.mxu1 %v7191_v23  ;;  %6777 = vmatprep.subr.bf16.mxu0 %v7194_v24  ;;  %v7525_v23 = vsel %vm7501_vm4, %v1827_v10, %v1828_v4  ;;  %v7227_v10 = vld [vmem:[%s7408_s30 + $0x70] sm:$0xff]  }
  0x30   : > { %6825 = vmatprep.subr.bf16.mxu1 %v7195_v25 }
  0x31   : > { %6778 = vmatpush3.bf16.msra.mxu0 %v7194_v24  ;;  %v1084_v24 = vshll.u32 %v1003_v11, 16 }
  0x32   : > { %6826 = vmatpush3.bf16.msra.mxu1 %v7195_v25  ;;  %6779 = vmatprep.subr.bf16.mxu0 %v7200_v27  ;;  %v1088_v25 = vshrl.u32 %v1003_v11, 16 }
  0x33   : > { %6827 = vmatprep.subr.bf16.mxu1 %v7201_v28 }
  0x34   : > { %6700 = vmatmul.mubr.bf16.gmra.mxu0 %v7192_v26  ;;  %v1058_v26 = vrot.slane %v1057_v14, 4 }
  0x35   : > { %6748 = vmatmul.mubr.bf16.gmra.mxu1 %v7193_v29  ;;  %6703 = vmatprep.mubr.bf16.mxu0 %v7196_v30  ;;  %v1080_v29 = vrot.slane %v1078_v18, 5  ;;  %v7532_v30 = vld [vmem:[%s9328_s2 + $0xf8] sm:$0xff]   ;;  %v1123_v18 = vshrl.u32 %v1008_v62, 16 }
  0x36   : > { %6751 = vmatprep.mubr.bf16.mxu1 %v7197_v31  ;;  %6780 = vmatpush3.bf16.msra.mxu0 %v7200_v27  ;;  %v5945_v27 = vcombine.low %v7512_v15, %v7525_v23  ;;  %v1068_v31 = vrot.slane %v1067_v22, 4  ;;  %v1017_v23 = vld [vmem:[%s7400_s25 + $0x48] sm:$0xf] }
  0x37   : > { %6828 = vmatpush3.bf16.msra.mxu1 %v7201_v28  ;;  %6781 = vmatprep.subr.bf16.mxu0 %v7206_v32  ;;  %v1077_v28 = vrot.slane %v1075_v17, 4  ;;  %v1010_v17 = vld [vmem:[%s7400_s25 + $0x2c] sm:$0x1] }
  0x38   : > { %6829 = vmatprep.subr.bf16.mxu1 %v7207_v33 }
  0x3a   : > { %6782 = vmatpush3.bf16.msra.mxu0 %v7206_v32  ;;  %v1086_v32 = vrot.slane %v1084_v24, 5 }
  0x3b   : > { %6830 = vmatpush3.bf16.msra.mxu1 %v7207_v33  ;;  %6783 = vmatprep.subr.bf16.mxu0 %v7212_v36  ;;  %v1090_v33 = vrot.slane %v1088_v25, 4 }
  0x3c   : > { %6704 = vmatmul.mubr.bf16.gmra.mxu0 %v7198_v34  ;;  %6831 = vmatprep.subr.bf16.mxu1 %v7213_v37  ;;  %v1094_v34 = vshll.u32 %v1004_v16, 16 }
  0x3d   : > { %6752 = vmatmul.mubr.bf16.gmra.mxu1 %v7199_v35  ;;  %6707 = vmatprep.mubr.bf16.mxu0 %v7202_v38  ;;  %v1063_v35 = vsel %vm7519_vm5, %v1058_v26, %v1062_v7  ;;  %v1832_v38 = vrot.slane %v1003_v11, 5  ;;  %v1136_v26 = vshrl.u32 %v1009_v0, 16 }
  0x3e   : > { %6755 = vmatprep.mubr.bf16.mxu1 %v7203_v39  ;;  %6784 = vmatpush3.bf16.msra.mxu0 %v7212_v36  ;;  %v1081_v36 = vor.u32 %v1080_v29, %v1077_v28  ;;  %v7540_v39 = vld [vmem:[%s9328_s2 + $0x138] sm:$0xff]   ;;  %v1759_v28 = vld [vmem:[%s7400_s25 + $0x24] sm:$0xe] }
  0x3f   : > { %6832 = vmatpush3.bf16.msra.mxu1 %v7213_v37  ;;  %6785 = vmatprep.subr.bf16.mxu0 %v7218_v40  ;;  %v5914_v37 = vrot.slane %v1757_v19, 9  ;;  %v1126_v19 = vshll.u32 %v1008_v62, 16 }
  0x40   : > { %6833 = vmatprep.subr.bf16.mxu1 %v7219_v41 }
  0x42   : > { %6786 = vmatpush3.bf16.msra.mxu0 %v7218_v40  ;;  %v1005_v40 = vld [vmem:[%s7400_s25 + $0x18] sm:$0xf] }
  0x43   : > { %6834 = vmatpush3.bf16.msra.mxu1 %v7219_v41  ;;  %6787 = vmatprep.subr.bf16.mxu0 %v7224_v46  ;;  %v1073_v41 = vsel %vm7519_vm5, %v1068_v31, %v1072_v9  ;;  %v1102_v54 = vshll.u32 %v1005_v40, 16  ;;  %v1125_v31 = vrot.slane %v1123_v18, 4 }
  0x44   : > { %6708 = vmatmul.mubr.bf16.gmra.mxu0 %v7204_v42  ;;  %6835 = vmatprep.subr.bf16.mxu1 %v7225_v47  ;;  %v1091_v42 = vor.u32 %v1090_v33, %v1086_v32 }
  0x45   : > { %6756 = vmatmul.mubr.bf16.gmra.mxu1 %v7205_v43  ;;  %6711 = vmatprep.mubr.bf16.mxu0 %v7208_v44  ;;  %v1096_v43 = vrot.slane %v1094_v34, 5  ;;  %v1835_v44 = vrot.slane %v1004_v16, 5  ;;  %v1104_v4 = vrot.slane %v1102_v54, 5 }
  0x46   : > { %6759 = vmatprep.mubr.bf16.mxu1 %v7209_v45  ;;  %6788 = vmatpush3.bf16.msra.mxu0 %v7224_v46  ;;  %v1006_v45 = vld [vmem:[%s7400_s25 + $0x1c] sm:$0xf]  ;;  %v1007_v46 = vld [vmem:[%s7400_s25 + $0x20] sm:$0x1] }
  0x47   : > { %6836 = vmatpush3.bf16.msra.mxu1 %v7225_v47  ;;  %6789 = vmatprep.subr.bf16.mxu0 %v7230_v52  ;;  %v7547_v47 = vcombine.low %v1063_v35, %v1073_v41  ;;  %v1108_v55 = vshll.u32 %v1006_v45, 16  ;;  %v1112_v60 = vshrl.u32 %v1006_v45, 16  ;;  %v1118_v61 = vshll.u32 %v1007_v46, 16  ;;  %v7229_v41 = vld [vmem:[%s7408_s30 + $0x78] sm:$0xff]  }
  0x48   : > { %6837 = vmatprep.subr.bf16.mxu1 %v7231_v53  ;;  %v1842_v14 = vrot.slane %v1007_v46, 5  ;;  %v1012_v46 = vld [vmem:[%s7400_s25 + $0x34] sm:$0xf] }
  0x49   : > { %v1110_v7 = vrot.slane %v1108_v55, 5  ;;  %v1114_v8 = vrot.slane %v1112_v60, 4  ;;  %v1120_v9 = vrot.slane %v1118_v61, 5  ;;  %v1849_v55 = vrot.slane %v1010_v17, 5 }
  0x4a   : > { %6790 = vmatpush3.bf16.msra.mxu0 %v7230_v52  ;;  %v1092_v52 = vrot.slane %v1091_v42, 4 }
  0x4b   : > { %6838 = vmatpush3.bf16.msra.mxu1 %v7231_v53  ;;  %6871 = vmatprep.subr.bf16.mxu0 %v7532_v30  ;;  %v1099_v53 = vshrl.u32 %v1005_v40, 16  ;;  %v1115_v16 = vor.u32 %v1114_v8, %v1110_v7  ;;  %v7228_v40 = vld [vmem:[%s7400_s25 + $0xb4] sm:$0xff]  }
  0x4c   : > { %6712 = vmatmul.mubr.bf16.gmra.mxu0 %v7210_v48  ;;  %v1082_v48 = vrot.slane %v1081_v36, 4  ;;  %6919 = vmatprep.subr.bf16.mxu1 %v7540_v39  ;;  %v1097_v1 = vsel %vm7519_vm5, %v1092_v52, %v1096_v43  ;;  %v1138_v36 = vrot.slane %v1136_v26, 4  ;;  %v1846_v52 = vrot.slane %v1009_v0, 5 }
  0x4d   : > { %6760 = vmatmul.mubr.bf16.gmra.mxu1 %v7211_v49  ;;  %6715 = vmatprep.mubr.bf16.mxu0 %v7214_v50  ;;  %v7551_v49 = vsel %vm7501_vm4, %v5914_v37, %v1832_v38  ;;  %v1834_v50 = vrot.slane %v1832_v38, 4  ;;  %v1101_v3 = vrot.slane %v1099_v53, 4  ;;  %v1116_v29 = vrot.slane %v1115_v16, 4  ;;  %v1011_v38 = vld [vmem:[%s7400_s25 + $0x30] sm:$0xf] }
  0x4e   : > { %6763 = vmatprep.mubr.bf16.mxu1 %v7215_v51  ;;  %v7222_v51 = vld [vmem:[%s7400_s25 + $0x9c] sm:$0xff]   ;;  %v1087_v58 = vsel %vm7519_vm5, %v1082_v48, %v1086_v32  ;;  %v1128_v32 = vrot.slane %v1126_v19, 5  ;;  %v1142_v37 = vshll.u32 %v1010_v17, 16  ;;  %v1013_v53 = vld [vmem:[%s7400_s25 + $0x38] sm:$0x1]  ;;  %v1848_v62 = vrot.slane %v1846_v52, 4 }
  0x4f   : > { %v7561_v59 = vsel %vm7501_vm4, %v1834_v50, %v1835_v44  ;;  %v1105_v11 = vor.u32 %v1104_v4, %v1101_v3  ;;  %v1121_v42 = vsel %vm7519_vm5, %v1116_v29, %v1120_v9  ;;  %v1015_v17 = vld [vmem:[%s7400_s25 + $0x40] sm:$0xf] }
  0x50   : > { %v5946_v2 = vcombine.low %v7551_v49, %v7561_v59  ;;  %v1129_v44 = vor.u32 %v1128_v32, %v1125_v31  ;;  %v7607_v8 = vsel %vm7501_vm4, %v1848_v62, %v1849_v55  ;;  %v1761_v31 = vld [vmem:[%s7400_s25 + $0x3c] sm:$0xe]  ;;  %v1184_v15 = vshrl.u32 %v1015_v17, 16  ;;  %v7237_v59 = vld [vmem:[%s9328_s2 + $0x128] sm:$0xff]  }
  0x51   : > { %v1106_v22 = vrot.slane %v1105_v11, 4  ;;  %v1014_v11 = vld [vmem:[%s7400_s25 + $0x3c] sm:$0xf] }
  0x52   : > { %v1130_v54 = vrot.slane %v1129_v44, 4  ;;  %v1174_v29 = vshll.u32 %v1014_v11, 16  ;;  %v1186_v44 = vrot.slane %v1184_v15, 4  ;;  %v7238_v15 = vld [vmem:[%s9328_s2 + $0xe0] sm:$0xff]  }
  0x53   : > { %v1111_v34 = vsel %vm7519_vm5, %v1106_v22, %v1110_v7  ;;  %v1856_v22 = vrot.slane %v1013_v53, 5 }
  0x54   : > { %6716 = vmatmul.mubr.bf16.gmra.mxu0 %v7216_v6  ;;  %v7570_v6 = vcombine.low %v1087_v58, %v1097_v1  ;;  %v7593_v48 = vcombine.low %v1111_v34, %v1121_v42  ;;  %v1760_v58 = vld [vmem:[%s7400_s25 + $0x30] sm:$0xe]  ;;  %v1156_v1 = vshll.u32 %v1012_v46, 16  ;;  %v1180_v34 = vshll.u32 %v1015_v17, 16 }
  0x55   : > { %6764 = vmatmul.mubr.bf16.gmra.mxu1 %v7217_v12  ;;  %6719 = vmatprep.mubr.bf16.mxu0 %v7220_v13  ;;  %v5915_v12 = vrot.slane %v1758_v56, 9  ;;  %v1839_v13 = vrot.slane %v1006_v45, 5  ;;  %v5916_v45 = vrot.slane %v1759_v28, 9  ;;  %v1147_v56 = vshrl.u32 %v1011_v38, 16 }
  0x56   : > { %6767 = vmatprep.mubr.bf16.mxu1 %v7221_v20  ;;  %v1132_v20 = vshll.u32 %v1009_v0, 16  ;;  %v1158_v9 = vrot.slane %v1156_v1, 5  ;;  %v5917_v19 = vrot.slane %v1760_v58, 9  ;;  %v1171_v28 = vshrl.u32 %v1014_v11, 16  ;;  %v1019_v1 = vld [vmem:[%s7400_s25 + $0x50] sm:$0x1] }
  0x57   : > { %v7576_v24 = vsel %vm7501_vm4, %v5915_v12, %v1839_v13  ;;  %v1841_v25 = vrot.slane %v1839_v13, 4  ;;  %v7599_v61 = vsel %vm7501_vm4, %v5916_v45, %v1846_v52  ;;  %v1149_v4 = vrot.slane %v1147_v56, 4  ;;  %v1020_v11 = vld [vmem:[%s7400_s25 + $0x54] sm:$0xf] }
  0x58   : > { %v1134_v33 = vrot.slane %v1132_v20, 5  ;;  %v5948_v13 = vcombine.low %v7599_v61, %v7607_v8  ;;  %v1853_v20 = vrot.slane %v1012_v46, 5  ;;  %v1182_v42 = vrot.slane %v1180_v34, 5  ;;  %v1023_v8 = vld [vmem:[%s7400_s25 + $0x60] sm:$0xf] }
  0x59   : > { %v7583_v35 = vsel %vm7501_vm4, %v1841_v25, %v1842_v14  ;;  %v1860_v58 = vrot.slane %v1015_v17, 5  ;;  %v1222_v34 = vshll.u32 %v1020_v11, 16 }
  0x5a   : > { %v5947_v43 = vcombine.low %v7576_v24, %v7583_v35  ;;  %v1139_v50 = vor.u32 %v1138_v36, %v1134_v33  ;;  %v1135_v3 = vsel %vm7519_vm5, %v1130_v54, %v1134_v33  ;;  %v7623_v32 = vsel %vm7501_vm4, %v5917_v19, %v1853_v20  ;;  %v7235_v54 = vld [vmem:[%s9328_s2 + $0x130] sm:$0xff]   ;;  %v1021_v19 = vld [vmem:[%s7400_s25 + $0x58] sm:$0xf] }
  0x5b   : > { %v1855_v33 = vrot.slane %v1853_v20, 4  ;;  %v1187_v56 = vor.u32 %v1186_v44, %v1182_v42  ;;  %v7684_v20 = vld [vmem:[%s7400_s25 + $0x5c] sm:$0x1]  ;;  %v1224_v44 = vrot.slane %v1222_v34, 5  ;;  %v1028_v34 = vld [vmem:[%s7400_s25 + $0x74] sm:$0x1] }
  0x5c   : > { %6720 = vmatmul.mubr.bf16.gmra.mxu0 %v7222_v51  ;;  %v1144_v51 = vrot.slane %v1142_v37, 5  ;;  %v1140_v60 = vrot.slane %v1139_v50, 4  ;;  %v1173_v37 = vrot.slane %v1171_v28, 4  ;;  %v1763_v28 = vld [vmem:[%s7400_s25 + $0x54] sm:$0xe]  ;;  %v1238_v61 = vshll.u32 %v7684_v20, 16 }
  0x5d   : > { %6768 = vmatmul.mubr.bf16.gmra.mxu1 %v7223_v57  ;;  %6723 = vmatprep.mubr.bf16.mxu0 %v7226_v5  ;;  %v1150_v57 = vshll.u32 %v1011_v38, 16  ;;  %v1160_v5 = vshrl.u32 %v1012_v46, 16  ;;  %v1176_v38 = vrot.slane %v1174_v29, 5  ;;  %v7234_v46 = vld [vmem:[%s9328_s2 + $0xf0] sm:$0xff]  }
  0x5e   : > { %6771 = vmatprep.mubr.bf16.mxu1 %v7227_v10  ;;  %v1145_v7 = vsel %vm7519_vm5, %v1140_v60, %v1144_v51  ;;  %v1166_v10 = vshll.u32 %v1013_v53, 16  ;;  %v5918_v53 = vrot.slane %v1761_v31, 9 }
  0x5f   : > { %v1152_v0 = vrot.slane %v1150_v57, 5  ;;  %v7611_v12 = vcombine.low %v1135_v3, %v1145_v7  ;;  %v1162_v16 = vrot.slane %v1160_v5, 4  ;;  %v1177_v52 = vor.u32 %v1176_v38, %v1173_v37  ;;  %v7239_v38 = vld [vmem:[%s9328_s2 + $0x120] sm:$0xff]  }
  0x60   : > { %v1168_v18 = vrot.slane %v1166_v10, 5  ;;  %v1195_v3 = vshrl.u32 %v1017_v23, 16  ;;  %v1862_v5 = vrot.slane %v1860_v58, 4  ;;  %v1214_v10 = vshll.u32 %v1019_v1, 16 }
  0x61   : > { %v1153_v14 = vor.u32 %v1152_v0, %v1149_v4  ;;  %v1163_v26 = vor.u32 %v1162_v16, %v1158_v9  ;;  %v1178_v60 = vrot.slane %v1177_v52, 4  ;;  %v1188_v4 = vrot.slane %v1187_v56, 4 }
  0x62   : > { %v7655_v0 = vsel %vm7501_vm4, %v5918_v53, %v1860_v58  ;;  %v1232_v37 = vshrl.u32 %v1021_v19, 16  ;;  %v1240_v56 = vrot.slane %v1238_v61, 5  ;;  %v1025_v58 = vld [vmem:[%s7400_s25 + $0x68] sm:$0x1]  ;;  %v1286_v61 = vshll.u32 %v1028_v34, 16 }
  0x63   : > { %v1154_v25 = vrot.slane %v1153_v14, 4  ;;  %v1164_v36 = vrot.slane %v1163_v26, 4  ;;  %v1870_v26 = vrot.slane %v1019_v1, 5  ;;  %v1877_v1 = vrot.slane %v7684_v20, 5 }
  0x64   : > { %6724 = vmatmul.mubr.bf16.gmra.mxu0 %v7228_v40  ;;  %v7629_v40 = vld [vmem:[%s7400_s25 + $0x4c] sm:$0xf] }
  0x65   : > { %6772 = vmatmul.mubr.bf16.gmra.mxu1 %v7229_v41  ;;  %6791 = vmatprep.mubr.bf16.mxu0 %v7547_v47  ;;  %v1016_v47 = vld [vmem:[%s7400_s25 + $0x44] sm:$0x1]  ;;  %v7633_v41 = vsel %vm7501_vm4, %v1855_v33, %v1856_v22  ;;  %v1169_v50 = vsel %vm7519_vm5, %v1164_v36, %v1168_v18  ;;  %v1204_v49 = vshll.u32 %v7629_v40, 16  ;;  %v1208_v7 = vshrl.u32 %v7629_v40, 16 }
  0x66   : > { %6839 = vmatprep.mubr.bf16.mxu1 %v5945_v27  ;;  %v1159_v27 = vsel %vm7519_vm5, %v1154_v25, %v1158_v9  ;;  %v1190_v45 = vshll.u32 %v1016_v47, 16  ;;  %v5949_v51 = vcombine.low %v7623_v32, %v7633_v41  ;;  %v1863_v62 = vrot.slane %v1016_v47, 5  ;;  %v1762_v9 = vld [vmem:[%s7400_s25 + $0x48] sm:$0xe]  ;;  %v1024_v41 = vld [vmem:[%s7400_s25 + $0x64] sm:$0xf] }
  0x67   : > { %v5893_v55 = vcombine.low %v1159_v27, %v1169_v50  ;;  %v1210_v18 = vrot.slane %v1208_v7, 4  ;;  %v1216_v22 = vrot.slane %v1214_v10, 5  ;;  %v5919_v47 = vrot.slane %v1762_v9, 9  ;;  %v7243_v10 = vld [vmem:[%s9328_s2 + $0x110] sm:$0xff]  }
  0x68   : > { %v1192_v57 = vrot.slane %v1190_v45, 5  ;;  %v7675_v35 = vsel %vm7501_vm4, %v1862_v5, %v1863_v62  ;;  %v1867_v25 = vrot.slane %v7629_v40, 5  ;;  %v1219_v33 = vshrl.u32 %v1020_v11, 16 }
  0x69   : > { %v5950_v16 = vcombine.low %v7655_v0, %v7675_v35  ;;  %v1228_v36 = vshll.u32 %v1021_v19, 16  ;;  %v1234_v50 = vrot.slane %v1232_v37, 4  ;;  %v5920_v32 = vrot.slane %v1763_v28, 9  ;;  %v7244_v0 = vld [vmem:[%s9328_s2 + $0xc8] sm:$0xff]  }
  0x6a   : > { %v1193_v24 = vsel %vm7519_vm5, %v1188_v4, %v1192_v57  ;;  %v1869_v27 = vrot.slane %v1867_v25, 4  ;;  %v1874_v57 = vrot.slane %v1021_v19, 5  ;;  %v1764_v4 = vld [vmem:[%s7400_s25 + $0x60] sm:$0xe]  ;;  %v1262_v19 = vshll.u32 %v1025_v58, 16 }
  0x6b   : > { %v1881_v28 = vrot.slane %v1024_v41, 5  ;;  %v1765_v37 = vld [vmem:[%s7400_s25 + $0x6c] sm:$0xe] }
  0x6c   : > { %6792 = vmatmul.mubr.bf16.vlgmr.msra.gmra.mxu0 %v7570_v6  ;;  %v1198_v6 = vshll.u32 %v1017_v23, 16  ;;  %v7694_v23 = vsel %vm7501_vm4, %v5919_v47, %v1867_v25  ;;  %v1871_v45 = vsel %vm7501_vm4, %v1869_v27, %v1870_v26  ;;  %v1264_v25 = vrot.slane %v1262_v19, 5 }
  0x6d   : > { %6840 = vmatmul.mubr.bf16.vlgmr.msra.gmra.mxu1 %v5946_v2  ;;  %6872 = vmatpush3.bf16.msra.mxu0 %v7532_v30  ;;  %v7236_v30 = vld [vmem:[%s9328_s2 + $0xe8] sm:$0xff]   ;;  %v1197_v2 = vrot.slane %v1195_v3, 4  ;;  %v5951_v52 = vcombine.low %v7694_v23, %v1871_v45  ;;  %v1243_v3 = vshrl.u32 %v1023_v8, 16  ;;  %v5921_v26 = vrot.slane %v1764_v4, 9  ;;  %v1766_v4 = vld [vmem:[%s7400_s25 + $0x78] sm:$0xe] }
  0x6e   : > { %6920 = vmatpush3.bf16.msra.mxu1 %v7540_v39  ;;  %6795 = vmatprep.mubr.bf16.mxu0 %v7593_v48  ;;  %v1183_v39 = vsel %vm7519_vm5, %v1178_v60, %v1182_v42  ;;  %v1200_v48 = vrot.slane %v1198_v6, 5  ;;  %v1221_v42 = vrot.slane %v1219_v33, 4  ;;  %v7241_v60 = vld [vmem:[%s9328_s2 + $0x118] sm:$0xff]   ;;  %v1246_v6 = vshll.u32 %v1023_v8, 16 }
  0x6f   : > { %6843 = vmatprep.mubr.bf16.mxu1 %v5947_v43  ;;  %6873 = vmatprep.subr.bf16.mxu0 %v7234_v46  ;;  %v1206_v43 = vrot.slane %v1204_v49, 5  ;;  %v7678_v14 = vcombine.low %v1183_v39, %v1193_v24  ;;  %v1876_v49 = vrot.slane %v1874_v57, 4  ;;  %v1252_v39 = vshll.u32 %v1024_v41, 16  ;;  %v1029_v8 = vld [vmem:[%s7400_s25 + $0x78] sm:$0xf] }
  0x70   : > { %6921 = vmatprep.subr.bf16.mxu1 %v7235_v54  ;;  %v1201_v17 = vor.u32 %v1200_v48, %v1197_v2  ;;  %v1225_v53 = vor.u32 %v1224_v44, %v1221_v42  ;;  %v7242_v2 = vld [vmem:[%s9328_s2 + $0xd0] sm:$0xff]   ;;  %v1245_v7 = vrot.slane %v1243_v3, 4  ;;  %v1248_v9 = vrot.slane %v1246_v6, 5 }
  0x71   : > { %6874 = vmatpush3.bf16.msra.mxu0 %v7234_v46  ;;  %v1211_v31 = vor.u32 %v1210_v18, %v1206_v43  ;;  %v1230_v46 = vrot.slane %v1228_v36, 5  ;;  %v1256_v24 = vshrl.u32 %v1024_v41, 16  ;;  %v1254_v18 = vrot.slane %v1252_v39, 5  ;;  %v1030_v41 = vld [vmem:[%s7400_s25 + $0x7c] sm:$0xf] }
  0x72   : > { %6922 = vmatpush3.bf16.msra.mxu1 %v7235_v54  ;;  %6875 = vmatprep.subr.bf16.mxu0 %v7236_v30  ;;  %v1202_v29 = vrot.slane %v1201_v17, 4  ;;  %v1226_v62 = vrot.slane %v1225_v53, 4  ;;  %v1878_v17 = vsel %vm7501_vm4, %v1876_v49, %v1877_v1  ;;  %v1249_v47 = vor.u32 %v1248_v9, %v1245_v7 }
  0x73   : > { %6923 = vmatprep.subr.bf16.mxu1 %v7237_v59  ;;  %v1212_v40 = vrot.slane %v1211_v31, 4  ;;  %v1882_v35 = vsel %vm7501_vm4, %v5921_v26, %v1881_v28  ;;  %v1891_v1 = vrot.slane %v1028_v34, 5  ;;  %v1291_v3 = vshrl.u32 %v1029_v8, 16 }
  0x74   : > { %6796 = vmatmul.mubr.bf16.gmra.mxu0 %v7611_v12  ;;  %v1207_v12 = vsel %vm7519_vm5, %v1202_v29, %v1206_v43  ;;  %v1231_v48 = vsel %vm7519_vm5, %v1226_v62, %v1230_v46  ;;  %v7735_v43 = vld [vmem:[%s7400_s25 + $0x70] sm:$0xf]  ;;  %v1884_v29 = vrot.slane %v1025_v58, 5  ;;  %v1250_v31 = vrot.slane %v1249_v47, 4  ;;  %v1033_v47 = vld [vmem:[%s7400_s25 + $0x88] sm:$0xf] }
  0x75   : > { %6844 = vmatmul.mubr.bf16.gmra.mxu1 %v5948_v13  ;;  %6799 = vmatprep.mubr.bf16.mxu0 %v5893_v55  ;;  %v1217_v13 = vsel %vm7519_vm5, %v1212_v40, %v1216_v22  ;;  %v1235_v55 = vor.u32 %v1234_v50, %v1230_v46  ;;  %v1276_v27 = vshll.u32 %v7735_v43, 16  ;;  %v1280_v36 = vshrl.u32 %v7735_v43, 16 }
  0x76   : > { %6847 = vmatprep.mubr.bf16.mxu1 %v5949_v51  ;;  %6876 = vmatpush3.bf16.msra.mxu0 %v7236_v30  ;;  %v7240_v51 = vld [vmem:[%s9328_s2 + $0xd8] sm:$0xff]   ;;  %v5895_v54 = vcombine.low %v1207_v12, %v1217_v13  ;;  %v7726_v30 = vsel %vm7501_vm4, %v5920_v32, %v1874_v57  ;;  %v1255_v12 = vsel %vm7519_vm5, %v1250_v31, %v1254_v18  ;;  %v5922_v32 = vrot.slane %v1765_v37, 9  ;;  %v1034_v31 = vld [vmem:[%s7400_s25 + $0x8c] sm:$0x1]  ;;  %v1035_v37 = vld [vmem:[%s7400_s25 + $0x90] sm:$0xf] }
  0x77   : > { %6924 = vmatpush3.bf16.msra.mxu1 %v7237_v59  ;;  %6877 = vmatprep.subr.bf16.mxu0 %v7238_v15  ;;  %v1236_v5 = vrot.slane %v1235_v55, 4  ;;  %v1026_v59 = vld [vmem:[%s7400_s25 + $0x6c] sm:$0xf]  ;;  %v5952_v22 = vcombine.low %v7726_v30, %v1878_v17  ;;  %v1278_v46 = vrot.slane %v1276_v27, 5  ;;  %v1282_v50 = vrot.slane %v1280_v36, 4  ;;  %v7790_v17 = vld [vmem:[%s9328_s2 + $0x178] sm:$0xff]  }
  0x78   : > { %6925 = vmatprep.subr.bf16.mxu1 %v7239_v38  ;;  %v1270_v23 = vshll.u32 %v1026_v59, 16  ;;  %v1288_v57 = vrot.slane %v1286_v61, 5  ;;  %v1888_v58 = vrot.slane %v7735_v43, 5  ;;  %v1294_v6 = vshll.u32 %v1029_v8, 16 }
  0x79   : > { %v1241_v11 = vsel %vm7519_vm5, %v1236_v5, %v1240_v56  ;;  %v1283_v56 = vor.u32 %v1282_v50, %v1278_v46  ;;  %v1300_v39 = vshll.u32 %v1030_v41, 16  ;;  %v1304_v7 = vshrl.u32 %v1030_v41, 16 }
  0x7a   : > { %6878 = vmatpush3.bf16.msra.mxu0 %v7238_v15  ;;  %v5896_v20 = vcombine.low %v1231_v48, %v1241_v11  ;;  %v1267_v15 = vshrl.u32 %v1026_v59, 16  ;;  %v1272_v44 = vrot.slane %v1270_v23, 5  ;;  %v1889_v30 = vsel %vm7501_vm4, %v5922_v32, %v1888_v58  ;;  %v1032_v11 = vld [vmem:[%s7400_s25 + $0x84] sm:$0xf]  ;;  %v1037_v32 = vld [vmem:[%s7400_s25 + $0x98] sm:$0x1] }
  0x7b   : > { %6926 = vmatpush3.bf16.msra.mxu1 %v7239_v38  ;;  %6879 = vmatprep.subr.bf16.mxu0 %v7240_v51  ;;  %v7245_v38 = vld [vmem:[%s9328_s2 + $0x108] sm:$0xff]   ;;  %v1284_v5 = vrot.slane %v1283_v56, 4  ;;  %v1890_v49 = vrot.slane %v1888_v58, 4  ;;  %v1296_v48 = vrot.slane %v1294_v6, 5  ;;  %v1302_v43 = vrot.slane %v1300_v39, 5 }
  0x7c   : > { %6800 = vmatmul.mubr.bf16.gmra.mxu0 %v7678_v14  ;;  %6927 = vmatprep.subr.bf16.mxu1 %v7241_v60  ;;  %v1258_v14 = vrot.slane %v1256_v24, 4  ;;  %v1269_v42 = vrot.slane %v1267_v15, 4  ;;  %v5923_v26 = vrot.slane %v1766_v4, 9  ;;  %v1315_v15 = vshrl.u32 %v1032_v11, 16  ;;  %v1768_v39 = vld [vmem:[%s7400_s25 + $0x90] sm:$0xe] }
  0x7d   : > { %6848 = vmatmul.mubr.bf16.gmra.mxu1 %v5950_v16  ;;  %6803 = vmatprep.mubr.bf16.mxu0 %v5895_v54  ;;  %v1883_v16 = vrot.slane %v1881_v28, 4  ;;  %v7247_v54 = vld [vmem:[%s9328_s2 + $0x100] sm:$0xff]   ;;  %v1289_v9 = vsel %vm7519_vm5, %v1284_v5, %v1288_v57  ;;  %v1892_v24 = vsel %vm7501_vm4, %v1890_v49, %v1891_v1  ;;  %v1895_v28 = vrot.slane %v1030_v41, 5 }
  0x7e   : > { %6851 = vmatprep.mubr.bf16.mxu1 %v5951_v52  ;;  %6880 = vmatpush3.bf16.msra.mxu0 %v7240_v51  ;;  %v1259_v33 = vor.u32 %v1258_v14, %v1254_v18  ;;  %v1273_v53 = vor.u32 %v1272_v44, %v1269_v42  ;;  %v7246_v51 = vld [vmem:[%s9328_s2 + $0xc0] sm:$0xff]   ;;  %v5954_v19 = vcombine.low %v1889_v30, %v1892_v24  ;;  %v7796_v14 = vld [vmem:[%s9328_s2 + $0x1b8] sm:$0xff]   ;;  %v1318_v23 = vshll.u32 %v1032_v11, 16  ;;  %v1036_v44 = vld [vmem:[%s7400_s25 + $0x94] sm:$0xf] }
  0x7f   : > { %6928 = vmatpush3.bf16.msra.mxu1 %v7241_v60  ;;  %6881 = vmatprep.subr.bf16.mxu0 %v7242_v2  ;;  %v1885_v45 = vsel %vm7501_vm4, %v1883_v16, %v1884_v29  ;;  %v1031_v60 = vld [vmem:[%s7400_s25 + $0x80] sm:$0x1]  ;;  %v1897_v16 = vrot.slane %v1895_v28, 4  ;;  %v1324_v27 = vshll.u32 %v1033_v47, 16  ;;  %v1328_v36 = vshrl.u32 %v1033_v47, 16 }
  0x80   : > { %6929 = vmatprep.subr.bf16.mxu1 %v7243_v10  ;;  %v1260_v40 = vrot.slane %v1259_v33, 4  ;;  %v5953_v52 = vcombine.low %v1882_v35, %v1885_v45  ;;  %v1274_v62 = vrot.slane %v1273_v53, 4  ;;  %v1898_v29 = vrot.slane %v1031_v60, 5 }
  0x81   : > { %v1896_v35 = vsel %vm7501_vm4, %v5923_v26, %v1895_v28  ;;  %v1320_v42 = vrot.slane %v1318_v23, 5  ;;  %v1330_v50 = vrot.slane %v1328_v36, 4  ;;  %v1334_v61 = vshll.u32 %v1034_v31, 16 }
  0x82   : > { %6882 = vmatpush3.bf16.msra.mxu0 %v7242_v2  ;;  %v1265_v13 = vsel %vm7519_vm5, %v1260_v40, %v1264_v25  ;;  %v1279_v59 = vsel %vm7519_vm5, %v1274_v62, %v1278_v46  ;;  %v1293_v2 = vrot.slane %v1291_v3, 4  ;;  %v1317_v40 = vrot.slane %v1315_v15, 4 }
  0x83   : > { %6930 = vmatpush3.bf16.msra.mxu1 %v7243_v10  ;;  %6883 = vmatprep.subr.bf16.mxu0 %v7244_v0  ;;  %v5897_v55 = vcombine.low %v1255_v12, %v1265_v13  ;;  %v1310_v10 = vshll.u32 %v1031_v60, 16  ;;  %v5898_v18 = vcombine.low %v1279_v59, %v1289_v9  ;;  %v1899_v45 = vsel %vm7501_vm4, %v1897_v16, %v1898_v29  ;;  %v1038_v9 = vld [vmem:[%s7400_s25 + $0x9c] sm:$0xf] }
  0x84   : > { %6804 = vmatmul.mubr.bf16.gmra.mxu0 %v5896_v20  ;;  %6931 = vmatprep.subr.bf16.mxu1 %v7245_v38  ;;  %v1297_v20 = vor.u32 %v1296_v48, %v1293_v2  ;;  %v1326_v46 = vrot.slane %v1324_v27, 5  ;;  %v5955_v13 = vcombine.low %v1896_v35, %v1899_v45  ;;  %v1905_v57 = vrot.slane %v1034_v31, 5  ;;  %v1041_v35 = vld [vmem:[%s7400_s25 + $0xa8] sm:$0xf] }
  0x85   : > { %6852 = vmatmul.mubr.bf16.gmra.mxu1 %v5952_v22  ;;  %6807 = vmatprep.mubr.bf16.mxu0 %v5897_v55  ;;  %v1306_v22 = vrot.slane %v1304_v7, 4  ;;  %v1312_v25 = vrot.slane %v1310_v10, 5  ;;  %v1902_v55 = vrot.slane %v1033_v47, 5  ;;  %v1339_v58 = vshrl.u32 %v1035_v37, 16 }
  0x86   : > { %6855 = vmatprep.mubr.bf16.mxu1 %v5953_v52  ;;  %6884 = vmatpush3.bf16.msra.mxu0 %v7244_v0  ;;  %v1298_v33 = vrot.slane %v1297_v20, 4  ;;  %v1767_v0 = vld [vmem:[%s7400_s25 + $0x84] sm:$0xe]  ;;  %v1321_v52 = vor.u32 %v1320_v42, %v1317_v40  ;;  %v1342_v60 = vshll.u32 %v1035_v37, 16  ;;  %v1348_v6 = vshll.u32 %v1036_v44, 16 }
  0x87   : > { %6932 = vmatpush3.bf16.msra.mxu1 %v7245_v38  ;;  %6885 = vmatprep.subr.bf16.mxu0 %v7246_v51  ;;  %v1307_v34 = vor.u32 %v1306_v22, %v1302_v43  ;;  %v5924_v53 = vrot.slane %v1767_v0, 9  ;;  %v1904_v3 = vrot.slane %v1902_v55, 4  ;;  %v1341_v5 = vrot.slane %v1339_v58, 4 }
  0x88   : > { %6933 = vmatprep.subr.bf16.mxu1 %v7247_v54  ;;  %v1303_v38 = vsel %vm7519_vm5, %v1298_v33, %v1302_v43  ;;  %v1322_v56 = vrot.slane %v1321_v52, 4  ;;  %v1344_v30 = vrot.slane %v1342_v60, 5  ;;  %v1352_v49 = vshrl.u32 %v1036_v44, 16  ;;  %v1769_v33 = vld [vmem:[%s7400_s25 + $0x9c] sm:$0xe] }
  0x89   : > { %v1308_v12 = vrot.slane %v1307_v34, 4  ;;  %v1903_v1 = vsel %vm7501_vm4, %v5924_v53, %v1902_v55  ;;  %v1906_v2 = vsel %vm7501_vm4, %v1904_v3, %v1905_v57  ;;  %v1350_v48 = vrot.slane %v1348_v6, 5 }
  0x8a   : > { %6886 = vmatpush3.bf16.msra.mxu0 %v7246_v51  ;;  %v1331_v51 = vor.u32 %v1330_v50, %v1326_v46  ;;  %v1327_v4 = vsel %vm7519_vm5, %v1322_v56, %v1326_v46  ;;  %v1358_v7 = vshll.u32 %v1037_v32, 16  ;;  %v5956_v43 = vcombine.low %v1903_v1, %v1906_v2 }
  0x8b   : > { %6934 = vmatpush3.bf16.msra.mxu1 %v7247_v54  ;;  %6967 = vmatprep.subr.bf16.mxu0 %v7790_v17  ;;  %v1313_v8 = vsel %vm7519_vm5, %v1308_v12, %v1312_v25  ;;  %v1336_v54 = vrot.slane %v1334_v61, 5  ;;  %v1345_v10 = vor.u32 %v1344_v30, %v1341_v5  ;;  %v1354_v11 = vrot.slane %v1352_v49, 4  ;;  %v1040_v25 = vld [vmem:[%s7400_s25 + $0xa4] sm:$0x1] }
  0x8c   : > { %6808 = vmatmul.mubr.bf16.gmra.mxu0 %v5898_v18  ;;  %7015 = vmatprep.subr.bf16.mxu1 %v7796_v14  ;;  %v5899_v41 = vcombine.low %v1303_v38, %v1313_v8  ;;  %v1332_v62 = vrot.slane %v1331_v51, 4  ;;  %v1039_v18 = vld [vmem:[%s7400_s25 + $0xa0] sm:$0xf]  ;;  %v5925_v20 = vrot.slane %v1768_v39, 9  ;;  %v1909_v22 = vrot.slane %v1036_v44, 5 }
  0x8d   : > { %6856 = vmatmul.mubr.bf16.gmra.mxu1 %v5954_v19  ;;  %v1360_v19 = vrot.slane %v1358_v7, 5  ;;  %v1912_v47 = vrot.slane %v1037_v32, 5  ;;  %v1346_v26 = vrot.slane %v1345_v10, 4  ;;  %v1355_v28 = vor.u32 %v1354_v11, %v1350_v48  ;;  %v1042_v38 = vld [vmem:[%s7400_s25 + $0xac] sm:$0xf] }
  0x8e   : > { %6859 = vmatprep.mubr.bf16.mxu1 %v5955_v13  ;;  %6811 = vmatprep.mubr.bf16.mxu0 %v5899_v41  ;;  %v1337_v59 = vsel %vm7519_vm5, %v1332_v62, %v1336_v54  ;;  %v1363_v29 = vshrl.u32 %v1038_v9, 16  ;;  %v1366_v31 = vshll.u32 %v1038_v9, 16  ;;  %v1910_v34 = vsel %vm7501_vm4, %v5925_v20, %v1909_v22  ;;  %v1043_v51 = vld [vmem:[%s7400_s25 + $0xb0] sm:$0x1]  ;;  %v1770_v62 = vld [vmem:[%s7400_s25 + $0xa8] sm:$0xe] }
  0x8f   : > { %v5900_v24 = vcombine.low %v1327_v4, %v1337_v59  ;;  %v1911_v15 = vrot.slane %v1909_v22, 4  ;;  %v1372_v23 = vshll.u32 %v1039_v18, 16  ;;  %v1376_v0 = vshrl.u32 %v1039_v18, 16  ;;  %v1044_v59 = vld [vmem:[%s7400_s25 + $0xb4] sm:$0xf] }
  0x90   : > { %v1351_v16 = vsel %vm7519_vm5, %v1346_v26, %v1350_v48  ;;  %v1356_v27 = vrot.slane %v1355_v28, 4  ;;  %v1365_v36 = vrot.slane %v1363_v29, 4  ;;  %v1368_v37 = vrot.slane %v1366_v31, 5  ;;  %v1771_v20 = vld [vmem:[%s7400_s25 + $0xb4] sm:$0xe] }
  0x91   : > { %v1913_v12 = vsel %vm7501_vm4, %v1911_v15, %v1912_v47  ;;  %v1374_v40 = vrot.slane %v1372_v23, 5  ;;  %v1378_v42 = vrot.slane %v1376_v0, 4  ;;  %v1382_v44 = vshll.u32 %v1040_v25, 16 }
  0x92   : > { %v1361_v45 = vsel %vm7519_vm5, %v1356_v27, %v1360_v19  ;;  %v5957_v46 = vcombine.low %v1910_v34, %v1913_v12  ;;  %v1369_v50 = vor.u32 %v1368_v37, %v1365_v36  ;;  %v5926_v61 = vrot.slane %v1769_v33, 9  ;;  %v6041_v34 = vld [vmem:[%s7400_s25 + $0xc] sm:$0xf] }
  0x93   : > { %v5901_v8 = vcombine.low %v1351_v16, %v1361_v45  ;;  %v1379_v13 = vor.u32 %v1378_v42, %v1374_v40  ;;  %v1384_v52 = vrot.slane %v1382_v44, 5  ;;  %v1916_v53 = vrot.slane %v1039_v18, 5  ;;  %v7860_v44 = vld [vmem:[%s7400_s25 + $0x10] sm:$0xf] }
  0x94   : > { %6812 = vmatmul.mubr.bf16.gmra.mxu0 %v5900_v24  ;;  %v1370_v32 = vrot.slane %v1369_v50, 4  ;;  %v1919_v41 = vrot.slane %v1040_v25, 5  ;;  %v1387_v54 = vshrl.u32 %v1041_v35, 16  ;;  %v1390_v55 = vshll.u32 %v1041_v35, 16  ;;  %v1045_v24 = vld [vmem:[%s7400_s25 + $0xb8] sm:$0xf] }
  0x95   : > { %6860 = vmatmul.mubr.bf16.gmra.mxu1 %v5956_v43  ;;  %6815 = vmatprep.mubr.bf16.mxu0 %v5901_v8  ;;  %v1380_v56 = vrot.slane %v1379_v13, 4  ;;  %v1917_v57 = vsel %vm7501_vm4, %v5926_v61, %v1916_v53  ;;  %v1918_v58 = vrot.slane %v1916_v53, 4  ;;  %v1396_v60 = vshll.u32 %v1042_v38, 16  ;;  %v1046_v43 = vld [vmem:[%s7400_s25 + $0xbc] sm:$0x1] }
  0x96   : > { %6863 = vmatprep.mubr.bf16.mxu1 %v5957_v46  ;;  %v1375_v1 = vsel %vm7519_vm5, %v1370_v32, %v1374_v40  ;;  %v1389_v3 = vrot.slane %v1387_v54, 4  ;;  %v1392_v6 = vrot.slane %v1390_v55, 5  ;;  %v1400_v4 = vshrl.u32 %v1042_v38, 16  ;;  %v7863_v8 = vld [vmem:[%s7400_s25 + $0x14] sm:$0x1] }
  0x97   : > { %v1385_v5 = vsel %vm7519_vm5, %v1380_v56, %v1384_v52  ;;  %v1920_v30 = vsel %vm7501_vm4, %v1918_v58, %v1919_v41  ;;  %v1398_v49 = vrot.slane %v1396_v60, 5  ;;  %v1406_v39 = vshll.u32 %v1043_v51, 16  ;;  %v6044_v41 = vld [vmem:[%s7400_s25 + $0x18] sm:$0xf]  ;;  %v7248_v58 = vld [vmem:[%s7400_s25 + $0xc] sm:$0xff]  }
  0x98   : > { %v5902_v2 = vcombine.low %v1375_v1, %v1385_v5  ;;  %v5958_v48 = vcombine.low %v1917_v57, %v1920_v30  ;;  %v1393_v7 = vor.u32 %v1392_v6, %v1389_v3  ;;  %v1402_v9 = vrot.slane %v1400_v4, 4  ;;  %v7874_v3 = vld [vmem:[%s7400_s25 + $0x1c] sm:$0xf] }
  0x99   : > { %v1408_v10 = vrot.slane %v1406_v39, 5  ;;  %v5927_v11 = vrot.slane %v1770_v62, 9  ;;  %v1923_v18 = vrot.slane %v1042_v38, 5  ;;  %v1926_v19 = vrot.slane %v1043_v51, 5  ;;  %v6047_v39 = vld [vmem:[%s7400_s25 + $0x24] sm:$0xf] }
  0x9a   : > { %v1394_v22 = vrot.slane %v1393_v7, 4  ;;  %v1403_v47 = vor.u32 %v1402_v9, %v1398_v49  ;;  %v1411_v25 = vshrl.u32 %v1044_v59, 16  ;;  %v1414_v26 = vshll.u32 %v1044_v59, 16  ;;  %v7886_v9 = vld [vmem:[%s7400_s25 + $0x28] sm:$0xf] }
  0x9b   : > { %v1924_v28 = vsel %vm7501_vm4, %v5927_v11, %v1923_v18  ;;  %v1925_v29 = vrot.slane %v1923_v18, 4  ;;  %v1420_v31 = vshll.u32 %v1045_v24, 16  ;;  %v1424_v33 = vshrl.u32 %v1045_v24, 16  ;;  %v7890_v18 = vld [vmem:[%s7400_s25 + $0x2c] sm:$0x1] }
  0x9c   : > { %6816 = vmatmul.mubr.bf16.gmra.mxu0 %v5902_v2  ;;  %v1399_v15 = vsel %vm7519_vm5, %v1394_v22, %v1398_v49  ;;  %v1404_v23 = vrot.slane %v1403_v47, 4  ;;  %v1413_v0 = vrot.slane %v1411_v25, 4  ;;  %v1416_v35 = vrot.slane %v1414_v26, 5  ;;  %v7882_v49 = vld [vmem:[%s7400_s25 + $0x20] sm:$0x1] }
  0x9d   : > { %6864 = vmatmul.mubr.bf16.gmra.mxu1 %v5958_v48  ;;  %v1927_v16 = vsel %vm7501_vm4, %v1925_v29, %v1926_v19  ;;  %v1422_v27 = vrot.slane %v1420_v31, 5  ;;  %v1426_v36 = vrot.slane %v1424_v33, 4  ;;  %v1430_v37 = vshll.u32 %v1046_v43, 16 }
  0x9e   : > { %v1409_v38 = vsel %vm7519_vm5, %v1404_v23, %v1408_v10  ;;  %v5959_v12 = vcombine.low %v1924_v28, %v1927_v16  ;;  %v1417_v40 = vor.u32 %v1416_v35, %v1413_v0  ;;  %v5928_v42 = vrot.slane %v1771_v20, 9 }
  0x9f   : > { %v5903_v45 = vcombine.low %v1399_v15, %v1409_v38  ;;  %v1427_v46 = vor.u32 %v1426_v36, %v1422_v27  ;;  %v1432_v50 = vrot.slane %v1430_v37, 5  ;;  %v1930_v61 = vrot.slane %v1045_v24, 5  ;;  %v7249_v37 = vld [vmem:[%s7400_s25 + $0x18] sm:$0xff]  }
  0xa0   : > { %6867 = vmatprep.mubr.bf16.mxu1 %v5959_v12  ;;  %v1418_v13 = vrot.slane %v1417_v40, 4  ;;  %v1933_v52 = vrot.slane %v1046_v43, 5  ;;  %v2693_v53 = vshrl.u32 %v6041_v34, 16  ;;  %v2696_v32 = vshll.u32 %v6041_v34, 16  ;;  %v7252_v12 = vld [vmem:[%s7400_s25 + $0x24] sm:$0xff]  }
  0xa1   : > { %6819 = vmatprep.mubr.bf16.mxu0 %v5903_v45  ;;  %v1428_v51 = vrot.slane %v1427_v46, 4  ;;  %v1931_v54 = vsel %vm7501_vm4, %v5928_v42, %v1930_v61  ;;  %v1932_v55 = vrot.slane %v1930_v61, 4  ;;  %v2702_v56 = vshll.u32 %v7860_v44, 16  ;;  %v7905_v45 = vld [vmem:[%s7400_s25 + $0x34] sm:$0xf] }
  0xa2   : > { %v1423_v57 = vsel %vm7519_vm5, %v1418_v13, %v1422_v27  ;;  %v2695_v60 = vrot.slane %v2693_v53, 4  ;;  %v2698_v62 = vrot.slane %v2696_v32, 5  ;;  %v2706_v1 = vshrl.u32 %v7860_v44, 16  ;;  %v6050_v27 = vld [vmem:[%s7400_s25 + $0x30] sm:$0xf] }
  0xa3   : > { %v1433_v6 = vsel %vm7519_vm5, %v1428_v51, %v1432_v50  ;;  %v1934_v4 = vsel %vm7501_vm4, %v1932_v55, %v1933_v52  ;;  %v2704_v5 = vrot.slane %v2702_v56, 5  ;;  %v2712_v30 = vshll.u32 %v7863_v8, 16  ;;  %v7254_v52 = vld [vmem:[%s9328_s2 + $0x170] sm:$0xff]   ;;  %v7913_v56 = vld [vmem:[%s7400_s25 + $0x38] sm:$0x1] }
  0xa4   : > { %v5904_v59 = vcombine.low %v1423_v57, %v1433_v6  ;;  %v5960_v2 = vcombine.low %v1931_v54, %v1934_v4  ;;  %v2699_v48 = vor.u32 %v2698_v62, %v2695_v60  ;;  %v2708_v7 = vrot.slane %v2706_v1, 4  ;;  %v7255_v60 = vld [vmem:[%s9328_s2 + $0x1b0] sm:$0xff]   ;;  %v6053_v62 = vld [vmem:[%s7400_s25 + $0x3c] sm:$0xf] }
  0xa5   : > { %v2714_v24 = vrot.slane %v2712_v30, 5  ;;  %v2717_v43 = vshrl.u32 %v6044_v41, 16  ;;  %v2720_v10 = vshll.u32 %v6044_v41, 16  ;;  %v2726_v11 = vshll.u32 %v7874_v3, 16  ;;  %v7924_v30 = vld [vmem:[%s7400_s25 + $0x40] sm:$0xf] }
  0xa6   : > { %6820 = vmatmul.mubr.bf16.gmra.mxu0 %v5904_v59  ;;  %6868 = vmatmul.mubr.bf16.gmra.mxu1 %v5960_v2  ;;  %v2700_v19 = vrot.slane %v2699_v48, 4  ;;  %v2709_v20 = vor.u32 %v2708_v7, %v2704_v5  ;;  %v2730_v22 = vshrl.u32 %v7874_v3, 16  ;;  %v2736_v47 = vshll.u32 %v7882_v49, 16  ;;  %v7928_v7 = vld [vmem:[%s7400_s25 + $0x44] sm:$0x1] }
  0xa7   : > { %6887 = vmatprep.mubr.bf16.mxu0 %v7248_v58  ;;  %v2719_v25 = vrot.slane %v2717_v43, 4  ;;  %v2722_v26 = vrot.slane %v2720_v10, 5  ;;  %v2728_v28 = vrot.slane %v2726_v11, 5  ;;  %v2741_v29 = vshrl.u32 %v6047_v39, 16  ;;  %v7258_v43 = vld [vmem:[%s9328_s2 + $0x168] sm:$0xff]   ;;  %v7253_v11 = vld [vmem:[%s7400_s25 + $0x30] sm:$0xff]  }
  0xa8   : > { %v2705_v31 = vsel %vm7519_vm5, %v2700_v19, %v2704_v5  ;;  %v2710_v33 = vrot.slane %v2709_v20, 4  ;;  %v2732_v34 = vrot.slane %v2730_v22, 4  ;;  %v2738_v15 = vrot.slane %v2736_v47, 5 }
  0xa9   : > { %v2723_v23 = vor.u32 %v2722_v26, %v2719_v25  ;;  %v2743_v0 = vrot.slane %v2741_v29, 4  ;;  %v2744_v35 = vshll.u32 %v6047_v39, 16  ;;  %v2750_v16 = vshll.u32 %v7886_v9, 16  ;;  %v7256_v25 = vld [vmem:[%s7400_s25 + $0x3c] sm:$0xff]  }
  0xaa   : > { %v2715_v36 = vsel %vm7519_vm5, %v2710_v33, %v2714_v24  ;;  %v2733_v38 = vor.u32 %v2732_v34, %v2728_v28  ;;  %v2754_v40 = vshrl.u32 %v7886_v9, 16  ;;  %v2760_v42 = vshll.u32 %v7890_v18, 16  ;;  %v6056_v24 = vld [vmem:[%s7400_s25 + $0x48] sm:$0xf] }
  0xab   : > { %v6105_v46 = vcombine.low %v2705_v31, %v2715_v36  ;;  %v2724_v50 = vrot.slane %v2723_v23, 4  ;;  %v2746_v61 = vrot.slane %v2744_v35, 5  ;;  %v2752_v13 = vrot.slane %v2750_v16, 5  ;;  %v7259_v23 = vld [vmem:[%s9328_s2 + $0x1a8] sm:$0xff]   ;;  %v7262_v36 = vld [vmem:[%s9328_s2 + $0x160] sm:$0xff]  }
  0xac   : > { %v2734_v53 = vrot.slane %v2733_v38, 4  ;;  %v2756_v32 = vrot.slane %v2754_v40, 4  ;;  %v2762_v41 = vrot.slane %v2760_v42, 5  ;;  %v2765_v51 = vshrl.u32 %v6050_v27, 16  ;;  %v6059_v42 = vld [vmem:[%s7400_s25 + $0x54] sm:$0xf] }
  0xad   : > { %6935 = vmatprep.mubr.bf16.mxu1 %v6105_v46  ;;  %v2729_v54 = vsel %vm7519_vm5, %v2724_v50, %v2728_v28  ;;  %v2747_v55 = vor.u32 %v2746_v61, %v2743_v0  ;;  %v2768_v57 = vshll.u32 %v6050_v27, 16  ;;  %v2774_v58 = vshll.u32 %v7905_v45, 16 }
  0xae   : > { %6888 = vmatmul.mubr.bf16.vlgmr.msra.gmra.mxu0 %v7249_v37  ;;  %v2739_v1 = vsel %vm7519_vm5, %v2734_v53, %v2738_v15  ;;  %v2757_v6 = vor.u32 %v2756_v32, %v2752_v13  ;;  %v2767_v4 = vrot.slane %v2765_v51, 4  ;;  %v2778_v5 = vshrl.u32 %v7905_v45, 16  ;;  %v7944_v15 = vld [vmem:[%s7400_s25 + $0x4c] sm:$0xf]  ;;  %v7966_v51 = vld [vmem:[%s7400_s25 + $0x58] sm:$0xf] }
  0xaf   : > { %v6106_v39 = vcombine.low %v2729_v54, %v2739_v1  ;;  %6968 = vmatpush3.bf16.msra.mxu0 %v7790_v17  ;;  %6891 = vmatprep.mubr.bf16.mxu0 %v7252_v12  ;;  %v2748_v59 = vrot.slane %v2747_v55, 4  ;;  %v2770_v2 = vrot.slane %v2768_v57, 5  ;;  %v2776_v48 = vrot.slane %v2774_v58, 5 }
  0xb0   : > { %v2758_v10 = vrot.slane %v2757_v6, 4  ;;  %v2780_v19 = vrot.slane %v2778_v5, 4  ;;  %v2784_v20 = vshll.u32 %v7913_v56, 16  ;;  %6969 = vmatprep.subr.bf16.mxu0 %v7254_v52  ;;  %v2789_v17 = vshrl.u32 %v6053_v62, 16  ;;  %v7257_v6 = vld [vmem:[%s7400_s25 + $0x48] sm:$0xff]  }
  0xb1   : > { %6936 = vmatmul.mubr.bf16.vlgmr.msra.gmra.mxu1 %v6106_v39  ;;  %v2753_v22 = vsel %vm7519_vm5, %v2748_v59, %v2752_v13  ;;  %v2771_v47 = vor.u32 %v2770_v2, %v2767_v4  ;;  %v2792_v26 = vshll.u32 %v6053_v62, 16  ;;  %v2798_v28 = vshll.u32 %v7924_v30, 16  ;;  %v7971_v62 = vld [vmem:[%s7400_s25 + $0x5c] sm:$0x1]  ;;  %v6062_v59 = vld [vmem:[%s7400_s25 + $0x60] sm:$0xf] }
  0xb2   : > { %7016 = vmatpush3.bf16.msra.mxu1 %v7796_v14  ;;  %v2763_v29 = vsel %vm7519_vm5, %v2758_v10, %v2762_v41  ;;  %v2781_v31 = vor.u32 %v2780_v19, %v2776_v48  ;;  %v2786_v33 = vrot.slane %v2784_v20, 5  ;;  %v2791_v34 = vrot.slane %v2789_v17, 4  ;;  %v7952_v14 = vld [vmem:[%s7400_s25 + $0x50] sm:$0x1]  ;;  %v7266_v2 = vld [vmem:[%s9328_s2 + $0x158] sm:$0xff]  }
  0xb3   : > { %v6107_v0 = vcombine.low %v2753_v22, %v2763_v29  ;;  %v2772_v35 = vrot.slane %v2771_v47, 4  ;;  %6970 = vmatpush3.bf16.msra.mxu0 %v7254_v52  ;;  %7017 = vmatprep.subr.bf16.mxu1 %v7255_v60  ;;  %v2794_v16 = vrot.slane %v2792_v26, 5  ;;  %v7949_v27 = vrot.slane %v2798_v28, 5  ;;  %v7990_v47 = vld [vmem:[%s7400_s25 + $0x64] sm:$0xf] }
  0xb4   : > { %v2782_v37 = vrot.slane %v2781_v31, 4  ;;  %v2802_v38 = vshrl.u32 %v7924_v30, 16  ;;  %v2808_v12 = vshll.u32 %v7928_v7, 16  ;;  %v2813_v40 = vshrl.u32 %v6056_v24, 16  ;;  %6971 = vmatprep.subr.bf16.mxu0 %v7258_v43 }
  0xb5   : > { %6939 = vmatprep.mubr.bf16.mxu1 %v6107_v0  ;;  %v2777_v46 = vsel %vm7519_vm5, %v2772_v35, %v2776_v48  ;;  %v2795_v50 = vor.u32 %v2794_v16, %v2791_v34  ;;  %v2816_v61 = vshll.u32 %v6056_v24, 16  ;;  %v2822_v13 = vshll.u32 %v7944_v15, 16 }
  0xb6   : > { %6892 = vmatmul.mubr.bf16.gmra.mxu0 %v7253_v11  ;;  %v2787_v52 = vsel %vm7519_vm5, %v2782_v37, %v2786_v33  ;;  %7018 = vmatpush3.bf16.msra.mxu1 %v7255_v60  ;;  %v2804_v53 = vrot.slane %v2802_v38, 4  ;;  %v2810_v32 = vrot.slane %v2808_v12, 5  ;;  %v2815_v41 = vrot.slane %v2813_v40, 4  ;;  %v7263_v60 = vld [vmem:[%s9328_s2 + $0x1a0] sm:$0xff]   ;;  %v8004_v38 = vld [vmem:[%s7400_s25 + $0x68] sm:$0x1] }
  0xb7   : > { %v6108_v54 = vcombine.low %v2777_v46, %v2787_v52  ;;  %6895 = vmatprep.mubr.bf16.mxu0 %v7256_v25  ;;  %v2796_v55 = vrot.slane %v2795_v50, 4  ;;  %v2818_v57 = vrot.slane %v2816_v61, 5  ;;  %v7968_v58 = vrot.slane %v2822_v13, 5  ;;  %6972 = vmatpush3.bf16.msra.mxu0 %v7258_v43  ;;  %v7260_v43 = vld [vmem:[%s7400_s25 + $0x54] sm:$0xff]   ;;  %v8011_v61 = vld [vmem:[%s7400_s25 + $0x70] sm:$0xf] }
  0xb8   : > { %v2805_v1 = vor.u32 %v2804_v53, %v7949_v27  ;;  %v2826_v4 = vshrl.u32 %v7944_v15, 16  ;;  %v2832_v5 = vshll.u32 %v7952_v14, 16  ;;  %7019 = vmatprep.subr.bf16.mxu1 %v7259_v23  ;;  %v2837_v39 = vshrl.u32 %v6059_v42, 16  ;;  %6973 = vmatprep.subr.bf16.mxu0 %v7262_v36  ;;  %v7267_v25 = vld [vmem:[%s9328_s2 + $0x198] sm:$0xff]   ;;  %v7270_v12 = vld [vmem:[%s9328_s2 + $0x150] sm:$0xff]  }
  0xb9   : > { %6940 = vmatmul.mubr.bf16.gmra.mxu1 %v6108_v54  ;;  %v2801_v48 = vsel %vm7519_vm5, %v2796_v55, %v7949_v27  ;;  %v2819_v24 = vor.u32 %v2818_v57, %v2815_v41  ;;  %v2840_v10 = vshll.u32 %v6059_v42, 16  ;;  %v2846_v11 = vshll.u32 %v7966_v51, 16  ;;  %v7271_v41 = vld [vmem:[%s9328_s2 + $0x190] sm:$0xff]   ;;  %v7261_v55 = vld [vmem:[%s7400_s25 + $0x60] sm:$0xff]  }
  0xba   : > { %v2806_v19 = vrot.slane %v2805_v1, 4  ;;  %v2828_v20 = vrot.slane %v2826_v4, 4  ;;  %v2834_v17 = vrot.slane %v2832_v5, 5  ;;  %7020 = vmatpush3.bf16.msra.mxu1 %v7259_v23  ;;  %v2839_v22 = vrot.slane %v2837_v39, 4  ;;  %v7274_v1 = vld [vmem:[%s9328_s2 + $0x148] sm:$0xff]  }
  0xbb   : > { %v2820_v26 = vrot.slane %v2819_v24, 4  ;;  %v2842_v28 = vrot.slane %v2840_v10, 5  ;;  %v2848_v29 = vrot.slane %v2846_v11, 5  ;;  %v2850_v31 = vshrl.u32 %v7966_v51, 16  ;;  %6974 = vmatpush3.bf16.msra.mxu0 %v7262_v36  ;;  %7021 = vmatprep.subr.bf16.mxu1 %v7263_v60  ;;  %v6065_v36 = vld [vmem:[%s7400_s25 + $0x6c] sm:$0xf] }
  0xbc   : > { %v2811_v33 = vsel %vm7519_vm5, %v2806_v19, %v2810_v32  ;;  %v2829_v34 = vor.u32 %v2828_v20, %v7968_v58  ;;  %v2856_v23 = vshll.u32 %v7971_v62, 16  ;;  %v2861_v0 = vshrl.u32 %v6062_v59, 16  ;;  %6975 = vmatprep.subr.bf16.mxu0 %v7266_v2  ;;  %v6068_v24 = vld [vmem:[%s7400_s25 + $0x78] sm:$0xf]  ;;  %v8033_v19 = vld [vmem:[%s7400_s25 + $0x7c] sm:$0xf] }
  0xbd   : > { %v6109_v35 = vcombine.low %v2801_v48, %v2811_v33  ;;  %v2825_v16 = vsel %vm7519_vm5, %v2820_v26, %v7968_v58  ;;  %v2843_v27 = vor.u32 %v2842_v28, %v2839_v22  ;;  %v2852_v37 = vrot.slane %v2850_v31, 4  ;;  %v8029_v48 = vld [vmem:[%s7400_s25 + $0x74] sm:$0x1]  ;;  %v7275_v20 = vld [vmem:[%s9328_s2 + $0x188] sm:$0xff]  }
  0xbe   : > { %6896 = vmatmul.mubr.bf16.gmra.mxu0 %v7257_v6  ;;  %v2830_v40 = vrot.slane %v2829_v34, 4  ;;  %v2858_v42 = vrot.slane %v2856_v23, 5  ;;  %v2863_v46 = vrot.slane %v2861_v0, 4  ;;  %v2864_v50 = vshll.u32 %v6062_v59, 16  ;;  %7022 = vmatpush3.bf16.msra.mxu1 %v7263_v60  ;;  %v7264_v59 = vld [vmem:[%s7400_s25 + $0x6c] sm:$0xff]  }
  0xbf   : > { %6943 = vmatprep.mubr.bf16.mxu1 %v6109_v35  ;;  %6899 = vmatprep.mubr.bf16.mxu0 %v7260_v43  ;;  %v2844_v13 = vrot.slane %v2843_v27, 4  ;;  %v2853_v52 = vor.u32 %v2852_v37, %v2848_v29  ;;  %v2870_v53 = vshll.u32 %v7990_v47, 16  ;;  %v2874_v32 = vshrl.u32 %v7990_v47, 16 }
  0xc0   : > { %v2835_v54 = vsel %vm7519_vm5, %v2830_v40, %v2834_v17  ;;  %v2866_v57 = vrot.slane %v2864_v50, 5  ;;  %v2880_v58 = vshll.u32 %v8004_v38, 16  ;;  %v2885_v60 = vshrl.u32 %v6065_v36, 16  ;;  %6976 = vmatpush3.bf16.msra.mxu0 %v7266_v2  ;;  %7023 = vmatprep.subr.bf16.mxu1 %v7267_v25 }
  0xc1   : > { %v6110_v6 = vcombine.low %v2825_v16, %v2835_v54  ;;  %v2849_v4 = vsel %vm7519_vm5, %v2844_v13, %v2848_v29  ;;  %v2854_v5 = vrot.slane %v2853_v52, 4  ;;  %v2872_v39 = vrot.slane %v2870_v53, 5  ;;  %6977 = vmatprep.subr.bf16.mxu0 %v7270_v12  ;;  %v8043_v29 = vld [vmem:[%s7400_s25 + $0x80] sm:$0x1]  ;;  %v7265_v53 = vld [vmem:[%s7400_s25 + $0x78] sm:$0xff]  }
  0xc2   : > { %v2867_v43 = vor.u32 %v2866_v57, %v2863_v46  ;;  %v2876_v10 = vrot.slane %v2874_v32, 4  ;;  %v2882_v2 = vrot.slane %v2880_v58, 5  ;;  %v2887_v11 = vrot.slane %v2885_v60, 4  ;;  %7024 = vmatpush3.bf16.msra.mxu1 %v7267_v25  ;;  %v7278_v25 = vld [vmem:[%s9328_s2 + $0x140] sm:$0xff]  }
  0xc3   : > { %6944 = vmatmul.mubr.bf16.gmra.mxu1 %v6110_v6  ;;  %v2859_v17 = vsel %vm7519_vm5, %v2854_v5, %v2858_v42  ;;  %v2888_v22 = vshll.u32 %v6065_v36, 16  ;;  %v2894_v26 = vshll.u32 %v8011_v61, 16  ;;  %v2898_v28 = vshrl.u32 %v8011_v61, 16  ;;  %7025 = vmatprep.subr.bf16.mxu1 %v7271_v41  ;;  %v6071_v57 = vld [vmem:[%s7400_s25 + $0x84] sm:$0xf] }
  0xc4   : > { %v6111_v31 = vcombine.low %v2849_v4, %v2859_v17  ;;  %v2868_v33 = vrot.slane %v2867_v43, 4  ;;  %v2877_v34 = vor.u32 %v2876_v10, %v2872_v39  ;;  %v2904_v23 = vshll.u32 %v8029_v48, 16  ;;  %6978 = vmatpush3.bf16.msra.mxu0 %v7270_v12  ;;  %v7279_v58 = vld [vmem:[%s9328_s2 + $0x180] sm:$0xff]   ;;  %v8071_v10 = vld [vmem:[%s7400_s25 + $0x8c] sm:$0x1] }
  0xc5   : > { %v2890_v0 = vrot.slane %v2888_v22, 5  ;;  %v2896_v35 = vrot.slane %v2894_v26, 5  ;;  %v2900_v16 = vrot.slane %v2898_v28, 4  ;;  %v2909_v27 = vshrl.u32 %v6068_v24, 16  ;;  %6979 = vmatprep.subr.bf16.mxu0 %v7274_v1  ;;  %v7268_v5 = vld [vmem:[%s7400_s25 + $0x84] sm:$0xff]  }
  0xc6   : > { %6947 = vmatprep.mubr.bf16.mxu1 %v6111_v31  ;;  %6900 = vmatmul.mubr.bf16.gmra.mxu0 %v7261_v55  ;;  %v2873_v37 = vsel %vm7519_vm5, %v2868_v33, %v2872_v39  ;;  %v2878_v36 = vrot.slane %v2877_v34, 4  ;;  %v2906_v40 = vrot.slane %v2904_v23, 5  ;;  %v2912_v42 = vshll.u32 %v6068_v24, 16  ;;  %v8063_v39 = vld [vmem:[%s7400_s25 + $0x88] sm:$0xf] }
  0xc7   : > { %6903 = vmatprep.mubr.bf16.mxu0 %v7264_v59  ;;  %v2891_v46 = vor.u32 %v2890_v0, %v2887_v11  ;;  %v2901_v50 = vor.u32 %v2900_v16, %v2896_v35  ;;  %v2911_v13 = vrot.slane %v2909_v27, 4  ;;  %v2918_v12 = vshll.u32 %v8033_v19, 16  ;;  %7026 = vmatpush3.bf16.msra.mxu1 %v7271_v41  ;;  %v8068_v59 = vld [vmem:[%s9328_s2 + $0x1f8] sm:$0xff]   ;;  %v6074_v26 = vld [vmem:[%s7400_s25 + $0x90] sm:$0xf] }
  0xc8   : > { %v2883_v52 = vsel %vm7519_vm5, %v2878_v36, %v2882_v2  ;;  %v2914_v32 = vrot.slane %v2912_v42, 5  ;;  %v2922_v54 = vshrl.u32 %v8033_v19, 16  ;;  %v2928_v55 = vshll.u32 %v8043_v29, 16  ;;  %6980 = vmatpush3.bf16.msra.mxu0 %v7274_v1  ;;  %7027 = vmatprep.subr.bf16.mxu1 %v7275_v20  ;;  %v8080_v23 = vld [vmem:[%s7400_s25 + $0x94] sm:$0xf]  ;;  %v8085_v0 = vld [vmem:[%s9328_s2 + $0x238] sm:$0xff]  }
  0xc9   : > { %v6112_v60 = vcombine.low %v2873_v37, %v2883_v52  ;;  %v2892_v6 = vrot.slane %v2891_v46, 4  ;;  %v2902_v41 = vrot.slane %v2901_v50, 4  ;;  %v2920_v4 = vrot.slane %v2918_v12, 5  ;;  %6981 = vmatprep.subr.bf16.mxu0 %v7278_v25  ;;  %v8090_v36 = vld [vmem:[%s7400_s25 + $0x98] sm:$0x1] }
  0xca   : > { %v2915_v1 = vor.u32 %v2914_v32, %v2911_v13  ;;  %v2924_v24 = vrot.slane %v2922_v54, 4  ;;  %v2930_v43 = vrot.slane %v2928_v55, 5  ;;  %v2933_v17 = vshrl.u32 %v6071_v57, 16  ;;  %v6077_v46 = vld [vmem:[%s7400_s25 + $0x9c] sm:$0xf] }
  0xcb   : > { %6948 = vmatmul.mubr.bf16.gmra.mxu1 %v6112_v60  ;;  %v2897_v2 = vsel %vm7519_vm5, %v2892_v6, %v2896_v35  ;;  %v2907_v11 = vsel %vm7519_vm5, %v2902_v41, %v2906_v40  ;;  %v2936_v22 = vshll.u32 %v6071_v57, 16  ;;  %v2942_v34 = vshll.u32 %v8063_v39, 16  ;;  %v8097_v32 = vld [vmem:[%s7400_s25 + $0xa0] sm:$0xf] }
  0xcc   : > { %v6113_v28 = vcombine.low %v2897_v2, %v2907_v11  ;;  %v2916_v31 = vrot.slane %v2915_v1, 4  ;;  %v2925_v33 = vor.u32 %v2924_v24, %v2920_v4  ;;  %7028 = vmatpush3.bf16.msra.mxu1 %v7275_v20  ;;  %6982 = vmatpush3.bf16.msra.mxu0 %v7278_v25  ;;  %v2935_v35 = vrot.slane %v2933_v17, 4  ;;  %v8108_v11 = vld [vmem:[%s7400_s25 + $0xa4] sm:$0x1] }
  0xcd   : > { %v2938_v16 = vrot.slane %v2936_v22, 5  ;;  %v2946_v27 = vshrl.u32 %v8063_v39, 16  ;;  %v2952_v37 = vshll.u32 %v8071_v10, 16  ;;  %7029 = vmatprep.subr.bf16.mxu1 %v7279_v58  ;;  %7063 = vmatprep.subr.bf16.mxu0 %v8068_v59  ;;  %v2944_v40 = vrot.slane %v2942_v34, 5 }
  0xce   : > { %6951 = vmatprep.mubr.bf16.mxu1 %v6113_v28  ;;  %6904 = vmatmul.mubr.bf16.gmra.mxu0 %v7265_v53  ;;  %v2921_v20 = vsel %vm7519_vm5, %v2916_v31, %v2920_v4  ;;  %v2926_v25 = vrot.slane %v2925_v33, 4  ;;  %v2957_v42 = vshrl.u32 %v6074_v26, 16  ;;  %v2960_v52 = vshll.u32 %v6074_v26, 16  ;;  %v7269_v53 = vld [vmem:[%s7400_s25 + $0x90] sm:$0xff]   ;;  %v6080_v28 = vld [vmem:[%s7400_s25 + $0xa8] sm:$0xf] }
  0xcf   : > { %6907 = vmatprep.mubr.bf16.mxu0 %v7268_v5  ;;  %v2939_v50 = vor.u32 %v2938_v16, %v2935_v35  ;;  %v2948_v13 = vrot.slane %v2946_v27, 4  ;;  %v2954_v12 = vrot.slane %v2952_v37, 5  ;;  %v2966_v57 = vshll.u32 %v8080_v23, 16  ;;  %v8114_v31 = vld [vmem:[%s7400_s25 + $0xac] sm:$0xf] }
  0xd0   : > { %v2931_v54 = vsel %vm7519_vm5, %v2926_v25, %v2930_v43  ;;  %v2959_v55 = vrot.slane %v2957_v42, 4  ;;  %v2970_v60 = vshrl.u32 %v8080_v23, 16  ;;  %7030 = vmatpush3.bf16.msra.mxu1 %v7279_v58  ;;  %v2962_v5 = vrot.slane %v2960_v52, 5  ;;  %v7272_v43 = vld [vmem:[%s7400_s25 + $0x9c] sm:$0xff]   ;;  %v8121_v52 = vld [vmem:[%s7400_s25 + $0xb0] sm:$0x1] }
  0xd1   : > { %v6114_v6 = vcombine.low %v2921_v20, %v2931_v54  ;;  %v2940_v41 = vrot.slane %v2939_v50, 4  ;;  %v2949_v4 = vor.u32 %v2948_v13, %v2944_v40  ;;  %7111 = vmatprep.subr.bf16.mxu1 %v8085_v0  ;;  %v2968_v1 = vrot.slane %v2966_v57, 5  ;;  %v6083_v57 = vld [vmem:[%s7400_s25 + $0xb4] sm:$0xf] }
  0xd2   : > { %v2972_v24 = vrot.slane %v2970_v60, 4  ;;  %v2976_v2 = vshll.u32 %v8090_v36, 16  ;;  %v2963_v22 = vor.u32 %v2962_v5, %v2959_v55  ;;  %v2981_v26 = vshrl.u32 %v6077_v46, 16  ;;  %v8132_v5 = vld [vmem:[%s7400_s25 + $0xb8] sm:$0xf] }
  0xd3   : > { %6952 = vmatmul.mubr.bf16.gmra.mxu1 %v6114_v6  ;;  %v2945_v17 = vsel %vm7519_vm5, %v2940_v41, %v2944_v40  ;;  %v2950_v58 = vrot.slane %v2949_v4, 4  ;;  %v2984_v35 = vshll.u32 %v6077_v46, 16  ;;  %v2990_v16 = vshll.u32 %v8097_v32, 16  ;;  %v7273_v6 = vld [vmem:[%s7400_s25 + $0xa8] sm:$0xff]  }
  0xd4   : > { %v2973_v33 = vor.u32 %v2972_v24, %v2968_v1  ;;  %v2978_v34 = vrot.slane %v2976_v2, 5  ;;  %v2964_v37 = vrot.slane %v2963_v22, 4  ;;  %v2983_v20 = vrot.slane %v2981_v26, 4 }
  0xd5   : > { %v2955_v27 = vsel %vm7519_vm5, %v2950_v58, %v2954_v12  ;;  %v2994_v25 = vshrl.u32 %v8097_v32, 16  ;;  %v2986_v50 = vrot.slane %v2984_v35, 5  ;;  %v2992_v13 = vrot.slane %v2990_v16, 5  ;;  %v7276_v35 = vld [vmem:[%s7400_s25 + $0xb4] sm:$0xff]  }
  0xd6   : > { %v6115_v40 = vcombine.low %v2945_v17, %v2955_v27  ;;  %6908 = vmatmul.mubr.bf16.gmra.mxu0 %v7269_v53  ;;  %v2974_v42 = vrot.slane %v2973_v33, 4  ;;  %v2969_v46 = vsel %vm7519_vm5, %v2964_v37, %v2968_v1  ;;  %v3000_v12 = vshll.u32 %v8108_v11, 16  ;;  %v8136_v33 = vld [vmem:[%s7400_s25 + $0xbc] sm:$0x1]  ;;  %v6086_v27 = vld [vmem:[%s7400_s25 + $0xc0] sm:$0xf] }
  0xd7   : > { %6911 = vmatprep.mubr.bf16.mxu0 %v7272_v43  ;;  %v2996_v54 = vrot.slane %v2994_v25, 4  ;;  %v3005_v55 = vshrl.u32 %v6080_v28, 16  ;;  %v2987_v60 = vor.u32 %v2986_v50, %v2983_v20  ;;  %v3008_v41 = vshll.u32 %v6080_v28, 16 }
  0xd8   : > { %6955 = vmatprep.mubr.bf16.mxu1 %v6115_v40  ;;  %v2979_v53 = vsel %vm7519_vm5, %v2974_v42, %v2978_v34  ;;  %v3014_v4 = vshll.u32 %v8114_v31, 16  ;;  %v3002_v2 = vrot.slane %v3000_v12, 5  ;;  %v3018_v26 = vshrl.u32 %v8114_v31, 16  ;;  %v8147_v12 = vld [vmem:[%s7400_s25 + $0xc4] sm:$0xf] }
  0xd9   : > { %v6116_v1 = vcombine.low %v2969_v46, %v2979_v53  ;;  %v2997_v24 = vor.u32 %v2996_v54, %v2992_v13  ;;  %v3007_v43 = vrot.slane %v3005_v55, 4  ;;  %v2988_v17 = vrot.slane %v2987_v60, 4 }
  0xda   : > { %v3010_v58 = vrot.slane %v3008_v41, 5  ;;  %v3016_v22 = vrot.slane %v3014_v4, 5  ;;  %v3024_v28 = vshll.u32 %v8121_v52, 16  ;;  %v3029_v16 = vshrl.u32 %v6083_v57, 16  ;;  %v8150_v4 = vld [vmem:[%s7400_s25 + $0xc8] sm:$0x1] }
  0xdb   : > { %6956 = vmatmul.mubr.bf16.gmra.mxu1 %v6116_v1  ;;  %v2998_v34 = vrot.slane %v2997_v24, 4  ;;  %v2993_v37 = vsel %vm7519_vm5, %v2988_v17, %v2992_v13  ;;  %v3020_v25 = vrot.slane %v3018_v26, 4  ;;  %v3032_v40 = vshll.u32 %v6083_v57, 16 }
  0xdc   : > { %v3011_v20 = vor.u32 %v3010_v58, %v3007_v43  ;;  %v3026_v50 = vrot.slane %v3024_v28, 5  ;;  %v3031_v46 = vrot.slane %v3029_v16, 4  ;;  %v3038_v54 = vshll.u32 %v8132_v5, 16 }
  0xdd   : > { %v3003_v42 = vsel %vm7519_vm5, %v2998_v34, %v3002_v2  ;;  %v3021_v60 = vor.u32 %v3020_v25, %v3016_v22  ;;  %v3034_v41 = vrot.slane %v3032_v40, 5  ;;  %v3042_v57 = vshrl.u32 %v8132_v5, 16  ;;  %v6129_v40 = vld [vmem:[%s7400_s25 + $0xc] sm:$0xe] }
  0xde   : > { %v6117_v55 = vcombine.low %v2993_v37, %v3003_v42  ;;  %6912 = vmatmul.mubr.bf16.gmra.mxu0 %v7273_v6  ;;  %v3012_v53 = vrot.slane %v3011_v20, 4  ;;  %v3040_v13 = vrot.slane %v3038_v54, 5  ;;  %v3048_v1 = vshll.u32 %v8136_v33, 16  ;;  %v7277_v37 = vld [vmem:[%s7400_s25 + $0xc0] sm:$0xff]  }
  0xdf   : > { %6915 = vmatprep.mubr.bf16.mxu0 %v7276_v35  ;;  %v3053_v24 = vshrl.u32 %v6086_v27, 16  ;;  %v3022_v43 = vrot.slane %v3021_v60, 4  ;;  %v3035_v6 = vor.u32 %v3034_v41, %v3031_v46  ;;  %v3056_v17 = vshll.u32 %v6086_v27, 16 }
  0xe0   : > { %6959 = vmatprep.mubr.bf16.mxu1 %v6117_v55  ;;  %v3017_v2 = vsel %vm7519_vm5, %v3012_v53, %v3016_v22  ;;  %v3044_v58 = vrot.slane %v3042_v57, 4  ;;  %v3050_v26 = vrot.slane %v3048_v1, 5  ;;  %v3062_v28 = vshll.u32 %v8147_v12, 16 }
  0xe1   : > { %v3055_v34 = vrot.slane %v3053_v24, 4  ;;  %v3027_v35 = vsel %vm7519_vm5, %v3022_v43, %v3026_v50  ;;  %v3036_v16 = vrot.slane %v3035_v6, 4  ;;  %v3058_v20 = vrot.slane %v3056_v17, 5  ;;  %v6130_v50 = vld [vmem:[%s7400_s25 + $0x18] sm:$0xe] }
  0xe2   : > { %v3066_v25 = vshrl.u32 %v8147_v12, 16  ;;  %v6118_v42 = vcombine.low %v3017_v2, %v3027_v35  ;;  %v3045_v22 = vor.u32 %v3044_v58, %v3040_v13  ;;  %v3064_v54 = vrot.slane %v3062_v28, 5 }
  0xe3   : > { %v3072_v27 = vshll.u32 %v8150_v4, 16  ;;  %v3041_v55 = vsel %vm7519_vm5, %v3036_v16, %v3040_v13  ;;  %v3059_v53 = vor.u32 %v3058_v20, %v3055_v34  ;;  %v6145_v24 = vrot.slane %v6129_v40, 9  ;;  %v6131_v34 = vld [vmem:[%s7400_s25 + $0x24] sm:$0xe] }
  0xe4   : > { %v3068_v60 = vrot.slane %v3066_v25, 4  ;;  %6960 = vmatmul.mubr.bf16.gmra.mxu1 %v6118_v42  ;;  %v3046_v57 = vrot.slane %v3045_v22, 4  ;;  %v3464_v43 = vrot.slane %v7860_v44, 5  ;;  %v3467_v58 = vrot.slane %v7863_v8, 5 }
  0xe5   : > { %v3074_v1 = vrot.slane %v3072_v27, 5  ;;  %v3060_v6 = vrot.slane %v3059_v53, 4  ;;  %v6146_v44 = vrot.slane %v6130_v50, 9  ;;  %v3471_v42 = vrot.slane %v7874_v3, 5  ;;  %v6132_v27 = vld [vmem:[%s7400_s25 + $0x30] sm:$0xe] }
  0xe6   : > { %6916 = vmatmul.mubr.bf16.gmra.mxu0 %v7277_v37  ;;  %v3069_v17 = vor.u32 %v3068_v60, %v3064_v54  ;;  %v3051_v35 = vsel %vm7519_vm5, %v3046_v57, %v3050_v26  ;;  %v3465_v16 = vsel %vm7501_vm4, %v6145_v24, %v3464_v43  ;;  %v3466_v20 = vrot.slane %v3464_v43, 4  ;;  %v6133_v50 = vld [vmem:[%s7400_s25 + $0x3c] sm:$0xe] }
  0xe7   : > { %v6119_v37 = vcombine.low %v3041_v55, %v3051_v35  ;;  %v3065_v40 = vsel %vm7519_vm5, %v3060_v6, %v3064_v54  ;;  %v7280_v57 = vld [vmem:[%s7400_s25 + $0x18] sm:$0xff]   ;;  %v3472_v3 = vsel %vm7501_vm4, %v6146_v44, %v3471_v42  ;;  %v3473_v24 = vrot.slane %v3471_v42, 4 }
  0xe8   : > { %v3070_v8 = vrot.slane %v3069_v17, 4  ;;  %v3468_v26 = vsel %vm7501_vm4, %v3466_v20, %v3467_v58  ;;  %v3485_v20 = vrot.slane %v7905_v45, 5  ;;  %v3488_v42 = vrot.slane %v7913_v56, 5  ;;  %v7284_v56 = vld [vmem:[%s7400_s25 + $0x30] sm:$0xff]  }
  0xe9   : > { %6963 = vmatprep.mubr.bf16.mxu1 %v6119_v37  ;;  %v6177_v55 = vcombine.low %v3465_v16, %v3468_v26  ;;  %v6148_v16 = vrot.slane %v6132_v27, 9  ;;  %v6149_v27 = vrot.slane %v6133_v50, 9  ;;  %v7281_v26 = vld [vmem:[%s7400_s25 + $0x24] sm:$0xff]  }
  0xea   : > { %v3075_v54 = vsel %vm7519_vm5, %v3070_v8, %v3074_v1  ;;  %v3481_v1 = vrot.slane %v7890_v18, 5  ;;  %v6134_v18 = vld [vmem:[%s7400_s25 + $0x48] sm:$0xe]  ;;  %v3487_v8 = vrot.slane %v3485_v20, 4 }
  0xeb   : > { %v6120_v6 = vcombine.low %v3065_v40, %v3075_v54  ;;  %6983 = vmatprep.mubr.bf16.mxu0 %v6177_v55  ;;  %v3486_v45 = vsel %vm7501_vm4, %v6148_v16, %v3485_v20  ;;  %v3492_v55 = vrot.slane %v7924_v30, 5  ;;  %v7287_v30 = vld [vmem:[%s9328_s2 + $0x230] sm:$0xff]  }
  0xec   : > { %v6697_v46 = vpop.f32.mrf.mxu0  ;;  %v3489_v50 = vsel %vm7501_vm4, %v3487_v8, %v3488_v42  ;;  %v6136_v8 = vld [vmem:[%s7400_s25 + $0x60] sm:$0xe] }
  0xed   : > { %v6745_v41 = vpop.f32.mrf.mxu1  ;;  %6964 = vmatmul.mubr.bf16.gmra.mxu1 %v6120_v6  ;;  %v6150_v6 = vrot.slane %v6134_v18, 9  ;;  %v8248_v42 = vld [vmem:[%s9328_s2 + $0x1e0] sm:$0xff]  }
  0xee   : > { %v567_v2 = vpop.f32.mrf.mxu0  ;;  %v8168_v28 = vadd.f32 %v6745_v41, %v6697_v46  ;;  %v3474_v46 = vrot.slane %v7882_v49, 5  ;;  %v6147_v49 = vrot.slane %v6131_v34, 9  ;;  %7031 = vmatprep.mubr.bf16.mxu1 %v7280_v57  ;;  %v3495_v57 = vrot.slane %v7928_v7, 5 }
  0xef   : > { %v872_v13 = vpop.f32.mrf.mxu1 }
  0xf0   : > { %v6698_v25 = vpop.f32.mrf.mxu0  ;;  %v8182_v53 = vadd.f32 %v872_v13, %v567_v2  ;;  %v3478_v2 = vrot.slane %v7886_v9, 5  ;;  %v3475_v13 = vsel %vm7501_vm4, %v3473_v24, %v3474_v46  ;;  %v7286_v9 = vld [vmem:[%s9328_s2 + $0x1f0] sm:$0xff]  }
  0xf1   : > { %v6746_v22 = vpop.f32.mrf.mxu1  ;;  %v6178_v44 = vcombine.low %v3472_v3, %v3475_v13  ;;  %v8218_v3 = vld [vmem:[%s7400_s25 + $0x54] sm:$0xe]  ;;  %v3494_v13 = vrot.slane %v3492_v55, 4 }
  0xf2   : > { %v8184_v60 = vadd.f32 %v6746_v22, %v6698_v25  ;;  %v570_v41 = vpop.f32.mrf.mxu0  ;;  %v3479_v34 = vsel %vm7501_vm4, %v6147_v49, %v3478_v2  ;;  %v3480_v25 = vrot.slane %v3478_v2, 4  ;;  %v3499_v49 = vrot.slane %v7944_v15, 5 }
  0xf3   : > { %v875_v43 = vpop.f32.mrf.mxu1  ;;  %6984 = vmatmul.mubr.bf16.vlgmr.msra.gmra.mxu0 %v6178_v44  ;;  %v6180_v2 = vcombine.low %v3486_v45, %v3489_v50  ;;  %v3530_v15 = vrot.slane %v8043_v29, 5  ;;  %v3502_v44 = vrot.slane %v7952_v14, 5  ;;  %v3506_v45 = vrot.slane %v7966_v51, 5  ;;  %v6137_v50 = vld [vmem:[%s7400_s25 + $0x6c] sm:$0xe] }
  0xf4   : > { %v8192_v17 = vadd.f32 %v875_v43, %v570_v41  ;;  %v6701_v58 = vpop.f32.mrf.mxu0  ;;  %v3482_v46 = vsel %vm7501_vm4, %v3480_v25, %v3481_v1  ;;  %7064 = vmatpush3.bf16.msra.mxu0 %v8068_v59  ;;  %v3493_v59 = vsel %vm7501_vm4, %v6149_v27, %v3492_v55  ;;  %v7290_v1 = vld [vmem:[%s9328_s2 + $0x1e8] sm:$0xff]   ;;  %v3501_v20 = vrot.slane %v3499_v49, 4 }
  0xf5   : > { %v6749_v35 = vpop.f32.mrf.mxu1  ;;  %v6179_v24 = vcombine.low %v3479_v34, %v3482_v46  ;;  %7065 = vmatprep.subr.bf16.mxu0 %v7286_v9  ;;  %v3558_v34 = vrot.slane %v8121_v52, 5  ;;  %v8252_v27 = vsel %vm7501_vm4, %v6150_v6, %v3499_v49  ;;  %v6151_v46 = vrot.slane %v8218_v3, 9  ;;  %7032 = vmatmul.mubr.bf16.vlgmr.msra.gmra.mxu1 %v7281_v26  ;;  %v6138_v6 = vld [vmem:[%s7400_s25 + $0x78] sm:$0xe]  ;;  %v7285_v49 = vld [vmem:[%s7400_s25 + $0x3c] sm:$0xff]  }
  0xf6   : > { %v8201_v37 = vadd.f32 %v6749_v35, %v6701_v58  ;;  %v583_v40 = vpop.f32.mrf.mxu0  ;;  %v3544_v35 = vrot.slane %v8090_v36, 5  ;;  %v8260_v55 = vsel %vm7501_vm4, %v3501_v20, %v3502_v44  ;;  %v3509_v3 = vrot.slane %v7971_v62, 5  ;;  %7112 = vmatpush3.bf16.msra.mxu1 %v8085_v0  ;;  %7035 = vmatprep.mubr.bf16.mxu1 %v7284_v56  ;;  %v7288_v62 = vld [vmem:[%s7400_s25 + $0x48] sm:$0xff]  }
  0xf7   : > { %v888_v22 = vpop.f32.mrf.mxu1  ;;  %6987 = vmatprep.mubr.bf16.mxu0 %v6179_v24  ;;  %v3508_v24 = vrot.slane %v3506_v45, 4  ;;  %7113 = vmatprep.subr.bf16.mxu1 %v7287_v30  ;;  %v6182_v20 = vcombine.low %v8252_v27, %v8260_v55  ;;  %v3516_v56 = vrot.slane %v8004_v38, 5  ;;  %v7298_v38 = vld [vmem:[%s9328_s2 + $0x1d8] sm:$0xff]   ;;  %v6154_v27 = vrot.slane %v6138_v6, 9 }
  0xf8   : > { %v8213_v41 = vadd.f32 %v888_v22, %v583_v40  ;;  %v6702_v54 = vpop.f32.mrf.mxu0  ;;  %v3496_v40 = vsel %vm7501_vm4, %v3494_v13, %v3495_v57  ;;  %7066 = vmatpush3.bf16.msra.mxu0 %v7286_v9  ;;  %v7291_v57 = vld [vmem:[%s9328_s2 + $0x228] sm:$0xff]  }
  0xf9   : > { %v6750_v43 = vpop.f32.mrf.mxu1  ;;  %v6181_v22 = vcombine.low %v3493_v59, %v3496_v40  ;;  %7067 = vmatprep.subr.bf16.mxu0 %v7290_v1 }
  0xfa   : > { %v8228_v7 = vadd.f32 %v6750_v43, %v6702_v54  ;;  %v586_v58 = vpop.f32.mrf.mxu0  ;;  %v3513_v54 = vrot.slane %v7990_v47, 5  ;;  %v3572_v47 = vrot.slane %v8150_v4, 5  ;;  %v6152_v43 = vrot.slane %v6136_v8, 9  ;;  %7114 = vmatpush3.bf16.msra.mxu1 %v7287_v30  ;;  %v7302_v30 = vld [vmem:[%s9328_s2 + $0x1d0] sm:$0xff]   ;;  %v6276_v4 = vld [vmem:[%s7400_s25 + $0x24] sm:$0xf] }
  0xfb   : > { %v891_v16 = vpop.f32.mrf.mxu1  ;;  %6988 = vmatmul.mubr.bf16.gmra.mxu0 %v6180_v2  ;;  %v3527_v2 = vrot.slane %v8033_v19, 5  ;;  %v6153_v8 = vrot.slane %v6137_v50, 9  ;;  %v6139_v19 = vld [vmem:[%s7400_s25 + $0x84] sm:$0xe]  ;;  %7115 = vmatprep.subr.bf16.mxu1 %v7291_v57  ;;  %v6140_v50 = vld [vmem:[%s7400_s25 + $0x90] sm:$0xe] }
  0xfc   : > { %v8239_v25 = vadd.f32 %v891_v16, %v586_v58  ;;  %v6705_v18 = vpop.f32.mrf.mxu0  ;;  %v3515_v13 = vrot.slane %v3513_v54, 4  ;;  %v3520_v16 = vrot.slane %v8011_v61, 5  ;;  %6991 = vmatprep.mubr.bf16.mxu0 %v6181_v22  ;;  %7068 = vmatpush3.bf16.msra.mxu0 %v7290_v1  ;;  %v3510_v61 = vsel %vm7501_vm4, %v3508_v24, %v3509_v3  ;;  %v7295_v1 = vld [vmem:[%s9328_s2 + $0x220] sm:$0xff]  }
  0xfd   : > { %v6753_v14 = vpop.f32.mrf.mxu1  ;;  %7069 = vmatprep.subr.bf16.mxu0 %v8248_v42  ;;  %v8299_v24 = vsel %vm7501_vm4, %v6152_v43, %v3513_v54  ;;  %v3529_v3 = vrot.slane %v3527_v2, 4  ;;  %v3537_v54 = vrot.slane %v8071_v10, 5  ;;  %7036 = vmatmul.mubr.bf16.gmra.mxu1 %v7285_v49 }
  0xfe   : > { %v8256_v51 = vadd.f32 %v6753_v14, %v6705_v18  ;;  %v599_v9 = vpop.f32.mrf.mxu0  ;;  %v3507_v18 = vsel %vm7501_vm4, %v6151_v46, %v3506_v45  ;;  %v3522_v14 = vrot.slane %v3520_v16, 4  ;;  %v3523_v45 = vrot.slane %v8029_v48, 5  ;;  %7039 = vmatprep.mubr.bf16.mxu1 %v7288_v62  ;;  %7116 = vmatpush3.bf16.msra.mxu1 %v7291_v57 }
  0xff   : > { %v904_v26 = vpop.f32.mrf.mxu1  ;;  %v3534_v46 = vrot.slane %v8063_v39, 5  ;;  %v6183_v48 = vcombine.low %v3507_v18, %v3510_v61  ;;  %v8308_v39 = vsel %vm7501_vm4, %v3515_v13, %v3516_v56  ;;  %v8321_v13 = vld [vmem:[%s9328_s2 + $0x218] sm:$0xff]   ;;  %v6156_v56 = vrot.slane %v6140_v50, 9  ;;  %7117 = vmatprep.subr.bf16.mxu1 %v7295_v1 }
 0x100   : > { %v8271_v58 = vadd.f32 %v904_v26, %v599_v9  ;;  %v6706_v59 = vpop.f32.mrf.mxu0  ;;  %v3541_v26 = vrot.slane %v8080_v23, 5  ;;  %7070 = vmatpush3.bf16.msra.mxu0 %v8248_v42  ;;  %v8325_v49 = vsel %vm7501_vm4, %v3522_v14, %v3523_v45  ;;  %v6141_v18 = vld [vmem:[%s7400_s25 + $0x9c] sm:$0xe]  ;;  %v3548_v61 = vrot.slane %v8097_v32, 5  ;;  %v7292_v14 = vld [vmem:[%s7400_s25 + $0x60] sm:$0xff]  }
 0x101   : > { %v6754_v0 = vpop.f32.mrf.mxu1  ;;  %7071 = vmatprep.subr.bf16.mxu0 %v7298_v38  ;;  %v3536_v42 = vrot.slane %v3534_v46, 4  ;;  %v8340_v62 = vsel %vm7501_vm4, %v3529_v3, %v3530_v15  ;;  %v6184_v32 = vcombine.low %v8299_v24, %v8308_v39 }
 0x102   : > { %v8279_v44 = vadd.f32 %v6754_v0, %v6706_v59  ;;  %v602_v40 = vpop.f32.mrf.mxu0  ;;  %v6155_v59 = vrot.slane %v6139_v19, 9  ;;  %v8316_v0 = vsel %vm7501_vm4, %v6153_v8, %v3520_v16  ;;  %v8329_v16 = vsel %vm7501_vm4, %v6154_v27, %v3527_v2  ;;  %v7289_v8 = vld [vmem:[%s7400_s25 + $0x54] sm:$0xff]   ;;  %v6142_v27 = vld [vmem:[%s7400_s25 + $0xa8] sm:$0xe]  ;;  %7118 = vmatpush3.bf16.msra.mxu1 %v7295_v1 }
 0x103   : > { %v907_v22 = vpop.f32.mrf.mxu1  ;;  %6992 = vmatmul.mubr.bf16.gmra.mxu0 %v6182_v20  ;;  %v3551_v2 = vrot.slane %v8108_v11, 5  ;;  %v3550_v45 = vrot.slane %v3548_v61, 4  ;;  %v6185_v15 = vcombine.low %v8316_v0, %v8325_v49  ;;  %v6158_v3 = vrot.slane %v6142_v27, 9  ;;  %7119 = vmatprep.subr.bf16.mxu1 %v8321_v13 }
 0x104   : > { %v8295_v55 = vadd.f32 %v907_v22, %v602_v40  ;;  %v6709_v9 = vpop.f32.mrf.mxu0  ;;  %v3543_v40 = vrot.slane %v3541_v26, 4  ;;  %v6157_v22 = vrot.slane %v6141_v18, 9  ;;  %6995 = vmatprep.mubr.bf16.mxu0 %v6183_v48  ;;  %7072 = vmatpush3.bf16.msra.mxu0 %v7298_v38  ;;  %v8354_v11 = vsel %vm7501_vm4, %v6155_v59, %v3534_v46  ;;  %v7306_v38 = vld [vmem:[%s9328_s2 + $0x1c8] sm:$0xff]  }
 0x105   : > { %v6757_v6 = vpop.f32.mrf.mxu1  ;;  %7073 = vmatprep.subr.bf16.mxu0 %v7302_v30  ;;  %v8363_v48 = vsel %vm7501_vm4, %v3536_v42, %v3537_v54  ;;  %v3562_v46 = vrot.slane %v8132_v5, 5  ;;  %v7303_v5 = vld [vmem:[%s9328_s2 + $0x210] sm:$0xff]   ;;  %v3565_v0 = vrot.slane %v8136_v33, 5  ;;  %v8390_v36 = vsel %vm7501_vm4, %v3550_v45, %v3551_v2  ;;  %7040 = vmatmul.mubr.bf16.gmra.mxu1 %v7289_v8  ;;  %v7307_v45 = vld [vmem:[%s9328_s2 + $0x208] sm:$0xff]  }
 0x106   : > { %v8312_v43 = vadd.f32 %v6757_v6, %v6709_v9  ;;  %v615_v23 = vpop.f32.mrf.mxu0  ;;  %v3555_v9 = vrot.slane %v8114_v31, 5  ;;  %v8377_v1 = vsel %vm7501_vm4, %v3543_v40, %v3544_v35  ;;  %v6143_v54 = vld [vmem:[%s7400_s25 + $0xb4] sm:$0xe]  ;;  %v6144_v40 = vld [vmem:[%s7400_s25 + $0xc0] sm:$0xe]  ;;  %v3569_v18 = vrot.slane %v8147_v12, 5  ;;  %7043 = vmatprep.mubr.bf16.mxu1 %v7292_v14  ;;  %7120 = vmatpush3.bf16.msra.mxu1 %v8321_v13 }
 0x107   : > { %v920_v10 = vpop.f32.mrf.mxu1  ;;  %v6159_v35 = vrot.slane %v6143_v54, 9  ;;  %v6160_v12 = vrot.slane %v6144_v40, 9  ;;  %7121 = vmatprep.subr.bf16.mxu1 %v7303_v5  ;;  %v6277_v13 = vld [vmem:[%s7400_s25 + $0x28] sm:$0xf] }
 0x108   : > { %v8334_v19 = vadd.f32 %v920_v10, %v615_v23  ;;  %v6710_v57 = vpop.f32.mrf.mxu0  ;;  %v3557_v6 = vrot.slane %v3555_v9, 4  ;;  %v8371_v23 = vsel %vm7501_vm4, %v6156_v56, %v3541_v26  ;;  %7074 = vmatpush3.bf16.msra.mxu0 %v7302_v30  ;;  %v8386_v26 = vsel %vm7501_vm4, %v6157_v22, %v3548_v61  ;;  %v7310_v61 = vld [vmem:[%s9328_s2 + $0x1c0] sm:$0xff]   ;;  %v7293_v22 = vld [vmem:[%s7400_s25 + $0x6c] sm:$0xff]  }
 0x109   : > { %v6758_v20 = vpop.f32.mrf.mxu1  ;;  %v3564_v56 = vrot.slane %v3562_v46, 4  ;;  %v8396_v33 = vsel %vm7501_vm4, %v6158_v3, %v3555_v9  ;;  %7075 = vmatprep.subr.bf16.mxu0 %v7306_v38  ;;  %v8414_v52 = vsel %vm7501_vm4, %v6159_v35, %v3562_v46  ;;  %v3571_v27 = vrot.slane %v3569_v18, 4  ;;  %v7296_v35 = vld [vmem:[%s7400_s25 + $0x78] sm:$0xff]  }
 0x10a   : > { %v8348_v50 = vadd.f32 %v6758_v20, %v6710_v57  ;;  %v618_v29 = vpop.f32.mrf.mxu0  ;;  %v8402_v30 = vsel %vm7501_vm4, %v3557_v6, %v3558_v34  ;;  %v8436_v3 = vsel %vm7501_vm4, %v6160_v12, %v3569_v18  ;;  %v6274_v6 = vld [vmem:[%s7400_s25 + $0x1c] sm:$0xf]  ;;  %7122 = vmatpush3.bf16.msra.mxu1 %v7303_v5 }
 0x10b   : > { %v923_v24 = vpop.f32.mrf.mxu1  ;;  %v8418_v34 = vsel %vm7501_vm4, %v3564_v56, %v3565_v0  ;;  %6996 = vmatmul.mubr.bf16.gmra.mxu0 %v6184_v32  ;;  %v4341_v40 = vshll.u32 %v6274_v6, 16  ;;  %v4345_v18 = vshrl.u32 %v6274_v6, 16  ;;  %7123 = vmatprep.subr.bf16.mxu1 %v7307_v45  ;;  %v5103_v20 = vrot.slane %v6274_v6, 5 }
 0x10c   : > { %v8366_v39 = vadd.f32 %v923_v24, %v618_v29  ;;  %v6713_v59 = vpop.f32.mrf.mxu0  ;;  %6999 = vmatprep.mubr.bf16.mxu0 %v6185_v15  ;;  %7076 = vmatpush3.bf16.msra.mxu0 %v7306_v38  ;;  %v6273_v24 = vld [vmem:[%s7400_s25 + $0x18] sm:$0xf]  ;;  %v8446_v15 = vsel %vm7501_vm4, %v3571_v27, %v3572_v47  ;;  %v6275_v38 = vld [vmem:[%s7400_s25 + $0x20] sm:$0x1]  ;;  %v4359_v6 = vshll.u32 %v6276_v4, 16 }
 0x10d   : > { %v6761_v42 = vpop.f32.mrf.mxu1  ;;  %7077 = vmatprep.subr.bf16.mxu0 %v7310_v61  ;;  %v4332_v54 = vshrl.u32 %v6273_v24, 16  ;;  %v4335_v0 = vshll.u32 %v6273_v24, 16  ;;  %v4343_v29 = vrot.slane %v4341_v40, 5  ;;  %7044 = vmatmul.mubr.bf16.gmra.mxu1 %v7293_v22  ;;  %v5106_v31 = vrot.slane %v6275_v38, 5  ;;  %v6278_v40 = vld [vmem:[%s7400_s25 + $0x2c] sm:$0x1] }
 0x10e   : > { %v8392_v10 = vadd.f32 %v6761_v42, %v6713_v59  ;;  %v631_v49 = vpop.f32.mrf.mxu0  ;;  %v6361_v42 = vld [vmem:[%s7400_s25 + $0x18] sm:$0xe]  ;;  %7047 = vmatprep.mubr.bf16.mxu1 %v7296_v35  ;;  %7124 = vmatpush3.bf16.msra.mxu1 %v7307_v45  ;;  %v9339_v22 = vcombine.low %v8329_v16, %v8340_v62  ;;  %v4361_v62 = vrot.slane %v4359_v6, 5 }
 0x10f   : > { %v936_v8 = vpop.f32.mrf.mxu1  ;;  %v4334_v27 = vrot.slane %v4332_v54, 4  ;;  %v6377_v24 = vrot.slane %v6361_v42, 9 }
 0x110   : > { %v8421_v2 = vadd.f32 %v936_v8, %v631_v49  ;;  %v6714_v14 = vpop.f32.mrf.mxu0  ;;  %v4351_v8 = vshll.u32 %v6275_v38, 16  ;;  %7078 = vmatpush3.bf16.msra.mxu0 %v7310_v61  ;;  %v4347_v49 = vrot.slane %v4345_v18, 4  ;;  %v9340_v18 = vcombine.low %v8354_v11, %v8363_v48 }
 0x111   : > { %v6762_v32 = vpop.f32.mrf.mxu1  ;;  %v8464_v61 = vsel %vm7501_vm4, %v6377_v24, %v5103_v20  ;;  %v7300_v24 = vld [vmem:[%s7400_s25 + $0x90] sm:$0xff]  }
 0x112   : > { %v8440_v46 = vadd.f32 %v6762_v32, %v6714_v14  ;;  %v634_v59 = vpop.f32.mrf.mxu0  ;;  %v7311_v14 = vld [vmem:[%s9328_s2 + $0x200] sm:$0xff]   ;;  %v4337_v32 = vrot.slane %v4335_v0, 5  ;;  %v4353_v9 = vrot.slane %v4351_v8, 5  ;;  %v4348_v54 = vor.u32 %v4347_v49, %v4343_v29 }
 0x113   : > { %v939_v56 = vpop.f32.mrf.mxu1  ;;  %v5105_v0 = vrot.slane %v5103_v20, 4  ;;  %7000 = vmatmul.mubr.bf16.gmra.mxu0 %v9339_v22  ;;  %7125 = vmatprep.subr.bf16.mxu1 %v7311_v14  ;;  %v4365_v49 = vshll.u32 %v6277_v13, 16 }
 0x114   : > { %9337 = vst [vmem:[#allocation2_spill] sm:$0xff] %v8440_v46  ;;  %v8454_v12 = vadd.f32 %v939_v56, %v634_v59  ;;  %v6717_v47 = vpop.f32.mrf.mxu0  ;;  %v4338_v56 = vor.u32 %v4337_v32, %v4334_v27  ;;  %7003 = vmatprep.mubr.bf16.mxu0 %v9340_v18  ;;  %v4349_v8 = vrot.slane %v4348_v54, 4  ;;  %7126 = vmatpush3.bf16.msra.mxu1 %v7311_v14  ;;  %v4375_v54 = vshll.u32 %v6278_v40, 16  ;;  %v6280_v18 = vld [vmem:[%s7400_s25 + $0x34] sm:$0xf] }
 0x115   : > { %v6765_v5 = vpop.f32.mrf.mxu1  ;;  %v8477_v16 = vsel %vm7501_vm4, %v5105_v0, %v5106_v31  ;;  %v4367_v48 = vrot.slane %v4365_v49, 5  ;;  %v6279_v0 = vld [vmem:[%s7400_s25 + $0x30] sm:$0xf] }
 0x116   : > { %9338 = vst [vmem:[#allocation3_spill] sm:$0xff] %v8454_v12  ;;  %v8460_v57 = vadd.f32 %v6765_v5, %v6717_v47  ;;  %v647_v59 = vpop.f32.mrf.mxu0  ;;  %v4356_v12 = vshrl.u32 %v6276_v4, 16  ;;  %v4339_v35 = vrot.slane %v4338_v56, 4  ;;  %v6362_v4 = vld [vmem:[%s7400_s25 + $0x24] sm:$0xe]  ;;  %v4354_v31 = vsel %vm7519_vm5, %v4349_v8, %v4353_v9 }
 0x117   : > { %v952_v46 = vpop.f32.mrf.mxu1  ;;  %v7297_v47 = vld [vmem:[%s7400_s25 + $0x84] sm:$0xff]   ;;  %v4377_v14 = vrot.slane %v4375_v54, 5  ;;  %v9344_v54 = vcombine.low %v8386_v26, %v8390_v36 }
 0x118   : > { %v8469_v42 = vadd.f32 %v952_v46, %v647_v59  ;;  %v6718_v38 = vpop.f32.mrf.mxu0  ;;  %v4358_v45 = vrot.slane %v4356_v12, 4  ;;  %v4369_v46 = vshrl.u32 %v6277_v13, 16  ;;  %v4344_v12 = vsel %vm7519_vm5, %v4339_v35, %v4343_v29  ;;  %7048 = vmatmul.mubr.bf16.gmra.mxu1 %v7297_v47  ;;  %v7304_v36 = vld [vmem:[%s7400_s25 + $0xa8] sm:$0xff]  }
 0x119   : > { %v6766_v20 = vpop.f32.mrf.mxu1  ;;  %v6378_v29 = vrot.slane %v6362_v4, 9  ;;  %v5110_v35 = vrot.slane %v6277_v13, 5  ;;  %7051 = vmatprep.mubr.bf16.mxu1 %v7300_v24  ;;  %v4389_v47 = vshll.u32 %v6280_v18, 16 }
 0x11a   : > { %v8481_v27 = vadd.f32 %v6766_v20, %v6718_v38  ;;  %v650_v32 = vpop.f32.mrf.mxu0  ;;  %v4362_v59 = vor.u32 %v4361_v62, %v4358_v45  ;;  %v4371_v56 = vrot.slane %v4369_v46, 4  ;;  %v8493_v38 = vcombine.low %v4344_v12, %v4354_v31  ;;  %v6281_v12 = vld [vmem:[%s7400_s25 + $0x38] sm:$0x1] }
 0x11b   : > { %v955_v5 = vpop.f32.mrf.mxu1  ;;  %v8500_v8 = vsel %vm7501_vm4, %v6378_v29, %v5110_v35  ;;  %v5112_v62 = vrot.slane %v5110_v35, 4  ;;  %v4380_v46 = vshrl.u32 %v6279_v0, 16  ;;  %v4391_v29 = vrot.slane %v4389_v47, 5  ;;  %v7301_v35 = vld [vmem:[%s7400_s25 + $0x9c] sm:$0xff]  }
 0x11c   : > { %9341 = vst [vmem:[#allocation4_spill] sm:$0xff] %v8481_v27  ;;  %v8491_v6 = vadd.f32 %v955_v5, %v650_v32  ;;  %v6721_v22 = vpop.f32.mrf.mxu0  ;;  %v4363_v20 = vrot.slane %v4362_v59, 4  ;;  %v4372_v11 = vor.u32 %v4371_v56, %v4367_v48  ;;  %v5113_v27 = vrot.slane %v6278_v40, 5 }
 0x11d   : > { %v6769_v49 = vpop.f32.mrf.mxu1  ;;  %v4383_v40 = vshll.u32 %v6279_v0, 16  ;;  %v9342_v5 = vcombine.low %v8371_v23, %v8377_v1  ;;  %v4382_v56 = vrot.slane %v4380_v46, 4  ;;  %v4399_v26 = vshll.u32 %v6281_v12, 16 }
 0x11e   : > { %v8496_v9 = vadd.f32 %v6769_v49, %v6721_v22  ;;  %v663_v45 = vpop.f32.mrf.mxu0  ;;  %v4368_v4 = vsel %vm7519_vm5, %v4363_v20, %v4367_v48  ;;  %v4373_v32 = vrot.slane %v4372_v11, 4  ;;  %v8512_v24 = vsel %vm7501_vm4, %v5112_v62, %v5113_v27  ;;  %v6363_v11 = vld [vmem:[%s7400_s25 + $0x30] sm:$0xe]  ;;  %v6282_v27 = vld [vmem:[%s7400_s25 + $0x3c] sm:$0xf] }
 0x11f   : > { %v968_v13 = vpop.f32.mrf.mxu1  ;;  %7004 = vmatmul.mubr.bf16.gmra.mxu0 %v9342_v5  ;;  %v4393_v48 = vshrl.u32 %v6280_v18, 16  ;;  %v4385_v22 = vrot.slane %v4383_v40, 5  ;;  %v6379_v5 = vrot.slane %v6363_v11, 9 }
 0x120   : > { %v8508_v31 = vadd.f32 %v968_v13, %v663_v45  ;;  %v6722_v59 = vpop.f32.mrf.mxu0  ;;  %7007 = vmatprep.mubr.bf16.mxu0 %v9344_v54  ;;  %v4378_v23 = vsel %vm7519_vm5, %v4373_v32, %v4377_v14  ;;  %v5117_v14 = vrot.slane %v6280_v18, 5  ;;  %v5120_v32 = vrot.slane %v6281_v12, 5  ;;  %v6283_v54 = vld [vmem:[%s7400_s25 + $0x40] sm:$0xf]  ;;  %7052 = vmatmul.mubr.bf16.gmra.mxu1 %v7301_v35  ;;  %v6364_v35 = vld [vmem:[%s7400_s25 + $0x3c] sm:$0xe] }
 0x121   : > { %v6770_v0 = vpop.f32.mrf.mxu1  ;;  %v8526_v45 = vcombine.low %v4368_v4, %v4378_v23  ;;  %v4395_v62 = vrot.slane %v4393_v48, 4  ;;  %v4386_v13 = vor.u32 %v4385_v22, %v4382_v56  ;;  %v4407_v56 = vshll.u32 %v6282_v27, 16  ;;  %v6284_v23 = vld [vmem:[%s7400_s25 + $0x44] sm:$0x1]  ;;  %7055 = vmatprep.mubr.bf16.mxu1 %v7304_v36 }
 0x122   : > { %9343 = vst [vmem:[#allocation5_spill] sm:$0xff] %v8508_v31  ;;  %v8524_v49 = vadd.f32 %v6770_v0, %v6722_v59  ;;  %v666_v20 = vpop.f32.mrf.mxu0  ;;  %v4401_v31 = vrot.slane %v4399_v26, 5  ;;  %v4404_v59 = vshrl.u32 %v6282_v27, 16  ;;  %v8534_v4 = vsel %vm7501_vm4, %v6379_v5, %v5117_v14 }
 0x123   : > { %v971_v46 = vpop.f32.mrf.mxu1  ;;  %v4396_v47 = vor.u32 %v4395_v62, %v4391_v29  ;;  %v5119_v48 = vrot.slane %v5117_v14, 4  ;;  %v4417_v27 = vshrl.u32 %v6283_v54, 16  ;;  %v9347_v5 = vcombine.low %v8396_v33, %v8402_v30 }
 0x124   : > { %9345 = vst [vmem:[#allocation6_spill] sm:$0xff] %v8524_v49  ;;  %v8530_v1 = vadd.f32 %v971_v46, %v666_v20  ;;  %v6725_v40 = vpop.f32.mrf.mxu0  ;;  %v4387_v49 = vrot.slane %v4386_v13, 4  ;;  %v4406_v22 = vrot.slane %v4404_v59, 4  ;;  %v4413_v20 = vshll.u32 %v6283_v54, 16 }
 0x125   : > { %v6773_v0 = vpop.f32.mrf.mxu1  ;;  %v4397_v11 = vrot.slane %v4396_v47, 4  ;;  %v8543_v46 = vsel %vm7501_vm4, %v5119_v48, %v5120_v32  ;;  %v4409_v13 = vrot.slane %v4407_v56, 5  ;;  %v6285_v32 = vld [vmem:[%s7400_s25 + $0x48] sm:$0xf]  ;;  %v9349_v47 = vcombine.low %v8414_v52, %v8418_v34  ;;  %v7305_v56 = vld [vmem:[%s7400_s25 + $0xb4] sm:$0xff]  }
 0x126   : > { %v8536_v18 = vadd.f32 %v6773_v0, %v6725_v40  ;;  %v679_v12 = vpop.f32.mrf.mxu0  ;;  %v4392_v26 = vsel %vm7519_vm5, %v4387_v49, %v4391_v29  ;;  %v4415_v49 = vrot.slane %v4413_v20, 5  ;;  %v4419_v0 = vrot.slane %v4417_v27, 4  ;;  %v7308_v20 = vld [vmem:[%s7400_s25 + $0xc0] sm:$0xff]  }
 0x127   : > { %v984_v62 = vpop.f32.mrf.mxu1  ;;  %7008 = vmatmul.mubr.bf16.gmra.mxu0 %v9347_v5  ;;  %v4402_v36 = vsel %vm7519_vm5, %v4397_v11, %v4401_v31  ;;  %v4410_v30 = vor.u32 %v4409_v13, %v4406_v22  ;;  %v4423_v48 = vshll.u32 %v6284_v23, 16  ;;  %v6380_v11 = vrot.slane %v6364_v35, 9 }
 0x128   : > { %9346 = vst [vmem:[#allocation7_spill] sm:$0xff] %v8536_v18  ;;  %v8549_v14 = vadd.f32 %v984_v62, %v679_v12  ;;  %v6726_v40 = vpop.f32.mrf.mxu0  ;;  %7011 = vmatprep.mubr.bf16.mxu0 %v9349_v47  ;;  %v8559_v33 = vcombine.low %v4392_v26, %v4402_v36  ;;  %v5124_v62 = vrot.slane %v6283_v54, 5  ;;  %v5127_v5 = vrot.slane %v6284_v23, 5  ;;  %v6286_v47 = vld [vmem:[%s7400_s25 + $0x4c] sm:$0xf]  ;;  %7056 = vmatmul.mubr.bf16.gmra.mxu1 %v7305_v56 }
 0x129   : > { %v6774_v59 = vpop.f32.mrf.mxu1  ;;  %v4420_v52 = vor.u32 %v4419_v0, %v4415_v49  ;;  %v4425_v34 = vrot.slane %v4423_v48, 5  ;;  %v4428_v18 = vshrl.u32 %v6285_v32, 16  ;;  %v4431_v35 = vshll.u32 %v6285_v32, 16  ;;  %v6365_v32 = vld [vmem:[%s7400_s25 + $0x48] sm:$0xe]  ;;  %7059 = vmatprep.mubr.bf16.mxu1 %v7308_v20 }
 0x12a   : > { %9348 = vst [vmem:[#allocation8_spill] sm:$0xff] %v8549_v14  ;;  %v8562_v12 = vadd.f32 %v6774_v59, %v6726_v40  ;;  %v682_v31 = vpop.f32.mrf.mxu0  ;;  %v4411_v14 = vrot.slane %v4410_v30, 4  ;;  %v8570_v13 = vsel %vm7501_vm4, %v6380_v11, %v5124_v62  ;;  %v5126_v27 = vrot.slane %v5124_v62, 4  ;;  %v6287_v59 = vld [vmem:[%s7400_s25 + $0x50] sm:$0x1] }
 0x12b   : > { %v987_v29 = vpop.f32.mrf.mxu1  ;;  %v4421_v36 = vrot.slane %v4420_v52, 4  ;;  %v4430_v30 = vrot.slane %v4428_v18, 4  ;;  %v4433_v48 = vrot.slane %v4431_v35, 5  ;;  %v4441_v11 = vshrl.u32 %v6286_v47, 16  ;;  %v6288_v35 = vld [vmem:[%s7400_s25 + $0x54] sm:$0xf] }
 0x12c   : > { %v8566_v26 = vadd.f32 %v987_v29, %v682_v31  ;;  %v6793_v22 = vpop.f32.mrf.mxu0  ;;  %v4416_v40 = vsel %vm7519_vm5, %v4411_v14, %v4415_v49  ;;  %v8578_v0 = vsel %vm7501_vm4, %v5126_v27, %v5127_v5  ;;  %v4437_v31 = vshll.u32 %v6286_v47, 16 }
 0x12d   : > { %v1726_v54 = vadd.f32 %v6793_v22, %v8168_v28  ;;  %v6841_v23 = vpop.f32.mrf.mxu1  ;;  %v4426_v18 = vsel %vm7519_vm5, %v4421_v36, %v4425_v34  ;;  %v6412_v49 = vcombine.low %v8570_v13, %v8578_v0  ;;  %v9350_v56 = vcombine.low %v8436_v3, %v8446_v15 }
 0x12e   : > { %v1597_v29 = vpop.f32.mrf.mxu0  ;;  %v8591_v52 = vcombine.low %v4416_v40, %v4426_v18  ;;  %v4434_v20 = vor.u32 %v4433_v48, %v4430_v30  ;;  %v4439_v22 = vrot.slane %v4437_v31, 5  ;;  %v4443_v27 = vrot.slane %v4441_v11, 4 }
 0x12f   : > { %v8581_v28 = vadd.f32 %v6841_v23, %v1726_v54  ;;  %v1724_v62 = vadd.f32 %v1597_v29, %v8182_v53  ;;  %v2098_v14 = vpop.f32.mrf.mxu1  ;;  %7012 = vmatmul.mubr.bf16.gmra.mxu0 %v9350_v56  ;;  %v4447_v23 = vshll.u32 %v6287_v59, 16  ;;  %v6381_v36 = vrot.slane %v6365_v32, 9  ;;  %v7309_v29 = vld [vmem:[%s7400_s25 + $0xcc] sm:$0xff]  }
 0x130   : > { %v6794_v5 = vpop.f32.mrf.mxu0  ;;  %7079 = vmatprep.mubr.bf16.mxu0 %v8493_v38  ;;  %v4435_v15 = vrot.slane %v4434_v20, 4  ;;  %v4444_v56 = vor.u32 %v4443_v27, %v4439_v22  ;;  %v5131_v40 = vrot.slane %v6286_v47, 5  ;;  %v5134_v30 = vrot.slane %v6287_v59, 5  ;;  %v6290_v27 = vld [vmem:[%s7400_s25 + $0x5c] sm:$0x1]  ;;  %7060 = vmatmul.mubr.bf16.gmra.mxu1 %v7309_v29 }
 0x131   : > { %v8595_v53 = vadd.f32 %v2098_v14, %v1724_v62  ;;  %v1727_v34 = vadd.f32 %v6794_v5, %v8184_v60  ;;  %v6842_v54 = vpop.f32.mrf.mxu1  ;;  %v4449_v11 = vrot.slane %v4447_v23, 5  ;;  %v6289_v62 = vld [vmem:[%s7400_s25 + $0x58] sm:$0xf]  ;;  %v4452_v14 = vshrl.u32 %v6288_v35, 16 }
 0x132   : > { %v1600_v3 = vpop.f32.mrf.mxu0  ;;  %v4440_v60 = vsel %vm7519_vm5, %v4435_v15, %v4439_v22  ;;  %v4445_v32 = vrot.slane %v4444_v56, 4  ;;  %v8607_v5 = vsel %vm7501_vm4, %v6381_v36, %v5131_v40  ;;  %v5133_v47 = vrot.slane %v5131_v40, 4  ;;  %v6366_v56 = vld [vmem:[%s7400_s25 + $0x54] sm:$0xe] }
 0x133   : > { %v8599_v48 = vadd.f32 %v6842_v54, %v1727_v34  ;;  %v1725_v31 = vadd.f32 %v1600_v3, %v8192_v17  ;;  %v2101_v38 = vpop.f32.mrf.mxu1  ;;  %v4454_v34 = vrot.slane %v4452_v14, 4  ;;  %v4455_v54 = vshll.u32 %v6288_v35, 16 }
 0x134   : > { %v6797_v18 = vpop.f32.mrf.mxu0  ;;  %v4450_v22 = vsel %vm7519_vm5, %v4445_v32, %v4449_v11  ;;  %v8617_v3 = vsel %vm7501_vm4, %v5133_v47, %v5134_v30  ;;  %v4461_v36 = vshll.u32 %v6289_v62, 16  ;;  %v4465_v15 = vshrl.u32 %v6289_v62, 16 }
 0x135   : > { %v8609_v59 = vadd.f32 %v2101_v38, %v1725_v31  ;;  %v1730_v20 = vadd.f32 %v6797_v18, %v8201_v37  ;;  %v6845_v17 = vpop.f32.mrf.mxu1  ;;  %v9351_v40 = vcombine.low %v8464_v61, %v8477_v16  ;;  %v6341_v31 = vcombine.low %v4440_v60, %v4450_v22 }
 0x136   : > { %v1613_v23 = vpop.f32.mrf.mxu0  ;;  %v6413_v38 = vcombine.low %v8607_v5, %v8617_v3  ;;  %v4457_v11 = vrot.slane %v4455_v54, 5  ;;  %v4463_v14 = vrot.slane %v4461_v36, 5  ;;  %v4467_v18 = vrot.slane %v4465_v15, 4  ;;  %v6292_v54 = vld [vmem:[%s7400_s25 + $0x64] sm:$0xf] }
 0x137   : > { %7127 = vmatprep.mubr.bf16.mxu1 %v9351_v40  ;;  %v8623_v37 = vadd.f32 %v6845_v17, %v1730_v20  ;;  %v1728_v35 = vadd.f32 %v1613_v23, %v8213_v41  ;;  %v2114_v29 = vpop.f32.mrf.mxu1  ;;  %7080 = vmatmul.mubr.bf16.vlgmr.msra.gmra.mxu0 %v8526_v45  ;;  %v4471_v32 = vshll.u32 %v6290_v27, 16  ;;  %v6382_v47 = vrot.slane %v6366_v56, 9  ;;  %v6291_v20 = vld [vmem:[%s7400_s25 + $0x60] sm:$0xf] }
 0x138   : > { %v6798_v30 = vpop.f32.mrf.mxu0  ;;  %7083 = vmatprep.mubr.bf16.mxu0 %v8559_v33  ;;  %v5138_v60 = vrot.slane %v6289_v62, 5  ;;  %v4458_v23 = vor.u32 %v4457_v11, %v4454_v34  ;;  %v4468_v22 = vor.u32 %v4467_v18, %v4463_v14  ;;  %v5141_v40 = vrot.slane %v6290_v27, 5 }
 0x139   : > { %v8630_v61 = vadd.f32 %v2114_v29, %v1728_v35  ;;  %v1731_v41 = vadd.f32 %v6798_v30, %v8228_v7  ;;  %v6846_v16 = vpop.f32.mrf.mxu1  ;;  %v4473_v45 = vrot.slane %v4471_v32, 5  ;;  %v4476_v34 = vshrl.u32 %v6291_v20, 16 }
 0x13a   : > { %v1616_v17 = vpop.f32.mrf.mxu0  ;;  %v8640_v7 = vsel %vm7501_vm4, %v6382_v47, %v5138_v60  ;;  %v5140_v56 = vrot.slane %v5138_v60, 4  ;;  %v4459_v35 = vrot.slane %v4458_v23, 4  ;;  %v4469_v29 = vrot.slane %v4468_v22, 4 }
 0x13b   : > { %v8635_v36 = vadd.f32 %v6846_v16, %v1731_v41  ;;  %v1729_v33 = vadd.f32 %v1616_v17, %v8239_v25  ;;  %v2117_v15 = vpop.f32.mrf.mxu1  ;;  %v4479_v30 = vshll.u32 %v6291_v20, 16  ;;  %v6293_v25 = vld [vmem:[%s7400_s25 + $0x68] sm:$0x1]  ;;  %v4485_v41 = vshll.u32 %v6292_v54, 16  ;;  %v6367_v16 = vld [vmem:[%s7400_s25 + $0x60] sm:$0xe] }
 0x13c   : > { %v6801_v62 = vpop.f32.mrf.mxu0  ;;  %v8647_v32 = vsel %vm7501_vm4, %v5140_v56, %v5141_v40  ;;  %v9352_v47 = vcombine.low %v8500_v8, %v8512_v24  ;;  %v4464_v60 = vsel %vm7519_vm5, %v4459_v35, %v4463_v14  ;;  %v4474_v20 = vsel %vm7519_vm5, %v4469_v29, %v4473_v45  ;;  %v6294_v14 = vld [vmem:[%s7400_s25 + $0x6c] sm:$0xf] }
 0x13d   : > { %v8642_v11 = vadd.f32 %v2117_v15, %v1729_v33  ;;  %v1734_v27 = vadd.f32 %v6801_v62, %v8256_v51  ;;  %v6849_v18 = vpop.f32.mrf.mxu1  ;;  %v6414_v51 = vcombine.low %v8640_v7, %v8647_v32  ;;  %v4478_v23 = vrot.slane %v4476_v34, 4 }
 0x13e   : > { %7128 = vmatmul.mubr.bf16.vlgmr.msra.gmra.mxu1 %v9352_v47  ;;  %v1629_v17 = vpop.f32.mrf.mxu0  ;;  %v9353_v22 = vcombine.low %v8534_v4, %v8543_v46  ;;  %v6342_v33 = vcombine.low %v4464_v60, %v4474_v20  ;;  %v4481_v15 = vrot.slane %v4479_v30, 5  ;;  %v4487_v56 = vrot.slane %v4485_v41, 5 }
 0x13f   : > { %v8663_v40 = vadd.f32 %v6849_v18, %v1734_v27  ;;  %v1732_v8 = vadd.f32 %v1629_v17, %v8271_v58  ;;  %v2130_v24 = vpop.f32.mrf.mxu1  ;;  %7084 = vmatmul.mubr.bf16.gmra.mxu0 %v8591_v52  ;;  %v4489_v62 = vshrl.u32 %v6292_v54, 16  ;;  %v4495_v35 = vshll.u32 %v6293_v25, 16  ;;  %v6295_v52 = vld [vmem:[%s7400_s25 + $0x70] sm:$0xf] }
 0x140   : > { %7131 = vmatprep.mubr.bf16.mxu1 %v9353_v22  ;;  %v6802_v45 = vpop.f32.mrf.mxu0  ;;  %v6383_v29 = vrot.slane %v6367_v16, 9  ;;  %7087 = vmatprep.mubr.bf16.mxu0 %v6341_v31  ;;  %v4482_v27 = vor.u32 %v4481_v15, %v4478_v23  ;;  %v5145_v58 = vrot.slane %v6292_v54, 5  ;;  %v5148_v60 = vrot.slane %v6293_v25, 5 }
 0x141   : > { %v8668_v34 = vadd.f32 %v2130_v24, %v1732_v8  ;;  %v1735_v4 = vadd.f32 %v6802_v45, %v8279_v44  ;;  %v6850_v46 = vpop.f32.mrf.mxu1  ;;  %v4491_v30 = vrot.slane %v4489_v62, 4  ;;  %v4497_v47 = vrot.slane %v4495_v35, 5  ;;  %v6296_v8 = vld [vmem:[%s7400_s25 + $0x74] sm:$0x1] }
 0x142   : > { %v1632_v18 = vpop.f32.mrf.mxu0  ;;  %v4500_v20 = vshrl.u32 %v6294_v14, 16  ;;  %v4483_v16 = vrot.slane %v4482_v27, 4  ;;  %v8677_v44 = vsel %vm7501_vm4, %v6383_v29, %v5145_v58  ;;  %v5147_v22 = vrot.slane %v5145_v58, 4 }
 0x143   : > { %v8672_v17 = vadd.f32 %v6850_v46, %v1735_v4  ;;  %v1733_v41 = vadd.f32 %v1632_v18, %v8295_v55  ;;  %v2133_v31 = vpop.f32.mrf.mxu1  ;;  %v4492_v23 = vor.u32 %v4491_v30, %v4487_v56  ;;  %v4503_v15 = vshll.u32 %v6294_v14, 16  ;;  %v6368_v4 = vld [vmem:[%s7400_s25 + $0x6c] sm:$0xe] }
 0x144   : > { %v6805_v54 = vpop.f32.mrf.mxu0  ;;  %v4502_v24 = vrot.slane %v4500_v20, 4  ;;  %v4488_v45 = vsel %vm7519_vm5, %v4483_v16, %v4487_v56  ;;  %v4509_v35 = vshll.u32 %v6295_v52, 16  ;;  %v5149_v46 = vsel %vm7501_vm4, %v5147_v22, %v5148_v60 }
 0x145   : > { %v8680_v25 = vadd.f32 %v2133_v31, %v1733_v41  ;;  %v1738_v62 = vadd.f32 %v6805_v54, %v8312_v43  ;;  %v6853_v55 = vpop.f32.mrf.mxu1  ;;  %v4493_v29 = vrot.slane %v4492_v23, 4  ;;  %v4505_v14 = vrot.slane %v4503_v15, 5  ;;  %v6297_v31 = vld [vmem:[%s7400_s25 + $0x78] sm:$0xf] }
 0x146   : > { %7132 = vmatmul.mubr.bf16.gmra.mxu1 %v6412_v49  ;;  %v4513_v27 = vshrl.u32 %v6295_v52, 16  ;;  %v1645_v58 = vpop.f32.mrf.mxu0  ;;  %v6415_v43 = vcombine.low %v8677_v44, %v5149_v46  ;;  %v4511_v18 = vrot.slane %v4509_v35, 5  ;;  %v4519_v30 = vshll.u32 %v6296_v8, 16 }
 0x147   : > { %7135 = vmatprep.mubr.bf16.mxu1 %v6413_v38  ;;  %v8695_v56 = vadd.f32 %v6853_v55, %v1738_v62  ;;  %v2146_v13 = vpop.f32.mrf.mxu1  ;;  %7088 = vmatmul.mubr.bf16.gmra.mxu0 %v6342_v33  ;;  %v4498_v0 = vsel %vm7519_vm5, %v4493_v29, %v4497_v47  ;;  %v4506_v49 = vor.u32 %v4505_v14, %v4502_v24  ;;  %v6384_v20 = vrot.slane %v6368_v4, 9  ;;  %v6299_v4 = vld [vmem:[%s7400_s25 + $0x80] sm:$0x1]  ;;  %v6369_v29 = vld [vmem:[%s7400_s25 + $0x78] sm:$0xe] }
 0x148   : > { %v4515_v60 = vrot.slane %v4513_v27, 4  ;;  %v6806_v41 = vpop.f32.mrf.mxu0  ;;  %v6343_v16 = vcombine.low %v4488_v45, %v4498_v0  ;;  %v4521_v5 = vrot.slane %v4519_v30, 5  ;;  %v5152_v3 = vrot.slane %v6295_v52, 5 }
 0x149   : > { %v5155_v38 = vrot.slane %v6296_v8, 5  ;;  %v6854_v44 = vpop.f32.mrf.mxu1  ;;  %v4507_v23 = vrot.slane %v4506_v49, 4  ;;  %v1736_v33 = vadd.f32 %v1645_v58, %v8334_v19  ;;  %v1739_v54 = vadd.f32 %v6806_v41, %v8348_v50  ;;  %v6298_v8 = vld [vmem:[%s7400_s25 + $0x7c] sm:$0xf] }
 0x14a   : > { %v4516_v22 = vor.u32 %v4515_v60, %v4511_v18  ;;  %v1648_v47 = vpop.f32.mrf.mxu0  ;;  %7091 = vmatprep.mubr.bf16.mxu0 %v6343_v16  ;;  %v8704_v24 = vsel %vm7501_vm4, %v6384_v20, %v5152_v3  ;;  %v5154_v15 = vrot.slane %v5152_v3, 4  ;;  %v4524_v62 = vshrl.u32 %v6297_v31, 16  ;;  %v6300_v60 = vld [vmem:[%s7400_s25 + $0x84] sm:$0xf] }
 0x14b   : > { %v1737_v45 = vadd.f32 %v1648_v47, %v8366_v39  ;;  %v2149_v52 = vpop.f32.mrf.mxu1  ;;  %v4512_v55 = vsel %vm7519_vm5, %v4507_v23, %v4511_v18  ;;  %v8710_v19 = vadd.f32 %v2146_v13, %v1736_v33  ;;  %v8712_v50 = vadd.f32 %v6854_v44, %v1739_v54  ;;  %v6301_v23 = vld [vmem:[%s7400_s25 + $0x88] sm:$0xf] }
 0x14c   : > { %v4517_v35 = vrot.slane %v4516_v22, 4  ;;  %v6809_v46 = vpop.f32.mrf.mxu0  ;;  %v5156_v14 = vsel %vm7501_vm4, %v5154_v15, %v5155_v38  ;;  %v4526_v39 = vrot.slane %v4524_v62, 4  ;;  %v4527_v58 = vshll.u32 %v6297_v31, 16 }
 0x14d   : > { %v8718_v27 = vadd.f32 %v2149_v52, %v1737_v45  ;;  %v6857_v30 = vpop.f32.mrf.mxu1  ;;  %v6416_v13 = vcombine.low %v8704_v24, %v5156_v14  ;;  %v4533_v0 = vshll.u32 %v6298_v8, 16  ;;  %v4537_v49 = vshrl.u32 %v6298_v8, 16  ;;  %v6302_v52 = vld [vmem:[%s7400_s25 + $0x8c] sm:$0x1] }
 0x14e   : > { %7136 = vmatmul.mubr.bf16.gmra.mxu1 %v6414_v51  ;;  %v4522_v18 = vsel %vm7519_vm5, %v4517_v35, %v4521_v5  ;;  %v1661_v20 = vpop.f32.mrf.mxu0  ;;  %v4529_v16 = vrot.slane %v4527_v58, 5  ;;  %v4543_v3 = vshll.u32 %v6299_v4, 16  ;;  %v6385_v31 = vrot.slane %v6369_v29, 9  ;;  %v6370_v29 = vld [vmem:[%s7400_s25 + $0x84] sm:$0xe] }
 0x14f   : > { %7139 = vmatprep.mubr.bf16.mxu1 %v6415_v43  ;;  %v6344_v41 = vcombine.low %v4512_v55, %v4522_v18  ;;  %v2162_v38 = vpop.f32.mrf.mxu1  ;;  %v4535_v44 = vrot.slane %v4533_v0, 5  ;;  %v4539_v7 = vrot.slane %v4537_v49, 4  ;;  %v5159_v32 = vrot.slane %v6298_v8, 5 }
 0x150   : > { %v5162_v51 = vrot.slane %v6299_v4, 5  ;;  %v6810_v5 = vpop.f32.mrf.mxu0  ;;  %v4530_v22 = vor.u32 %v4529_v16, %v4526_v39  ;;  %v4545_v33 = vrot.slane %v4543_v3, 5  ;;  %v1742_v54 = vadd.f32 %v6809_v46, %v8392_v10 }
 0x151   : > { %7092 = vmatmul.mubr.bf16.gmra.mxu0 %v6344_v41  ;;  %v4548_v47 = vshrl.u32 %v6300_v60, 16  ;;  %v6858_v43 = vpop.f32.mrf.mxu1  ;;  %v4540_v24 = vor.u32 %v4539_v7, %v4535_v44  ;;  %v5160_v15 = vsel %vm7501_vm4, %v6385_v31, %v5159_v32  ;;  %v5161_v45 = vrot.slane %v5159_v32, 4  ;;  %v6303_v7 = vld [vmem:[%s7400_s25 + $0x90] sm:$0xf] }
 0x152   : > { %v4551_v62 = vshll.u32 %v6300_v60, 16  ;;  %v4531_v55 = vrot.slane %v4530_v22, 4  ;;  %v8732_v8 = vadd.f32 %v6857_v30, %v1742_v54  ;;  %v4557_v4 = vshll.u32 %v6301_v23, 16  ;;  %v1664_v14 = vpop.f32.mrf.mxu0 }
 0x153   : > { %v4550_v35 = vrot.slane %v4548_v47, 4  ;;  %v2165_v39 = vpop.f32.mrf.mxu1  ;;  %v4541_v58 = vrot.slane %v4540_v24, 4  ;;  %v5163_v10 = vsel %vm7501_vm4, %v5161_v45, %v5162_v51  ;;  %v4561_v18 = vshrl.u32 %v6301_v23, 16  ;;  %v9354_v45 = vld [vmem:[#allocation2_spill] sm:$0xff] }
 0x154   : > { %v4553_v46 = vrot.slane %v4551_v62, 5  ;;  %v4536_v0 = vsel %vm7519_vm5, %v4531_v55, %v4535_v44  ;;  %v6417_v49 = vcombine.low %v5160_v15, %v5163_v10  ;;  %v4559_v60 = vrot.slane %v4557_v4, 5  ;;  %v6813_v47 = vpop.f32.mrf.mxu0 }
 0x155   : > { %v4567_v41 = vshll.u32 %v6302_v52, 16  ;;  %v4546_v30 = vsel %vm7519_vm5, %v4541_v58, %v4545_v33  ;;  %v4563_v3 = vrot.slane %v4561_v18, 4  ;;  %v6386_v31 = vrot.slane %v6370_v29, 9  ;;  %v6861_v24 = vpop.f32.mrf.mxu1  ;;  %v6304_v29 = vld [vmem:[%s7400_s25 + $0x94] sm:$0xf] }
 0x156   : > { %7140 = vmatmul.mubr.bf16.gmra.mxu1 %v6416_v13  ;;  %v4554_v16 = vor.u32 %v4553_v46, %v4550_v35  ;;  %v6345_v32 = vcombine.low %v4536_v0, %v4546_v30  ;;  %v5166_v22 = vrot.slane %v6301_v23, 5  ;;  %v5169_v54 = vrot.slane %v6302_v52, 5  ;;  %v9355_v35 = vld [vmem:[#allocation3_spill] sm:$0xff]  ;;  %v8748_v52 = vpop.f32.mrf.mxu0  ;;  %v6305_v46 = vld [vmem:[%s7400_s25 + $0x98] sm:$0x1] }
 0x157   : > { %7143 = vmatprep.mubr.bf16.mxu1 %v6417_v49  ;;  %v4569_v51 = vrot.slane %v4567_v41, 5  ;;  %v4564_v15 = vor.u32 %v4563_v3, %v4559_v60  ;;  %v1740_v13 = vadd.f32 %v1661_v20, %v8421_v2  ;;  %v1743_v33 = vadd.f32 %v6810_v5, %v9354_v45  ;;  %v8750_v58 = vpop.f32.mrf.mxu1  ;;  %v6371_v18 = vld [vmem:[%s7400_s25 + $0x90] sm:$0xe]  ;;  %v6307_v45 = vld [vmem:[%s7400_s25 + $0xa0] sm:$0xf] }
 0x158   : > { %v4555_v44 = vrot.slane %v4554_v16, 4  ;;  %7095 = vmatprep.mubr.bf16.mxu0 %v6345_v32  ;;  %v5167_v62 = vsel %vm7501_vm4, %v6386_v31, %v5166_v22  ;;  %v5168_v55 = vrot.slane %v5166_v22, 4  ;;  %v1741_v4 = vadd.f32 %v1664_v14, %v9355_v35  ;;  %v6814_v30 = vpop.f32.mrf.mxu0  ;;  %v6306_v31 = vld [vmem:[%s7400_s25 + $0x9c] sm:$0xf] }
 0x159   : > { %v4572_v23 = vshrl.u32 %v6303_v7, 16  ;;  %v4565_v2 = vrot.slane %v4564_v15, 4  ;;  %v8754_v20 = vadd.f32 %v2162_v38, %v1740_v13  ;;  %v8756_v5 = vadd.f32 %v6858_v43, %v1743_v33  ;;  %v8764_v16 = vpop.f32.mrf.mxu1 }
 0x15a   : > { %v4560_v10 = vsel %vm7519_vm5, %v4555_v44, %v4559_v60  ;;  %v5170_v14 = vsel %vm7501_vm4, %v5168_v55, %v5169_v54  ;;  %v8762_v0 = vadd.f32 %v2165_v39, %v1741_v4  ;;  %v4575_v41 = vshll.u32 %v6303_v7, 16  ;;  %v1680_v35 = vpop.f32.mrf.mxu0 }
 0x15b   : > { %9356 = vst [vmem:[#allocation2_spill] sm:$0xff] %v8754_v20  ;;  %9357 = vst [vmem:[#allocation3_spill] sm:$0xff] %v8756_v5  ;;  %v4574_v49 = vrot.slane %v4572_v23, 4  ;;  %v4570_v60 = vsel %vm7519_vm5, %v4565_v2, %v4569_v51  ;;  %v6418_v38 = vcombine.low %v5167_v62, %v5170_v14  ;;  %v4581_v3 = vshll.u32 %v6304_v29, 16  ;;  %v2181_v4 = vpop.f32.mrf.mxu1 }
 0x15c   : > { %9358 = vst [vmem:[#allocation9_spill] sm:$0xff] %v8762_v0  ;;  %v4585_v43 = vshrl.u32 %v6304_v29, 16  ;;  %v6346_v32 = vcombine.low %v4560_v10, %v4570_v60  ;;  %v4577_v22 = vrot.slane %v4575_v41, 5  ;;  %v4591_v44 = vshll.u32 %v6305_v46, 16 }
 0x15d   : > { %v6387_v15 = vrot.slane %v6371_v18, 9  ;;  %v4583_v39 = vrot.slane %v4581_v3, 5  ;;  %v5173_v7 = vrot.slane %v6304_v29, 5  ;;  %v5176_v13 = vrot.slane %v6305_v46, 5  ;;  %v6308_v18 = vld [vmem:[%s7400_s25 + $0xa4] sm:$0x1] }
 0x15e   : > { %7144 = vmatmul.mubr.bf16.gmra.mxu1 %v6418_v38  ;;  %v4587_v54 = vrot.slane %v4585_v43, 4  ;;  %7096 = vmatmul.mubr.bf16.gmra.mxu0 %v6346_v32  ;;  %v4578_v33 = vor.u32 %v4577_v22, %v4574_v49  ;;  %v4593_v55 = vrot.slane %v4591_v44, 5  ;;  %v1746_v51 = vadd.f32 %v6813_v47, %v8460_v57  ;;  %v6372_v49 = vld [vmem:[%s7400_s25 + $0x9c] sm:$0xe] }
 0x15f   : > { %v4596_v62 = vshrl.u32 %v6306_v31, 16  ;;  %v5174_v10 = vsel %vm7501_vm4, %v6387_v15, %v5173_v7  ;;  %v5175_v2 = vrot.slane %v5173_v7, 4  ;;  %v4599_v14 = vshll.u32 %v6306_v31, 16  ;;  %v6817_v31 = vpop.f32.mrf.mxu0  ;;  %v8781_v15 = vpop.f32.mrf.mxu1 }
 0x160   : > { %v4588_v23 = vor.u32 %v4587_v54, %v4583_v39  ;;  %v4579_v41 = vrot.slane %v4578_v33, 4  ;;  %v8774_v29 = vadd.f32 %v6861_v24, %v1746_v51  ;;  %v4605_v60 = vshll.u32 %v6307_v45, 16  ;;  %v6309_v51 = vld [vmem:[%s7400_s25 + $0xa8] sm:$0xf] }
 0x161   : > { %v4598_v46 = vrot.slane %v4596_v62, 4  ;;  %v5177_v57 = vsel %vm7501_vm4, %v5175_v2, %v5176_v13  ;;  %v4601_v47 = vrot.slane %v4599_v14, 5  ;;  %v4609_v3 = vshrl.u32 %v6307_v45, 16 }
 0x162   : > { %9359 = vst [vmem:[#allocation10_spill] sm:$0xff] %v8774_v29  ;;  %v4589_v38 = vrot.slane %v4588_v23, 4  ;;  %v4584_v43 = vsel %vm7519_vm5, %v4579_v41, %v4583_v39  ;;  %v6419_v32 = vcombine.low %v5174_v10, %v5177_v57  ;;  %v4607_v22 = vrot.slane %v4605_v60, 5  ;;  %v8786_v39 = vpop.f32.mrf.mxu0  ;;  %v8788_v10 = vpop.f32.mrf.mxu1 }
 0x163   : > { %v4615_v44 = vshll.u32 %v6308_v18, 16  ;;  %v4602_v54 = vor.u32 %v4601_v47, %v4598_v46  ;;  %v4611_v7 = vrot.slane %v4609_v3, 4  ;;  %v6388_v33 = vrot.slane %v6372_v49, 9  ;;  %v9360_v46 = vld [vmem:[#allocation4_spill] sm:$0xff] }
 0x164   : > { %v4594_v24 = vsel %vm7519_vm5, %v4589_v38, %v4593_v55  ;;  %7147 = vmatprep.mubr.bf16.mxu1 %v6419_v32  ;;  %v5180_v23 = vrot.slane %v6307_v45, 5  ;;  %v5183_v2 = vrot.slane %v6308_v18, 5  ;;  %v1744_v55 = vadd.f32 %v8748_v52, %v8469_v42  ;;  %v6310_v18 = vld [vmem:[%s7400_s25 + $0xac] sm:$0xf]  ;;  %v8797_v47 = vpop.f32.mrf.mxu0  ;;  %v8799_v3 = vpop.f32.mrf.mxu1  ;;  %v6311_v32 = vld [vmem:[%s7400_s25 + $0xb0] sm:$0x1] }
 0x165   : > { %v6347_v13 = vcombine.low %v4584_v43, %v4594_v24  ;;  %v4617_v62 = vrot.slane %v4615_v44, 5  ;;  %v4603_v14 = vrot.slane %v4602_v54, 4  ;;  %v4612_v41 = vor.u32 %v4611_v7, %v4607_v22  ;;  %v6373_v44 = vld [vmem:[%s7400_s25 + $0xa8] sm:$0xe] }
 0x166   : > { %v1747_v60 = vadd.f32 %v6814_v30, %v9360_v46  ;;  %v5181_v49 = vsel %vm7501_vm4, %v6388_v33, %v5180_v23  ;;  %v5182_v38 = vrot.slane %v5180_v23, 4  ;;  %v1745_v45 = vadd.f32 %v1680_v35, %v8491_v6  ;;  %v8818_v46 = vpop.f32.mrf.mxu1 }
 0x167   : > { %7099 = vmatprep.mubr.bf16.mxu0 %v6347_v13  ;;  %v4620_v57 = vshrl.u32 %v6309_v51, 16  ;;  %v4608_v43 = vsel %vm7519_vm5, %v4603_v14, %v4607_v22  ;;  %v4613_v42 = vrot.slane %v4612_v41, 4  ;;  %v8804_v52 = vadd.f32 %v8750_v58, %v1744_v55  ;;  %v6312_v13 = vld [vmem:[%s7400_s25 + $0xb4] sm:$0xf]  ;;  %v1696_v55 = vpop.f32.mrf.mxu0 }
 0x168   : > { %v8807_v30 = vadd.f32 %v8764_v16, %v1747_v60  ;;  %v5184_v6 = vsel %vm7501_vm4, %v5182_v38, %v5183_v2  ;;  %v8813_v35 = vadd.f32 %v2181_v4, %v1745_v45  ;;  %v4623_v54 = vshll.u32 %v6309_v51, 16 }
 0x169   : > { %9361 = vst [vmem:[#allocation4_spill] sm:$0xff] %v8804_v52  ;;  %v4622_v24 = vrot.slane %v4620_v57, 4  ;;  %v4618_v7 = vsel %vm7519_vm5, %v4613_v42, %v4617_v62  ;;  %v6420_v22 = vcombine.low %v5181_v49, %v5184_v6  ;;  %v4629_v33 = vshll.u32 %v6310_v18, 16  ;;  %v6313_v62 = vld [vmem:[%s7400_s25 + $0xb8] sm:$0xf] }
 0x16a   : > { %9362 = vst [vmem:[#allocation11_spill] sm:$0xff] %v8807_v30  ;;  %9363 = vst [vmem:[#allocation12_spill] sm:$0xff] %v8813_v35  ;;  %v4633_v58 = vshrl.u32 %v6310_v18, 16  ;;  %v6348_v23 = vcombine.low %v4608_v43, %v4618_v7  ;;  %v4625_v16 = vrot.slane %v4623_v54, 5  ;;  %v4639_v14 = vshll.u32 %v6311_v32, 16  ;;  %v9365_v35 = vld [vmem:[#allocation5_spill] sm:$0xff] }
 0x16b   : > { %v6389_v41 = vrot.slane %v6373_v44, 9  ;;  %7148 = vmatmul.mubr.bf16.gmra.mxu1 %v6420_v22  ;;  %v4631_v4 = vrot.slane %v4629_v33, 5  ;;  %v5187_v51 = vrot.slane %v6310_v18, 5  ;;  %v5190_v60 = vrot.slane %v6311_v32, 5  ;;  %v6314_v6 = vld [vmem:[%s7400_s25 + $0xbc] sm:$0x1] }
 0x16c   : > { %v4635_v2 = vrot.slane %v4633_v58, 4  ;;  %7100 = vmatmul.mubr.bf16.gmra.mxu0 %v6348_v23  ;;  %v4626_v49 = vor.u32 %v4625_v16, %v4622_v24  ;;  %v4641_v38 = vrot.slane %v4639_v14, 5  ;;  %v1750_v45 = vadd.f32 %v6817_v31, %v8496_v9  ;;  %v6374_v33 = vld [vmem:[%s7400_s25 + $0xb4] sm:$0xe]  ;;  %v8829_v58 = vpop.f32.mrf.mxu0  ;;  %v8831_v24 = vpop.f32.mrf.mxu1 }
 0x16d   : > { %v4644_v57 = vshrl.u32 %v6312_v13, 16  ;;  %v5188_v42 = vsel %vm7501_vm4, %v6389_v41, %v5187_v51  ;;  %v5189_v44 = vrot.slane %v5187_v51, 4  ;;  %v4647_v54 = vshll.u32 %v6312_v13, 16 }
 0x16e   : > { %v4636_v43 = vor.u32 %v4635_v2, %v4631_v4  ;;  %v4627_v7 = vrot.slane %v4626_v49, 4  ;;  %v8826_v22 = vadd.f32 %v8781_v15, %v1750_v45  ;;  %v4653_v32 = vshll.u32 %v6313_v62, 16  ;;  %v8837_v2 = vpop.f32.mrf.mxu0  ;;  %v8839_v51 = vpop.f32.mrf.mxu1 }
 0x16f   : > { %v4646_v18 = vrot.slane %v4644_v57, 4  ;;  %v5191_v31 = vsel %vm7501_vm4, %v5189_v44, %v5190_v60  ;;  %v4649_v23 = vrot.slane %v4647_v54, 5  ;;  %v4657_v16 = vshrl.u32 %v6313_v62, 16 }
 0x170   : > { %9364 = vst [vmem:[#allocation13_spill] sm:$0xff] %v8826_v22  ;;  %v4637_v9 = vrot.slane %v4636_v43, 4  ;;  %v4632_v13 = vsel %vm7519_vm5, %v4627_v7, %v4631_v4  ;;  %v6421_v14 = vcombine.low %v5188_v42, %v5191_v31  ;;  %v4655_v15 = vrot.slane %v4653_v32, 5  ;;  %v6315_v22 = vld [vmem:[%s7400_s25 + $0xc0] sm:$0xf]  ;;  %v8844_v42 = vpop.f32.mrf.mxu0  ;;  %v8846_v7 = vpop.f32.mrf.mxu1 }
 0x171   : > { %v4663_v41 = vshll.u32 %v6314_v6, 16  ;;  %v4650_v45 = vor.u32 %v4649_v23, %v4646_v18  ;;  %v4659_v57 = vrot.slane %v4657_v16, 4  ;;  %v6390_v43 = vrot.slane %v6374_v33, 9  ;;  %v9366_v18 = vld [vmem:[#allocation6_spill] sm:$0xff] }
 0x172   : > { %v4642_v49 = vsel %vm7519_vm5, %v4637_v9, %v4641_v38  ;;  %7151 = vmatprep.mubr.bf16.mxu1 %v6421_v14  ;;  %v5194_v54 = vrot.slane %v6313_v62, 5  ;;  %v5197_v4 = vrot.slane %v6314_v6, 5  ;;  %v1748_v38 = vadd.f32 %v8786_v39, %v9365_v35  ;;  %v6316_v23 = vld [vmem:[%s7400_s25 + $0xc4] sm:$0xf]  ;;  %v6317_v35 = vld [vmem:[%s7400_s25 + $0xc8] sm:$0x1] }
 0x173   : > { %v6349_v60 = vcombine.low %v4632_v13, %v4642_v49  ;;  %v4665_v44 = vrot.slane %v4663_v41, 5  ;;  %v4651_v32 = vrot.slane %v4650_v45, 4  ;;  %v4660_v31 = vor.u32 %v4659_v57, %v4655_v15  ;;  %v8856_v13 = vpop.f32.mrf.mxu0  ;;  %v6375_v49 = vld [vmem:[%s7400_s25 + $0xc0] sm:$0xe]  ;;  %v8868_v45 = vpop.f32.mrf.mxu1 }
 0x174   : > { %v1751_v33 = vadd.f32 %v8797_v47, %v9366_v18  ;;  %v5195_v9 = vsel %vm7501_vm4, %v6390_v43, %v5194_v54  ;;  %v5196_v62 = vrot.slane %v5194_v54, 4  ;;  %v1749_v6 = vadd.f32 %v1696_v55, %v8530_v1 }
 0x175   : > { %7103 = vmatprep.mubr.bf16.mxu0 %v6349_v60  ;;  %v4668_v16 = vshrl.u32 %v6315_v22, 16  ;;  %v4656_v14 = vsel %vm7519_vm5, %v4651_v32, %v4655_v15  ;;  %v4661_v41 = vrot.slane %v4660_v31, 4  ;;  %v8861_v39 = vadd.f32 %v8788_v10, %v1748_v38  ;;  %v8875_v43 = vpop.f32.mrf.mxu0  ;;  %v6318_v32 = vld [vmem:[%s7400_s25 + $0xcc] sm:$0xf] }
 0x176   : > { %v8864_v47 = vadd.f32 %v8799_v3, %v1751_v33  ;;  %v5198_v1 = vsel %vm7501_vm4, %v5196_v62, %v5197_v4  ;;  %v8873_v55 = vadd.f32 %v8818_v46, %v1749_v6  ;;  %v4671_v15 = vshll.u32 %v6315_v22, 16 }
 0x177   : > { %9367 = vst [vmem:[#allocation5_spill] sm:$0xff] %v8861_v39  ;;  %v4670_v57 = vrot.slane %v4668_v16, 4  ;;  %v4666_v10 = vsel %vm7519_vm5, %v4661_v41, %v4665_v44  ;;  %v6422_v3 = vcombine.low %v5195_v9, %v5198_v1  ;;  %v4677_v60 = vshll.u32 %v6316_v23, 16  ;;  %v8880_v4 = vpop.f32.mrf.mxu0  ;;  %v6319_v16 = vld [vmem:[%s7400_s25 + $0xd0] sm:$0xf]  ;;  %v9370_v41 = vld [vmem:[#allocation7_spill] sm:$0xff] }
 0x178   : > { %9368 = vst [vmem:[#allocation6_spill] sm:$0xff] %v8864_v47  ;;  %9369 = vst [vmem:[#allocation14_spill] sm:$0xff] %v8873_v55  ;;  %v4681_v54 = vshrl.u32 %v6316_v23, 16  ;;  %v6350_v31 = vcombine.low %v4656_v14, %v4666_v10  ;;  %v4673_v38 = vrot.slane %v4671_v15, 5  ;;  %v4687_v18 = vshll.u32 %v6317_v35, 16  ;;  %v6937_v55 = vpop.f32.mrf.mxu1 }
 0x179   : > { %v6391_v33 = vrot.slane %v6375_v49, 9  ;;  %7152 = vmatmul.mubr.bf16.gmra.mxu1 %v6422_v3  ;;  %v4679_v46 = vrot.slane %v4677_v60, 5  ;;  %v5201_v62 = vrot.slane %v6316_v23, 5  ;;  %v5204_v6 = vrot.slane %v6317_v35, 5  ;;  %v6890_v15 = vpop.f32.mrf.mxu0  ;;  %v6320_v60 = vld [vmem:[%s7400_s25 + $0xd4] sm:$0x1] }
 0x17a   : > { %v4683_v22 = vrot.slane %v4681_v54, 4  ;;  %7104 = vmatmul.mubr.bf16.gmra.mxu0 %v6350_v31  ;;  %v4674_v44 = vor.u32 %v4673_v38, %v4670_v57  ;;  %v4689_v9 = vrot.slane %v4687_v18, 5  ;;  %v1754_v14 = vadd.f32 %v8829_v58, %v9370_v41  ;;  %v3239_v23 = vpop.f32.mrf.mxu1  ;;  %v6376_v38 = vld [vmem:[%s7400_s25 + $0xcc] sm:$0xe]  ;;  %s6437_s25 = sshll.u32 %s9432_s22, 8 }
 0x17b   : > { %v4692_v1 = vshrl.u32 %v6318_v32, 16  ;;  %v5202_v10 = vsel %vm7501_vm4, %v6391_v33, %v5201_v62  ;;  %v5203_v3 = vrot.slane %v5201_v62, 4  ;;  %v4695_v54 = vshll.u32 %v6318_v32, 16  ;;  %v2488_v18 = vpop.f32.mrf.mxu0  ;;  %s9144_s24 = scalar_lea.vmem %s9331_s5, %s6437_s25  ;;  %s9184_s7 = scalar_lea.vmem %s9332_s6, %s6437_s25 }
 0x17c   : > { %v4684_v49 = vor.u32 %v4683_v22, %v4679_v46  ;;  %v4675_v35 = vrot.slane %v4674_v44, 4  ;;  %v8889_v47 = vadd.f32 %v8831_v24, %v1754_v14  ;;  %v4701_v57 = vshll.u32 %v6319_v16, 16  ;;  %v6938_v30 = vpop.f32.mrf.mxu1 }
 0x17d   : > { %v4694_v31 = vrot.slane %v4692_v1, 4  ;;  %v5205_v58 = vsel %vm7501_vm4, %v5203_v3, %v5204_v6  ;;  %v4697_v22 = vrot.slane %v4695_v54, 5  ;;  %v4705_v41 = vshrl.u32 %v6319_v16, 16  ;;  %v6893_v52 = vpop.f32.mrf.mxu0 }
 0x17e   : > { %9371 = vst [vmem:[#allocation7_spill] sm:$0xff] %v8889_v47  ;;  %v4685_v39 = vrot.slane %v4684_v49, 4  ;;  %v4680_v33 = vsel %vm7519_vm5, %v4675_v35, %v4679_v46  ;;  %v6423_v32 = vcombine.low %v5202_v10, %v5205_v58  ;;  %v4703_v62 = vrot.slane %v4701_v57, 5  ;;  %v3242_v49 = vpop.f32.mrf.mxu1  ;;  %v9372_v46 = vld [vmem:[#allocation8_spill] sm:$0xff] }
 0x17f   : > { %v4711_v44 = vshll.u32 %v6320_v60, 16  ;;  %v4698_v14 = vor.u32 %v4697_v22, %v4694_v31  ;;  %v4707_v1 = vrot.slane %v4705_v41, 4  ;;  %v6392_v47 = vrot.slane %v6376_v38, 9  ;;  %v2501_v0 = vpop.f32.mrf.mxu0 }
 0x180   : > { %v4690_v24 = vsel %vm7519_vm5, %v4685_v39, %v4689_v9  ;;  %7155 = vmatprep.mubr.bf16.mxu1 %v6423_v32  ;;  %v5208_v3 = vrot.slane %v6319_v16, 5  ;;  %v5211_v54 = vrot.slane %v6320_v60, 5  ;;  %v1752_v10 = vadd.f32 %v8837_v2, %v9372_v46  ;;  %v6941_v57 = vpop.f32.mrf.mxu1 }
 0x181   : > { %v6351_v29 = vcombine.low %v4680_v33, %v4690_v24  ;;  %v4713_v6 = vrot.slane %v4711_v44, 5  ;;  %v4699_v5 = vrot.slane %v4698_v14, 4  ;;  %v4708_v20 = vor.u32 %v4707_v1, %v4703_v62  ;;  %v6894_v60 = vpop.f32.mrf.mxu0 }
 0x182   : > { %v1755_v35 = vadd.f32 %v8844_v42, %v8562_v12  ;;  %v5209_v39 = vsel %vm7501_vm4, %v6392_v47, %v5208_v3  ;;  %v5210_v9 = vrot.slane %v5208_v3, 4  ;;  %v1753_v31 = vadd.f32 %v8856_v13, %v8566_v26 }
 0x183   : > { %7107 = vmatprep.mubr.bf16.mxu0 %v6351_v29  ;;  %v2614_v16 = vadd.f32 %v8875_v43, %v8581_v28  ;;  %v4704_v38 = vsel %vm7519_vm5, %v4699_v5, %v4703_v62  ;;  %v4709_v2 = vrot.slane %v4708_v20, 4  ;;  %v8911_v58 = vadd.f32 %v8839_v51, %v1752_v10  ;;  %v3255_v29 = vpop.f32.mrf.mxu1  ;;  %v2504_v5 = vpop.f32.mrf.mxu0 }
 0x184   : > { %v8914_v12 = vadd.f32 %v8846_v7, %v1755_v35  ;;  %v5212_v42 = vsel %vm7501_vm4, %v5210_v9, %v5211_v54  ;;  %v8919_v26 = vadd.f32 %v8868_v45, %v1753_v31  ;;  %v2612_v28 = vadd.f32 %v8880_v4, %v8595_v53 }
 0x185   : > { %v8921_v13 = vadd.f32 %v6937_v55, %v2614_v16  ;;  %v4714_v20 = vsel %vm7519_vm5, %v4709_v2, %v4713_v6  ;;  %v6424_v51 = vcombine.low %v5209_v39, %v5212_v42  ;;  %v2615_v7 = vadd.f32 %v6890_v15, %v8599_v48  ;;  %v6942_v43 = vpop.f32.mrf.mxu1  ;;  %v6897_v41 = vpop.f32.mrf.mxu0  ;;  %v9375_v2 = vld [vmem:[#allocation2_spill] sm:$0xff] }
 0x186   : > { %v2613_v47 = vadd.f32 %v2488_v18, %v8609_v59  ;;  %v6352_v63 = vcombine.low %v4704_v38, %v4714_v20  ;;  %v8929_v22 = vadd.f32 %v3239_v23, %v2612_v28  ;;  %v2618_v45 = vadd.f32 %v6893_v52, %v8623_v37 }
 0x187   : > { %v2616_v55 = vadd.f32 %v2501_v0, %v8630_v61  ;;  %7156 = vmatmul.mubr.bf16.gmra.mxu1 %v6424_v51  ;;  %v8933_v53 = vadd.f32 %v6938_v30, %v2615_v7  ;;  %v2619_v21 = vadd.f32 %v6894_v60, %v8635_v36  ;;  %v2617_v48 = vadd.f32 %v2504_v5, %v8642_v11  ;;  %v3258_v15 = vpop.f32.mrf.mxu1  ;;  %v2517_v52 = vpop.f32.mrf.mxu0  ;;  %v9377_v5 = vld [vmem:[#allocation3_spill] sm:$0xff] }
 0x188   : > { %v8935_v4 = vadd.f32 %v3242_v49, %v2613_v47  ;;  %7108 = vmatmul.mubr.bf16.gmra.mxu0 %v6352_v63  ;;  %v8939_v59 = vadd.f32 %v6941_v57, %v2618_v45  ;;  %v2622_v37 = vadd.f32 %v6897_v41, %v8663_v40  ;;  %v2620_v30 = vadd.f32 %v2517_v52, %v8668_v34  ;;  %v9379_v47 = vld [vmem:[#allocation9_spill] sm:$0xff] }
 0x189   : > { %v8941_v23 = vadd.f32 %v3255_v29, %v2616_v55  ;;  %v8944_v61 = vadd.f32 %v6942_v43, %v2619_v21  ;;  %v8946_v0 = vadd.f32 %v3258_v15, %v2617_v48  ;;  %v6898_v18 = vpop.f32.mrf.mxu0  ;;  %v6945_v33 = vpop.f32.mrf.mxu1  ;;  %v9381_v55 = vld [vmem:[#allocation10_spill] sm:$0xff] }
 0x18a   : > { %v2623_v36 = vadd.f32 %v6898_v18, %v8672_v17  ;;  %v8950_v11 = vadd.f32 %v6945_v33, %v2622_v37  ;;  %v9383_v37 = vld [vmem:[#allocation4_spill] sm:$0xff] }
 0x18b   : > { %v2520_v32 = vpop.f32.mrf.mxu0  ;;  %v3271_v62 = vpop.f32.mrf.mxu1 }
 0x18c   : > { %v2621_v44 = vadd.f32 %v2520_v32, %v8680_v25  ;;  %v8953_v24 = vadd.f32 %v3271_v62, %v2620_v30 }
 0x18d   : > { %v6901_v40 = vpop.f32.mrf.mxu0  ;;  %v6946_v14 = vpop.f32.mrf.mxu1 }
 0x18e   : > { %v2626_v1 = vadd.f32 %v6901_v40, %v8695_v56  ;;  %v8956_v49 = vadd.f32 %v6946_v14, %v2623_v36  ;;  %v9385_v36 = vld [vmem:[#allocation11_spill] sm:$0xff]  ;;  %v9386_v14 = vld [vmem:[#allocation12_spill] sm:$0xff] }
 0x18f   : > { %v2533_v6 = vpop.f32.mrf.mxu0  ;;  %v3274_v34 = vpop.f32.mrf.mxu1 }
 0x190   : > { %v2624_v3 = vadd.f32 %v2533_v6, %v8710_v19  ;;  %v8959_v54 = vadd.f32 %v3274_v34, %v2621_v44 }
 0x191   : > { %v6902_v17 = vpop.f32.mrf.mxu0  ;;  %v6949_v46 = vpop.f32.mrf.mxu1 }
 0x192   : > { %v2627_v10 = vadd.f32 %v6902_v17, %v8712_v50  ;;  %v8962_v35 = vadd.f32 %v6949_v46, %v2626_v1  ;;  %v9387_v17 = vld [vmem:[#allocation13_spill] sm:$0xff] }
 0x193   : > { %v2536_v25 = vpop.f32.mrf.mxu0  ;;  %v3287_v57 = vpop.f32.mrf.mxu1 }
 0x194   : > { %v2625_v39 = vadd.f32 %v2536_v25, %v8718_v27  ;;  %v8965_v9 = vadd.f32 %v3287_v57, %v2624_v3 }
 0x195   : > { %v6905_v56 = vpop.f32.mrf.mxu0  ;;  %v6950_v31 = vpop.f32.mrf.mxu1 }
 0x196   : > { %9373 = vst [vmem:[#allocation8_spill] sm:$0xff] %v8965_v9  ;;  %v2630_v16 = vadd.f32 %v6905_v56, %v8732_v8  ;;  %v8968_v60 = vadd.f32 %v6950_v31, %v2627_v10 }
 0x197   : > { %v2549_v19 = vpop.f32.mrf.mxu0  ;;  %v3290_v38 = vpop.f32.mrf.mxu1 }
 0x198   : > { %9374 = vst [vmem:[#allocation15_spill] sm:$0xff] %v8968_v60  ;;  %v2628_v29 = vadd.f32 %v2549_v19, %v9375_v2  ;;  %v8971_v42 = vadd.f32 %v3290_v38, %v2625_v39  ;;  %v9388_v39 = vld [vmem:[#allocation5_spill] sm:$0xff]  ;;  %v9389_v19 = vld [vmem:[#allocation6_spill] sm:$0xff] }
 0x199   : > { %v6906_v50 = vpop.f32.mrf.mxu0  ;;  %v6953_v28 = vpop.f32.mrf.mxu1 }
 0x19a   : > { %9376 = vst [vmem:[#allocation2_spill] sm:$0xff] %v8971_v42  ;;  %v2631_v20 = vadd.f32 %v6906_v50, %v9377_v5  ;;  %v8974_v51 = vadd.f32 %v6953_v28, %v2630_v16  ;;  %v9390_v50 = vld [vmem:[#allocation14_spill] sm:$0xff] }
 0x19b   : > { %v2552_v27 = vpop.f32.mrf.mxu0  ;;  %v3303_v7 = vpop.f32.mrf.mxu1 }
 0x19c   : > { %9378 = vst [vmem:[#allocation3_spill] sm:$0xff] %v8974_v51  ;;  %v2629_v43 = vadd.f32 %v2552_v27, %v9379_v47  ;;  %v8977_v63 = vadd.f32 %v3303_v7, %v2628_v29  ;;  %v9391_v7 = vld [vmem:[#allocation7_spill] sm:$0xff] }
 0x19d   : > { %v6909_v8 = vpop.f32.mrf.mxu0  ;;  %v6954_v45 = vpop.f32.mrf.mxu1 }
 0x19e   : > { %9380 = vst [vmem:[#allocation9_spill] sm:$0xff] %v8977_v63  ;;  %v2634_v41 = vadd.f32 %v6909_v8, %v9381_v55  ;;  %v8980_v21 = vadd.f32 %v6954_v45, %v2631_v20 }
 0x19f   : > { %v2565_v48 = vpop.f32.mrf.mxu0  ;;  %v3306_v15 = vpop.f32.mrf.mxu1 }
 0x1a0   : > { %9382 = vst [vmem:[#allocation10_spill] sm:$0xff] %v8980_v21  ;;  %v2632_v52 = vadd.f32 %v2565_v48, %v9383_v37  ;;  %v8983_v30 = vadd.f32 %v3306_v15, %v2629_v43 }
 0x1a1   : > { %v6910_v18 = vpop.f32.mrf.mxu0  ;;  %v6957_v33 = vpop.f32.mrf.mxu1 }
 0x1a2   : > { %9384 = vst [vmem:[#allocation4_spill] sm:$0xff] %v8983_v30  ;;  %v2635_v32 = vadd.f32 %v6910_v18, %v9385_v36  ;;  %v8986_v62 = vadd.f32 %v6957_v33, %v2634_v41 }
 0x1a3   : > { %v2568_v44 = vpop.f32.mrf.mxu0  ;;  %v3319_v40 = vpop.f32.mrf.mxu1 }
 0x1a4   : > { %v2633_v1 = vadd.f32 %v2568_v44, %v9386_v14  ;;  %v8989_v6 = vadd.f32 %v3319_v40, %v2632_v52 }
 0x1a5   : > { %v6913_v34 = vpop.f32.mrf.mxu0  ;;  %v6958_v3 = vpop.f32.mrf.mxu1 }
 0x1a6   : > { %v2638_v46 = vadd.f32 %v6913_v34, %v9387_v17  ;;  %v8992_v10 = vadd.f32 %v6958_v3, %v2635_v32 }
 0x1a7   : > { %v2581_v25 = vpop.f32.mrf.mxu0  ;;  %v3322_v57 = vpop.f32.mrf.mxu1 }
 0x1a8   : > { %v2636_v56 = vadd.f32 %v2581_v25, %v9388_v39  ;;  %v8995_v31 = vadd.f32 %v3322_v57, %v2633_v1 }
 0x1a9   : > { %v6914_v16 = vpop.f32.mrf.mxu0  ;;  %v6961_v29 = vpop.f32.mrf.mxu1 }
 0x1aa   : > { %v2639_v38 = vadd.f32 %v6914_v16, %v9389_v19  ;;  %v8999_v5 = vadd.f32 %v6961_v29, %v2638_v46 }
 0x1ab   : > { %v2584_v2 = vpop.f32.mrf.mxu0  ;;  %v3335_v27 = vpop.f32.mrf.mxu1 }
 0x1ac   : > { %v2637_v28 = vadd.f32 %v2584_v2, %v9390_v50  ;;  %v9002_v43 = vadd.f32 %v3335_v27, %v2636_v56 }
 0x1ad   : > { %v6917_v20 = vpop.f32.mrf.mxu0  ;;  %v6962_v45 = vpop.f32.mrf.mxu1 }
 0x1ae   : > { %v2642_v47 = vadd.f32 %v6917_v20, %v9391_v7  ;;  %v9005_v41 = vadd.f32 %v6962_v45, %v2639_v38 }
 0x1af   : > { %v2597_v8 = vpop.f32.mrf.mxu0  ;;  %v3338_v15 = vpop.f32.mrf.mxu1 }
 0x1b0   : > { %v2640_v55 = vadd.f32 %v2597_v8, %v8911_v58  ;;  %v9008_v52 = vadd.f32 %v3338_v15, %v2637_v28 }
 0x1b1   : > { %v6918_v48 = vpop.f32.mrf.mxu0  ;;  %v6965_v33 = vpop.f32.mrf.mxu1 }
 0x1b2   : > { %v2643_v37 = vadd.f32 %v6918_v48, %v8914_v12  ;;  %v9011_v32 = vadd.f32 %v6965_v33, %v2642_v47 }
 0x1b3   : > { %v2600_v18 = vpop.f32.mrf.mxu0  ;;  %v3351_v44 = vpop.f32.mrf.mxu1 }
 0x1b4   : > { %v2641_v36 = vadd.f32 %v2600_v18, %v8919_v26  ;;  %v9015_v14 = vadd.f32 %v3351_v44, %v2640_v55 }
 0x1b5   : > { %v9013_v40 = vpop.f32.mrf.mxu0  ;;  %v6966_v58 = vpop.f32.mrf.mxu1 }
 0x1b6   : > { %v9019_v34 = vadd.f32 %v6966_v58, %v2643_v37 }
 0x1b7   : > { %v9017_v1 = vpop.f32.mrf.mxu0  ;;  %v3354_v3 = vpop.f32.mrf.mxu1 }
 0x1b8   : > { %v9023_v17 = vadd.f32 %v3354_v3, %v2641_v36 }
 0x1b9   : > { %v9021_v12 = vpop.f32.mrf.mxu0  ;;  %v9025_v46 = vpop.f32.mrf.mxu1 }
 0x1bb   : > { %v9027_v26 = vpop.f32.mrf.mxu0  ;;  %v9029_v25 = vpop.f32.mrf.mxu1 }
 0x1bd   : > { %v9031_v57 = vpop.f32.mrf.mxu0  ;;  %v9033_v39 = vpop.f32.mrf.mxu1 }
 0x1bf   : > { %v9035_v56 = vpop.f32.mrf.mxu0  ;;  %v9037_v16 = vpop.f32.mrf.mxu1 }
 0x1c1   : > { %v9039_v19 = vpop.f32.mrf.mxu0  ;;  %v9041_v38 = vpop.f32.mrf.mxu1 }
 0x1c3   : > { %v9043_v2 = vpop.f32.mrf.mxu0  ;;  %v9045_v29 = vpop.f32.mrf.mxu1 }
 0x1c5   : > { %v9047_v50 = vpop.f32.mrf.mxu0  ;;  %v9049_v28 = vpop.f32.mrf.mxu1 }
 0x1c7   : > { %v9051_v20 = vpop.f32.mrf.mxu0  ;;  %v9053_v27 = vpop.f32.mrf.mxu1 }
 0x1c9   : > { %v9055_v7 = vpop.f32.mrf.mxu0  ;;  %v9057_v47 = vpop.f32.mrf.mxu1 }
 0x1cb   : > { %v9059_v8 = vpop.f32.mrf.mxu0  ;;  %v9061_v45 = vpop.f32.mrf.mxu1 }
 0x1cd   : > { %v9063_v55 = vpop.f32.mrf.mxu0  ;;  %v9065_v48 = vpop.f32.mrf.mxu1 }
 0x1cf   : > { %v9067_v15 = vpop.f32.mrf.mxu0  ;;  %v9069_v37 = vpop.f32.mrf.mxu1 }
 0x1d0   : > { %9392 = vst [vmem:[#allocation11_spill] sm:$0xff] %v9067_v15  ;;  %9393 = vst [vmem:[#allocation12_spill] sm:$0xff] %v9069_v37 }
 0x1d1   : > { %v9071_v18 = vpop.f32.mrf.mxu0  ;;  %v9073_v33 = vpop.f32.mrf.mxu1 }
 0x1d2   : > { %9394 = vst [vmem:[#allocation13_spill] sm:$0xff] %v9071_v18  ;;  %9395 = vst [vmem:[#allocation5_spill] sm:$0xff] %v9073_v33 }
 0x1d3   : > { %v9075_v36 = vpop.f32.mrf.mxu0  ;;  %v9077_v44 = vpop.f32.mrf.mxu1 }
 0x1d4   : > { %9396 = vst [vmem:[#allocation6_spill] sm:$0xff] %v9075_v36  ;;  %9397 = vst [vmem:[#allocation14_spill] sm:$0xff] %v9077_v44 }
 0x1d5   : > { %v9079_v58 = vpop.f32.mrf.mxu0  ;;  %v9081_v3 = vpop.f32.mrf.mxu1 }
 0x1d6   : > { %9398 = vst [vmem:[#allocation7_spill] sm:$0xff] %v9079_v58  ;;  %9399 = vst [vmem:[#allocation16_spill] sm:$0xff] %v9081_v3 }
 0x1d7   : > { %v9083_v30 = vpop.f32.mrf.mxu0  ;;  %v9085_v21 = vpop.f32.mrf.mxu1 }
 0x1d8   : > { %9400 = vst [vmem:[#allocation17_spill] sm:$0xff] %v9083_v30  ;;  %9401 = vst [vmem:[#allocation18_spill] sm:$0xff] %v9085_v21 }
 0x1d9   : > { %v9087_v63 = vpop.f32.mrf.mxu0  ;;  %v9089_v51 = vpop.f32.mrf.mxu1 }
 0x1da   : > { %9402 = vst [vmem:[#allocation19_spill] sm:$0xff] %v9087_v63  ;;  %9403 = vst [vmem:[#allocation20_spill] sm:$0xff] %v9089_v51 }
 0x1db   : > { %v9091_v42 = vpop.f32.mrf.mxu0  ;;  %v9093_v18 = vpop.f32.mrf.mxu1 }
 0x1dc   : > { %9404 = vst [vmem:[#allocation21_spill] sm:$0xff] %v9091_v42  ;;  %9405 = vst [vmem:[#allocation22_spill] sm:$0xff] %v9093_v18 }
 0x1dd   : > { %v9096_v44 = vpop.f32.mrf.mxu1 }
 0x1de   : > { %9406 = vst [vmem:[#allocation23_spill] sm:$0xff] %v9096_v44 }
 0x1df   : > { %v7005_v60 = vpop.f32.mrf.mxu0  ;;  %v9099_v33 = vpop.f32.mrf.mxu1 }
 0x1e0   : > { %v3886_v36 = vadd.f32 %v7005_v60, %v8986_v62  ;;  %9407 = vst [vmem:[#allocation24_spill] sm:$0xff] %v9099_v33 }
 0x1e1   : > { %v3817_v58 = vpop.f32.mrf.mxu0  ;;  %v7053_v63 = vpop.f32.mrf.mxu1 }
 0x1e2   : > { %v3884_v3 = vadd.f32 %v3817_v58, %v8989_v6  ;;  %v9102_v51 = vadd.f32 %v7053_v63, %v3886_v36 }
 0x1e3   : > { %v7006_v30 = vpop.f32.mrf.mxu0  ;;  %v4204_v18 = vpop.f32.mrf.mxu1 }
 0x1e4   : > { %v3887_v21 = vadd.f32 %v7006_v30, %v8992_v10  ;;  %v9105_v37 = vadd.f32 %v4204_v18, %v3884_v3 }
 0x1e5   : > { %v3820_v15 = vpop.f32.mrf.mxu0  ;;  %v7054_v62 = vpop.f32.mrf.mxu1 }
 0x1e6   : > { %v3885_v42 = vadd.f32 %v3820_v15, %v8995_v31  ;;  %v9108_v6 = vadd.f32 %v7054_v62, %v3887_v21 }
 0x1e7   : > { %v7009_v9 = vpop.f32.mrf.mxu0  ;;  %v4207_v33 = vpop.f32.mrf.mxu1 }
 0x1e8   : > { %v3890_v60 = vadd.f32 %v7009_v9, %v8999_v5  ;;  %v9111_v10 = vadd.f32 %v4207_v33, %v3885_v42 }
 0x1e9   : > { %v3833_v44 = vpop.f32.mrf.mxu0  ;;  %v7057_v36 = vpop.f32.mrf.mxu1 }
 0x1ea   : > { %v3888_v58 = vadd.f32 %v3833_v44, %v9002_v43  ;;  %v9114_v15 = vadd.f32 %v7057_v36, %v3890_v60  ;;  %v3866_v60 = vadd.f32 %v9013_v40, %v8921_v13  ;;  %v3867_v13 = vadd.f32 %v9021_v12, %v8933_v53 }
 0x1eb   : > { %v7010_v30 = vpop.f32.mrf.mxu0  ;;  %v4220_v3 = vpop.f32.mrf.mxu1 }
 0x1ec   : > { %v3891_v63 = vadd.f32 %v7010_v30, %v9005_v41  ;;  %v9117_v5 = vadd.f32 %v4220_v3, %v3888_v58 }
 0x1ed   : > { %v3836_v31 = vpop.f32.mrf.mxu0  ;;  %v7058_v43 = vpop.f32.mrf.mxu1 }
 0x1ee   : > { %v3889_v18 = vadd.f32 %v3836_v31, %v9008_v52  ;;  %v9120_v62 = vadd.f32 %v7058_v43, %v3891_v63  ;;  %v3870_v43 = vadd.f32 %v9031_v57, %v8939_v59  ;;  %v3871_v57 = vadd.f32 %v9039_v19, %v8944_v61 }
 0x1ef   : > { %v7013_v9 = vpop.f32.mrf.mxu0  ;;  %v4223_v41 = vpop.f32.mrf.mxu1 }
 0x1f0   : > { %v3894_v21 = vadd.f32 %v7013_v9, %v9011_v32  ;;  %v9125_v52 = vadd.f32 %v4223_v41, %v3889_v18  ;;  %v3864_v32 = vadd.f32 %v9017_v1, %v8929_v22  ;;  %v4253_v9 = vadd.f32 %v9025_v46, %v3866_v60 }
 0x1f1   : > { %v3849_v44 = vpop.f32.mrf.mxu0  ;;  %v7061_v30 = vpop.f32.mrf.mxu1 }
 0x1f2   : > { %v3892_v42 = vadd.f32 %v3849_v44, %v9015_v14  ;;  %v9130_v31 = vadd.f32 %v7061_v30, %v3894_v21  ;;  %v4251_v1 = vadd.f32 %v9029_v25, %v3864_v32  ;;  %v4254_v21 = vadd.f32 %v9033_v39, %v3867_v13 }
 0x1f3   : > { %v7014_v33 = vpop.f32.mrf.mxu0  ;;  %v4236_v14 = vpop.f32.mrf.mxu1  ;;  %v3868_v25 = vadd.f32 %v9035_v56, %v8941_v23  ;;  %v4257_v23 = vadd.f32 %v9041_v38, %v3870_v43  ;;  %v5607_v38 = vld [vmem:[%s9144_s24 + $0x8] sm:$0xff] }
 0x1f4   : > { %v3895_v58 = vadd.f32 %v7014_v33, %v9019_v34  ;;  %v9137_v40 = vadd.f32 %v4236_v14, %v3892_v42  ;;  %v5608_v42 = vld [vmem:[%s9144_s24 + $0x10] sm:$0xff]  ;;  %v5609_v14 = vld [vmem:[%s9144_s24 + $0x18] sm:$0xff] }
 0x1f5   : > { %v3852_v36 = vpop.f32.mrf.mxu0  ;;  %v7062_v34 = vpop.f32.mrf.mxu1  ;;  %v5640_v30 = vmul.f32 3.0, %v5608_v42 }
 0x1f6   : > { %v3893_v63 = vadd.f32 %v3852_v36, %v9023_v17  ;;  %v3865_v17 = vadd.f32 %v9027_v26, %v8935_v4  ;;  %v9149_v46 = vadd.f32 %v7062_v34, %v3895_v58  ;;  %v9162_v26 = vld [vmem:[%s9330_s4] ss:$0 sm:$0xff] }
 0x1f7   : > { %v7081_v3 = vpop.f32.mrf.mxu0  ;;  %v4239_v12 = vpop.f32.mrf.mxu1  ;;  %v5606_v58 = vld [vmem:[%s9144_s24] sm:$0xff] }
 0x1f8   : > { %v5007_v53 = vadd.f32 %v7081_v3, %v4253_v9  ;;  %v9154_v44 = vadd.f32 %v4239_v12, %v3893_v63  ;;  %v4252_v39 = vadd.f32 %v9037_v16, %v3865_v17  ;;  %v4255_v16 = vadd.f32 %v9045_v29, %v3868_v25 }
 0x1f9   : > { %v4878_v22 = vpop.f32.mrf.mxu0  ;;  %v3869_v9 = vadd.f32 %v9043_v2, %v8946_v0  ;;  %v5638_v13 = vmul.f32 3.0, %v5606_v58  ;;  %v3874_v12 = vadd.f32 %v9047_v50, %v8950_v11  ;;  %v5641_v0 = vmul.f32 3.0, %v5609_v14 }
 0x1fa   : > { %v5005_v41 = vadd.f32 %v4878_v22, %v4251_v1  ;;  %v3872_v50 = vadd.f32 %v9051_v20, %v8953_v24  ;;  %v5639_v25 = vmul.f32 3.0, %v5607_v38  ;;  %v5611_v38 = vld [vmem:[%s9144_s24 + $0x28] sm:$0xff] }
 0x1fb   : > { %v7082_v18 = vpop.f32.mrf.mxu0  ;;  %v4256_v11 = vadd.f32 %v9053_v27, %v3869_v9  ;;  %v3875_v27 = vadd.f32 %v9055_v7, %v8956_v49 }
 0x1fc   : > { %v5008_v59 = vadd.f32 %v7082_v18, %v4254_v21  ;;  %v4259_v9 = vadd.f32 %v9061_v45, %v3872_v50  ;;  %v3878_v45 = vadd.f32 %v9063_v55, %v8962_v35  ;;  %v5643_v35 = vmul.f32 3.0, %v5611_v38 }
 0x1fd   : > { %v4881_v33 = vpop.f32.mrf.mxu0 }
 0x1fe   : > { %v7129_v4 = vpop.f32.mrf.mxu1  ;;  %v5006_v3 = vadd.f32 %v4881_v33, %v4252_v39 }
 0x1ff   : > { %v5505_v60 = vadd.f32 %v7129_v4, %v5007_v53  ;;  %v7085_v32 = vpop.f32.mrf.mxu0  ;;  %v4258_v53 = vadd.f32 %v9049_v28, %v3871_v57 }
 0x200   : > { %v5376_v36 = vpop.f32.mrf.mxu1  ;;  %v5011_v17 = vadd.f32 %v7085_v32, %v4257_v23 }
 0x201   : > { %v5544_v56 = vadd.f32 %v9162_v26, %v5505_v60  ;;  %v5503_v63 = vadd.f32 %v5376_v36, %v5005_v41  ;;  %v4894_v61 = vpop.f32.mrf.mxu0  ;;  %v5612_v41 = vld [vmem:[%s9144_s24 + $0x30] sm:$0xff]  ;;  %v4261_v36 = vadd.f32 %v9057_v47, %v3874_v12  ;;  %v3873_v47 = vadd.f32 %v9059_v8, %v8959_v54 }
 0x202   : > { %v7130_v34 = vpop.f32.mrf.mxu1  ;;  %v5009_v29 = vadd.f32 %v4894_v61, %v4255_v16  ;;  %v5644_v32 = vmul.f32 3.0, %v5612_v41  ;;  %v5613_v16 = vld [vmem:[%s9144_s24 + $0x38] sm:$0xff] }
 0x203   : > { %v5576_v19 = vmax.f32 %v5544_v56, 0.0  ;;  %v5542_v22 = vadd.f32 %v9162_v26, %v5503_v63  ;;  %v5506_v1 = vadd.f32 %v7130_v34, %v5008_v59  ;;  %v7086_v18 = vpop.f32.mrf.mxu0 }
 0x204   : > { %v5379_v2 = vpop.f32.mrf.mxu1  ;;  %v5012_v33 = vadd.f32 %v7086_v18, %v4258_v53  ;;  %v5645_v53 = vmul.f32 3.0, %v5613_v16  ;;  %v9414_v16 = vld [vmem:[#allocation14_spill] sm:$0xff] }
 0x205   : > { %v5672_v21 = vadd.f32 %v5640_v30, %v5576_v19  ;;  %v5574_v43 = vmax.f32 %v5542_v22, 0.0  ;;  %v5545_v42 = vadd.f32 %v9162_v26, %v5506_v1  ;;  %v5504_v28 = vadd.f32 %v5379_v2, %v5006_v3  ;;  %v4897_v39 = vpop.f32.mrf.mxu0  ;;  %v5610_v30 = vld [vmem:[%s9144_s24 + $0x20] sm:$0xff] }
 0x206   : > { %v7133_v4 = vpop.f32.mrf.mxu1  ;;  %v5010_v20 = vadd.f32 %v4897_v39, %v4256_v11 }
 0x207   : > { %5704 = vst [vmem:[%s9184_s7 + $0x10] sm:$0xff] %v5672_v21  ;;  %v5670_v60 = vadd.f32 %v5638_v13, %v5574_v43  ;;  %v5577_v58 = vmax.f32 %v5545_v42, 0.0  ;;  %v5543_v59 = vadd.f32 %v9162_v26, %v5504_v28  ;;  %v5509_v57 = vadd.f32 %v7133_v4, %v5011_v17  ;;  %v7089_v23 = vpop.f32.mrf.mxu0  ;;  %v5616_v21 = vld [vmem:[%s9144_s24 + $0x50] sm:$0xff] }
 0x208   : > { %v5392_v24 = vpop.f32.mrf.mxu1  ;;  %v5642_v13 = vmul.f32 3.0, %v5610_v30  ;;  %v5015_v7 = vadd.f32 %v7089_v23, %v4261_v36  ;;  %v4262_v17 = vadd.f32 %v9065_v48, %v3875_v27  ;;  %v9408_v43 = vld [vmem:[#allocation12_spill] sm:$0xff]  ;;  %v9410_v48 = vld [vmem:[#allocation11_spill] sm:$0xff]  ;;  %v9413_v30 = vld [vmem:[#allocation13_spill] sm:$0xff]  ;;  %v5648_v27 = vmul.f32 3.0, %v5616_v21 }
 0x209   : > { %5702 = vst [vmem:[%s9184_s7] sm:$0xff] %v5670_v60  ;;  %v5673_v56 = vadd.f32 %v5641_v0, %v5577_v58  ;;  %v5575_v63 = vmax.f32 %v5543_v59, 0.0  ;;  %v5548_v14 = vadd.f32 %v9162_v26, %v5509_v57  ;;  %v5507_v3 = vadd.f32 %v5392_v24, %v5009_v29  ;;  %v4910_v34 = vpop.f32.mrf.mxu0  ;;  %v9409_v28 = vld [vmem:[#allocation8_spill] sm:$0xff]  ;;  %v5614_v60 = vld [vmem:[%s9144_s24 + $0x40] sm:$0xff]  ;;  %v9411_v58 = vld [vmem:[#allocation5_spill] sm:$0xff] }
 0x20a   : > { %v7134_v49 = vpop.f32.mrf.mxu1  ;;  %v5013_v8 = vadd.f32 %v4910_v34, %v4259_v9  ;;  %v4260_v42 = vadd.f32 %v9408_v43, %v3873_v47  ;;  %v3876_v41 = vadd.f32 %v9410_v48, %v9409_v28  ;;  %v4265_v59 = vadd.f32 %v9411_v58, %v3878_v45  ;;  %v9412_v57 = vld [vmem:[#allocation15_spill] sm:$0xff]  ;;  %v9415_v47 = vld [vmem:[#allocation2_spill] sm:$0xff]  ;;  %v5620_v43 = vld [vmem:[%s9144_s24 + $0x70] sm:$0xff] }
 0x20b   : > { %5705 = vst [vmem:[%s9184_s7 + $0x18] sm:$0xff] %v5673_v56  ;;  %v5671_v61 = vadd.f32 %v5639_v25, %v5575_v63  ;;  %v5580_v19 = vmax.f32 %v5548_v14, 0.0  ;;  %v5546_v22 = vadd.f32 %v9162_v26, %v5507_v3  ;;  %v5510_v1 = vadd.f32 %v7134_v49, %v5012_v33  ;;  %v7090_v12 = vpop.f32.mrf.mxu0  ;;  %v5617_v14 = vld [vmem:[%s9144_s24 + $0x58] sm:$0xff]  ;;  %v9418_v28 = vld [vmem:[#allocation18_spill] sm:$0xff] }
 0x20c   : > { %v5395_v54 = vpop.f32.mrf.mxu1  ;;  %v5016_v11 = vadd.f32 %v7090_v12, %v4262_v17  ;;  %v3879_v36 = vadd.f32 %v9413_v30, %v9412_v57  ;;  %v4263_v9 = vadd.f32 %v9414_v16, %v3876_v41  ;;  %v5615_v17 = vld [vmem:[%s9144_s24 + $0x48] sm:$0xff] }
 0x20d   : > { %5703 = vst [vmem:[%s9184_s7 + $0x8] sm:$0xff] %v5671_v61  ;;  %v5676_v0 = vadd.f32 %v5644_v32, %v5580_v19  ;;  %v5578_v2 = vmax.f32 %v5546_v22, 0.0  ;;  %v5549_v29 = vadd.f32 %v9162_v26, %v5510_v1  ;;  %v5508_v18 = vadd.f32 %v5395_v54, %v5010_v20  ;;  %v4913_v50 = vpop.f32.mrf.mxu0 }
 0x20e   : > { %v7137_v55 = vpop.f32.mrf.mxu1  ;;  %v5014_v24 = vadd.f32 %v4913_v50, %v4260_v42  ;;  %v5647_v41 = vmul.f32 3.0, %v5615_v17  ;;  %v9423_v17 = vld [vmem:[#allocation20_spill] sm:$0xff] }
 0x20f   : > { %5708 = vst [vmem:[%s9184_s7 + $0x30] sm:$0xff] %v5676_v0  ;;  %v5674_v25 = vadd.f32 %v5642_v13, %v5578_v2  ;;  %v5581_v4 = vmax.f32 %v5549_v29, 0.0  ;;  %v5547_v33 = vadd.f32 %v9162_v26, %v5508_v18  ;;  %v5513_v39 = vadd.f32 %v7137_v55, %v5015_v7  ;;  %v9416_v13 = vld [vmem:[#allocation6_spill] sm:$0xff] }
 0x210   : > { %v5408_v32 = vpop.f32.mrf.mxu1  ;;  %v3877_v49 = vadd.f32 %v9416_v13, %v9415_v47  ;;  %v5646_v7 = vmul.f32 3.0, %v5614_v60  ;;  %v5652_v60 = vmul.f32 3.0, %v5620_v43  ;;  %v9421_v47 = vld [vmem:[#allocation9_spill] sm:$0xff]  ;;  %v9426_v43 = vld [vmem:[#allocation22_spill] sm:$0xff] }
 0x211   : > { %5706 = vst [vmem:[%s9184_s7 + $0x20] sm:$0xff] %v5674_v25  ;;  %v5677_v20 = vadd.f32 %v5645_v53, %v5581_v4  ;;  %v5579_v23 = vmax.f32 %v5547_v33, 0.0  ;;  %v5552_v56 = vadd.f32 %v9162_v26, %v5513_v39  ;;  %v5511_v63 = vadd.f32 %v5408_v32, %v5013_v8  ;;  %v7093_v3 = vpop.f32.mrf.mxu0  ;;  %v9417_v53 = vld [vmem:[#allocation16_spill] sm:$0xff]  ;;  %v5618_v33 = vld [vmem:[%s9144_s24 + $0x60] sm:$0xff]  ;;  %v5621_v32 = vld [vmem:[%s9144_s24 + $0x78] sm:$0xff] }
 0x212   : > { %v7138_v34 = vpop.f32.mrf.mxu1  ;;  %v5019_v61 = vadd.f32 %v7093_v3, %v4265_v59  ;;  %v4266_v54 = vadd.f32 %v9417_v53, %v3879_v36  ;;  %v5649_v8 = vmul.f32 3.0, %v5617_v14  ;;  %v4264_v48 = vadd.f32 %v9418_v28, %v3877_v49  ;;  %v9422_v13 = vld [vmem:[#allocation17_spill] sm:$0xff]  ;;  %v9424_v53 = vld [vmem:[#allocation10_spill] sm:$0xff]  ;;  %v9427_v28 = vld [vmem:[#allocation4_spill] sm:$0xff] }
 0x213   : > { %5709 = vst [vmem:[%s9184_s7 + $0x38] sm:$0xff] %v5677_v20  ;;  %v5675_v19 = vadd.f32 %v5643_v35, %v5579_v23  ;;  %v5584_v22 = vmax.f32 %v5552_v56, 0.0  ;;  %v5550_v1 = vadd.f32 %v9162_v26, %v5511_v63  ;;  %v5514_v38 = vadd.f32 %v7138_v34, %v5016_v11  ;;  %v4926_v45 = vpop.f32.mrf.mxu0  ;;  %v9420_v20 = vld [vmem:[#allocation7_spill] sm:$0xff] }
 0x214   : > { %v5411_v12 = vpop.f32.mrf.mxu1  ;;  %v5017_v0 = vadd.f32 %v4926_v45, %v4263_v9  ;;  %v5650_v56 = vmul.f32 3.0, %v5618_v33  ;;  %v3880_v49 = vadd.f32 %v9422_v13, %v9421_v47  ;;  %v9429_v33 = vld [vmem:[#allocation23_spill] sm:$0xff] }
 0x215   : > { %5707 = vst [vmem:[%s9184_s7 + $0x28] sm:$0xff] %v5675_v19  ;;  %v5680_v2 = vadd.f32 %v5648_v27, %v5584_v22  ;;  %v5582_v29 = vmax.f32 %v5550_v1, 0.0  ;;  %v5553_v18 = vadd.f32 %v9162_v26, %v5514_v38  ;;  %v5512_v21 = vadd.f32 %v5411_v12, %v5014_v24  ;;  %v7094_v42 = vpop.f32.mrf.mxu0  ;;  %v9419_v24 = vld [vmem:[#allocation3_spill] sm:$0xff] }
 0x216   : > { %v7141_v35 = vpop.f32.mrf.mxu1  ;;  %v5020_v55 = vadd.f32 %v7094_v42, %v4266_v54  ;;  %v3882_v23 = vadd.f32 %v9420_v20, %v9419_v24  ;;  %v9425_v54 = vld [vmem:[#allocation19_spill] sm:$0xff]  ;;  %v4267_v42 = vadd.f32 %v9426_v43, %v3880_v49 }
 0x217   : > { %5712 = vst [vmem:[%s9184_s7 + $0x50] sm:$0xff] %v5680_v2  ;;  %v5678_v11 = vadd.f32 %v5646_v7, %v5582_v29  ;;  %v5585_v50 = vmax.f32 %v5553_v18, 0.0  ;;  %v5551_v25 = vadd.f32 %v9162_v26, %v5512_v21  ;;  %v5517_v4 = vadd.f32 %v7141_v35, %v5019_v61  ;;  %v4929_v39 = vpop.f32.mrf.mxu0  ;;  %v5619_v61 = vld [vmem:[%s9144_s24 + $0x68] sm:$0xff] }
 0x218   : > { %v5424_v58 = vpop.f32.mrf.mxu1  ;;  %v5018_v59 = vadd.f32 %v4929_v39, %v4264_v48  ;;  %v5653_v7 = vmul.f32 3.0, %v5621_v32  ;;  %v4269_v45 = vadd.f32 %v9423_v17, %v3882_v23  ;;  %v5651_v18 = vmul.f32 3.0, %v5619_v61  ;;  %v9428_v48 = vld [vmem:[#allocation21_spill] sm:$0xff]  ;;  %v9430_v32 = vld [vmem:[#allocation24_spill] sm:$0xff] }
 0x219   : > { %5710 = vst [vmem:[%s9184_s7 + $0x40] sm:$0xff] %v5678_v11  ;;  %v5681_v57 = vadd.f32 %v5649_v8, %v5585_v50  ;;  %v5583_v30 = vmax.f32 %v5551_v25, 0.0  ;;  %v5556_v36 = vadd.f32 %v9162_v26, %v5517_v4  ;;  %v5515_v27 = vadd.f32 %v5424_v58, %v5017_v0 }
 0x21a   : > { %v7142_v63 = vpop.f32.mrf.mxu1  ;;  %v3883_v8 = vadd.f32 %v9425_v54, %v9424_v53 }
 0x21b   : > { %5713 = vst [vmem:[%s9184_s7 + $0x58] sm:$0xff] %v5681_v57  ;;  %v5679_v14 = vadd.f32 %v5647_v41, %v5583_v30  ;;  %v5588_v3 = vmax.f32 %v5556_v36, 0.0  ;;  %v5554_v16 = vadd.f32 %v9162_v26, %v5515_v27  ;;  %v5518_v9 = vadd.f32 %v7142_v63, %v5020_v55  ;;  %v5624_v55 = vld [vmem:[%s9144_s24 + $0x90] sm:$0xff]  ;;  %v5625_v63 = vld [vmem:[%s9144_s24 + $0x98] sm:$0xff] }
 0x21c   : > { %v5427_v34 = vpop.f32.mrf.mxu1  ;;  %v3881_v41 = vadd.f32 %v9428_v48, %v9427_v28  ;;  %v4270_v39 = vadd.f32 %v9429_v33, %v3883_v8  ;;  %v5656_v30 = vmul.f32 3.0, %v5624_v55  ;;  %v5657_v49 = vmul.f32 3.0, %v5625_v63  ;;  %v5626_v48 = vld [vmem:[%s9144_s24 + $0xa0] sm:$0xff] }
 0x21d   : > { %5711 = vst [vmem:[%s9184_s7 + $0x48] sm:$0xff] %v5679_v14  ;;  %v5684_v19 = vadd.f32 %v5652_v60, %v5588_v3  ;;  %v5586_v22 = vmax.f32 %v5554_v16, 0.0  ;;  %v5557_v1 = vadd.f32 %v9162_v26, %v5518_v9  ;;  %v5516_v38 = vadd.f32 %v5427_v34, %v5018_v59  ;;  %v5622_v59 = vld [vmem:[%s9144_s24 + $0x80] sm:$0xff]  ;;  %v5623_v34 = vld [vmem:[%s9144_s24 + $0x88] sm:$0xff] }
 0x21e   : > { %v7145_v12 = vpop.f32.mrf.mxu1  ;;  %v7097_v21 = vpop.f32.mrf.mxu0  ;;  %v4268_v24 = vadd.f32 %v9430_v32, %v3881_v41  ;;  %v5654_v14 = vmul.f32 3.0, %v5622_v59  ;;  %v5655_v53 = vmul.f32 3.0, %v5623_v34 }
 0x21f   : > { %5716 = vst [vmem:[%s9184_s7 + $0x70] sm:$0xff] %v5684_v19  ;;  %v5682_v0 = vadd.f32 %v5650_v56, %v5586_v22  ;;  %v5589_v2 = vmax.f32 %v5557_v1, 0.0  ;;  %v5555_v29 = vadd.f32 %v9162_v26, %v5516_v38  ;;  %v5023_v35 = vadd.f32 %v7097_v21, %v4269_v45  ;;  %v5628_v21 = vld [vmem:[%s9144_s24 + $0xb0] sm:$0xff] }
 0x220   : > { %v5440_v11 = vpop.f32.mrf.mxu1  ;;  %v4942_v4 = vpop.f32.mrf.mxu0 }
 0x221   : > { %5714 = vst [vmem:[%s9184_s7 + $0x60] sm:$0xff] %v5682_v0  ;;  %v5685_v50 = vadd.f32 %v5653_v7, %v5589_v2  ;;  %v5587_v25 = vmax.f32 %v5555_v29, 0.0  ;;  %v5521_v60 = vadd.f32 %v7145_v12, %v5023_v35  ;;  %v5021_v58 = vadd.f32 %v4942_v4, %v4267_v42  ;;  %v5629_v4 = vld [vmem:[%s9144_s24 + $0xb8] sm:$0xff] }
 0x222   : > { %v7098_v36 = vpop.f32.mrf.mxu0  ;;  %v7146_v27 = vpop.f32.mrf.mxu1  ;;  %v5661_v59 = vmul.f32 3.0, %v5629_v4 }
 0x223   : > { %5717 = vst [vmem:[%s9184_s7 + $0x78] sm:$0xff] %v5685_v50  ;;  %v5683_v57 = vadd.f32 %v5651_v18, %v5587_v25  ;;  %v5560_v20 = vadd.f32 %v9162_v26, %v5521_v60  ;;  %v5519_v23 = vadd.f32 %v5440_v11, %v5021_v58  ;;  %v5024_v56 = vadd.f32 %v7098_v36, %v4270_v39 }
 0x224   : > { %v4945_v3 = vpop.f32.mrf.mxu0  ;;  %v5443_v7 = vpop.f32.mrf.mxu1  ;;  %v5660_v11 = vmul.f32 3.0, %v5628_v21 }
 0x225   : > { %5715 = vst [vmem:[%s9184_s7 + $0x68] sm:$0xff] %v5683_v57  ;;  %v5592_v16 = vmax.f32 %v5560_v20, 0.0  ;;  %v5558_v9 = vadd.f32 %v9162_v26, %v5519_v23  ;;  %v5522_v47 = vadd.f32 %v7146_v27, %v5024_v56  ;;  %v5022_v13 = vadd.f32 %v4945_v3, %v4268_v24 }
 0x227   : > { %v5688_v61 = vadd.f32 %v5656_v30, %v5592_v16  ;;  %v5590_v19 = vmax.f32 %v5558_v9, 0.0  ;;  %v5561_v22 = vadd.f32 %v9162_v26, %v5522_v47  ;;  %v5520_v1 = vadd.f32 %v5443_v7, %v5022_v13  ;;  %v5627_v30 = vld [vmem:[%s9144_s24 + $0xa8] sm:$0xff]  ;;  %v5632_v13 = vld [vmem:[%s9144_s24 + $0xd0] sm:$0xff] }
 0x228   : > { %v5659_v56 = vmul.f32 3.0, %v5627_v30 }
 0x229   : > { %5720 = vst [vmem:[%s9184_s7 + $0x90] sm:$0xff] %v5688_v61  ;;  %v5686_v38 = vadd.f32 %v5654_v14, %v5590_v19  ;;  %v5593_v17 = vmax.f32 %v5561_v22, 0.0  ;;  %v5559_v45 = vadd.f32 %v9162_v26, %v5520_v1  ;;  %v5630_v61 = vld [vmem:[%s9144_s24 + $0xc0] sm:$0xff] }
 0x22b   : > { %5718 = vst [vmem:[%s9184_s7 + $0x80] sm:$0xff] %v5686_v38  ;;  %v5689_v54 = vadd.f32 %v5657_v49, %v5593_v17  ;;  %v5591_v8 = vmax.f32 %v5559_v45, 0.0  ;;  %v7149_v12 = vpop.f32.mrf.mxu1  ;;  %v5664_v38 = vmul.f32 3.0, %v5632_v13 }
 0x22c   : > { %v7101_v0 = vpop.f32.mrf.mxu0 }
 0x22d   : > { %5721 = vst [vmem:[%s9184_s7 + $0x98] sm:$0xff] %v5689_v54  ;;  %v5687_v2 = vadd.f32 %v5655_v53, %v5591_v8  ;;  %v5027_v29 = vadd.f32 %v7101_v0, %v9102_v51  ;;  %v5456_v18 = vpop.f32.mrf.mxu1  ;;  %v5658_v51 = vmul.f32 3.0, %v5626_v48  ;;  %v5633_v53 = vld [vmem:[%s9144_s24 + $0xd8] sm:$0xff] }
 0x22e   : > { %v4958_v43 = vpop.f32.mrf.mxu0 }
 0x22f   : > { %5719 = vst [vmem:[%s9184_s7 + $0x88] sm:$0xff] %v5687_v2  ;;  %v5525_v42 = vadd.f32 %v7149_v12, %v5027_v29  ;;  %v5025_v28 = vadd.f32 %v4958_v43, %v9105_v37  ;;  %v7150_v35 = vpop.f32.mrf.mxu1  ;;  %v5665_v2 = vmul.f32 3.0, %v5633_v53 }
 0x230   : > { %v7102_v41 = vpop.f32.mrf.mxu0 }
 0x231   : > { %v5564_v55 = vadd.f32 %v9162_v26, %v5525_v42  ;;  %v5523_v50 = vadd.f32 %v5456_v18, %v5025_v28  ;;  %v5028_v25 = vadd.f32 %v7102_v41, %v9108_v6  ;;  %v5459_v57 = vpop.f32.mrf.mxu1  ;;  %v5631_v18 = vld [vmem:[%s9144_s24 + $0xc8] sm:$0xff] }
 0x232   : > { %v4961_v33 = vpop.f32.mrf.mxu0 }
 0x233   : > { %v5596_v39 = vmax.f32 %v5564_v55, 0.0  ;;  %v5562_v60 = vadd.f32 %v9162_v26, %v5523_v50  ;;  %v5526_v58 = vadd.f32 %v7150_v35, %v5028_v25  ;;  %v5026_v37 = vadd.f32 %v4961_v33, %v9111_v10  ;;  %v5636_v33 = vld [vmem:[%s9144_s24 + $0xf0] sm:$0xff] }
 0x234   : > { %v5663_v35 = vmul.f32 3.0, %v5631_v18 }
 0x235   : > { %v5692_v36 = vadd.f32 %v5660_v11, %v5596_v39  ;;  %v5594_v27 = vmax.f32 %v5562_v60, 0.0  ;;  %v5565_v32 = vadd.f32 %v9162_v26, %v5526_v58  ;;  %v5524_v6 = vadd.f32 %v5459_v57, %v5026_v37  ;;  %v5634_v37 = vld [vmem:[%s9144_s24 + $0xe0] sm:$0xff] }
 0x237   : > { %5724 = vst [vmem:[%s9184_s7 + $0xb0] sm:$0xff] %v5692_v36  ;;  %v5690_v24 = vadd.f32 %v5658_v51, %v5594_v27  ;;  %v5597_v20 = vmax.f32 %v5565_v32, 0.0  ;;  %v5563_v23 = vadd.f32 %v9162_v26, %v5524_v6  ;;  %v5668_v36 = vmul.f32 3.0, %v5636_v33  ;;  %v5637_v6 = vld [vmem:[%s9144_s24 + $0xf8] sm:$0xff] }
 0x239   : > { %5722 = vst [vmem:[%s9184_s7 + $0xa0] sm:$0xff] %v5690_v24  ;;  %v5693_v10 = vadd.f32 %v5661_v59, %v5597_v20  ;;  %v5595_v63 = vmax.f32 %v5563_v23, 0.0  ;;  %v7153_v14 = vpop.f32.mrf.mxu1 }
 0x23a   : > { %v7105_v3 = vpop.f32.mrf.mxu0 }
 0x23b   : > { %5725 = vst [vmem:[%s9184_s7 + $0xb8] sm:$0xff] %v5693_v10  ;;  %v5691_v16 = vadd.f32 %v5659_v56, %v5595_v63  ;;  %v5031_v9 = vadd.f32 %v7105_v3, %v9114_v15  ;;  %v5472_v47 = vpop.f32.mrf.mxu1  ;;  %v5662_v15 = vmul.f32 3.0, %v5630_v61  ;;  %v5669_v10 = vmul.f32 3.0, %v5637_v6 }
 0x23c   : > { %v4974_v49 = vpop.f32.mrf.mxu0 }
 0x23d   : > { %5723 = vst [vmem:[%s9184_s7 + $0xa8] sm:$0xff] %v5691_v16  ;;  %v5529_v7 = vadd.f32 %v7153_v14, %v5031_v9  ;;  %v5029_v34 = vadd.f32 %v4974_v49, %v9117_v5  ;;  %v7154_v22 = vpop.f32.mrf.mxu1  ;;  %v5635_v14 = vld [vmem:[%s9144_s24 + $0xe8] sm:$0xff] }
 0x23e   : > { %v7106_v19 = vpop.f32.mrf.mxu0 }
 0x23f   : > { %v5568_v1 = vadd.f32 %v9162_v26, %v5529_v7  ;;  %v5527_v17 = vadd.f32 %v5472_v47, %v5029_v34  ;;  %v5032_v45 = vadd.f32 %v7106_v19, %v9120_v62  ;;  %v5475_v29 = vpop.f32.mrf.mxu1  ;;  %v5667_v7 = vmul.f32 3.0, %v5635_v14 }
 0x240   : > { %v4977_v54 = vpop.f32.mrf.mxu0 }
 0x241   : > { %v5600_v8 = vmax.f32 %v5568_v1, 0.0  ;;  %v5566_v12 = vadd.f32 %v9162_v26, %v5527_v17  ;;  %v5530_v0 = vadd.f32 %v7154_v22, %v5032_v45  ;;  %v5030_v5 = vadd.f32 %v4977_v54, %v9125_v52 }
 0x243   : > { %v5696_v21 = vadd.f32 %v5664_v38, %v5600_v8  ;;  %v5598_v43 = vmax.f32 %v5566_v12, 0.0  ;;  %v5569_v42 = vadd.f32 %v9162_v26, %v5530_v0  ;;  %v5528_v62 = vadd.f32 %v5475_v29, %v5030_v5 }
 0x245   : > { %5728 = vst [vmem:[%s9184_s7 + $0xd0] sm:$0xff] %v5696_v21  ;;  %v5694_v28 = vadd.f32 %v5662_v15, %v5598_v43  ;;  %v5601_v48 = vmax.f32 %v5569_v42, 0.0  ;;  %v5567_v41 = vadd.f32 %v9162_v26, %v5528_v62 }
 0x247   : > { %5726 = vst [vmem:[%s9184_s7 + $0xc0] sm:$0xff] %v5694_v28  ;;  %v5697_v52 = vadd.f32 %v5665_v2, %v5601_v48  ;;  %v5599_v55 = vmax.f32 %v5567_v41, 0.0  ;;  %v7157_v11 = vpop.f32.mrf.mxu1 }
 0x248   : > { %v7109_v50 = vpop.f32.mrf.mxu0 }
 0x249   : > { %5729 = vst [vmem:[%s9184_s7 + $0xd8] sm:$0xff] %v5697_v52  ;;  %v5695_v25 = vadd.f32 %v5663_v35, %v5599_v55  ;;  %v5035_v4 = vadd.f32 %v7109_v50, %v9130_v31  ;;  %v5488_v51 = vpop.f32.mrf.mxu1  ;;  %v5666_v31 = vmul.f32 3.0, %v5634_v37 }
 0x24a   : > { %v4990_v39 = vpop.f32.mrf.mxu0 }
 0x24b   : > { %5727 = vst [vmem:[%s9184_s7 + $0xc8] sm:$0xff] %v5695_v25  ;;  %v5533_v60 = vadd.f32 %v7157_v11, %v5035_v4  ;;  %v5033_v58 = vadd.f32 %v4990_v39, %v9137_v40  ;;  %v7158_v57 = vpop.f32.mrf.mxu1 }
 0x24c   : > { %v7110_v59 = vpop.f32.mrf.mxu0 }
 0x24d   : > { %v5572_v30 = vadd.f32 %v9162_v26, %v5533_v60  ;;  %v5531_v27 = vadd.f32 %v5488_v51, %v5033_v58  ;;  %v5036_v32 = vadd.f32 %v7110_v59, %v9149_v46  ;;  %v5491_v63 = vpop.f32.mrf.mxu1 }
 0x24e   : > { %v4993_v24 = vpop.f32.mrf.mxu0 }
 0x24f   : > { %v5604_v20 = vmax.f32 %v5572_v30, 0.0  ;;  %v5570_v23 = vadd.f32 %v9162_v26, %v5531_v27  ;;  %v5534_v56 = vadd.f32 %v7158_v57, %v5036_v32  ;;  %v5034_v40 = vadd.f32 %v4993_v24, %v9154_v44 }
 0x251   : > { %v5700_v3 = vadd.f32 %v5668_v36, %v5604_v20  ;;  %v5602_v16 = vmax.f32 %v5570_v23, 0.0  ;;  %v5573_v9 = vadd.f32 %v9162_v26, %v5534_v56  ;;  %v5532_v46 = vadd.f32 %v5491_v63, %v5034_v40 }
 0x253   : > { %5732 = vst [vmem:[%s9184_s7 + $0xf0] sm:$0xff] %v5700_v3  ;;  %v5698_v47 = vadd.f32 %v5666_v31, %v5602_v16  ;;  %v5605_v13 = vmax.f32 %v5573_v9, 0.0  ;;  %v5571_v49 = vadd.f32 %v9162_v26, %v5532_v46 }
 0x255   : > { %5730 = vst [vmem:[%s9184_s7 + $0xe0] sm:$0xff] %v5698_v47  ;;  %v5701_v34 = vadd.f32 %v5669_v10, %v5605_v13  ;;  %v5603_v61 = vmax.f32 %v5571_v49, 0.0 }
 0x257   : > { %5733 = vst [vmem:[%s9184_s7 + $0xf8] sm:$0xff] %v5701_v34  ;;  %v5699_v44 = vadd.f32 %v5667_v7, %v5603_v61 }
 0x259   : > { %5731 = vst [vmem:[%s9184_s7 + $0xe8] sm:$0xff] %v5699_v44 }
 0x25a PF: > { %s16_s21 = sadd.s32 1, %s7318_s21  }
 0x25b   : > { %p13_p4 = scmp.ge.s32.totalorder %s16_s21, 4  }
 0x25d   :  { %15 = sbr.rel (!%p13_p4) target bundleno = 1 (0x1), region = 90 }

</bundles_post_ra>
